<compile_context>
chip_gen: v5e
topology: v5e:2x2
jax: 0.10.0
libtpu: 0.0.40
codegen_flags: <defaults>
</compile_context>

<pallas_src>
import functools

import jax
import jax.numpy as jnp
from jax import lax
from jax.experimental import pallas as pl
from jax.experimental.pallas import tpu as pltpu

LANES = 128


def _round_up(x, m):
    return (x + m - 1) // m * m


def _choose_th(H, Wp2, Cp):
    """Rows per chunk: largest divisor of H with TH*Wp2 <= M target,
    preferring bf16-tile-aligned (mult of 16) matmul M."""
    m_target = 256 if Cp <= 128 else 128       # v6e/v7x MXU is 256x256
    divs = [d for d in range(1, H + 1) if H % d == 0 and d * Wp2 <= m_target]
    if not divs:
        return 1                               # very wide rows: perf hazard only
    for align in (16, 8, 1):
        ok = [d for d in divs if (d * Wp2) % align == 0]
        if ok:
            return max(ok)
    return max(divs)


# ----------------------------------------------------------------------------
# Fused kernel: one image per grid step
# ----------------------------------------------------------------------------
def basic_block_kernel(x_ref, w1_ref, b1_ref, w2_ref, b2_ref, out_ref, out1_ref,
                       *, H, W, TH, F):
    """Fused BasicBlock forward for one image (flattened padded-row layout).

    x_ref   : (1, S1, Cp) bf16  zero front pad F + padded image rows, flattened
    w*_ref  : (9, Cp, Cp) bf16  BN-folded per-tap weights (kh*3+kw)
    b*_ref  : (1, Cp)     f32   BN-folded bias
    out_ref : (1, H*(W+2), Cp)  flattened output rows (2 wrap cols sliced off outside)
    out1_ref: (S1, Cp)    bf16  VMEM scratch: conv1 activation in padded layout
    """
    Wp2 = W + 2
    M = TH * Wp2                               # matmul M per chunk (W valid + 2 wrap cols per row)
    n_chunks = H // TH
    S1, Cp = out1_ref.shape

    def conv3x3(load, w_ref, b_ref, base):
        acc = b_ref[...].astype(jnp.float32)   # (1, Cp) bias-initialised accumulator
        for kh in range(3):
            for kw in range(3):
                lhs = load(base + kh * Wp2 + kw)          # (M, Cp) direct view
                acc = acc + jnp.dot(lhs, w_ref[kh * 3 + kw],
                                    preferred_element_type=jnp.float32)
        return acc                             # (M, Cp) f32

    load_x = lambda s: x_ref[0, s:s + M]
    load_o1 = lambda s: out1_ref[s:s + M]

    # Zero only the halo / tail of the conv1 scratch; the interior is fully
    # overwritten by the conv1 stores below.
    top = F + Wp2 + 1                          # multiple of 16 by construction of F
    out1_ref[0:top] = jnp.zeros((top, Cp), out1_ref.dtype)
    bot = (F + (H + 1) * Wp2) // 8 * 8
    out1_ref[bot:S1] = jnp.zeros((S1 - bot, Cp), out1_ref.dtype)

    # Mask for the 2 wrap-around columns each flattened conv row produces.
    q = lax.broadcasted_iota(jnp.int32, (M, 1), 0)
    valid = (q % Wp2) < W

    # ---- conv1 -> BN1 -> ReLU, activation kept in VMEM (bf16) ---------------
    for c in range(n_chunks):
        base = F + c * M
        acc = conv3x3(load_x, w1_ref, b1_ref, base)
        o1 = jnp.where(valid, jnp.maximum(acc, 0.0), 0.0)
        # Aligned, full-lane store into the padded layout; masked wrap columns
        # land exactly on the halo columns conv2 needs to be zero.
        out1_ref[base + Wp2 + 1: base + Wp2 + 1 + M] = o1.astype(out1_ref.dtype)

    # ---- conv2 -> BN2 -> +residual -> ReLU ----------------------------------
    for c in range(n_chunks):
        base = F + c * M
        acc = conv3x3(load_o1, w2_ref, b2_ref, base)
        res = x_ref[0, base + Wp2 + 1: base + Wp2 + 1 + M].astype(jnp.float32)
        out_ref[0, c * M:(c + 1) * M] = jnp.maximum(acc + res, 0.0).astype(out_ref.dtype)


# ----------------------------------------------------------------------------
# Parameter folding / packing (JAX glue)
# ----------------------------------------------------------------------------
def _fold_bn(w_hwio, conv_bias, gamma, beta, mean, var, eps=1e-5):
    scale = gamma / jnp.sqrt(var + eps)                        # (Cout,)
    return w_hwio * scale[None, None, None, :], (conv_bias - mean) * scale + beta


def _prep_weight(w_hwio, Cin, Cout, Cp):
    # (3,3,Cin,Cout) -> (9, Cp, Cp) bf16, per-tap tiles, zero-padded channels.
    wp = jnp.zeros((3, 3, Cp, Cp), jnp.float32).at[:, :, :Cin, :Cout].set(w_hwio)
    return wp.reshape(9, Cp, Cp).astype(jnp.bfloat16)


def _prep_bias(b, C, Cp):
    return jnp.zeros((1, Cp), jnp.float32).at[0, :C].set(b)


def basic_block_forward(x_nchw, params, *, stride=1, dilation=1, downsample=None,
                        eps=1e-5, out_dtype=jnp.bfloat16):
    """BasicBlock forward (stride=1, dilation=1, identity residual). NCHW API."""
    if stride != 1 or dilation != 1 or downsample is not None:
        raise NotImplementedError(
            "Pallas BasicBlock kernel only supports stride=1, dilation=1, "
            "downsample=None (the module defaults).")

    N, C, H, W = x_nchw.shape
    assert params["w1"].shape[3] == C, "identity residual requires planes == inplanes"
    Cp = _round_up(C, LANES)
    Wp2 = W + 2
    S = (H + 2) * Wp2
    F = (-(Wp2 + 1)) % 16                       # front pad -> conv1 stores tile-aligned
    S1 = _round_up(F + S + 2, 8)                # +2: last chunk's kh=2,kw=2 taps read past S
    TH = _choose_th(H, Wp2, Cp)
    Hflat = H * Wp2

    w1f, b1f = _fold_bn(params["w1"], params["b1"], params["g1"],
                        params["beta1"], params["m1"], params["v1"], eps)
    w2f, b2f = _fold_bn(params["w2"], params["b2"], params["g2"],
                        params["beta2"], params["m2"], params["v2"], eps)

    # Single materialisation of the kernel input: NHWC, lane-padded channels,
    # 1-px spatial halo, flattened rows, bf16.
    x_nhwc = jnp.transpose(x_nchw, (0, 2, 3, 1)).astype(jnp.bfloat16)
    xp = jnp.zeros((N, H + 2, Wp2, Cp), jnp.bfloat16)
    xp = xp.at[:, 1:H + 1, 1:W + 1, :C].set(x_nhwc)
    xp = xp.reshape(N, S, Cp)
    xp = jnp.pad(xp, ((0, 0), (F, S1 - F - S), (0, 0)))

    out_bytes = jnp.dtype(out_dtype).itemsize
    flops = 2 * 2 * N * H * Wp2 * 9 * Cp * Cp               # 2 convs, MAC = 2 flops
    bytes_accessed = (N * S1 * Cp * 2 + 2 * 9 * Cp * Cp * 2 + 2 * Cp * 4
                      + N * Hflat * Cp * out_bytes)
    est_vmem = (2 * S1 * Cp * 2                  # x block, double-buffered, bf16
                + 2 * 2 * 9 * Cp * Cp * 2        # w1/w2, double-buffered, bf16
                + 2 * 2 * Cp * 4                 # biases
                + 2 * Hflat * Cp * out_bytes     # output, double-buffered
                + S1 * Cp * 2)                   # conv1 scratch
    vmem_limit = int(min(64 * 2 ** 20, max(32 * 2 ** 20, 3 * est_vmem)))

    kernel = functools.partial(basic_block_kernel, H=H, W=W, TH=TH, F=F)

    out_flat = pl.pallas_call(
        kernel,
        out_shape=jax.ShapeDtypeStruct((N, Hflat, Cp), out_dtype),
        grid_spec=pltpu.PrefetchScalarGridSpec(
            num_scalar_prefetch=0,
            grid=(N,),
            in_specs=[
                pl.BlockSpec((1, S1, Cp), lambda n: (n, 0, 0)),
                pl.BlockSpec((9, Cp, Cp), lambda n: (0, 0, 0)),
                pl.BlockSpec((1, Cp), lambda n: (0, 0)),
                pl.BlockSpec((9, Cp, Cp), lambda n: (0, 0, 0)),
                pl.BlockSpec((1, Cp), lambda n: (0, 0)),
            ],
            out_specs=pl.BlockSpec((1, Hflat, Cp), lambda n: (n, 0, 0)),
            scratch_shapes=[pltpu.VMEM((S1, Cp), jnp.bfloat16)],
        ),
        compiler_params=pltpu.CompilerParams(
            dimension_semantics=("parallel",),
            vmem_limit_bytes=vmem_limit,
        ),
        cost_estimate=pl.CostEstimate(flops=flops, transcendentals=0,
                                      bytes_accessed=int(bytes_accessed)),
    )(xp, _prep_weight(w1f, C, C, Cp), _prep_bias(b1f, C, Cp),
      _prep_weight(w2f, C, C, Cp), _prep_bias(b2f, C, Cp))

    out = out_flat.reshape(N, H, Wp2, Cp)[:, :, :W, :C]      # drop wrap cols + lane pad
    return jnp.transpose(out, (0, 3, 1, 2))                  # back to NCHW


# ----------------------------------------------------------------------------
# Pure-JAX reference (matches the kernel's bf16 operand rounding)
# ----------------------------------------------------------------------------
def reference_forward(x_nchw, params, eps=1e-5):
    w1f, b1f = _fold_bn(params["w1"], params["b1"], params["g1"],
                        params["beta1"], params["m1"], params["v1"], eps)
    w2f, b2f = _fold_bn(params["w2"], params["b2"], params["g2"],
                        params["beta2"], params["m2"], params["v2"], eps)
    x = jnp.transpose(x_nchw, (0, 2, 3, 1)).astype(jnp.float32)
    xb = x.astype(jnp.bfloat16).astype(jnp.float32)
    w1b = w1f.astype(jnp.bfloat16).astype(jnp.float32)
    w2b = w2f.astype(jnp.bfloat16).astype(jnp.float32)
    dn = ("NHWC", "HWIO", "NHWC")
    hp = lax.Precision.HIGHEST
    o1 = lax.conv_general_dilated(xb, w1b, (1, 1), "SAME",
                                  dimension_numbers=dn, precision=hp)
    o1 = jnp.maximum(o1 + b1f, 0.0)
    o1 = o1.astype(jnp.bfloat16).astype(jnp.float32)         # kernel keeps out1 in bf16
    o2 = lax.conv_general_dilated(o1, w2b, (1, 1), "SAME",
                                  dimension_numbers=dn, precision=hp)
    o2 = jnp.maximum(o2 + b2f + xb, 0.0)
    return jnp.transpose(o2, (0, 3, 1, 2))


# ----------------------------------------------------------------------------
# Deterministic parameter construction + smoke test
# ----------------------------------------------------------------------------
def make_params(inplanes, planes, key):
    ks = jax.random.split(key, 12)
    s1 = 1.0 / jnp.sqrt(9.0 * inplanes)
    s2 = 1.0 / jnp.sqrt(9.0 * planes)
    return {
        # conv weights stored HWIO (kh, kw, Cin, Cout)
        "w1": jax.random.uniform(ks[0], (3, 3, inplanes, planes),
                                 jnp.float32, -s1, s1),
        "b1": jax.random.uniform(ks[1], (planes,), jnp.float32, -s1, s1),
        "w2": jax.random.uniform(ks[2], (3, 3, planes, planes),
                                 jnp.float32, -s2, s2),
        "b2": jax.random.uniform(ks[3], (planes,), jnp.float32, -s2, s2),
        # BatchNorm params / running stats
        "g1": 1.0 + 0.1 * jax.random.normal(ks[4], (planes,), jnp.float32),
        "beta1": 0.1 * jax.random.normal(ks[5], (planes,), jnp.float32),
        "m1": 0.05 * jax.random.normal(ks[6], (planes,), jnp.float32),
        "v1": 1.0 + 0.1 * jax.random.uniform(ks[7], (planes,), jnp.float32),
        "g2": 1.0 + 0.1 * jax.random.normal(ks[8], (planes,), jnp.float32),
        "beta2": 0.1 * jax.random.normal(ks[9], (planes,), jnp.float32),
        "m2": 0.05 * jax.random.normal(ks[10], (planes,), jnp.float32),
        "v2": 1.0 + 0.1 * jax.random.uniform(ks[11], (planes,), jnp.float32),
    }


if __name__ == "__main__":
    key = jax.random.PRNGKey(0)
    kx, kp = jax.random.split(key)

    N, C, H, W = 2, 8, 16, 16          # inplanes = planes = 8, stride = 1
    x = jax.random.normal(kx, (N, C, H, W), jnp.float32)
    params = make_params(C, C, kp)

    out = jax.jit(basic_block_forward)(x, params)
    out = jax.block_until_ready(out)

    ref = reference_forward(x, params)
    assert out.shape == (N, C, H, W)
    out32 = out.astype(jnp.float32)
    max_err = float(jnp.max(jnp.abs(out32 - ref)))
    assert jnp.allclose(out32, ref, atol=5e-2, rtol=5e-2), (
        f"mismatch vs reference (max abs err {max_err})")

    print("KERNEL_OK")
</pallas_src>

<mosaic_0001>
module attributes {stable_mosaic.version = 11 : i64} {
  func.func @basic_block_kernel(%arg0: i32, %arg1: memref<1x344x128xbf16, #tpu.memory_space<vmem>>, %arg2: memref<9x128x128xbf16, #tpu.memory_space<vmem>>, %arg3: memref<1x128xf32, #tpu.memory_space<vmem>>, %arg4: memref<9x128x128xbf16, #tpu.memory_space<vmem>>, %arg5: memref<1x128xf32, #tpu.memory_space<vmem>>, %arg6: memref<1x288x128xbf16, #tpu.memory_space<vmem>>, %arg7: memref<344x128xbf16, #tpu.memory_space<vmem>>) attributes {dimension_semantics = [#tpu.dimension_semantics<parallel>], iteration_bounds = array<i64: 2>, scalar_prefetch = 0 : i64, scratch_operands = 1 : i64, tpu.core_type = #tpu.core_type<tc>, window_params = [{transform_indices = @transform_0, window_bounds = array<i64: 1, 344, 128>}, {pipeline_mode = #tpu.pipeline_mode<synchronous>, transform_indices = @transform_1, window_bounds = array<i64: 9, 128, 128>}, {pipeline_mode = #tpu.pipeline_mode<synchronous>, transform_indices = @transform_2, window_bounds = array<i64: 1, 128>}, {pipeline_mode = #tpu.pipeline_mode<synchronous>, transform_indices = @transform_3, window_bounds = array<i64: 9, 128, 128>}, {pipeline_mode = #tpu.pipeline_mode<synchronous>, transform_indices = @transform_4, window_bounds = array<i64: 1, 128>}, {transform_indices = @transform_5, window_bounds = array<i64: 1, 288, 128>}]} {
    %cst = arith.constant 0.000000e+00 : bf16
    %0 = vector.broadcast %cst : bf16 to vector<32x128xbf16>
    %c0 = arith.constant 0 : index
    %c0_0 = arith.constant 0 : index
    %1 = vector.load %arg7[%c0, %c0_0] : memref<344x128xbf16, #tpu.memory_space<vmem>>, vector<32x128xbf16>
    tpu.vector_store %arg7[%c0, %c0_0], %0 {strides = array<i32>} : memref<344x128xbf16, #tpu.memory_space<vmem>>, vector<32x128xbf16>,
    %cst_1 = arith.constant 0.000000e+00 : bf16
    %2 = vector.broadcast %cst_1 : bf16 to vector<32x128xbf16>
    %c312 = arith.constant 312 : index
    %c0_2 = arith.constant 0 : index
    %3 = vector.load %arg7[%c312, %c0_2] : memref<344x128xbf16, #tpu.memory_space<vmem>>, vector<32x128xbf16>
    tpu.vector_store %arg7[%c312, %c0_2], %2 {strides = array<i32>} : memref<344x128xbf16, #tpu.memory_space<vmem>>, vector<32x128xbf16>,
    %4 = tpu.iota {dimensions = array<i32: 0>} : vector<144x1xi32>
    %c18_i32 = arith.constant 18 : i32
    %c0_i32 = arith.constant 0 : i32
    %5 = arith.cmpi eq, %c18_i32, %c0_i32 : i32
    %c1_i32 = arith.constant 1 : i32
    %6 = arith.select %5, %c1_i32, %c18_i32 : i32
    %7 = vector.broadcast %6 : i32 to vector<144x1xi32>
    %8 = arith.remsi %4, %7 : vector<144x1xi32>
    %c0_i32_3 = arith.constant 0 : i32
    %9 = vector.broadcast %c0_i32_3 : i32 to vector<144x1xi32>
    %10 = arith.cmpi ne, %8, %9 : vector<144x1xi32>
    %c0_i32_4 = arith.constant 0 : i32
    %11 = vector.broadcast %c0_i32_4 : i32 to vector<144x1xi32>
    %12 = arith.cmpi slt, %8, %11 : vector<144x1xi32>
    %c0_i32_5 = arith.constant 0 : i32
    %13 = arith.cmpi slt, %6, %c0_i32_5 : i32
    %14 = vector.broadcast %13 : i1 to vector<144x1xi1>
    %15 = vector.broadcast %14 : vector<144x1xi1> to vector<144x1xi1>
    %16 = arith.xori %12, %15 : vector<144x1xi1>
    %17 = arith.andi %16, %10 : vector<144x1xi1>
    %18 = vector.broadcast %6 : i32 to vector<144x1xi32>
    %19 = arith.addi %8, %18 : vector<144x1xi32>
    %20 = arith.select %17, %19, %8 : vector<144x1xi1>, vector<144x1xi32>
    %c16_i32 = arith.constant 16 : i32
    %21 = vector.broadcast %c16_i32 : i32 to vector<144x1xi32>
    %22 = arith.cmpi slt, %20, %21 : vector<144x1xi32>
    %c0_6 = arith.constant 0 : index
    %c0_7 = arith.constant 0 : index
    %23 = vector.load %arg3[%c0_6, %c0_7] : memref<1x128xf32, #tpu.memory_space<vmem>>, vector<1x128xf32>
    %c0_8 = arith.constant 0 : index
    %c13 = arith.constant 13 : index
    %c0_9 = arith.constant 0 : index
    %24 = vector.load %arg1[%c0_8, %c13, %c0_9] : memref<1x344x128xbf16, #tpu.memory_space<vmem>>, vector<1x144x128xbf16>
    %25 = vector.shape_cast %24 : vector<1x144x128xbf16> to vector<144x128xbf16>
    %c0_10 = arith.constant 0 : index
    %c0_11 = arith.constant 0 : index
    %c0_12 = arith.constant 0 : index
    %26 = vector.load %arg2[%c0_10, %c0_11, %c0_12] : memref<9x128x128xbf16, #tpu.memory_space<vmem>>, vector<1x128x128xbf16>
    %27 = vector.shape_cast %26 : vector<1x128x128xbf16> to vector<128x128xbf16>
    %cst_13 = arith.constant dense<0.000000e+00> : vector<144x128xf32>
    %28 = tpu.matmul %25, %27, %cst_13 {dimension_numbers = #tpu.dot_dimension_numbers<[1], [0], [0], [1], [0, 0, 1, 1], [], []>} : vector<144x128xbf16>, vector<128x128xbf16>, vector<144x128xf32> -> vector<144x128xf32>
    %29 = vector.broadcast %23 : vector<1x128xf32> to vector<144x128xf32>
    %30 = arith.addf %29, %28 : vector<144x128xf32>
    %c0_14 = arith.constant 0 : index
    %c14 = arith.constant 14 : index
    %c0_15 = arith.constant 0 : index
    %31 = vector.load %arg1[%c0_14, %c14, %c0_15] : memref<1x344x128xbf16, #tpu.memory_space<vmem>>, vector<1x144x128xbf16>
    %32 = vector.shape_cast %31 : vector<1x144x128xbf16> to vector<144x128xbf16>
    %c1 = arith.constant 1 : index
    %c0_16 = arith.constant 0 : index
    %c0_17 = arith.constant 0 : index
    %33 = vector.load %arg2[%c1, %c0_16, %c0_17] : memref<9x128x128xbf16, #tpu.memory_space<vmem>>, vector<1x128x128xbf16>
    %34 = vector.shape_cast %33 : vector<1x128x128xbf16> to vector<128x128xbf16>
    %cst_18 = arith.constant dense<0.000000e+00> : vector<144x128xf32>
    %35 = tpu.matmul %32, %34, %cst_18 {dimension_numbers = #tpu.dot_dimension_numbers<[1], [0], [0], [1], [0, 0, 1, 1], [], []>} : vector<144x128xbf16>, vector<128x128xbf16>, vector<144x128xf32> -> vector<144x128xf32>
    %36 = arith.addf %30, %35 : vector<144x128xf32>
    %c0_19 = arith.constant 0 : index
    %c15 = arith.constant 15 : index
    %c0_20 = arith.constant 0 : index
    %37 = vector.load %arg1[%c0_19, %c15, %c0_20] : memref<1x344x128xbf16, #tpu.memory_space<vmem>>, vector<1x144x128xbf16>
    %38 = vector.shape_cast %37 : vector<1x144x128xbf16> to vector<144x128xbf16>
    %c2 = arith.constant 2 : index
    %c0_21 = arith.constant 0 : index
    %c0_22 = arith.constant 0 : index
    %39 = vector.load %arg2[%c2, %c0_21, %c0_22] : memref<9x128x128xbf16, #tpu.memory_space<vmem>>, vector<1x128x128xbf16>
    %40 = vector.shape_cast %39 : vector<1x128x128xbf16> to vector<128x128xbf16>
    %cst_23 = arith.constant dense<0.000000e+00> : vector<144x128xf32>
    %41 = tpu.matmul %38, %40, %cst_23 {dimension_numbers = #tpu.dot_dimension_numbers<[1], [0], [0], [1], [0, 0, 1, 1], [], []>} : vector<144x128xbf16>, vector<128x128xbf16>, vector<144x128xf32> -> vector<144x128xf32>
    %42 = arith.addf %36, %41 : vector<144x128xf32>
    %c0_24 = arith.constant 0 : index
    %c31 = arith.constant 31 : index
    %c0_25 = arith.constant 0 : index
    %43 = vector.load %arg1[%c0_24, %c31, %c0_25] : memref<1x344x128xbf16, #tpu.memory_space<vmem>>, vector<1x144x128xbf16>
    %44 = vector.shape_cast %43 : vector<1x144x128xbf16> to vector<144x128xbf16>
    %c3 = arith.constant 3 : index
    %c0_26 = arith.constant 0 : index
    %c0_27 = arith.constant 0 : index
    %45 = vector.load %arg2[%c3, %c0_26, %c0_27] : memref<9x128x128xbf16, #tpu.memory_space<vmem>>, vector<1x128x128xbf16>
    %46 = vector.shape_cast %45 : vector<1x128x128xbf16> to vector<128x128xbf16>
    %cst_28 = arith.constant dense<0.000000e+00> : vector<144x128xf32>
    %47 = tpu.matmul %44, %46, %cst_28 {dimension_numbers = #tpu.dot_dimension_numbers<[1], [0], [0], [1], [0, 0, 1, 1], [], []>} : vector<144x128xbf16>, vector<128x128xbf16>, vector<144x128xf32> -> vector<144x128xf32>
    %48 = arith.addf %42, %47 : vector<144x128xf32>
    %c0_29 = arith.constant 0 : index
    %c32 = arith.constant 32 : index
    %c0_30 = arith.constant 0 : index
    %49 = vector.load %arg1[%c0_29, %c32, %c0_30] : memref<1x344x128xbf16, #tpu.memory_space<vmem>>, vector<1x144x128xbf16>
    %50 = vector.shape_cast %49 : vector<1x144x128xbf16> to vector<144x128xbf16>
    %c4 = arith.constant 4 : index
    %c0_31 = arith.constant 0 : index
    %c0_32 = arith.constant 0 : index
    %51 = vector.load %arg2[%c4, %c0_31, %c0_32] : memref<9x128x128xbf16, #tpu.memory_space<vmem>>, vector<1x128x128xbf16>
    %52 = vector.shape_cast %51 : vector<1x128x128xbf16> to vector<128x128xbf16>
    %cst_33 = arith.constant dense<0.000000e+00> : vector<144x128xf32>
    %53 = tpu.matmul %50, %52, %cst_33 {dimension_numbers = #tpu.dot_dimension_numbers<[1], [0], [0], [1], [0, 0, 1, 1], [], []>} : vector<144x128xbf16>, vector<128x128xbf16>, vector<144x128xf32> -> vector<144x128xf32>
    %54 = arith.addf %48, %53 : vector<144x128xf32>
    %c0_34 = arith.constant 0 : index
    %c33 = arith.constant 33 : index
    %c0_35 = arith.constant 0 : index
    %55 = vector.load %arg1[%c0_34, %c33, %c0_35] : memref<1x344x128xbf16, #tpu.memory_space<vmem>>, vector<1x144x128xbf16>
    %56 = vector.shape_cast %55 : vector<1x144x128xbf16> to vector<144x128xbf16>
    %c5 = arith.constant 5 : index
    %c0_36 = arith.constant 0 : index
    %c0_37 = arith.constant 0 : index
    %57 = vector.load %arg2[%c5, %c0_36, %c0_37] : memref<9x128x128xbf16, #tpu.memory_space<vmem>>, vector<1x128x128xbf16>
    %58 = vector.shape_cast %57 : vector<1x128x128xbf16> to vector<128x128xbf16>
    %cst_38 = arith.constant dense<0.000000e+00> : vector<144x128xf32>
    %59 = tpu.matmul %56, %58, %cst_38 {dimension_numbers = #tpu.dot_dimension_numbers<[1], [0], [0], [1], [0, 0, 1, 1], [], []>} : vector<144x128xbf16>, vector<128x128xbf16>, vector<144x128xf32> -> vector<144x128xf32>
    %60 = arith.addf %54, %59 : vector<144x128xf32>
    %c0_39 = arith.constant 0 : index
    %c49 = arith.constant 49 : index
    %c0_40 = arith.constant 0 : index
    %61 = vector.load %arg1[%c0_39, %c49, %c0_40] : memref<1x344x128xbf16, #tpu.memory_space<vmem>>, vector<1x144x128xbf16>
    %62 = vector.shape_cast %61 : vector<1x144x128xbf16> to vector<144x128xbf16>
    %c6 = arith.constant 6 : index
    %c0_41 = arith.constant 0 : index
    %c0_42 = arith.constant 0 : index
    %63 = vector.load %arg2[%c6, %c0_41, %c0_42] : memref<9x128x128xbf16, #tpu.memory_space<vmem>>, vector<1x128x128xbf16>
    %64 = vector.shape_cast %63 : vector<1x128x128xbf16> to vector<128x128xbf16>
    %cst_43 = arith.constant dense<0.000000e+00> : vector<144x128xf32>
    %65 = tpu.matmul %62, %64, %cst_43 {dimension_numbers = #tpu.dot_dimension_numbers<[1], [0], [0], [1], [0, 0, 1, 1], [], []>} : vector<144x128xbf16>, vector<128x128xbf16>, vector<144x128xf32> -> vector<144x128xf32>
    %66 = arith.addf %60, %65 : vector<144x128xf32>
    %c0_44 = arith.constant 0 : index
    %c50 = arith.constant 50 : index
    %c0_45 = arith.constant 0 : index
    %67 = vector.load %arg1[%c0_44, %c50, %c0_45] : memref<1x344x128xbf16, #tpu.memory_space<vmem>>, vector<1x144x128xbf16>
    %68 = vector.shape_cast %67 : vector<1x144x128xbf16> to vector<144x128xbf16>
    %c7 = arith.constant 7 : index
    %c0_46 = arith.constant 0 : index
    %c0_47 = arith.constant 0 : index
    %69 = vector.load %arg2[%c7, %c0_46, %c0_47] : memref<9x128x128xbf16, #tpu.memory_space<vmem>>, vector<1x128x128xbf16>
    %70 = vector.shape_cast %69 : vector<1x128x128xbf16> to vector<128x128xbf16>
    %cst_48 = arith.constant dense<0.000000e+00> : vector<144x128xf32>
    %71 = tpu.matmul %68, %70, %cst_48 {dimension_numbers = #tpu.dot_dimension_numbers<[1], [0], [0], [1], [0, 0, 1, 1], [], []>} : vector<144x128xbf16>, vector<128x128xbf16>, vector<144x128xf32> -> vector<144x128xf32>
    %72 = arith.addf %66, %71 : vector<144x128xf32>
    %c0_49 = arith.constant 0 : index
    %c51 = arith.constant 51 : index
    %c0_50 = arith.constant 0 : index
    %73 = vector.load %arg1[%c0_49, %c51, %c0_50] : memref<1x344x128xbf16, #tpu.memory_space<vmem>>, vector<1x144x128xbf16>
    %74 = vector.shape_cast %73 : vector<1x144x128xbf16> to vector<144x128xbf16>
    %c8 = arith.constant 8 : index
    %c0_51 = arith.constant 0 : index
    %c0_52 = arith.constant 0 : index
    %75 = vector.load %arg2[%c8, %c0_51, %c0_52] : memref<9x128x128xbf16, #tpu.memory_space<vmem>>, vector<1x128x128xbf16>
    %76 = vector.shape_cast %75 : vector<1x128x128xbf16> to vector<128x128xbf16>
    %cst_53 = arith.constant dense<0.000000e+00> : vector<144x128xf32>
    %77 = tpu.matmul %74, %76, %cst_53 {dimension_numbers = #tpu.dot_dimension_numbers<[1], [0], [0], [1], [0, 0, 1, 1], [], []>} : vector<144x128xbf16>, vector<128x128xbf16>, vector<144x128xf32> -> vector<144x128xf32>
    %78 = arith.addf %72, %77 : vector<144x128xf32>
    %cst_54 = arith.constant 0.000000e+00 : f32
    %79 = vector.broadcast %cst_54 : f32 to vector<144x128xf32>
    %80 = arith.maximumf %78, %79 : vector<144x128xf32>
    %cst_55 = arith.constant 0.000000e+00 : f32
    %81 = vector.shape_cast %22 : vector<144x1xi1> to vector<144x1xi1>
    %82 = vector.broadcast %81 : vector<144x1xi1> to vector<144x128xi1>
    %83 = vector.broadcast %cst_55 : f32 to vector<144x128xf32>
    %84 = arith.select %82, %80, %83 : vector<144x128xi1>, vector<144x128xf32>
    %85 = arith.truncf %84 : vector<144x128xf32> to vector<144x128xbf16>
    %c32_56 = arith.constant 32 : index
    %c0_57 = arith.constant 0 : index
    %86 = vector.load %arg7[%c32_56, %c0_57] : memref<344x128xbf16, #tpu.memory_space<vmem>>, vector<144x128xbf16>
    tpu.vector_store %arg7[%c32_56, %c0_57], %85 {strides = array<i32>} : memref<344x128xbf16, #tpu.memory_space<vmem>>, vector<144x128xbf16>,
    %c0_58 = arith.constant 0 : index
    %c0_59 = arith.constant 0 : index
    %87 = vector.load %arg3[%c0_58, %c0_59] : memref<1x128xf32, #tpu.memory_space<vmem>>, vector<1x128xf32>
    %c0_60 = arith.constant 0 : index
    %c157 = arith.constant 157 : index
    %c0_61 = arith.constant 0 : index
    %88 = vector.load %arg1[%c0_60, %c157, %c0_61] : memref<1x344x128xbf16, #tpu.memory_space<vmem>>, vector<1x144x128xbf16>
    %89 = vector.shape_cast %88 : vector<1x144x128xbf16> to vector<144x128xbf16>
    %c0_62 = arith.constant 0 : index
    %c0_63 = arith.constant 0 : index
    %c0_64 = arith.constant 0 : index
    %90 = vector.load %arg2[%c0_62, %c0_63, %c0_64] : memref<9x128x128xbf16, #tpu.memory_space<vmem>>, vector<1x128x128xbf16>
    %91 = vector.shape_cast %90 : vector<1x128x128xbf16> to vector<128x128xbf16>
    %cst_65 = arith.constant dense<0.000000e+00> : vector<144x128xf32>
    %92 = tpu.matmul %89, %91, %cst_65 {dimension_numbers = #tpu.dot_dimension_numbers<[1], [0], [0], [1], [0, 0, 1, 1], [], []>} : vector<144x128xbf16>, vector<128x128xbf16>, vector<144x128xf32> -> vector<144x128xf32>
    %93 = vector.broadcast %87 : vector<1x128xf32> to vector<144x128xf32>
    %94 = arith.addf %93, %92 : vector<144x128xf32>
    %c0_66 = arith.constant 0 : index
    %c158 = arith.constant 158 : index
    %c0_67 = arith.constant 0 : index
    %95 = vector.load %arg1[%c0_66, %c158, %c0_67] : memref<1x344x128xbf16, #tpu.memory_space<vmem>>, vector<1x144x128xbf16>
    %96 = vector.shape_cast %95 : vector<1x144x128xbf16> to vector<144x128xbf16>
    %c1_68 = arith.constant 1 : index
    %c0_69 = arith.constant 0 : index
    %c0_70 = arith.constant 0 : index
    %97 = vector.load %arg2[%c1_68, %c0_69, %c0_70] : memref<9x128x128xbf16, #tpu.memory_space<vmem>>, vector<1x128x128xbf16>
    %98 = vector.shape_cast %97 : vector<1x128x128xbf16> to vector<128x128xbf16>
    %cst_71 = arith.constant dense<0.000000e+00> : vector<144x128xf32>
    %99 = tpu.matmul %96, %98, %cst_71 {dimension_numbers = #tpu.dot_dimension_numbers<[1], [0], [0], [1], [0, 0, 1, 1], [], []>} : vector<144x128xbf16>, vector<128x128xbf16>, vector<144x128xf32> -> vector<144x128xf32>
    %100 = arith.addf %94, %99 : vector<144x128xf32>
    %c0_72 = arith.constant 0 : index
    %c159 = arith.constant 159 : index
    %c0_73 = arith.constant 0 : index
    %101 = vector.load %arg1[%c0_72, %c159, %c0_73] : memref<1x344x128xbf16, #tpu.memory_space<vmem>>, vector<1x144x128xbf16>
    %102 = vector.shape_cast %101 : vector<1x144x128xbf16> to vector<144x128xbf16>
    %c2_74 = arith.constant 2 : index
    %c0_75 = arith.constant 0 : index
    %c0_76 = arith.constant 0 : index
    %103 = vector.load %arg2[%c2_74, %c0_75, %c0_76] : memref<9x128x128xbf16, #tpu.memory_space<vmem>>, vector<1x128x128xbf16>
    %104 = vector.shape_cast %103 : vector<1x128x128xbf16> to vector<128x128xbf16>
    %cst_77 = arith.constant dense<0.000000e+00> : vector<144x128xf32>
    %105 = tpu.matmul %102, %104, %cst_77 {dimension_numbers = #tpu.dot_dimension_numbers<[1], [0], [0], [1], [0, 0, 1, 1], [], []>} : vector<144x128xbf16>, vector<128x128xbf16>, vector<144x128xf32> -> vector<144x128xf32>
    %106 = arith.addf %100, %105 : vector<144x128xf32>
    %c0_78 = arith.constant 0 : index
    %c175 = arith.constant 175 : index
    %c0_79 = arith.constant 0 : index
    %107 = vector.load %arg1[%c0_78, %c175, %c0_79] : memref<1x344x128xbf16, #tpu.memory_space<vmem>>, vector<1x144x128xbf16>
    %108 = vector.shape_cast %107 : vector<1x144x128xbf16> to vector<144x128xbf16>
    %c3_80 = arith.constant 3 : index
    %c0_81 = arith.constant 0 : index
    %c0_82 = arith.constant 0 : index
    %109 = vector.load %arg2[%c3_80, %c0_81, %c0_82] : memref<9x128x128xbf16, #tpu.memory_space<vmem>>, vector<1x128x128xbf16>
    %110 = vector.shape_cast %109 : vector<1x128x128xbf16> to vector<128x128xbf16>
    %cst_83 = arith.constant dense<0.000000e+00> : vector<144x128xf32>
    %111 = tpu.matmul %108, %110, %cst_83 {dimension_numbers = #tpu.dot_dimension_numbers<[1], [0], [0], [1], [0, 0, 1, 1], [], []>} : vector<144x128xbf16>, vector<128x128xbf16>, vector<144x128xf32> -> vector<144x128xf32>
    %112 = arith.addf %106, %111 : vector<144x128xf32>
    %c0_84 = arith.constant 0 : index
    %c176 = arith.constant 176 : index
    %c0_85 = arith.constant 0 : index
    %113 = vector.load %arg1[%c0_84, %c176, %c0_85] : memref<1x344x128xbf16, #tpu.memory_space<vmem>>, vector<1x144x128xbf16>
    %114 = vector.shape_cast %113 : vector<1x144x128xbf16> to vector<144x128xbf16>
    %c4_86 = arith.constant 4 : index
    %c0_87 = arith.constant 0 : index
    %c0_88 = arith.constant 0 : index
    %115 = vector.load %arg2[%c4_86, %c0_87, %c0_88] : memref<9x128x128xbf16, #tpu.memory_space<vmem>>, vector<1x128x128xbf16>
    %116 = vector.shape_cast %115 : vector<1x128x128xbf16> to vector<128x128xbf16>
    %cst_89 = arith.constant dense<0.000000e+00> : vector<144x128xf32>
    %117 = tpu.matmul %114, %116, %cst_89 {dimension_numbers = #tpu.dot_dimension_numbers<[1], [0], [0], [1], [0, 0, 1, 1], [], []>} : vector<144x128xbf16>, vector<128x128xbf16>, vector<144x128xf32> -> vector<144x128xf32>
    %118 = arith.addf %112, %117 : vector<144x128xf32>
    %c0_90 = arith.constant 0 : index
    %c177 = arith.constant 177 : index
    %c0_91 = arith.constant 0 : index
    %119 = vector.load %arg1[%c0_90, %c177, %c0_91] : memref<1x344x128xbf16, #tpu.memory_space<vmem>>, vector<1x144x128xbf16>
    %120 = vector.shape_cast %119 : vector<1x144x128xbf16> to vector<144x128xbf16>
    %c5_92 = arith.constant 5 : index
    %c0_93 = arith.constant 0 : index
    %c0_94 = arith.constant 0 : index
    %121 = vector.load %arg2[%c5_92, %c0_93, %c0_94] : memref<9x128x128xbf16, #tpu.memory_space<vmem>>, vector<1x128x128xbf16>
    %122 = vector.shape_cast %121 : vector<1x128x128xbf16> to vector<128x128xbf16>
    %cst_95 = arith.constant dense<0.000000e+00> : vector<144x128xf32>
    %123 = tpu.matmul %120, %122, %cst_95 {dimension_numbers = #tpu.dot_dimension_numbers<[1], [0], [0], [1], [0, 0, 1, 1], [], []>} : vector<144x128xbf16>, vector<128x128xbf16>, vector<144x128xf32> -> vector<144x128xf32>
    %124 = arith.addf %118, %123 : vector<144x128xf32>
    %c0_96 = arith.constant 0 : index
    %c193 = arith.constant 193 : index
    %c0_97 = arith.constant 0 : index
    %125 = vector.load %arg1[%c0_96, %c193, %c0_97] : memref<1x344x128xbf16, #tpu.memory_space<vmem>>, vector<1x144x128xbf16>
    %126 = vector.shape_cast %125 : vector<1x144x128xbf16> to vector<144x128xbf16>
    %c6_98 = arith.constant 6 : index
    %c0_99 = arith.constant 0 : index
    %c0_100 = arith.constant 0 : index
    %127 = vector.load %arg2[%c6_98, %c0_99, %c0_100] : memref<9x128x128xbf16, #tpu.memory_space<vmem>>, vector<1x128x128xbf16>
    %128 = vector.shape_cast %127 : vector<1x128x128xbf16> to vector<128x128xbf16>
    %cst_101 = arith.constant dense<0.000000e+00> : vector<144x128xf32>
    %129 = tpu.matmul %126, %128, %cst_101 {dimension_numbers = #tpu.dot_dimension_numbers<[1], [0], [0], [1], [0, 0, 1, 1], [], []>} : vector<144x128xbf16>, vector<128x128xbf16>, vector<144x128xf32> -> vector<144x128xf32>
    %130 = arith.addf %124, %129 : vector<144x128xf32>
    %c0_102 = arith.constant 0 : index
    %c194 = arith.constant 194 : index
    %c0_103 = arith.constant 0 : index
    %131 = vector.load %arg1[%c0_102, %c194, %c0_103] : memref<1x344x128xbf16, #tpu.memory_space<vmem>>, vector<1x144x128xbf16>
    %132 = vector.shape_cast %131 : vector<1x144x128xbf16> to vector<144x128xbf16>
    %c7_104 = arith.constant 7 : index
    %c0_105 = arith.constant 0 : index
    %c0_106 = arith.constant 0 : index
    %133 = vector.load %arg2[%c7_104, %c0_105, %c0_106] : memref<9x128x128xbf16, #tpu.memory_space<vmem>>, vector<1x128x128xbf16>
    %134 = vector.shape_cast %133 : vector<1x128x128xbf16> to vector<128x128xbf16>
    %cst_107 = arith.constant dense<0.000000e+00> : vector<144x128xf32>
    %135 = tpu.matmul %132, %134, %cst_107 {dimension_numbers = #tpu.dot_dimension_numbers<[1], [0], [0], [1], [0, 0, 1, 1], [], []>} : vector<144x128xbf16>, vector<128x128xbf16>, vector<144x128xf32> -> vector<144x128xf32>
    %136 = arith.addf %130, %135 : vector<144x128xf32>
    %c0_108 = arith.constant 0 : index
    %c195 = arith.constant 195 : index
    %c0_109 = arith.constant 0 : index
    %137 = vector.load %arg1[%c0_108, %c195, %c0_109] : memref<1x344x128xbf16, #tpu.memory_space<vmem>>, vector<1x144x128xbf16>
    %138 = vector.shape_cast %137 : vector<1x144x128xbf16> to vector<144x128xbf16>
    %c8_110 = arith.constant 8 : index
    %c0_111 = arith.constant 0 : index
    %c0_112 = arith.constant 0 : index
    %139 = vector.load %arg2[%c8_110, %c0_111, %c0_112] : memref<9x128x128xbf16, #tpu.memory_space<vmem>>, vector<1x128x128xbf16>
    %140 = vector.shape_cast %139 : vector<1x128x128xbf16> to vector<128x128xbf16>
    %cst_113 = arith.constant dense<0.000000e+00> : vector<144x128xf32>
    %141 = tpu.matmul %138, %140, %cst_113 {dimension_numbers = #tpu.dot_dimension_numbers<[1], [0], [0], [1], [0, 0, 1, 1], [], []>} : vector<144x128xbf16>, vector<128x128xbf16>, vector<144x128xf32> -> vector<144x128xf32>
    %142 = arith.addf %136, %141 : vector<144x128xf32>
    %cst_114 = arith.constant 0.000000e+00 : f32
    %143 = vector.broadcast %cst_114 : f32 to vector<144x128xf32>
    %144 = arith.maximumf %142, %143 : vector<144x128xf32>
    %cst_115 = arith.constant 0.000000e+00 : f32
    %145 = vector.shape_cast %22 : vector<144x1xi1> to vector<144x1xi1>
    %146 = vector.broadcast %145 : vector<144x1xi1> to vector<144x128xi1>
    %147 = vector.broadcast %cst_115 : f32 to vector<144x128xf32>
    %148 = arith.select %146, %144, %147 : vector<144x128xi1>, vector<144x128xf32>
    %149 = arith.truncf %148 : vector<144x128xf32> to vector<144x128xbf16>
    %c176_116 = arith.constant 176 : index
    %c0_117 = arith.constant 0 : index
    %150 = vector.load %arg7[%c176_116, %c0_117] : memref<344x128xbf16, #tpu.memory_space<vmem>>, vector<144x128xbf16>
    tpu.vector_store %arg7[%c176_116, %c0_117], %149 {strides = array<i32>} : memref<344x128xbf16, #tpu.memory_space<vmem>>, vector<144x128xbf16>,
    %c0_118 = arith.constant 0 : index
    %c0_119 = arith.constant 0 : index
    %151 = vector.load %arg5[%c0_118, %c0_119] : memref<1x128xf32, #tpu.memory_space<vmem>>, vector<1x128xf32>
    %c13_120 = arith.constant 13 : index
    %c0_121 = arith.constant 0 : index
    %152 = vector.load %arg7[%c13_120, %c0_121] : memref<344x128xbf16, #tpu.memory_space<vmem>>, vector<144x128xbf16>
    %c0_122 = arith.constant 0 : index
    %c0_123 = arith.constant 0 : index
    %c0_124 = arith.constant 0 : index
    %153 = vector.load %arg4[%c0_122, %c0_123, %c0_124] : memref<9x128x128xbf16, #tpu.memory_space<vmem>>, vector<1x128x128xbf16>
    %154 = vector.shape_cast %153 : vector<1x128x128xbf16> to vector<128x128xbf16>
    %cst_125 = arith.constant dense<0.000000e+00> : vector<144x128xf32>
    %155 = tpu.matmul %152, %154, %cst_125 {dimension_numbers = #tpu.dot_dimension_numbers<[1], [0], [0], [1], [0, 0, 1, 1], [], []>} : vector<144x128xbf16>, vector<128x128xbf16>, vector<144x128xf32> -> vector<144x128xf32>
    %156 = vector.broadcast %151 : vector<1x128xf32> to vector<144x128xf32>
    %157 = arith.addf %156, %155 : vector<144x128xf32>
    %c14_126 = arith.constant 14 : index
    %c0_127 = arith.constant 0 : index
    %158 = vector.load %arg7[%c14_126, %c0_127] : memref<344x128xbf16, #tpu.memory_space<vmem>>, vector<144x128xbf16>
    %c1_128 = arith.constant 1 : index
    %c0_129 = arith.constant 0 : index
    %c0_130 = arith.constant 0 : index
    %159 = vector.load %arg4[%c1_128, %c0_129, %c0_130] : memref<9x128x128xbf16, #tpu.memory_space<vmem>>, vector<1x128x128xbf16>
    %160 = vector.shape_cast %159 : vector<1x128x128xbf16> to vector<128x128xbf16>
    %cst_131 = arith.constant dense<0.000000e+00> : vector<144x128xf32>
    %161 = tpu.matmul %158, %160, %cst_131 {dimension_numbers = #tpu.dot_dimension_numbers<[1], [0], [0], [1], [0, 0, 1, 1], [], []>} : vector<144x128xbf16>, vector<128x128xbf16>, vector<144x128xf32> -> vector<144x128xf32>
    %162 = arith.addf %157, %161 : vector<144x128xf32>
    %c15_132 = arith.constant 15 : index
    %c0_133 = arith.constant 0 : index
    %163 = vector.load %arg7[%c15_132, %c0_133] : memref<344x128xbf16, #tpu.memory_space<vmem>>, vector<144x128xbf16>
    %c2_134 = arith.constant 2 : index
    %c0_135 = arith.constant 0 : index
    %c0_136 = arith.constant 0 : index
    %164 = vector.load %arg4[%c2_134, %c0_135, %c0_136] : memref<9x128x128xbf16, #tpu.memory_space<vmem>>, vector<1x128x128xbf16>
    %165 = vector.shape_cast %164 : vector<1x128x128xbf16> to vector<128x128xbf16>
    %cst_137 = arith.constant dense<0.000000e+00> : vector<144x128xf32>
    %166 = tpu.matmul %163, %165, %cst_137 {dimension_numbers = #tpu.dot_dimension_numbers<[1], [0], [0], [1], [0, 0, 1, 1], [], []>} : vector<144x128xbf16>, vector<128x128xbf16>, vector<144x128xf32> -> vector<144x128xf32>
    %167 = arith.addf %162, %166 : vector<144x128xf32>
    %c31_138 = arith.constant 31 : index
    %c0_139 = arith.constant 0 : index
    %168 = vector.load %arg7[%c31_138, %c0_139] : memref<344x128xbf16, #tpu.memory_space<vmem>>, vector<144x128xbf16>
    %c3_140 = arith.constant 3 : index
    %c0_141 = arith.constant 0 : index
    %c0_142 = arith.constant 0 : index
    %169 = vector.load %arg4[%c3_140, %c0_141, %c0_142] : memref<9x128x128xbf16, #tpu.memory_space<vmem>>, vector<1x128x128xbf16>
    %170 = vector.shape_cast %169 : vector<1x128x128xbf16> to vector<128x128xbf16>
    %cst_143 = arith.constant dense<0.000000e+00> : vector<144x128xf32>
    %171 = tpu.matmul %168, %170, %cst_143 {dimension_numbers = #tpu.dot_dimension_numbers<[1], [0], [0], [1], [0, 0, 1, 1], [], []>} : vector<144x128xbf16>, vector<128x128xbf16>, vector<144x128xf32> -> vector<144x128xf32>
    %172 = arith.addf %167, %171 : vector<144x128xf32>
    %c32_144 = arith.constant 32 : index
    %c0_145 = arith.constant 0 : index
    %173 = vector.load %arg7[%c32_144, %c0_145] : memref<344x128xbf16, #tpu.memory_space<vmem>>, vector<144x128xbf16>
    %c4_146 = arith.constant 4 : index
    %c0_147 = arith.constant 0 : index
    %c0_148 = arith.constant 0 : index
    %174 = vector.load %arg4[%c4_146, %c0_147, %c0_148] : memref<9x128x128xbf16, #tpu.memory_space<vmem>>, vector<1x128x128xbf16>
    %175 = vector.shape_cast %174 : vector<1x128x128xbf16> to vector<128x128xbf16>
    %cst_149 = arith.constant dense<0.000000e+00> : vector<144x128xf32>
    %176 = tpu.matmul %173, %175, %cst_149 {dimension_numbers = #tpu.dot_dimension_numbers<[1], [0], [0], [1], [0, 0, 1, 1], [], []>} : vector<144x128xbf16>, vector<128x128xbf16>, vector<144x128xf32> -> vector<144x128xf32>
    %177 = arith.addf %172, %176 : vector<144x128xf32>
    %c33_150 = arith.constant 33 : index
    %c0_151 = arith.constant 0 : index
    %178 = vector.load %arg7[%c33_150, %c0_151] : memref<344x128xbf16, #tpu.memory_space<vmem>>, vector<144x128xbf16>
    %c5_152 = arith.constant 5 : index
    %c0_153 = arith.constant 0 : index
    %c0_154 = arith.constant 0 : index
    %179 = vector.load %arg4[%c5_152, %c0_153, %c0_154] : memref<9x128x128xbf16, #tpu.memory_space<vmem>>, vector<1x128x128xbf16>
    %180 = vector.shape_cast %179 : vector<1x128x128xbf16> to vector<128x128xbf16>
    %cst_155 = arith.constant dense<0.000000e+00> : vector<144x128xf32>
    %181 = tpu.matmul %178, %180, %cst_155 {dimension_numbers = #tpu.dot_dimension_numbers<[1], [0], [0], [1], [0, 0, 1, 1], [], []>} : vector<144x128xbf16>, vector<128x128xbf16>, vector<144x128xf32> -> vector<144x128xf32>
    %182 = arith.addf %177, %181 : vector<144x128xf32>
    %c49_156 = arith.constant 49 : index
    %c0_157 = arith.constant 0 : index
    %183 = vector.load %arg7[%c49_156, %c0_157] : memref<344x128xbf16, #tpu.memory_space<vmem>>, vector<144x128xbf16>
    %c6_158 = arith.constant 6 : index
    %c0_159 = arith.constant 0 : index
    %c0_160 = arith.constant 0 : index
    %184 = vector.load %arg4[%c6_158, %c0_159, %c0_160] : memref<9x128x128xbf16, #tpu.memory_space<vmem>>, vector<1x128x128xbf16>
    %185 = vector.shape_cast %184 : vector<1x128x128xbf16> to vector<128x128xbf16>
    %cst_161 = arith.constant dense<0.000000e+00> : vector<144x128xf32>
    %186 = tpu.matmul %183, %185, %cst_161 {dimension_numbers = #tpu.dot_dimension_numbers<[1], [0], [0], [1], [0, 0, 1, 1], [], []>} : vector<144x128xbf16>, vector<128x128xbf16>, vector<144x128xf32> -> vector<144x128xf32>
    %187 = arith.addf %182, %186 : vector<144x128xf32>
    %c50_162 = arith.constant 50 : index
    %c0_163 = arith.constant 0 : index
    %188 = vector.load %arg7[%c50_162, %c0_163] : memref<344x128xbf16, #tpu.memory_space<vmem>>, vector<144x128xbf16>
    %c7_164 = arith.constant 7 : index
    %c0_165 = arith.constant 0 : index
    %c0_166 = arith.constant 0 : index
    %189 = vector.load %arg4[%c7_164, %c0_165, %c0_166] : memref<9x128x128xbf16, #tpu.memory_space<vmem>>, vector<1x128x128xbf16>
    %190 = vector.shape_cast %189 : vector<1x128x128xbf16> to vector<128x128xbf16>
    %cst_167 = arith.constant dense<0.000000e+00> : vector<144x128xf32>
    %191 = tpu.matmul %188, %190, %cst_167 {dimension_numbers = #tpu.dot_dimension_numbers<[1], [0], [0], [1], [0, 0, 1, 1], [], []>} : vector<144x128xbf16>, vector<128x128xbf16>, vector<144x128xf32> -> vector<144x128xf32>
    %192 = arith.addf %187, %191 : vector<144x128xf32>
    %c51_168 = arith.constant 51 : index
    %c0_169 = arith.constant 0 : index
    %193 = vector.load %arg7[%c51_168, %c0_169] : memref<344x128xbf16, #tpu.memory_space<vmem>>, vector<144x128xbf16>
    %c8_170 = arith.constant 8 : index
    %c0_171 = arith.constant 0 : index
    %c0_172 = arith.constant 0 : index
    %194 = vector.load %arg4[%c8_170, %c0_171, %c0_172] : memref<9x128x128xbf16, #tpu.memory_space<vmem>>, vector<1x128x128xbf16>
    %195 = vector.shape_cast %194 : vector<1x128x128xbf16> to vector<128x128xbf16>
    %cst_173 = arith.constant dense<0.000000e+00> : vector<144x128xf32>
    %196 = tpu.matmul %193, %195, %cst_173 {dimension_numbers = #tpu.dot_dimension_numbers<[1], [0], [0], [1], [0, 0, 1, 1], [], []>} : vector<144x128xbf16>, vector<128x128xbf16>, vector<144x128xf32> -> vector<144x128xf32>
    %197 = arith.addf %192, %196 : vector<144x128xf32>
    %c0_174 = arith.constant 0 : index
    %c32_175 = arith.constant 32 : index
    %c0_176 = arith.constant 0 : index
    %198 = vector.load %arg1[%c0_174, %c32_175, %c0_176] : memref<1x344x128xbf16, #tpu.memory_space<vmem>>, vector<1x144x128xbf16>
    %199 = vector.shape_cast %198 : vector<1x144x128xbf16> to vector<144x128xbf16>
    %200 = arith.extf %199 : vector<144x128xbf16> to vector<144x128xf32>
    %201 = arith.addf %197, %200 : vector<144x128xf32>
    %cst_177 = arith.constant 0.000000e+00 : f32
    %202 = vector.broadcast %cst_177 : f32 to vector<144x128xf32>
    %203 = arith.maximumf %201, %202 : vector<144x128xf32>
    %204 = arith.truncf %203 : vector<144x128xf32> to vector<144x128xbf16>
    %c0_178 = arith.constant 0 : index
    %c0_179 = arith.constant 0 : index
    %c0_180 = arith.constant 0 : index
    %205 = vector.load %arg6[%c0_178, %c0_179, %c0_180] : memref<1x288x128xbf16, #tpu.memory_space<vmem>>, vector<1x144x128xbf16>
    %206 = vector.shape_cast %205 : vector<1x144x128xbf16> to vector<144x128xbf16>
    %207 = vector.shape_cast %204 : vector<144x128xbf16> to vector<1x144x128xbf16>
    tpu.vector_store %arg6[%c0_178, %c0_179, %c0_180], %207 {strides = array<i32>} : memref<1x288x128xbf16, #tpu.memory_space<vmem>>, vector<1x144x128xbf16>,
    %c0_181 = arith.constant 0 : index
    %c0_182 = arith.constant 0 : index
    %208 = vector.load %arg5[%c0_181, %c0_182] : memref<1x128xf32, #tpu.memory_space<vmem>>, vector<1x128xf32>
    %c157_183 = arith.constant 157 : index
    %c0_184 = arith.constant 0 : index
    %209 = vector.load %arg7[%c157_183, %c0_184] : memref<344x128xbf16, #tpu.memory_space<vmem>>, vector<144x128xbf16>
    %c0_185 = arith.constant 0 : index
    %c0_186 = arith.constant 0 : index
    %c0_187 = arith.constant 0 : index
    %210 = vector.load %arg4[%c0_185, %c0_186, %c0_187] : memref<9x128x128xbf16, #tpu.memory_space<vmem>>, vector<1x128x128xbf16>
    %211 = vector.shape_cast %210 : vector<1x128x128xbf16> to vector<128x128xbf16>
    %cst_188 = arith.constant dense<0.000000e+00> : vector<144x128xf32>
    %212 = tpu.matmul %209, %211, %cst_188 {dimension_numbers = #tpu.dot_dimension_numbers<[1], [0], [0], [1], [0, 0, 1, 1], [], []>} : vector<144x128xbf16>, vector<128x128xbf16>, vector<144x128xf32> -> vector<144x128xf32>
    %213 = vector.broadcast %208 : vector<1x128xf32> to vector<144x128xf32>
    %214 = arith.addf %213, %212 : vector<144x128xf32>
    %c158_189 = arith.constant 158 : index
    %c0_190 = arith.constant 0 : index
    %215 = vector.load %arg7[%c158_189, %c0_190] : memref<344x128xbf16, #tpu.memory_space<vmem>>, vector<144x128xbf16>
    %c1_191 = arith.constant 1 : index
    %c0_192 = arith.constant 0 : index
    %c0_193 = arith.constant 0 : index
    %216 = vector.load %arg4[%c1_191, %c0_192, %c0_193] : memref<9x128x128xbf16, #tpu.memory_space<vmem>>, vector<1x128x128xbf16>
    %217 = vector.shape_cast %216 : vector<1x128x128xbf16> to vector<128x128xbf16>
    %cst_194 = arith.constant dense<0.000000e+00> : vector<144x128xf32>
    %218 = tpu.matmul %215, %217, %cst_194 {dimension_numbers = #tpu.dot_dimension_numbers<[1], [0], [0], [1], [0, 0, 1, 1], [], []>} : vector<144x128xbf16>, vector<128x128xbf16>, vector<144x128xf32> -> vector<144x128xf32>
    %219 = arith.addf %214, %218 : vector<144x128xf32>
    %c159_195 = arith.constant 159 : index
    %c0_196 = arith.constant 0 : index
    %220 = vector.load %arg7[%c159_195, %c0_196] : memref<344x128xbf16, #tpu.memory_space<vmem>>, vector<144x128xbf16>
    %c2_197 = arith.constant 2 : index
    %c0_198 = arith.constant 0 : index
    %c0_199 = arith.constant 0 : index
    %221 = vector.load %arg4[%c2_197, %c0_198, %c0_199] : memref<9x128x128xbf16, #tpu.memory_space<vmem>>, vector<1x128x128xbf16>
    %222 = vector.shape_cast %221 : vector<1x128x128xbf16> to vector<128x128xbf16>
    %cst_200 = arith.constant dense<0.000000e+00> : vector<144x128xf32>
    %223 = tpu.matmul %220, %222, %cst_200 {dimension_numbers = #tpu.dot_dimension_numbers<[1], [0], [0], [1], [0, 0, 1, 1], [], []>} : vector<144x128xbf16>, vector<128x128xbf16>, vector<144x128xf32> -> vector<144x128xf32>
    %224 = arith.addf %219, %223 : vector<144x128xf32>
    %c175_201 = arith.constant 175 : index
    %c0_202 = arith.constant 0 : index
    %225 = vector.load %arg7[%c175_201, %c0_202] : memref<344x128xbf16, #tpu.memory_space<vmem>>, vector<144x128xbf16>
    %c3_203 = arith.constant 3 : index
    %c0_204 = arith.constant 0 : index
    %c0_205 = arith.constant 0 : index
    %226 = vector.load %arg4[%c3_203, %c0_204, %c0_205] : memref<9x128x128xbf16, #tpu.memory_space<vmem>>, vector<1x128x128xbf16>
    %227 = vector.shape_cast %226 : vector<1x128x128xbf16> to vector<128x128xbf16>
    %cst_206 = arith.constant dense<0.000000e+00> : vector<144x128xf32>
    %228 = tpu.matmul %225, %227, %cst_206 {dimension_numbers = #tpu.dot_dimension_numbers<[1], [0], [0], [1], [0, 0, 1, 1], [], []>} : vector<144x128xbf16>, vector<128x128xbf16>, vector<144x128xf32> -> vector<144x128xf32>
    %229 = arith.addf %224, %228 : vector<144x128xf32>
    %c176_207 = arith.constant 176 : index
    %c0_208 = arith.constant 0 : index
    %230 = vector.load %arg7[%c176_207, %c0_208] : memref<344x128xbf16, #tpu.memory_space<vmem>>, vector<144x128xbf16>
    %c4_209 = arith.constant 4 : index
    %c0_210 = arith.constant 0 : index
    %c0_211 = arith.constant 0 : index
    %231 = vector.load %arg4[%c4_209, %c0_210, %c0_211] : memref<9x128x128xbf16, #tpu.memory_space<vmem>>, vector<1x128x128xbf16>
    %232 = vector.shape_cast %231 : vector<1x128x128xbf16> to vector<128x128xbf16>
    %cst_212 = arith.constant dense<0.000000e+00> : vector<144x128xf32>
    %233 = tpu.matmul %230, %232, %cst_212 {dimension_numbers = #tpu.dot_dimension_numbers<[1], [0], [0], [1], [0, 0, 1, 1], [], []>} : vector<144x128xbf16>, vector<128x128xbf16>, vector<144x128xf32> -> vector<144x128xf32>
    %234 = arith.addf %229, %233 : vector<144x128xf32>
    %c177_213 = arith.constant 177 : index
    %c0_214 = arith.constant 0 : index
    %235 = vector.load %arg7[%c177_213, %c0_214] : memref<344x128xbf16, #tpu.memory_space<vmem>>, vector<144x128xbf16>
    %c5_215 = arith.constant 5 : index
    %c0_216 = arith.constant 0 : index
    %c0_217 = arith.constant 0 : index
    %236 = vector.load %arg4[%c5_215, %c0_216, %c0_217] : memref<9x128x128xbf16, #tpu.memory_space<vmem>>, vector<1x128x128xbf16>
    %237 = vector.shape_cast %236 : vector<1x128x128xbf16> to vector<128x128xbf16>
    %cst_218 = arith.constant dense<0.000000e+00> : vector<144x128xf32>
    %238 = tpu.matmul %235, %237, %cst_218 {dimension_numbers = #tpu.dot_dimension_numbers<[1], [0], [0], [1], [0, 0, 1, 1], [], []>} : vector<144x128xbf16>, vector<128x128xbf16>, vector<144x128xf32> -> vector<144x128xf32>
    %239 = arith.addf %234, %238 : vector<144x128xf32>
    %c193_219 = arith.constant 193 : index
    %c0_220 = arith.constant 0 : index
    %240 = vector.load %arg7[%c193_219, %c0_220] : memref<344x128xbf16, #tpu.memory_space<vmem>>, vector<144x128xbf16>
    %c6_221 = arith.constant 6 : index
    %c0_222 = arith.constant 0 : index
    %c0_223 = arith.constant 0 : index
    %241 = vector.load %arg4[%c6_221, %c0_222, %c0_223] : memref<9x128x128xbf16, #tpu.memory_space<vmem>>, vector<1x128x128xbf16>
    %242 = vector.shape_cast %241 : vector<1x128x128xbf16> to vector<128x128xbf16>
    %cst_224 = arith.constant dense<0.000000e+00> : vector<144x128xf32>
    %243 = tpu.matmul %240, %242, %cst_224 {dimension_numbers = #tpu.dot_dimension_numbers<[1], [0], [0], [1], [0, 0, 1, 1], [], []>} : vector<144x128xbf16>, vector<128x128xbf16>, vector<144x128xf32> -> vector<144x128xf32>
    %244 = arith.addf %239, %243 : vector<144x128xf32>
    %c194_225 = arith.constant 194 : index
    %c0_226 = arith.constant 0 : index
    %245 = vector.load %arg7[%c194_225, %c0_226] : memref<344x128xbf16, #tpu.memory_space<vmem>>, vector<144x128xbf16>
    %c7_227 = arith.constant 7 : index
    %c0_228 = arith.constant 0 : index
    %c0_229 = arith.constant 0 : index
    %246 = vector.load %arg4[%c7_227, %c0_228, %c0_229] : memref<9x128x128xbf16, #tpu.memory_space<vmem>>, vector<1x128x128xbf16>
    %247 = vector.shape_cast %246 : vector<1x128x128xbf16> to vector<128x128xbf16>
    %cst_230 = arith.constant dense<0.000000e+00> : vector<144x128xf32>
    %248 = tpu.matmul %245, %247, %cst_230 {dimension_numbers = #tpu.dot_dimension_numbers<[1], [0], [0], [1], [0, 0, 1, 1], [], []>} : vector<144x128xbf16>, vector<128x128xbf16>, vector<144x128xf32> -> vector<144x128xf32>
    %249 = arith.addf %244, %248 : vector<144x128xf32>
    %c195_231 = arith.constant 195 : index
    %c0_232 = arith.constant 0 : index
    %250 = vector.load %arg7[%c195_231, %c0_232] : memref<344x128xbf16, #tpu.memory_space<vmem>>, vector<144x128xbf16>
    %c8_233 = arith.constant 8 : index
    %c0_234 = arith.constant 0 : index
    %c0_235 = arith.constant 0 : index
    %251 = vector.load %arg4[%c8_233, %c0_234, %c0_235] : memref<9x128x128xbf16, #tpu.memory_space<vmem>>, vector<1x128x128xbf16>
    %252 = vector.shape_cast %251 : vector<1x128x128xbf16> to vector<128x128xbf16>
    %cst_236 = arith.constant dense<0.000000e+00> : vector<144x128xf32>
    %253 = tpu.matmul %250, %252, %cst_236 {dimension_numbers = #tpu.dot_dimension_numbers<[1], [0], [0], [1], [0, 0, 1, 1], [], []>} : vector<144x128xbf16>, vector<128x128xbf16>, vector<144x128xf32> -> vector<144x128xf32>
    %254 = arith.addf %249, %253 : vector<144x128xf32>
    %c0_237 = arith.constant 0 : index
    %c176_238 = arith.constant 176 : index
    %c0_239 = arith.constant 0 : index
    %255 = vector.load %arg1[%c0_237, %c176_238, %c0_239] : memref<1x344x128xbf16, #tpu.memory_space<vmem>>, vector<1x144x128xbf16>
    %256 = vector.shape_cast %255 : vector<1x144x128xbf16> to vector<144x128xbf16>
    %257 = arith.extf %256 : vector<144x128xbf16> to vector<144x128xf32>
    %258 = arith.addf %254, %257 : vector<144x128xf32>
    %cst_240 = arith.constant 0.000000e+00 : f32
    %259 = vector.broadcast %cst_240 : f32 to vector<144x128xf32>
    %260 = arith.maximumf %258, %259 : vector<144x128xf32>
    %261 = arith.truncf %260 : vector<144x128xf32> to vector<144x128xbf16>
    %c0_241 = arith.constant 0 : index
    %c144 = arith.constant 144 : index
    %c0_242 = arith.constant 0 : index
    %262 = vector.load %arg6[%c0_241, %c144, %c0_242] : memref<1x288x128xbf16, #tpu.memory_space<vmem>>, vector<1x144x128xbf16>
    %263 = vector.shape_cast %262 : vector<1x144x128xbf16> to vector<144x128xbf16>
    %264 = vector.shape_cast %261 : vector<144x128xbf16> to vector<1x144x128xbf16>
    tpu.vector_store %arg6[%c0_241, %c144, %c0_242], %264 {strides = array<i32>} : memref<1x288x128xbf16, #tpu.memory_space<vmem>>, vector<1x144x128xbf16>,
    return
  }
  func.func @transform_0(%arg0: i32) -> (i32, i32, i32) {
    %c0_i32 = arith.constant 0 : i32
    %c0_i32_0 = arith.constant 0 : i32
    %c0_i32_1 = arith.constant 0 : i32
    return %arg0, %c0_i32, %c0_i32_0 : i32, i32, i32
  }
  func.func @transform_1(%arg0: i32) -> (i32, i32, i32) {
    %c0_i32 = arith.constant 0 : i32
    %c0_i32_0 = arith.constant 0 : i32
    %c0_i32_1 = arith.constant 0 : i32
    %c0_i32_2 = arith.constant 0 : i32
    return %c0_i32, %c0_i32_0, %c0_i32_1 : i32, i32, i32
  }
  func.func @transform_2(%arg0: i32) -> (i32, i32) {
    %c0_i32 = arith.constant 0 : i32
    %c0_i32_0 = arith.constant 0 : i32
    %c0_i32_1 = arith.constant 0 : i32
    return %c0_i32, %c0_i32_0 : i32, i32
  }
  func.func @transform_3(%arg0: i32) -> (i32, i32, i32) {
    %c0_i32 = arith.constant 0 : i32
    %c0_i32_0 = arith.constant 0 : i32
    %c0_i32_1 = arith.constant 0 : i32
    %c0_i32_2 = arith.constant 0 : i32
    return %c0_i32, %c0_i32_0, %c0_i32_1 : i32, i32, i32
  }
  func.func @transform_4(%arg0: i32) -> (i32, i32) {
    %c0_i32 = arith.constant 0 : i32
    %c0_i32_0 = arith.constant 0 : i32
    %c0_i32_1 = arith.constant 0 : i32
    return %c0_i32, %c0_i32_0 : i32, i32
  }
  func.func @transform_5(%arg0: i32) -> (i32, i32, i32) {
    %c0_i32 = arith.constant 0 : i32
    %c0_i32_0 = arith.constant 0 : i32
    %c0_i32_1 = arith.constant 0 : i32
    return %arg0, %c0_i32, %c0_i32_0 : i32, i32, i32
  }
}

</mosaic_0001>

<bundles_post_ra>
// kernel: basic_block_forward.1
= control target key start
LH: loop header
LB: loop body
LE: loop exit
PB: predicated region body
PF: predicated region fallthrough
CT: control target
= control target key end

     0   :  { %s12914_s18 = smov 0   ;;  %s16516_s0 = inlined_call_operand.vmem [shape: bf16[2,344,128], index: 0, kind: input, shape index: {}]   ;;  %s16517_s1 = inlined_call_operand.vmem [shape: bf16[9,128,128], index: 1, kind: input, shape index: {}]   ;;  %s16518_s2 = inlined_call_operand.vmem [shape: f32[1,128], index: 2, kind: input, shape index: {}]   ;;  %s16519_s3 = inlined_call_operand.vmem [shape: bf16[9,128,128], index: 3, kind: input, shape index: {}]   ;;  %s16520_s4 = inlined_call_operand.vmem [shape: f32[1,128], index: 4, kind: input, shape index: {}]   ;;  %s16521_s5 = inlined_call_operand.vmem [shape: bf16[2,288,128], index: 5, kind: output, shape index: {}]  }
   0x1 LB: > { %s9628_s19 = sadd.s32 4294967295, %s12881_s18   ;;  %p9632_p0 = scmp.ge.s32.totalorder %s12881_s18, 1  ;;  %s12881_s18 = sphi %s12914_s18, %s15_s18  }
   0x2   : > { %p187_p1 = scmp.lt.s32.totalorder %s12881_s18, 3 }
   0x4   : > { %p188_p2 = pnand %p9632_p0, %p187_p1 }
   0x6   : > { %191 = sbr.rel (%p188_p2) target bundleno = 1498 (0x5da), region = 40 }
   0xb   : > { %v11716_v0 = vld [vmem:[%s16517_s1 + $0x38] sm:$0xff]  ;;  %p215_p3 = scmp.lt.s32.totalorder %s9628_s19, 1  ;;  %v11715_v4 = vld [vmem:[%s16517_s1 + $0x30] sm:$0xff]  ;;  %v11714_v8 = vld [vmem:[%s16517_s1 + $0x28] sm:$0xff]  ;;  %vm16537_vm0 = vsmask.f32 5376 }
   0xc   : > { %v11724_v1 = vld [vmem:[%s16517_s1 + $0x78] sm:$0xff]  ;;  %1114 = vmatpush.bf16.msra.mxu0 %v11716_v0  ;;  %v11723_v5 = vld [vmem:[%s16517_s1 + $0x70] sm:$0xff]  ;;  %v11722_v9 = vld [vmem:[%s16517_s1 + $0x68] sm:$0xff]  ;;  %vm16534_vm1 = vcmask 1044480   ;;  %vm16551_vm2 = vsmask.f32 4352 }
   0xd   : > { %v11732_v2 = vld [vmem:[%s16517_s1 + $0xb8] sm:$0xff]  ;;  %1287 = vmatpush.bf16.msra.mxu1 %v11724_v1  ;;  %s16904_s19 = smov (!%p215_p3, %s9628_s19), 1  ;;  %v11731_v6 = vld [vmem:[%s16517_s1 + $0xb0] sm:$0xff]  ;;  %v11730_v10 = vld [vmem:[%s16517_s1 + $0xa8] sm:$0xff]  ;;  %vm16544_vm3 = vsmask.f32 7424 }
   0xe   : > { %v11740_v3 = vld [vmem:[%s16517_s1 + $0xf8] sm:$0xff]  ;;  %1487 = vmatpush.bf16.msra.mxu2 %v11732_v2  ;;  %v11739_v7 = vld [vmem:[%s16517_s1 + $0xf0] sm:$0xff]  ;;  %s12850_s11 = smul.u32 172, %s16904_s19  ;;  %v11738_v11 = vld [vmem:[%s16517_s1 + $0xe8] sm:$0xff]  ;;  %vm16542_vm4 = vcmask 1046528  }
   0xf   : > { %1789 = vmatpush.bf16.msra.mxu3 %v11740_v3  ;;  %v11713_v12 = vld [vmem:[%s16517_s1 + $0x20] sm:$0xff]  ;;  %v11712_v25 = vld [vmem:[%s16517_s1 + $0x18] sm:$0xff]  ;;  %v11711_v35 = vld [vmem:[%s16517_s1 + $0x10] sm:$0xff]  ;;  %vm16543_vm5 = vsmask.f32 6400  ;;  %s12851_s8 = smul.u32 144, %s16904_s19 }
  0x10   : > { %1115 = vmatpush.bf16.msra.mxu0 %v11715_v4  ;;  %s12964_s24 = scalar_lea.vmem %s16516_s0, %s12850_s11  ;;  %v11721_v13 = vld [vmem:[%s16517_s1 + $0x60] sm:$0xff]  ;;  %v11720_v26 = vld [vmem:[%s16517_s1 + $0x58] sm:$0xff]  ;;  %v11719_v36 = vld [vmem:[%s16517_s1 + $0x50] sm:$0xff] }
  0x11   : > { %1288 = vmatpush.bf16.msra.mxu1 %v11723_v5  ;;  %v11729_v14 = vld [vmem:[%s16517_s1 + $0xa0] sm:$0xff]  ;;  %v885_v17 = vld [vmem:[%s12964_s24 + $0x8] sm:$0xf]  ;;  %v12608_v22 = vld [vmem:[%s12964_s24 + $0xc] sm:$0x8]  ;;  %s16119_s11 = scalar_lea.vmem %s16521_s5, %s12851_s8 }
  0x12   : > { %1488 = vmatpush.bf16.msra.mxu2 %v11731_v6  ;;  %v884_v15 = vld [vmem:[%s12964_s24 + $0x4] sm:$0xc]  ;;  %v939_v20 = vunpack.c.l.b16 %v885_v17  ;;  %v12783_v23 = vld [vmem:[%s12964_s24 + $0xc] sm:$0xf0]   ;;  %v11728_v27 = vld [vmem:[%s16517_s1 + $0x98] sm:$0xff] }
  0x13   : > { %1790 = vmatpush.bf16.msra.mxu3 %v11739_v7  ;;  %v11737_v16 = vld [vmem:[%s16517_s1 + $0xe0] sm:$0xff]  ;;  %v938_v18 = vunpack.c.l.b16 %v884_v15  ;;  %v12984_v24 = vld [vmem:[%s12964_s24 + $0xc] sm:$0xff]  ;;  %v11736_v30 = vld [vmem:[%s16517_s1 + $0xd8] sm:$0xff]  ;;  %v12609_v32 = vor.u32 %v12783_v23, %v12608_v22 }
  0x14   : > { %1116 = vmatpush.bf16.msra.mxu0 %v11714_v8  ;;  %v1189_v19 = vld [vmem:[%s12964_s24 + $0x4] sm:$0x8]  ;;  %v12785_v31 = vld [vmem:[%s12964_s24 + $0x14] sm:$0xff]   ;;  %v977_v33 = vshrl.u32 %v12984_v24, 16  ;;  %v980_v34 = vshll.u32 %v12984_v24, 16  ;;  %v11710_v51 = vld [vmem:[%s16517_s1 + $0x8] sm:$0xff] }
  0x15   : > { %1289 = vmatpush.bf16.msra.mxu1 %v11722_v9  ;;  %v1208_v21 = vunpack.c.l.b16 %v1189_v19  ;;  %v957_v28 = vpack.c.b16 %v939_v20, %v938_v18  ;;  %v11727_v41 = vld [vmem:[%s16517_s1 + $0x90] sm:$0xff]  ;;  %v1644_v43 = vshrl.u32 %v12609_v32, 16  ;;  %v1647_v44 = vshll.u32 %v12609_v32, 16  ;;  %v11718_v52 = vld [vmem:[%s16517_s1 + $0x48] sm:$0xff]  ;;  %v11709_v0 = vld [vmem:[%s16517_s1] sm:$0xff] }
  0x16   : > { %1489 = vmatpush.bf16.msra.mxu2 %v11730_v10  ;;  %v11735_v42 = vld [vmem:[%s16517_s1 + $0xd0] sm:$0xff]  ;;  %v1652_v45 = vshrl.u32 %v12785_v31, 16  ;;  %v1655_v46 = vshll.u32 %v12785_v31, 16  ;;  %v979_v47 = vrot.slane %v977_v33, 2  ;;  %v982_v48 = vrot.slane %v980_v34, 3  ;;  %v11726_v57 = vld [vmem:[%s16517_s1 + $0x88] sm:$0xff] }
  0x17   : > { %1791 = vmatpush.bf16.msra.mxu3 %v11738_v11  ;;  %v12995_v29 = vpack.c.b16 %v939_v20, %v1208_v21  ;;  %v969_v37 = vshrl.u32 %v957_v28, 16  ;;  %v972_v38 = vshll.u32 %v957_v28, 16  ;;  %v1389_v49 = vrot.slane %v977_v33, 3  ;;  %v11734_v58 = vld [vmem:[%s16517_s1 + $0xc8] sm:$0xff]  ;;  %v11717_v1 = vld [vmem:[%s16517_s1 + $0x40] sm:$0xff]  ;;  %v11781_v11 = vld [vmem:[%s16517_s1 + $0x1b8] sm:$0xff] }
  0x18   : > { %1117 = vmatpush.bf16.msra.mxu0 %v11713_v12  ;;  %v1390_v50 = vrot.slane %v980_v34, 4  ;;  %v1646_v59 = vrot.slane %v1644_v43, 3  ;;  %v1649_v60 = vrot.slane %v1647_v44, 4  ;;  %v1654_v61 = vrot.slane %v1652_v45, 3  ;;  %v11725_v6 = vld [vmem:[%s16517_s1 + $0x80] sm:$0xff]  ;;  %v11748_v12 = vld [vmem:[%s16517_s1 + $0x138] sm:$0xff] }
  0x19   : > { %1290 = vmatpush.bf16.msra.mxu1 %v11721_v13  ;;  %v1382_v39 = vshrl.u32 %v12995_v29, 16  ;;  %v1385_v40 = vshll.u32 %v12995_v29, 16  ;;  %v971_v53 = vrot.slane %v969_v37, 2  ;;  %v974_v54 = vrot.slane %v972_v38, 3  ;;  %v11733_v7 = vld [vmem:[%s16517_s1 + $0xc0] sm:$0xff]  ;;  %v13059_v15 = vld [vmem:[%s12964_s24 + $0x14] sm:$0xff] }
  0x1a   : > { %1490 = vmatpush.bf16.msra.mxu2 %v11729_v14  ;;  %v1657_v62 = vrot.slane %v1655_v46, 4  ;;  %v1212_v63 = vrot.slane %v12984_v24, 3  ;;  %v13036_v3 = vor.u32 %v982_v48, %v979_v47  ;;  %v1211_v4 = vrot.slane %v12995_v29, 3  ;;  %v11789_v18 = vld [vmem:[%s16517_s1 + $0x1f8] sm:$0xff]  ;;  %v11780_v21 = vld [vmem:[%s16517_s1 + $0x1b0] sm:$0xff]  ;;  %v11746_v31 = vld [vmem:[%s16517_s1 + $0x128] sm:$0xff] }
  0x1b   : > { %1792 = vmatpush.bf16.msra.mxu3 %v11737_v16  ;;  %v1384_v55 = vrot.slane %v1382_v39, 3  ;;  %v1387_v56 = vrot.slane %v1385_v40, 4  ;;  %v975_v2 = vor.u32 %v974_v54, %v971_v53  ;;  %v13039_v5 = vor.u32 %v1390_v50, %v1389_v49  ;;  %v11765_v19 = vld [vmem:[%s16517_s1 + $0x178] sm:$0xff]  ;;  %v11747_v22 = vld [vmem:[%s16517_s1 + $0x130] sm:$0xff]  ;;  %v11787_v38 = vld [vmem:[%s16517_s1 + $0x1e8] sm:$0xff] }
  0x1c   : > { %1118 = vmatpush.bf16.msra.mxu0 %v11712_v25  ;;  %v1650_v9 = vor.u32 %v1649_v60, %v1646_v59  ;;  %v1658_v10 = vor.u32 %v1657_v62, %v1654_v61  ;;  %v1213_v14 = vsel %vm16534_vm1, %v1211_v4, %v1212_v63  ;;  %v12787_v20 = vld [vmem:[%s12964_s24 + $0x1c] sm:$0xff]   ;;  %v986_v23 = vshrl.u32 %v13059_v15, 16  ;;  %v11788_v28 = vld [vmem:[%s16517_s1 + $0x1f0] sm:$0xff]  ;;  %v11763_v39 = vld [vmem:[%s16517_s1 + $0x168] sm:$0xff] }
  0x1d   : > { %1291 = vmatpush.bf16.msra.mxu1 %v11720_v26  ;;  %v1388_v8 = vor.u32 %v1387_v56, %v1384_v55  ;;  %v984_v13 = vsel %vm16537_vm0, %v975_v2, %v13036_v3  ;;  %v989_v25 = vshll.u32 %v13059_v15, 16  ;;  %v1661_v26 = vshrl.u32 %v12787_v20, 16  ;;  %v11764_v29 = vld [vmem:[%s16517_s1 + $0x170] sm:$0xff]  ;;  %v13104_v46 = vld [vmem:[%s12964_s24 + $0x1c] sm:$0xff]  ;;  %v12789_v49 = vld [vmem:[%s12964_s24 + $0x24] sm:$0xff]  }
  0x1e   : > { %1491 = vmatpush.bf16.msra.mxu2 %v11728_v27  ;;  %v1659_v17 = vsel %vm16551_vm2, %v1650_v9, %v1658_v10  ;;  %v1664_v27 = vshll.u32 %v12787_v20, 16  ;;  %v988_v32 = vrot.slane %v986_v23, 2  ;;  %v1393_v34 = vrot.slane %v986_v23, 3  ;;  %v11778_v24 = vld [vmem:[%s16517_s1 + $0x1a0] sm:$0xff] }
  0x1f   : > { %1793 = vmatpush.bf16.msra.mxu3 %v11736_v30  ;;  %v1392_v16 = vsel %vm16551_vm2, %v1388_v8, %v13039_v5  ;;  %v11779_v30 = vld [vmem:[%s16517_s1 + $0x1a8] sm:$0xff]  ;;  %v991_v33 = vrot.slane %v989_v25, 3  ;;  %v995_v50 = vshrl.u32 %v13104_v46, 16  ;;  %v11786_v53 = vld [vmem:[%s16517_s1 + $0x1e0] sm:$0xff]  ;;  %v1670_v54 = vshrl.u32 %v12789_v49, 16 }
  0x20   : > { %1119 = vmatpush.bf16.msra.mxu0 %v11711_v35  ;;  %v1394_v35 = vrot.slane %v989_v25, 4  ;;  %v1666_v37 = vrot.slane %v1664_v27, 4  ;;  %v1673_v55 = vshll.u32 %v12789_v49, 16  ;;  %v11762_v56 = vld [vmem:[%s16517_s1 + $0x160] sm:$0xff]  ;;  %v12791_v8 = vld [vmem:[%s12964_s24 + $0x2c] sm:$0xff]  }
  0x21   : > { %1292 = vmatpush.bf16.msra.mxu1 %v11719_v36  ;;  %v1663_v36 = vrot.slane %v1661_v26, 3  ;;  %v992_v40 = vor.u32 %v991_v33, %v988_v32  ;;  %v1397_v59 = vrot.slane %v995_v50, 3  ;;  %v1672_v61 = vrot.slane %v1670_v54, 3  ;;  %v12793_v33 = vld [vmem:[%s12964_s24 + $0x34] sm:$0xff]  }
  0x22   : > { %1492 = vmatpush.bf16.msra.mxu2 %v11727_v41  ;;  %v1214_v41 = vrot.slane %v13059_v15, 3  ;;  %v1675_v62 = vrot.slane %v1673_v55, 4  ;;  %v1682_v15 = vshll.u32 %v12791_v8, 16 }
  0x23   : > { %1794 = vmatpush.bf16.msra.mxu3 %v11735_v42  ;;  %v1395_v42 = vor.u32 %v1394_v35, %v1393_v34  ;;  %v1667_v43 = vor.u32 %v1666_v37, %v1663_v36  ;;  %v993_v44 = vsel %vm16537_vm0, %v13036_v3, %v992_v40  ;;  %v11776_v36 = vld [vmem:[%s16517_s1 + $0x190] sm:$0xff] }
  0x24   : > { %1120 = vmatpush.bf16.msra.mxu0 %v11710_v51  ;;  %v1215_v45 = vsel %vm16534_vm1, %v1212_v63, %v1214_v41  ;;  %v998_v51 = vshll.u32 %v13104_v46, 16  ;;  %v1676_v2 = vor.u32 %v1675_v62, %v1672_v61  ;;  %v11743_v37 = vld [vmem:[%s16517_s1 + $0x110] sm:$0xff]  ;;  %v11783_v61 = vld [vmem:[%s16517_s1 + $0x1c8] sm:$0xff] }
  0x25   : > { %1293 = vmatpush.bf16.msra.mxu1 %v11718_v52  ;;  %v1396_v47 = vsel %vm16551_vm2, %v13039_v5, %v1395_v42  ;;  %v1668_v48 = vsel %vm16551_vm2, %v1658_v10, %v1667_v43  ;;  %v11745_v52 = vld [vmem:[%s16517_s1 + $0x120] sm:$0xff] }
  0x26   : > { %1493 = vmatpush.bf16.msra.mxu2 %v11726_v57  ;;  %v997_v57 = vrot.slane %v995_v50, 2  ;;  %v1398_v60 = vrot.slane %v998_v51, 4  ;;  %v13128_v5 = vld [vmem:[%s12964_s24 + $0x24] sm:$0xff] }
  0x27   : > { %1795 = vmatpush.bf16.msra.mxu3 %v11734_v58  ;;  %v1000_v58 = vrot.slane %v998_v51, 3  ;;  %v1004_v9 = vshrl.u32 %v13128_v5, 16  ;;  %v1007_v10 = vshll.u32 %v13128_v5, 16  ;;  %v1218_v25 = vrot.slane %v13128_v5, 3 }
  0x28   : > { %1121 = vmatpush.bf16.msra.mxu0 %v11709_v0  ;;  %v1216_v0 = vrot.slane %v13104_v46, 3 }
  0x29   : > { %1294 = vmatpush.bf16.msra.mxu1 %v11717_v1  ;;  %v1001_v63 = vor.u32 %v1000_v58, %v997_v57  ;;  %v1399_v1 = vor.u32 %v1398_v60, %v1397_v59  ;;  %v1402_v20 = vrot.slane %v1007_v10, 4  ;;  %v11775_v59 = vld [vmem:[%s16517_s1 + $0x188] sm:$0xff] }
  0x2a   : > { %1494 = vmatpush.bf16.msra.mxu2 %v11725_v6  ;;  %v1217_v4 = vsel %vm16534_vm1, %v1214_v41, %v1216_v0  ;;  %v11760_v41 = vld [vmem:[%s16517_s1 + $0x150] sm:$0xff]  ;;  %v11742_v60 = vld [vmem:[%s16517_s1 + $0x108] sm:$0xff] }
  0x2b   : > { %1796 = vmatpush.bf16.msra.mxu3 %v11733_v7  ;;  %1122 = vmatmul.bf16.vlgmr.msra.gmra.mxu0 %v984_v13  ;;  %v1002_v3 = vsel %vm16537_vm0, %v992_v40, %v1001_v63  ;;  %v1400_v6 = vsel %vm16551_vm2, %v1395_v42, %v1399_v1  ;;  %v1677_v7 = vsel %vm16551_vm2, %v1667_v43, %v1676_v2  ;;  %v11785_v13 = vld [vmem:[%s16517_s1 + $0x1d8] sm:$0xff]  ;;  %v1691_v40 = vshll.u32 %v12793_v33, 16 }
  0x2c   : > { %1944 = vmatpush.bf16.msrb.mxu0 %v11748_v12  ;;  %1295 = vmatmul.bf16.vlgmr.msra.gmra.mxu1 %v1213_v14  ;;  %v11744_v12 = vld [vmem:[%s16517_s1 + $0x118] sm:$0xff]  ;;  %v1679_v14 = vshrl.u32 %v12791_v8, 16 }
  0x2d   : > { %1495 = vmatmul.bf16.vlgmr.msra.gmra.mxu2 %v1392_v16  ;;  %2234 = vmatpush.bf16.msrb.mxu1 %v11765_v19  ;;  %v11761_v16 = vld [vmem:[%s16517_s1 + $0x158] sm:$0xff]  ;;  %v1401_v19 = vrot.slane %v1004_v9, 3 }
  0x2e   : > { %2523 = vmatpush.bf16.msrb.mxu2 %v11781_v11  ;;  %1797 = vmatmul.bf16.vlgmr.msra.gmra.mxu3 %v1659_v17  ;;  %v11777_v11 = vld [vmem:[%s16517_s1 + $0x198] sm:$0xff]  ;;  %v1006_v17 = vrot.slane %v1004_v9, 2 }
  0x2f   : > { %2693 = vmatpush.bf16.msrb.mxu3 %v11789_v18  ;;  %v1009_v18 = vrot.slane %v1007_v10, 3  ;;  %v1403_v26 = vor.u32 %v1402_v20, %v1401_v19 }
  0x30   : > { %1945 = vmatpush.bf16.msrb.mxu0 %v11747_v22  ;;  %v1684_v22 = vrot.slane %v1682_v15, 4  ;;  %v12797_v15 = vld [vmem:[%s12964_s24 + $0x44] sm:$0xff]  }
  0x31   : > { %2235 = vmatpush.bf16.msrb.mxu1 %v11764_v29  ;;  %v1010_v23 = vor.u32 %v1009_v18, %v1006_v17  ;;  %v1219_v29 = vsel %vm16534_vm1, %v1216_v0, %v1218_v25  ;;  %v11759_v18 = vld [vmem:[%s16517_s1 + $0x148] sm:$0xff]  ;;  %v1706_v19 = vshrl.u32 %v12797_v15, 16  ;;  %v1709_v20 = vshll.u32 %v12797_v15, 16 }
  0x32   : > { %2524 = vmatpush.bf16.msrb.mxu2 %v11780_v21  ;;  %v1681_v21 = vrot.slane %v1679_v14, 3 }
  0x33   : > { %2694 = vmatpush.bf16.msrb.mxu3 %v11788_v28  ;;  %v1011_v28 = vsel %vm16537_vm0, %v1001_v63, %v1010_v23 }
  0x34   : > { %1946 = vmatpush.bf16.msrb.mxu0 %v11746_v31  ;;  %v1685_v27 = vor.u32 %v1684_v22, %v1681_v21  ;;  %v1404_v31 = vsel %vm16551_vm2, %v1399_v1, %v1403_v26 }
  0x35   : > { %2236 = vmatpush.bf16.msrb.mxu1 %v11763_v39  ;;  %v1688_v39 = vshrl.u32 %v12793_v33, 16 }
  0x36   : > { %2525 = vmatpush.bf16.msrb.mxu2 %v11779_v30  ;;  %v13151_v30 = vld [vmem:[%s12964_s24 + $0x2c] sm:$0xff]  ;;  %v1686_v32 = vsel %vm16551_vm2, %v1676_v2, %v1685_v27 }
  0x37   : > { %2695 = vmatpush.bf16.msrb.mxu3 %v11787_v38  ;;  %v1013_v34 = vshrl.u32 %v13151_v30, 16  ;;  %v1016_v35 = vshll.u32 %v13151_v30, 16  ;;  %v11784_v38 = vld [vmem:[%s16517_s1 + $0x1d0] sm:$0xff]  ;;  %v1690_v46 = vrot.slane %v1688_v39, 3  ;;  %v1220_v49 = vrot.slane %v13151_v30, 3 }
  0x38   : > { %1947 = vmatpush.bf16.msrb.mxu0 %v11745_v52 }
  0x39   : > { %2237 = vmatpush.bf16.msrb.mxu1 %v11762_v56  ;;  %v1015_v42 = vrot.slane %v1013_v34, 2  ;;  %v1018_v43 = vrot.slane %v1016_v35, 3  ;;  %v1221_v52 = vsel %vm16534_vm1, %v1218_v25, %v1220_v49  ;;  %v12795_v56 = vld [vmem:[%s12964_s24 + $0x3c] sm:$0xff]  }
  0x3a   : > { %2526 = vmatpush.bf16.msrb.mxu2 %v11778_v24  ;;  %v1697_v62 = vshrl.u32 %v12795_v56, 16  ;;  %v1700_v63 = vshll.u32 %v12795_v56, 16 }
  0x3b   : > { %1127 = vmatmul.bf16.gmra.mxu0 %v993_v44  ;;  %2696 = vmatpush.bf16.msrb.mxu3 %v11786_v53  ;;  %v1405_v44 = vrot.slane %v1013_v34, 3  ;;  %v11706_v53 = vld [vmem:[%s12964_s24 + $0x34] sm:$0xff]  ;;  %v13203_v34 = vld [vmem:[%s12964_s24 + $0x44] sm:$0xff] }
  0x3c   : > { %1300 = vmatmul.bf16.gmra.mxu1 %v1215_v45  ;;  %1948 = vmatpush.bf16.msrb.mxu0 %v11744_v12  ;;  %v1406_v45 = vrot.slane %v1016_v35, 4  ;;  %v1022_v57 = vshrl.u32 %v11706_v53, 16  ;;  %v1025_v58 = vshll.u32 %v11706_v53, 16  ;;  %v1702_v5 = vrot.slane %v1700_v63, 4  ;;  %v13189_v12 = vld [vmem:[%s12964_s24 + $0x3c] sm:$0xff] }
  0x3d   : > { %1500 = vmatmul.bf16.gmra.mxu2 %v1396_v47  ;;  %2238 = vmatpush.bf16.msrb.mxu1 %v11761_v16  ;;  %v1693_v47 = vrot.slane %v1691_v40, 4  ;;  %v1031_v16 = vshrl.u32 %v13189_v12, 16  ;;  %v1034_v17 = vshll.u32 %v13189_v12, 16  ;;  %v1040_v39 = vshrl.u32 %v13203_v34, 16 }
  0x3e   : > { %1802 = vmatmul.bf16.gmra.mxu3 %v1668_v48  ;;  %2527 = vmatpush.bf16.msrb.mxu2 %v11777_v11  ;;  %v1019_v48 = vor.u32 %v1018_v43, %v1015_v42  ;;  %v1407_v50 = vor.u32 %v1406_v45, %v1405_v44  ;;  %v1024_v0 = vrot.slane %v1022_v57, 2  ;;  %v1027_v1 = vrot.slane %v1025_v58, 3  ;;  %v11782_v42 = vld [vmem:[%s16517_s1 + $0x1c0] sm:$0xff] }
  0x3f   : > { %2697 = vmatpush.bf16.msrb.mxu3 %v11785_v13  ;;  %v1694_v51 = vor.u32 %v1693_v47, %v1690_v46  ;;  %v1409_v2 = vrot.slane %v1022_v57, 3  ;;  %v1033_v21 = vrot.slane %v1031_v16, 2  ;;  %v1036_v22 = vrot.slane %v1034_v17, 3  ;;  %v11758_v43 = vld [vmem:[%s16517_s1 + $0x140] sm:$0xff] }
  0x40   : > { %1949 = vmatpush.bf16.msrb.mxu0 %v11743_v37  ;;  %v1020_v24 = vsel %vm16537_vm0, %v1010_v23, %v1019_v48  ;;  %v1408_v54 = vsel %vm16551_vm2, %v1403_v26, %v1407_v50  ;;  %v1413_v23 = vrot.slane %v1031_v16, 3  ;;  %v1414_v25 = vrot.slane %v1034_v17, 4  ;;  %v12798_v37 = vld [vmem:[%s12964_s24 + $0x4c] sm:$0xff]  }
  0x41   : > { %2239 = vmatpush.bf16.msrb.mxu1 %v11760_v41  ;;  %v1695_v55 = vsel %vm16551_vm2, %v1685_v27, %v1694_v51  ;;  %v1708_v26 = vrot.slane %v1706_v19, 3  ;;  %v1711_v27 = vrot.slane %v1709_v20, 4  ;;  %v1043_v40 = vshll.u32 %v13203_v34, 16  ;;  %v11741_v41 = vld [vmem:[%s16517_s1 + $0x100] sm:$0xff]  ;;  %v11813_v19 = vld [vmem:[%s16517_s1 + $0x38] sm:$0xff] }
  0x42   : > { %2528 = vmatpush.bf16.msrb.mxu2 %v11776_v36  ;;  %v1415_v30 = vor.u32 %v1414_v25, %v1413_v23  ;;  %v1715_v44 = vshrl.u32 %v12798_v37, 16  ;;  %v1718_v45 = vshll.u32 %v12798_v37, 16  ;;  %v1042_v46 = vrot.slane %v1040_v39, 2 }
  0x43   : > { %2698 = vmatpush.bf16.msrb.mxu3 %v11784_v38  ;;  %v11774_v38 = vld [vmem:[%s16517_s1 + $0x180] sm:$0xff]  ;;  %v1045_v47 = vrot.slane %v1043_v40, 3 }
  0x44   : > { %1950 = vmatpush.bf16.msrb.mxu0 %v11742_v60 }
  0x45   : > { %2240 = vmatpush.bf16.msrb.mxu1 %v11759_v18 }
  0x46   : > { %2529 = vmatpush.bf16.msrb.mxu2 %v11775_v59 }
  0x47   : > { %2699 = vmatpush.bf16.msrb.mxu3 %v11783_v61 }
  0x48   : > { %1951 = vmatpush.bf16.msrb.mxu0 %v11741_v41  ;;  %v12511_v41 = vld [vmem:[%s12964_s24 + $0x18] sm:$0xf0] }
  0x49   : > { %2241 = vmatpush.bf16.msrb.mxu1 %v11758_v43 }
  0x4a   : > { %2530 = vmatpush.bf16.msrb.mxu2 %v11774_v38  ;;  %v11820_v38 = vld [vmem:[%s16517_s1 + $0x70] sm:$0xff] }
  0x4b   : > { %1132 = vmatmul.bf16.gmra.mxu0 %v1002_v3  ;;  %v1410_v3 = vrot.slane %v1025_v58, 4  ;;  %2700 = vmatpush.bf16.msrb.mxu3 %v11782_v42  ;;  %v12512_v42 = vld [vmem:[%s12964_s24 + $0x18] sm:$0xe] }
  0x4c   : > { %1305 = vmatmul.bf16.gmra.mxu1 %v1217_v4  ;;  %v1699_v4 = vrot.slane %v1697_v62, 3 }
  0x4d   : > { %1505 = vmatmul.bf16.gmra.mxu2 %v1400_v6  ;;  %v1028_v6 = vor.u32 %v1027_v1, %v1024_v0  ;;  %v1411_v8 = vor.u32 %v1410_v3, %v1409_v2  ;;  %3303 = vmatpush.bf16.msra.mxu1 %v11813_v19 }
  0x4e   : > { %1807 = vmatmul.bf16.gmra.mxu3 %v1677_v7  ;;  %v1222_v7 = vrot.slane %v11706_v53, 3  ;;  %v1703_v9 = vor.u32 %v1702_v5, %v1699_v4  ;;  %v13225_v53 = vld [vmem:[%s12964_s24 + $0x50] sm:$0xff]  }
  0x4f   : > { %v1029_v10 = vsel %vm16537_vm0, %v1019_v48, %v1028_v6  ;;  %v1412_v13 = vsel %vm16551_vm2, %v1407_v50, %v1411_v8  ;;  %v1416_v35 = vsel %vm16551_vm2, %v1411_v8, %v1415_v30  ;;  %v1417_v48 = vrot.slane %v1040_v39, 3  ;;  %v11829_v8 = vld [vmem:[%s16517_s1 + $0xb8] sm:$0xff]  ;;  %v13266_v39 = vld [vmem:[%s12964_s24 + $0x20] sm:$0xff] }
  0x50   : > { %v1223_v11 = vsel %vm16534_vm1, %v1220_v49, %v1222_v7  ;;  %v1704_v14 = vsel %vm16551_vm2, %v1694_v51, %v1703_v9  ;;  %v1418_v49 = vrot.slane %v1043_v40, 4  ;;  %v1717_v50 = vrot.slane %v1715_v44, 3  ;;  %3672 = vmatpush.bf16.msra.mxu3 %v11829_v8  ;;  %v12501_v8 = vld [vmem:[%s12964_s24 + $0x10] sm:$0xff]  }
  0x51   : > { %v1720_v51 = vrot.slane %v1718_v45, 4  ;;  %v12124_v60 = vunpack.c.h.b16 %v13225_v53 }
  0x52   : > { %v1419_v57 = vor.u32 %v1418_v49, %v1417_v48 }
  0x53   : > { %v1721_v58 = vor.u32 %v1720_v51, %v1717_v50  ;;  %v1642_v3 = vpack.c.b16 %v12124_v60, %v12124_v60  ;;  %v11812_v60 = vld [vmem:[%s16517_s1 + $0x30] sm:$0xff] }
  0x54   : > { %v1420_v0 = vsel %vm16551_vm2, %v1415_v30, %v1419_v57  ;;  %v11749_v30 = vld [vmem:[%s12964_s24 + $0x10] sm:$0xff]  ;;  %3304 = vmatpush.bf16.msra.mxu1 %v11812_v60 }
  0x55   : > { %v2104_v37 = vshll.u32 %v11749_v30, 16  ;;  %v2102_v45 = vshrl.u32 %v11749_v30, 16  ;;  %v11819_v30 = vld [vmem:[%s16517_s1 + $0x68] sm:$0xff] }
  0x57   : > { %v2106_v49 = vrot.slane %v2104_v37, 1 }
  0x5b   : > { %1137 = vmatmul.bf16.gmra.mxu0 %v1011_v28  ;;  %v1037_v28 = vor.u32 %v1036_v22, %v1033_v21  ;;  %v13248_v22 = vld [vmem:[%s16518_s2] ss:$0 sm:$0xff] }
  0x5c   : > { %1310 = vmatmul.bf16.gmra.mxu1 %v1219_v29  ;;  %v1224_v29 = vrot.slane %v13189_v12, 3  ;;  %v1727_v12 = vshll.u32 %v1642_v3, 16 }
  0x5d   : > { %1510 = vmatmul.bf16.gmra.mxu2 %v1404_v31  ;;  %v1712_v31 = vor.u32 %v1711_v27, %v1708_v26 }
  0x5e   : > { %1812 = vmatmul.bf16.gmra.mxu3 %v1686_v32  ;;  %v1038_v32 = vsel %vm16537_vm0, %v1028_v6, %v1037_v28  ;;  %v1225_v33 = vsel %vm16534_vm1, %v1222_v7, %v1224_v29  ;;  %v11821_v6 = vld [vmem:[%s16517_s1 + $0x78] sm:$0xff]  ;;  %v1729_v18 = vrot.slane %v1727_v12, 4 }
  0x5f   : > { %v1713_v36 = vsel %vm16551_vm2, %v1703_v9, %v1712_v31  ;;  %v1722_v1 = vsel %vm16551_vm2, %v1712_v31, %v1721_v58  ;;  %v11797_v7 = vld [vmem:[%s16517_s1 + $0x238] sm:$0xff]  ;;  %3474 = vmatpush.bf16.msra.mxu2 %v11821_v6 }
  0x60   : > { %2893 = vmatpush.bf16.msra.mxu0 %v11797_v7 }
  0x63   : > { %3475 = vmatpush.bf16.msra.mxu2 %v11820_v38 }
  0x67   : > { %3476 = vmatpush.bf16.msra.mxu2 %v11819_v30 }
  0x6b   : > { %1142 = vmatmul.bf16.gmra.mxu0 %v1020_v24  ;;  %v902_v24 = vld [vmem:[%s12964_s24 + $0x4c] sm:$0x7] }
  0x6c   : > { %1315 = vmatmul.bf16.gmra.mxu1 %v1221_v52  ;;  %v1359_v52 = vld [vmem:[%s12964_s24 + $0x4c] sm:$0xf]  ;;  %v956_v56 = vunpack.c.l.b16 %v902_v24 }
  0x6d   : > { %1515 = vmatmul.bf16.gmra.mxu2 %v1408_v54  ;;  %v1046_v54 = vor.u32 %v1045_v47, %v1042_v46  ;;  %v1378_v59 = vunpack.c.l.b16 %v1359_v52 }
  0x6e   : > { %1817 = vmatmul.bf16.gmra.mxu3 %v1695_v55  ;;  %v1226_v55 = vrot.slane %v13203_v34, 3  ;;  %v966_v63 = vpack.c.b16 %v956_v56, %v956_v56  ;;  %v13257_v34 = vld [vmem:[%s12964_s24 + $0x18] sm:$0xff]  }
  0x6f   : > { %v1047_v61 = vsel %vm16537_vm0, %v1037_v28, %v1046_v54  ;;  %v1379_v2 = vpack.c.b16 %v1378_v59, %v1378_v59  ;;  %v2393_v40 = vshll.u32 %v13257_v34, 16  ;;  %v2391_v51 = vshrl.u32 %v13257_v34, 16 }
  0x70   : > { %v1227_v62 = vsel %vm16534_vm1, %v1224_v29, %v1226_v55  ;;  %v1049_v4 = vshrl.u32 %v966_v63, 16  ;;  %v1052_v5 = vshll.u32 %v966_v63, 16  ;;  %v1228_v21 = vrot.slane %v966_v63, 3 }
  0x71   : > { %v1422_v9 = vshrl.u32 %v1379_v2, 16  ;;  %v2395_v52 = vrot.slane %v2393_v40, 1  ;;  %v2618_v63 = vrot.slane %v13266_v39, 1 }
  0x72   : > { %v1229_v29 = vsel %vm16534_vm1, %v1226_v55, %v1228_v21  ;;  %v13275_v55 = vor.u32 %v12512_v42, %v12511_v41 }
  0x73   : > { %v1424_v15 = vrot.slane %v1422_v9, 3 }
  0x7b   : > { %1147 = vmatmul.bf16.gmra.mxu0 %v1029_v10  ;;  %v1425_v10 = vshll.u32 %v1379_v2, 16  ;;  %v2617_v2 = vrot.slane %v13275_v55, 1 }
  0x7c   : > { %1320 = vmatmul.bf16.gmra.mxu1 %v1223_v11  ;;  %v1724_v11 = vshrl.u32 %v1642_v3, 16 }
  0x7d   : > { %1520 = vmatmul.bf16.gmra.mxu2 %v1412_v13  ;;  %v1051_v13 = vrot.slane %v1049_v4, 2  ;;  %v1427_v16 = vrot.slane %v1425_v10, 4  ;;  %v2619_v12 = vsel %vm16542_vm4, %v2617_v2, %v2618_v63 }
  0x7e   : > { %1822 = vmatmul.bf16.gmra.mxu3 %v1704_v14  ;;  %v1054_v14 = vrot.slane %v1052_v5, 3  ;;  %v1726_v17 = vrot.slane %v1724_v11, 3 }
  0x7f   : > { %v1428_v23 = vor.u32 %v1427_v16, %v1424_v15  ;;  %v11751_v15 = vld [vmem:[%s12964_s24 + $0x20] sm:$0xff]  ;;  %v13301_v16 = vld [vmem:[%s12964_s24 + $0x28] sm:$0xff] }
  0x80   : > { %v1055_v20 = vor.u32 %v1054_v14, %v1051_v13  ;;  %v1730_v25 = vor.u32 %v1729_v18, %v1726_v17  ;;  %v2620_v41 = vrot.slane %v13301_v16, 1  ;;  %v2410_v2 = vshrl.u32 %v13301_v16, 16 }
  0x82   : > { %v1056_v28 = vsel %vm16537_vm0, %v1046_v54, %v1055_v20  ;;  %v2398_v54 = vshll.u32 %v13266_v39, 16 }
  0x8b   : > { %1152 = vmatmul.bf16.gmra.mxu0 %v1038_v32  ;;  %v1429_v32 = vsel %vm16551_vm2, %v1419_v57, %v1428_v23  ;;  %v11796_v57 = vld [vmem:[%s16517_s1 + $0x230] sm:$0xff] }
  0x8c   : > { %1325 = vmatmul.bf16.gmra.mxu1 %v1225_v33  ;;  %v1731_v33 = vsel %vm16551_vm2, %v1721_v58, %v1730_v25  ;;  %v11828_v58 = vld [vmem:[%s16517_s1 + $0xb0] sm:$0xff]  ;;  %2894 = vmatpush.bf16.msra.mxu0 %v11796_v57  ;;  %v2117_v25 = vshll.u32 %v11751_v15, 16 }
  0x8d   : > { %1525 = vmatmul.bf16.gmra.mxu2 %v1416_v35  ;;  %3673 = vmatpush.bf16.msra.mxu3 %v11828_v58  ;;  %v13335_v57 = vld [vmem:[%s12964_s24 + $0x30] sm:$0xff] }
  0x8e   : > { %1827 = vmatmul.bf16.gmra.mxu3 %v1713_v36  ;;  %v13260_v36 = vld [vmem:[%s12964_s24 + $0x18] sm:$0xff]  ;;  %v2119_v37 = vrot.slane %v2117_v25, 1 }
  0x8f   : > { %v2109_v50 = vshll.u32 %v13260_v36, 16  ;;  %v2113_v23 = vshrl.u32 %v13260_v36, 16 }
  0x9b   : > { %1157 = vmatmul.bf16.gmra.mxu0 %v1047_v61  ;;  %v2107_v61 = vor.u32 %v2106_v49, %v2102_v45 }
  0x9c   : > { %1330 = vmatmul.bf16.gmra.mxu1 %v1227_v62  ;;  %v2111_v62 = vrot.slane %v2109_v50, 1  ;;  %v2621_v50 = vsel %vm16542_vm4, %v2618_v63, %v2620_v41 }
  0x9d   : > { %1530 = vmatmul.bf16.gmra.mxu2 %v1420_v0  ;;  %v2396_v0 = vor.u32 %v2395_v52, %v2391_v51  ;;  %v11752_v52 = vld [vmem:[%s12964_s24 + $0x28] sm:$0xff] }
  0x9e   : > { %1832 = vmatmul.bf16.gmra.mxu3 %v1722_v1  ;;  %v2400_v1 = vrot.slane %v2398_v54, 1  ;;  %v2112_v9 = vsel %vm16544_vm3, %v2107_v61, %v2111_v62  ;;  %v2115_v36 = vor.u32 %v2113_v23, %v2111_v62 }
  0xa0   : > { %v2401_v11 = vsel %vm16544_vm3, %v2396_v0, %v2400_v1  ;;  %v2121_v0 = vshrl.u32 %v11751_v15, 16 }
  0xa8   : > { %v1123_v26 = vpop.f32.mrf.mxu0 }
  0xa9   : > { %v1296_v27 = vpop.f32.mrf.mxu1  ;;  %v1171_v31 = vadd.f32 %v13248_v22, %v1123_v26 }
  0xab   : > { %v1341_v35 = vadd.f32 %v1296_v27, %v1171_v31  ;;  %1162 = vmatmul.bf16.gmra.mxu0 %v1056_v28  ;;  %v2402_v27 = vshrl.u32 %v13266_v39, 16  ;;  %v2406_v28 = vshll.u32 %v13301_v16, 16  ;;  %v11876_v16 = vld [vmem:[%s16517_s1 + $0x1a8] sm:$0xff] }
  0xac   : > { %1335 = vmatmul.bf16.gmra.mxu1 %v1229_v29 }
  0xad   : > { %1535 = vmatmul.bf16.gmra.mxu2 %v1429_v32  ;;  %v11795_v32 = vld [vmem:[%s16517_s1 + $0x228] sm:$0xff]  ;;  %v2404_v38 = vor.u32 %v2402_v27, %v2400_v1  ;;  %v2408_v40 = vrot.slane %v2406_v28, 1  ;;  %v2125_v1 = vshll.u32 %v11752_v52, 16 }
  0xae   : > { %1837 = vmatmul.bf16.gmra.mxu3 %v1731_v33  ;;  %v11827_v33 = vld [vmem:[%s16517_s1 + $0xa8] sm:$0xff]  ;;  %2895 = vmatpush.bf16.msra.mxu0 %v11795_v32 }
  0xaf   : > { %3674 = vmatpush.bf16.msra.mxu3 %v11827_v33  ;;  %v2409_v49 = vsel %vm16544_vm3, %v2404_v38, %v2408_v40  ;;  %v11753_v33 = vld [vmem:[%s12964_s24 + $0x30] sm:$0xff] }
  0xb0   : > { %v1496_v43 = vpop.f32.mrf.mxu2  ;;  %v1125_v47 = vpop.f32.mrf.mxu0 }
  0xb1   : > { %v1798_v44 = vpop.f32.mrf.mxu3  ;;  %v1541_v46 = vadd.f32 %v1496_v43, %v1341_v35  ;;  %v1298_v48 = vpop.f32.mrf.mxu1  ;;  %v1172_v24 = vadd.f32 %v13248_v22, %v1125_v47  ;;  %v11811_v35 = vld [vmem:[%s16517_s1 + $0x28] sm:$0xff]  ;;  %v2120_v47 = vsel %vm16544_vm3, %v2115_v36, %v2119_v37 }
  0xb2   : > { %3305 = vmatpush.bf16.msra.mxu1 %v11811_v35  ;;  %v13368_v35 = vld [vmem:[%s12964_s24 + $0x38] sm:$0xff] }
  0xb3   : > { %v13277_v56 = vadd.f32 %v1798_v44, %v1541_v46  ;;  %v1342_v59 = vadd.f32 %v1298_v48, %v1172_v24 }
  0xb8   : > { %v1498_v3 = vpop.f32.mrf.mxu2  ;;  %v1128_v6 = vpop.f32.mrf.mxu0 }
  0xb9   : > { %v1800_v4 = vpop.f32.mrf.mxu3  ;;  %v1542_v5 = vadd.f32 %v1498_v3, %v1342_v59  ;;  %v1301_v7 = vpop.f32.mrf.mxu1  ;;  %v1173_v10 = vadd.f32 %v13248_v22, %v1128_v6  ;;  %v2414_v3 = vshll.u32 %v13335_v57, 16  ;;  %v11794_v6 = vld [vmem:[%s16517_s1 + $0x220] sm:$0xff] }
  0xba   : > { %2896 = vmatpush.bf16.msra.mxu0 %v11794_v6 }
  0xbb   : > { %v13297_v13 = vadd.f32 %v1800_v4, %v1542_v5  ;;  %v1343_v14 = vadd.f32 %v1301_v7, %v1173_v10  ;;  %1952 = vmatmul.bf16.vlgmr.msrb.gmra.mxu0 %v12501_v8  ;;  %v11818_v5 = vld [vmem:[%s16517_s1 + $0x60] sm:$0xff]  ;;  %v2123_v8 = vor.u32 %v2121_v0, %v2119_v37 }
  0xbc   : > { %2242 = vmatmul.bf16.vlgmr.msrb.gmra.mxu1 %v2112_v9  ;;  %v11826_v7 = vld [vmem:[%s16517_s1 + $0xa0] sm:$0xff]  ;;  %v2127_v9 = vrot.slane %v2125_v1, 1  ;;  %3477 = vmatpush.bf16.msra.mxu2 %v11818_v5  ;;  %v12504_v5 = vld [vmem:[%s12964_s24 + $0x28] sm:$0xff]  }
  0xbd   : > { %2531 = vmatmul.bf16.vlgmr.msrb.gmra.mxu2 %v2401_v11  ;;  %v11810_v10 = vld [vmem:[%s16517_s1 + $0x20] sm:$0xff]  ;;  %v2412_v11 = vor.u32 %v2410_v2, %v2408_v40  ;;  %3675 = vmatpush.bf16.msra.mxu3 %v11826_v7 }
  0xbe   : > { %2701 = vmatmul.bf16.vlgmr.msrb.gmra.mxu3 %v2619_v12  ;;  %v2416_v12 = vrot.slane %v2414_v3, 1  ;;  %3306 = vmatpush.bf16.msra.mxu1 %v11810_v10  ;;  %v2128_v23 = vsel %vm16544_vm3, %v2123_v8, %v2127_v9 }
  0xc0   : > { %v1501_v17 = vpop.f32.mrf.mxu2  ;;  %v1130_v20 = vpop.f32.mrf.mxu0 }
  0xc1   : > { %v1803_v18 = vpop.f32.mrf.mxu3  ;;  %v1543_v19 = vadd.f32 %v1501_v17, %v1343_v14  ;;  %v1303_v21 = vpop.f32.mrf.mxu1  ;;  %v1174_v26 = vadd.f32 %v13248_v22, %v1130_v20  ;;  %v2622_v14 = vrot.slane %v13335_v57, 1 }
  0xc3   : > { %v13307_v29 = vadd.f32 %v1803_v18, %v1543_v19  ;;  %v1344_v31 = vadd.f32 %v1303_v21, %v1174_v26  ;;  %v12503_v21 = vld [vmem:[%s12964_s24 + $0x20] sm:$0xff]   ;;  %v2417_v26 = vsel %vm16544_vm3, %v2412_v11, %v2416_v12  ;;  %v2623_v30 = vsel %vm16542_vm4, %v2620_v41, %v2622_v14  ;;  %v11809_v11 = vld [vmem:[%s16517_s1 + $0x18] sm:$0xff] }
  0xc4   : > { %v2418_v41 = vshrl.u32 %v13335_v57, 16  ;;  %3307 = vmatpush.bf16.msra.mxu1 %v11809_v11  ;;  %v11875_v57 = vld [vmem:[%s16517_s1 + $0x1a0] sm:$0xff] }
  0xc8   : > { %v1503_v42 = vpop.f32.mrf.mxu2  ;;  %v1133_v45 = vpop.f32.mrf.mxu0 }
  0xc9   : > { %v1805_v43 = vpop.f32.mrf.mxu3  ;;  %v1544_v44 = vadd.f32 %v1503_v42, %v1344_v31  ;;  %v1306_v46 = vpop.f32.mrf.mxu1  ;;  %v1175_v48 = vadd.f32 %v13248_v22, %v1133_v45 }
  0xcb   : > { %v13330_v51 = vadd.f32 %v1805_v43, %v1544_v44  ;;  %v1345_v24 = vadd.f32 %v1306_v46, %v1175_v48  ;;  %1957 = vmatmul.bf16.gmra.mxu0 %v13257_v34  ;;  %v2129_v43 = vshrl.u32 %v11752_v52, 16  ;;  %v2133_v44 = vshll.u32 %v11753_v33, 16 }
  0xcc   : > { %2247 = vmatmul.bf16.gmra.mxu1 %v2120_v47  ;;  %v2422_v46 = vshll.u32 %v13368_v35, 16 }
  0xcd   : > { %2536 = vmatmul.bf16.gmra.mxu2 %v2409_v49  ;;  %v11817_v49 = vld [vmem:[%s16517_s1 + $0x58] sm:$0xff]  ;;  %v2131_v52 = vor.u32 %v2129_v43, %v2127_v9 }
  0xce   : > { %2706 = vmatmul.bf16.gmra.mxu3 %v2621_v50  ;;  %v11793_v50 = vld [vmem:[%s16517_s1 + $0x218] sm:$0xff]  ;;  %3478 = vmatpush.bf16.msra.mxu2 %v11817_v49 }
  0xcf   : > { %2897 = vmatpush.bf16.msra.mxu0 %v11793_v50 }
  0xd0   : > { %v1506_v58 = vpop.f32.mrf.mxu2  ;;  %v1135_v61 = vpop.f32.mrf.mxu0 }
  0xd1   : > { %v1808_v59 = vpop.f32.mrf.mxu3  ;;  %v1545_v60 = vadd.f32 %v1506_v58, %v1345_v24  ;;  %v1308_v62 = vpop.f32.mrf.mxu1  ;;  %v1176_v63 = vadd.f32 %v13248_v22, %v1135_v61  ;;  %v11825_v24 = vld [vmem:[%s16517_s1 + $0x98] sm:$0xff]  ;;  %v2135_v58 = vrot.slane %v2133_v44, 1  ;;  %v2624_v61 = vrot.slane %v13368_v35, 1 }
  0xd2   : > { %3676 = vmatpush.bf16.msra.mxu3 %v11825_v24 }
  0xd3   : > { %v13340_v34 = vadd.f32 %v1808_v59, %v1545_v60  ;;  %v1346_v4 = vadd.f32 %v1308_v62, %v1176_v63  ;;  %v2420_v59 = vor.u32 %v2418_v41, %v2416_v12  ;;  %v2424_v60 = vrot.slane %v2422_v46, 1 }
  0xd4   : > { %v2136_v6 = vsel %vm16544_vm3, %v2131_v52, %v2135_v58  ;;  %v2625_v9 = vsel %vm16542_vm4, %v2622_v14, %v2624_v61  ;;  %v12505_v52 = vld [vmem:[%s12964_s24 + $0x30] sm:$0xff]  }
  0xd5   : > { %v2425_v8 = vsel %vm16544_vm3, %v2420_v59, %v2424_v60 }
  0xd8   : > { %v1508_v15 = vpop.f32.mrf.mxu2  ;;  %v1138_v19 = vpop.f32.mrf.mxu0 }
  0xd9   : > { %v1810_v17 = vpop.f32.mrf.mxu3  ;;  %v1546_v18 = vadd.f32 %v1508_v15, %v1346_v4  ;;  %v1311_v20 = vpop.f32.mrf.mxu1  ;;  %v1177_v25 = vadd.f32 %v13248_v22, %v1138_v19  ;;  %v11754_v15 = vld [vmem:[%s12964_s24 + $0x38] sm:$0xff] }
  0xdb   : > { %v13364_v31 = vadd.f32 %v1810_v17, %v1546_v18  ;;  %v1347_v32 = vadd.f32 %v1311_v20, %v1177_v25  ;;  %1962 = vmatmul.bf16.gmra.mxu0 %v12503_v21  ;;  %v13401_v17 = vld [vmem:[%s12964_s24 + $0x40] sm:$0xff]  ;;  %v2141_v25 = vshll.u32 %v11754_v15, 16 }
  0xdc   : > { %2252 = vmatmul.bf16.gmra.mxu1 %v2128_v23  ;;  %v2137_v23 = vshrl.u32 %v11753_v33, 16  ;;  %v2626_v44 = vrot.slane %v13401_v17, 1 }
  0xdd   : > { %2541 = vmatmul.bf16.gmra.mxu2 %v2417_v26 }
  0xde   : > { %2711 = vmatmul.bf16.gmra.mxu3 %v2623_v30  ;;  %v2426_v30 = vshrl.u32 %v13368_v35, 16  ;;  %v11874_v35 = vld [vmem:[%s16517_s1 + $0x198] sm:$0xff] }
  0xe0   : > { %v1511_v36 = vpop.f32.mrf.mxu2  ;;  %v1140_v40 = vpop.f32.mrf.mxu0  ;;  %v2428_v33 = vor.u32 %v2426_v30, %v2424_v60 }
  0xe1   : > { %v1813_v37 = vpop.f32.mrf.mxu3  ;;  %v1547_v38 = vadd.f32 %v1511_v36, %v1347_v32  ;;  %v1313_v42 = vpop.f32.mrf.mxu1  ;;  %v1178_v45 = vadd.f32 %v13248_v22, %v1140_v40  ;;  %v2430_v32 = vshll.u32 %v13401_v17, 16  ;;  %v2139_v40 = vor.u32 %v2137_v23, %v2135_v58 }
  0xe3   : > { %v13373_v47 = vadd.f32 %v1813_v37, %v1547_v38  ;;  %v1348_v48 = vadd.f32 %v1313_v42, %v1178_v45  ;;  %v11816_v38 = vld [vmem:[%s16517_s1 + $0x50] sm:$0xff]  ;;  %v2143_v42 = vrot.slane %v2141_v25, 1  ;;  %v2432_v43 = vrot.slane %v2430_v32, 1 }
  0xe4   : > { %3479 = vmatpush.bf16.msra.mxu2 %v11816_v38 }
  0xe5   : > { %v2144_v58 = vsel %vm16544_vm3, %v2139_v40, %v2143_v42  ;;  %v2433_v60 = vsel %vm16544_vm3, %v2428_v33, %v2432_v43 }
  0xe8   : > { %v1513_v62 = vpop.f32.mrf.mxu2  ;;  %v1143_v63 = vpop.f32.mrf.mxu0 }
  0xe9   : > { %v1815_v0 = vpop.f32.mrf.mxu3  ;;  %v1548_v1 = vadd.f32 %v1513_v62, %v1348_v48  ;;  %v1316_v4 = vpop.f32.mrf.mxu1  ;;  %v1179_v7 = vadd.f32 %v13248_v22, %v1143_v63  ;;  %v2627_v62 = vsel %vm16542_vm4, %v2624_v61, %v2626_v44  ;;  %v11824_v63 = vld [vmem:[%s16517_s1 + $0x90] sm:$0xff]  ;;  %v11755_v61 = vld [vmem:[%s12964_s24 + $0x40] sm:$0xff] }
  0xea   : > { %3677 = vmatpush.bf16.msra.mxu3 %v11824_v63  ;;  %v11823_v63 = vld [vmem:[%s16517_s1 + $0x88] sm:$0xff] }
  0xeb   : > { %v13394_v10 = vadd.f32 %v1815_v0, %v1548_v1  ;;  %v1349_v12 = vadd.f32 %v1316_v4, %v1179_v7  ;;  %1967 = vmatmul.bf16.gmra.mxu0 %v12504_v5  ;;  %v11792_v1 = vld [vmem:[%s16517_s1 + $0x210] sm:$0xff] }
  0xec   : > { %2257 = vmatmul.bf16.gmra.mxu1 %v2136_v6  ;;  %v11808_v5 = vld [vmem:[%s16517_s1 + $0x10] sm:$0xff]  ;;  %v13434_v6 = vld [vmem:[%s12964_s24 + $0x48] sm:$0xff]  ;;  %2898 = vmatpush.bf16.msra.mxu0 %v11792_v1 }
  0xed   : > { %2546 = vmatmul.bf16.gmra.mxu2 %v2425_v8  ;;  %3308 = vmatpush.bf16.msra.mxu1 %v11808_v5  ;;  %v11791_v1 = vld [vmem:[%s16517_s1 + $0x208] sm:$0xff]  ;;  %v13469_v5 = vld [vmem:[%s12964_s24 + $0x50] sm:$0xff] }
  0xee   : > { %2716 = vmatmul.bf16.gmra.mxu3 %v2625_v9 }
  0xef   : > { %3678 = vmatpush.bf16.msra.mxu3 %v11823_v63 }
  0xf0   : > { %v1516_v18 = vpop.f32.mrf.mxu2  ;;  %v1145_v21 = vpop.f32.mrf.mxu0  ;;  %2899 = vmatpush.bf16.msra.mxu0 %v11791_v1 }
  0xf1   : > { %v1818_v19 = vpop.f32.mrf.mxu3  ;;  %v1549_v20 = vadd.f32 %v1516_v18, %v1349_v12  ;;  %v1318_v14 = vpop.f32.mrf.mxu1  ;;  %v1180_v26 = vadd.f32 %v13248_v22, %v1145_v21  ;;  %v2145_v18 = vshrl.u32 %v11754_v15, 16  ;;  %v2434_v21 = vshrl.u32 %v13401_v17, 16 }
  0xf2   : > { %v2628_v15 = vrot.slane %v13434_v6, 1 }
  0xf3   : > { %v13406_v36 = vadd.f32 %v1818_v19, %v1549_v20  ;;  %v1350_v37 = vadd.f32 %v1318_v14, %v1180_v26  ;;  %v2149_v19 = vshll.u32 %v11755_v61, 16  ;;  %v16525_v14 = vshll.u32 %v13434_v6, 16 }
  0xf4   : > { %v2147_v26 = vor.u32 %v2145_v18, %v2143_v42  ;;  %v2436_v38 = vor.u32 %v2434_v21, %v2432_v43  ;;  %v2629_v43 = vsel %vm16542_vm4, %v2626_v44, %v2628_v15  ;;  %v13463_v44 = vld [vmem:[%s12964_s24 + $0x48] sm:$0xff]  ;;  %v2153_v18 = vshrl.u32 %v11755_v61, 16 }
  0xf5   : > { %v2440_v40 = vrot.slane %v16525_v14, 1 }
  0xf8   : > { %v1518_v45 = vpop.f32.mrf.mxu2  ;;  %v1148_v50 = vpop.f32.mrf.mxu0 }
  0xf9   : > { %v1820_v48 = vpop.f32.mrf.mxu3  ;;  %v1550_v49 = vadd.f32 %v1518_v45, %v1350_v37  ;;  %v1321_v24 = vpop.f32.mrf.mxu1  ;;  %v1181_v59 = vadd.f32 %v13248_v22, %v1148_v50  ;;  %v2151_v37 = vrot.slane %v2149_v19, 1  ;;  %v2157_v19 = vshll.u32 %v13463_v44, 16 }
  0xfb   : > { %v13421_v0 = vadd.f32 %v1820_v48, %v1550_v49  ;;  %v1351_v4 = vadd.f32 %v1321_v24, %v1181_v59  ;;  %1972 = vmatmul.bf16.gmra.mxu0 %v12505_v52  ;;  %v12506_v24 = vld [vmem:[%s12964_s24 + $0x38] sm:$0xff]   ;;  %v2152_v52 = vsel %vm16544_vm3, %v2147_v26, %v2151_v37  ;;  %v16523_v26 = vshll.u32 %v13469_v5, 16 }
  0xfc   : > { %2262 = vmatmul.bf16.gmra.mxu1 %v2144_v58  ;;  %v2441_v58 = vsel %vm16544_vm3, %v2436_v38, %v2440_v40 }
  0xfd   : > { %2551 = vmatmul.bf16.gmra.mxu2 %v2433_v60  ;;  %v11815_v60 = vld [vmem:[%s16517_s1 + $0x48] sm:$0xff]  ;;  %v2448_v61 = vrot.slane %v16523_v26, 1 }
  0xfe   : > { %2721 = vmatmul.bf16.gmra.mxu3 %v2627_v62  ;;  %3480 = vmatpush.bf16.msra.mxu2 %v11815_v60  ;;  %v12507_v60 = vld [vmem:[%s12964_s24 + $0x40] sm:$0xff]  }
 0x100   : > { %v1521_v7 = vpop.f32.mrf.mxu2  ;;  %v1150_v11 = vpop.f32.mrf.mxu0 }
 0x101   : > { %v1823_v8 = vpop.f32.mrf.mxu3  ;;  %v1551_v9 = vadd.f32 %v1521_v7, %v1351_v4  ;;  %v1323_v12 = vpop.f32.mrf.mxu1  ;;  %v1182_v20 = vadd.f32 %v13248_v22, %v1150_v11  ;;  %v11807_v4 = vld [vmem:[%s16517_s1 + $0x8] sm:$0xff] }
 0x102   : > { %3309 = vmatpush.bf16.msra.mxu1 %v11807_v4 }
 0x103   : > { %v13439_v23 = vadd.f32 %v1823_v8, %v1551_v9  ;;  %v1352_v25 = vadd.f32 %v1323_v12, %v1182_v20 }
 0x108   : > { %v1523_v33 = vpop.f32.mrf.mxu2  ;;  %v1153_v49 = vpop.f32.mrf.mxu0 }
 0x109   : > { %v1825_v45 = vpop.f32.mrf.mxu3  ;;  %v1552_v48 = vadd.f32 %v1523_v33, %v1352_v25  ;;  %v1326_v50 = vpop.f32.mrf.mxu1  ;;  %v1183_v42 = vadd.f32 %v13248_v22, %v1153_v49  ;;  %v16526_v25 = vshrl.u32 %v13434_v6, 16 }
 0x10b   : > { %v13451_v59 = vadd.f32 %v1825_v45, %v1552_v48  ;;  %v1353_v62 = vadd.f32 %v1326_v50, %v1183_v42  ;;  %1977 = vmatmul.bf16.gmra.mxu0 %v12506_v24  ;;  %v2155_v45 = vor.u32 %v2153_v18, %v2151_v37  ;;  %v2159_v48 = vrot.slane %v2157_v19, 1 }
 0x10c   : > { %2267 = vmatmul.bf16.gmra.mxu1 %v2152_v52  ;;  %v2444_v49 = vor.u32 %v16526_v25, %v2440_v40  ;;  %v2630_v50 = vrot.slane %v13469_v5, 1 }
 0x10d   : > { %2556 = vmatmul.bf16.gmra.mxu2 %v2441_v58 }
 0x10e   : > { %2726 = vmatmul.bf16.gmra.mxu3 %v2629_v43  ;;  %v2449_v1 = vsel %vm16544_vm3, %v2444_v49, %v2448_v61  ;;  %v2631_v40 = vsel %vm16542_vm4, %v2628_v15, %v2630_v50  ;;  %v11822_v15 = vld [vmem:[%s16517_s1 + $0x80] sm:$0xff] }
 0x10f   : > { %3679 = vmatpush.bf16.msra.mxu3 %v11822_v15  ;;  %v2324_v15 = vld [vmem:[%s12964_s24 + $0x60] sm:$0x1] }
 0x110   : > { %v1526_v7 = vpop.f32.mrf.mxu2  ;;  %v1155_v11 = vpop.f32.mrf.mxu0 }
 0x111   : > { %v1828_v8 = vpop.f32.mrf.mxu3  ;;  %v1553_v9 = vadd.f32 %v1526_v7, %v1353_v62  ;;  %v1328_v12 = vpop.f32.mrf.mxu1  ;;  %v1184_v20 = vadd.f32 %v13248_v22, %v1155_v11  ;;  %v2160_v62 = vsel %vm16544_vm3, %v2155_v45, %v2159_v48  ;;  %v13490_v7 = vld [vmem:[%s12964_s24 + $0x50] sm:$0xff]  ;;  %v11790_v11 = vld [vmem:[%s16517_s1 + $0x200] sm:$0xff] }
 0x112   : > { %2900 = vmatpush.bf16.msra.mxu0 %v11790_v11  ;;  %v2034_v11 = vld [vmem:[%s12964_s24 + $0x58] sm:$0x1] }
 0x113   : > { %v13475_v38 = vadd.f32 %v1828_v8, %v1553_v9  ;;  %v1354_v33 = vadd.f32 %v1328_v12, %v1184_v20  ;;  %v13493_v8 = vld [vmem:[%s12964_s24 + $0x58] sm:$0xff]  ;;  %v11814_v9 = vld [vmem:[%s16517_s1 + $0x40] sm:$0xff]  ;;  %v2161_v20 = vshrl.u32 %v13463_v44, 16 }
 0x114   : > { %v11806_v12 = vld [vmem:[%s16517_s1] sm:$0xff]  ;;  %3481 = vmatpush.bf16.msra.mxu2 %v11814_v9  ;;  %v2632_v9 = vrot.slane %v13493_v8, 1 }
 0x115   : > { %3310 = vmatpush.bf16.msra.mxu1 %v11806_v12 }
 0x116   : > { %v2633_v39 = vsel %vm16542_vm4, %v2630_v50, %v2632_v9  ;;  %v11837_v50 = vld [vmem:[%s16517_s1 + $0xf8] sm:$0xff] }
 0x117   : > { %3973 = vmatpush.bf16.msrb.mxu0 %v11837_v50 }
 0x118   : > { %v1528_v24 = vpop.f32.mrf.mxu2  ;;  %v1158_v58 = vpop.f32.mrf.mxu0 }
 0x119   : > { %v1830_v52 = vpop.f32.mrf.mxu3  ;;  %v1554_v42 = vadd.f32 %v1528_v24, %v1354_v33  ;;  %v1331_v43 = vpop.f32.mrf.mxu1  ;;  %v1185_v37 = vadd.f32 %v13248_v22, %v1158_v58  ;;  %v2165_v24 = vshll.u32 %v13490_v7, 16 }
 0x11b   : > { %v13487_v63 = vadd.f32 %v1830_v52, %v1554_v42  ;;  %v1355_v4 = vadd.f32 %v1331_v43, %v1185_v37  ;;  %1982 = vmatmul.bf16.gmra.mxu0 %v12507_v60  ;;  %v16524_v52 = vshrl.u32 %v13469_v5, 16  ;;  %v16522_v42 = vshll.u32 %v13493_v8, 16 }
 0x11c   : > { %2272 = vmatmul.bf16.gmra.mxu1 %v2160_v62  ;;  %v2163_v62 = vor.u32 %v2161_v20, %v2159_v48  ;;  %v2167_v44 = vrot.slane %v2165_v24, 1 }
 0x11d   : > { %2561 = vmatmul.bf16.gmra.mxu2 %v2449_v1  ;;  %v2452_v37 = vor.u32 %v16524_v52, %v2448_v61  ;;  %v2456_v1 = vrot.slane %v16522_v42, 1 }
 0x11e   : > { %2731 = vmatmul.bf16.gmra.mxu3 %v2631_v40  ;;  %v2796_v40 = vrot.slane %v2398_v54, 2  ;;  %v2168_v61 = vsel %vm16544_vm3, %v2163_v62, %v2167_v44 }
 0x120   : > { %v1531_v18 = vpop.f32.mrf.mxu2  ;;  %v1160_v45 = vpop.f32.mrf.mxu0 }
 0x121   : > { %v1833_v19 = vpop.f32.mrf.mxu3  ;;  %v1555_v33 = vadd.f32 %v1531_v18, %v1355_v4  ;;  %v1333_v49 = vpop.f32.mrf.mxu1  ;;  %v1186_v58 = vadd.f32 %v13248_v22, %v1160_v45  ;;  %v2795_v4 = vrot.slane %v2402_v27, 1  ;;  %v2457_v45 = vsel %vm16544_vm3, %v2452_v37, %v2456_v1  ;;  %v11862_v37 = vld [vmem:[%s16517_s1 + $0x178] sm:$0xff] }
 0x122   : > { %v2379_v27 = vunpack.c.l.b16 %v2324_v15  ;;  %4415 = vmatpush.bf16.msrb.mxu2 %v11862_v37  ;;  %v11845_v37 = vld [vmem:[%s16517_s1 + $0x138] sm:$0xff] }
 0x123   : > { %v13512_v43 = vadd.f32 %v1833_v19, %v1555_v33  ;;  %v1356_v60 = vadd.f32 %v1333_v49, %v1186_v58  ;;  %v12508_v33 = vld [vmem:[%s12964_s24 + $0x48] sm:$0xff]   ;;  %v2089_v49 = vunpack.c.l.b16 %v2034_v11  ;;  %v13532_v24 = vor.u32 %v2796_v40, %v2795_v4  ;;  %v11878_v40 = vld [vmem:[%s16517_s1 + $0x1b8] sm:$0xff]  ;;  %4127 = vmatpush.bf16.msrb.mxu1 %v11845_v37 }
 0x124   : > { %v2389_v4 = vpack.c.b16 %v2379_v27, %v2379_v27  ;;  %4703 = vmatpush.bf16.msrb.mxu3 %v11878_v40 }
 0x125   : > { %v2099_v62 = vpack.c.b16 %v2089_v49, %v2089_v49  ;;  %v2458_v49 = vshrl.u32 %v13493_v8, 16 }
 0x126   : > { %v2634_v42 = vrot.slane %v2389_v4, 1 }
 0x128   : > { %v1533_v12 = vpop.f32.mrf.mxu2  ;;  %v1163_v19 = vpop.f32.mrf.mxu0 }
 0x129   : > { %v1835_v18 = vpop.f32.mrf.mxu3  ;;  %v1556_v48 = vadd.f32 %v1533_v12, %v1356_v60  ;;  %v1336_v20 = vpop.f32.mrf.mxu1  ;;  %v1187_v54 = vadd.f32 %v13248_v22, %v1163_v19  ;;  %v2169_v19 = vshrl.u32 %v13490_v7, 16 }
 0x12b   : > { %v13534_v58 = vadd.f32 %v1835_v18, %v1556_v48  ;;  %v1357_v60 = vadd.f32 %v1336_v20, %v1187_v54  ;;  %1987 = vmatmul.bf16.gmra.mxu0 %v12508_v33  ;;  %v2173_v20 = vshll.u32 %v2099_v62, 16  ;;  %v3074_v33 = vld [vmem:[%s12964_s24 + $0x4c] sm:$0xc]  ;;  %v2462_v54 = vshll.u32 %v2389_v4, 16 }
 0x12c   : > { %2277 = vmatmul.bf16.gmra.mxu1 %v2168_v61  ;;  %v3075_v61 = vld [vmem:[%s12964_s24 + $0x50] sm:$0xf]  ;;  %v3128_v50 = vunpack.c.l.b16 %v3074_v33  ;;  %v2171_v7 = vor.u32 %v2169_v19, %v2167_v44  ;;  %v13560_v33 = vld [vmem:[%s12964_s24 + $0x54] sm:$0xff] }
 0x12d   : > { %2566 = vmatmul.bf16.gmra.mxu2 %v2457_v45  ;;  %v3129_v40 = vunpack.c.l.b16 %v3075_v61  ;;  %v2175_v62 = vrot.slane %v2173_v20, 1 }
 0x12e   : > { %2736 = vmatmul.bf16.gmra.mxu3 %v2633_v39  ;;  %v3378_v39 = vld [vmem:[%s12964_s24 + $0x4c] sm:$0x8] }
 0x130   : > { %v1536_v11 = vpop.f32.mrf.mxu2  ;;  %v1165_v18 = vpop.f32.mrf.mxu0 }
 0x131   : > { %v1838_v15 = vpop.f32.mrf.mxu3  ;;  %v1557_v12 = vadd.f32 %v1536_v11, %v1357_v60  ;;  %v1338_v48 = vpop.f32.mrf.mxu1  ;;  %v1188_v45 = vadd.f32 %v13248_v22, %v1165_v18  ;;  %v3396_v11 = vunpack.c.l.b16 %v3378_v39  ;;  %v2460_v22 = vor.u32 %v2458_v49, %v2456_v1 }
 0x132   : > { %v2464_v18 = vrot.slane %v2462_v54, 1  ;;  %v2635_v1 = vsel %vm16542_vm4, %v2632_v9, %v2634_v42 }
 0x133   : > { %v13551_v27 = vadd.f32 %v1838_v15, %v1557_v12  ;;  %v1358_v60 = vadd.f32 %v1338_v48, %v1188_v45  ;;  %v3147_v12 = vpack.c.b16 %v3129_v40, %v3128_v50  ;;  %v2176_v48 = vsel %vm16544_vm3, %v2171_v7, %v2175_v62 }
 0x134   : > { %v13562_v61 = vpack.c.b16 %v3129_v40, %v3396_v11  ;;  %v2465_v19 = vsel %vm16544_vm3, %v2460_v22, %v2464_v18  ;;  %v2791_v45 = vshll.u32 %v13275_v55, 16 }
 0x135   : > { %v3158_v54 = vshrl.u32 %v3147_v12, 16  ;;  %v3161_v39 = vshll.u32 %v3147_v12, 16 }
 0x136   : > { %v3567_v42 = vshrl.u32 %v13562_v61, 16  ;;  %v2793_v37 = vrot.slane %v2791_v45, 2  ;;  %v11844_v45 = vld [vmem:[%s16517_s1 + $0x130] sm:$0xff] }
 0x137   : > { %v3163_v50 = vrot.slane %v3161_v39, 3  ;;  %4128 = vmatpush.bf16.msrb.mxu1 %v11844_v45 }
 0x138   : > { %v1538_v26 = vpop.f32.mrf.mxu2  ;;  %v1953_v14 = vpop.f32.mrf.mxu0  ;;  %v3569_v18 = vrot.slane %v3567_v42, 3 }
 0x139   : > { %v1840_v15 = vpop.f32.mrf.mxu3  ;;  %v1558_v52 = vadd.f32 %v1538_v26, %v1358_v60  ;;  %v2243_v25 = vpop.f32.mrf.mxu1  ;;  %v1998_v44 = vadd.f32 %v1953_v14, %v13277_v56  ;;  %v2788_v26 = vshrl.u32 %v13275_v55, 16  ;;  %v3166_v56 = vshrl.u32 %v13560_v33, 16 }
 0x13a   : > { %v3169_v14 = vshll.u32 %v13560_v33, 16  ;;  %v3160_v60 = vrot.slane %v3158_v54, 2 }
 0x13b   : > { %v13569_v4 = vadd.f32 %v1840_v15, %v1558_v52  ;;  %v2288_v20 = vadd.f32 %v2243_v25, %v1998_v44  ;;  %1992 = vmatmul.bf16.gmra.mxu0 %v13225_v53  ;;  %v11861_v52 = vld [vmem:[%s16517_s1 + $0x170] sm:$0xff]  ;;  %v3570_v25 = vshll.u32 %v13562_v61, 16  ;;  %v2790_v55 = vrot.slane %v2788_v26, 1 }
 0x13c   : > { %2282 = vmatmul.bf16.gmra.mxu1 %v2176_v48  ;;  %4416 = vmatpush.bf16.msrb.mxu2 %v11861_v52  ;;  %v3168_v11 = vrot.slane %v3166_v56, 2  ;;  %v3171_v22 = vrot.slane %v3169_v14, 3  ;;  %v3574_v48 = vrot.slane %v3166_v56, 3  ;;  %v3575_v44 = vrot.slane %v3169_v14, 4  ;;  %v11877_v26 = vld [vmem:[%s16517_s1 + $0x1b0] sm:$0xff] }
 0x13d   : > { %2571 = vmatmul.bf16.gmra.mxu2 %v2465_v19  ;;  %v3572_v12 = vrot.slane %v3570_v25, 4  ;;  %v3164_v54 = vor.u32 %v3163_v50, %v3160_v60  ;;  %4704 = vmatpush.bf16.msrb.mxu3 %v11877_v26  ;;  %v3398_v56 = vrot.slane %v13562_v61, 3  ;;  %v3399_v14 = vrot.slane %v13560_v33, 3  ;;  %v13599_v60 = vld [vmem:[%s12964_s24 + $0x5c] sm:$0xff] }
 0x13e   : > { %2741 = vmatmul.bf16.gmra.mxu3 %v2635_v1  ;;  %v11836_v1 = vld [vmem:[%s16517_s1 + $0xf0] sm:$0xff]  ;;  %v3172_v39 = vor.u32 %v3171_v22, %v3168_v11  ;;  %v3576_v52 = vor.u32 %v3575_v44, %v3574_v48  ;;  %v3175_v22 = vshrl.u32 %v13599_v60, 16  ;;  %v2800_v26 = vrot.slane %v2406_v28, 2  ;;  %v11843_v28 = vld [vmem:[%s16517_s1 + $0x128] sm:$0xff] }
 0x13f   : > { %3974 = vmatpush.bf16.msrb.mxu0 %v11836_v1  ;;  %v3573_v42 = vor.u32 %v3572_v12, %v3569_v18  ;;  %v3400_v61 = vsel %vm16534_vm1, %v3398_v56, %v3399_v14  ;;  %v3178_v18 = vshll.u32 %v13599_v60, 16  ;;  %4129 = vmatpush.bf16.msrb.mxu1 %v11843_v28  ;;  %v11842_v28 = vld [vmem:[%s16517_s1 + $0x120] sm:$0xff] }
 0x140   : > { %v2532_v53 = vpop.f32.mrf.mxu2  ;;  %v1955_v7 = vpop.f32.mrf.mxu0 }
 0x141   : > { %v2702_v9 = vpop.f32.mrf.mxu3  ;;  %v2577_v40 = vadd.f32 %v2532_v53, %v2288_v20  ;;  %v2245_v62 = vpop.f32.mrf.mxu1  ;;  %v1999_v15 = vadd.f32 %v1955_v7, %v13297_v13  ;;  %v2794_v13 = vor.u32 %v2793_v37, %v2790_v55  ;;  %v3173_v37 = vsel %vm16537_vm0, %v3164_v54, %v3172_v39  ;;  %4705 = vmatpush.bf16.msrb.mxu3 %v11876_v16  ;;  %v11859_v16 = vld [vmem:[%s16517_s1 + $0x160] sm:$0xff] }
 0x142   : > { %v3577_v33 = vsel %vm16551_vm2, %v3573_v42, %v3576_v52  ;;  %v3180_v45 = vrot.slane %v3178_v18, 3  ;;  %v3578_v54 = vrot.slane %v3175_v22, 3  ;;  %v3579_v56 = vrot.slane %v3178_v18, 4  ;;  %v13632_v18 = vld [vmem:[%s12964_s24 + $0x64] sm:$0xff] }
 0x143   : > { %v13582_v19 = vadd.f32 %v2702_v9, %v2577_v40  ;;  %v2289_v20 = vadd.f32 %v2245_v62, %v1999_v15  ;;  %v2798_v55 = vsel %vm16543_vm5, %v2794_v13, %v13532_v24  ;;  %4130 = vmatpush.bf16.msrb.mxu1 %v11842_v28 }
 0x145   : > { %4706 = vmatpush.bf16.msrb.mxu3 %v11875_v57 }
 0x148   : > { %v2534_v25 = vpop.f32.mrf.mxu2  ;;  %v1958_v40 = vpop.f32.mrf.mxu0 }
 0x149   : > { %v2704_v53 = vpop.f32.mrf.mxu3  ;;  %v2578_v9 = vadd.f32 %v2534_v25, %v2289_v20  ;;  %v2248_v7 = vpop.f32.mrf.mxu1  ;;  %v2000_v50 = vadd.f32 %v1958_v40, %v13307_v29  ;;  %v2799_v29 = vrot.slane %v2410_v2, 1  ;;  %v3177_v20 = vrot.slane %v3175_v22, 2  ;;  %v11860_v25 = vld [vmem:[%s16517_s1 + $0x168] sm:$0xff]  ;;  %4707 = vmatpush.bf16.msrb.mxu3 %v11874_v35 }
 0x14a   : > { %v11835_v2 = vld [vmem:[%s16517_s1 + $0xe8] sm:$0xff]  ;;  %4417 = vmatpush.bf16.msrb.mxu2 %v11860_v25  ;;  %v3401_v40 = vrot.slane %v13599_v60, 3 }
 0x14b   : > { %v13604_v62 = vadd.f32 %v2704_v53, %v2578_v9  ;;  %v2290_v11 = vadd.f32 %v2248_v7, %v2000_v50  ;;  %2901 = vmatmul.bf16.vlgmr.msra.gmra.mxu0 %v2798_v55  ;;  %v3181_v9 = vor.u32 %v3180_v45, %v3177_v20  ;;  %v3580_v7 = vor.u32 %v3579_v56, %v3578_v54 }
 0x14c   : > { %3311 = vmatmul.bf16.vlgmr.msra.gmra.mxu1 %v3173_v37  ;;  %3975 = vmatpush.bf16.msrb.mxu0 %v11835_v2  ;;  %v3402_v60 = vsel %vm16534_vm1, %v3399_v14, %v3401_v40 }
 0x14d   : > { %3482 = vmatmul.bf16.vlgmr.msra.gmra.mxu2 %v3400_v61  ;;  %v3182_v22 = vsel %vm16537_vm0, %v3172_v39, %v3181_v9 }
 0x14e   : > { %3680 = vmatmul.bf16.vlgmr.msra.gmra.mxu3 %v3577_v33  ;;  %4418 = vmatpush.bf16.msrb.mxu2 %v11859_v16 }
 0x150   : > { %v2537_v15 = vpop.f32.mrf.mxu2  ;;  %v1960_v44 = vpop.f32.mrf.mxu0 }
 0x151   : > { %v2707_v12 = vpop.f32.mrf.mxu3  ;;  %v2579_v48 = vadd.f32 %v2537_v15, %v2290_v11  ;;  %v2250_v1 = vpop.f32.mrf.mxu1  ;;  %v2001_v13 = vadd.f32 %v1960_v44, %v13330_v51  ;;  %v2801_v51 = vor.u32 %v2800_v26, %v2799_v29  ;;  %v3184_v44 = vshrl.u32 %v13632_v18, 16 }
 0x153   : > { %v13613_v42 = vadd.f32 %v2707_v12, %v2579_v48  ;;  %v2291_v53 = vadd.f32 %v2250_v1, %v2001_v13  ;;  %v2802_v11 = vsel %vm16543_vm5, %v13532_v24, %v2801_v51  ;;  %v3581_v12 = vsel %vm16551_vm2, %v3576_v52, %v3580_v7 }
 0x154   : > { %v3187_v24 = vshll.u32 %v13632_v18, 16  ;;  %v2804_v52 = vrot.slane %v2414_v3, 2  ;;  %v3186_v45 = vrot.slane %v3184_v44, 2  ;;  %v3582_v56 = vrot.slane %v3184_v44, 3 }
 0x156   : > { %v3189_v13 = vrot.slane %v3187_v24, 3  ;;  %v3583_v25 = vrot.slane %v3187_v24, 4 }
 0x158   : > { %v2539_v55 = vpop.f32.mrf.mxu2  ;;  %v1963_v61 = vpop.f32.mrf.mxu0 }
 0x159   : > { %v2709_v37 = vpop.f32.mrf.mxu3  ;;  %v2580_v50 = vadd.f32 %v2539_v55, %v2291_v53  ;;  %v2253_v33 = vpop.f32.mrf.mxu1  ;;  %v2002_v15 = vadd.f32 %v1963_v61, %v13340_v34  ;;  %v2803_v34 = vrot.slane %v2418_v41, 1  ;;  %v11834_v41 = vld [vmem:[%s16517_s1 + $0xe0] sm:$0xff]  ;;  %v3403_v55 = vrot.slane %v13632_v18, 3 }
 0x15a   : > { %3976 = vmatpush.bf16.msrb.mxu0 %v11834_v41 }
 0x15b   : > { %v13637_v29 = vadd.f32 %v2709_v37, %v2580_v50  ;;  %v2292_v48 = vadd.f32 %v2253_v33, %v2002_v15  ;;  %2906 = vmatmul.bf16.gmra.mxu0 %v2802_v11  ;;  %v2805_v3 = vor.u32 %v2804_v52, %v2803_v34  ;;  %v3584_v37 = vor.u32 %v3583_v25, %v3582_v56 }
 0x15c   : > { %3316 = vmatmul.bf16.gmra.mxu1 %v3182_v22  ;;  %v3404_v18 = vsel %vm16534_vm1, %v3401_v40, %v3403_v55 }
 0x15d   : > { %3487 = vmatmul.bf16.gmra.mxu2 %v3402_v60  ;;  %v2806_v15 = vsel %vm16543_vm5, %v2801_v51, %v2805_v3  ;;  %v3585_v44 = vsel %vm16551_vm2, %v3580_v7, %v3584_v37  ;;  %v2808_v7 = vrot.slane %v2422_v46, 2 }
 0x15e   : > { %3685 = vmatmul.bf16.gmra.mxu3 %v3581_v12  ;;  %v13664_v12 = vld [vmem:[%s12964_s24 + $0x6c] sm:$0xff] }
 0x15f   : > { %v3196_v51 = vshll.u32 %v13664_v12, 16  ;;  %v3405_v16 = vrot.slane %v13664_v12, 3 }
 0x160   : > { %v2542_v39 = vpop.f32.mrf.mxu2  ;;  %v1965_v14 = vpop.f32.mrf.mxu0 }
 0x161   : > { %v2712_v1 = vpop.f32.mrf.mxu3  ;;  %v2581_v26 = vadd.f32 %v2542_v39, %v2292_v48  ;;  %v2255_v20 = vpop.f32.mrf.mxu1  ;;  %v2003_v54 = vadd.f32 %v1965_v14, %v13364_v31  ;;  %v3190_v31 = vor.u32 %v3189_v13, %v3186_v45  ;;  %v3198_v52 = vrot.slane %v3196_v51, 3 }
 0x163   : > { %v13646_v53 = vadd.f32 %v2712_v1, %v2581_v26  ;;  %v2293_v2 = vadd.f32 %v2255_v20, %v2003_v54  ;;  %v3191_v60 = vsel %vm16537_vm0, %v3181_v9, %v3190_v31  ;;  %v3193_v1 = vshrl.u32 %v13664_v12, 16 }
 0x164   : > { %v3587_v54 = vrot.slane %v3196_v51, 4 }
 0x165   : > { %v3195_v20 = vrot.slane %v3193_v1, 2  ;;  %v3586_v13 = vrot.slane %v3193_v1, 3 }
 0x167   : > { %v3588_v41 = vor.u32 %v3587_v54, %v3586_v13  ;;  %v13723_v54 = vld [vmem:[%s12964_s24 + $0x7c] sm:$0xff] }
 0x168   : > { %v2544_v50 = vpop.f32.mrf.mxu2  ;;  %v1968_v11 = vpop.f32.mrf.mxu0 }
 0x169   : > { %v2714_v61 = vpop.f32.mrf.mxu3  ;;  %v2582_v33 = vadd.f32 %v2544_v50, %v2293_v2  ;;  %v2258_v22 = vpop.f32.mrf.mxu1  ;;  %v2004_v48 = vadd.f32 %v1968_v11, %v13373_v47  ;;  %v2807_v47 = vrot.slane %v2426_v30, 1  ;;  %v11858_v2 = vld [vmem:[%s16517_s1 + $0x158] sm:$0xff]  ;;  %v3589_v12 = vsel %vm16551_vm2, %v3584_v37, %v3588_v41 }
 0x16a   : > { %v11833_v30 = vld [vmem:[%s16517_s1 + $0xd8] sm:$0xff]  ;;  %4419 = vmatpush.bf16.msrb.mxu2 %v11858_v2  ;;  %v2811_v37 = vrot.slane %v2434_v21, 1  ;;  %v11857_v21 = vld [vmem:[%s16517_s1 + $0x150] sm:$0xff] }
 0x16b   : > { %v13669_v24 = vadd.f32 %v2714_v61, %v2582_v33  ;;  %v2294_v39 = vadd.f32 %v2258_v22, %v2004_v48  ;;  %2911 = vmatmul.bf16.gmra.mxu0 %v2806_v15  ;;  %v2809_v46 = vor.u32 %v2808_v7, %v2807_v47  ;;  %v13693_v15 = vld [vmem:[%s12964_s24 + $0x74] sm:$0xff]  ;;  %v3406_v48 = vsel %vm16534_vm1, %v3403_v55, %v3405_v16 }
 0x16c   : > { %3321 = vmatmul.bf16.gmra.mxu1 %v3191_v60  ;;  %3977 = vmatpush.bf16.msrb.mxu0 %v11833_v30  ;;  %v3407_v17 = vrot.slane %v13693_v15, 3 }
 0x16d   : > { %3492 = vmatmul.bf16.gmra.mxu2 %v3404_v18  ;;  %v2810_v11 = vsel %vm16543_vm5, %v2805_v3, %v2809_v46  ;;  %v3202_v3 = vshrl.u32 %v13693_v15, 16 }
 0x16e   : > { %3690 = vmatmul.bf16.gmra.mxu3 %v3585_v44  ;;  %v11841_v44 = vld [vmem:[%s16517_s1 + $0x118] sm:$0xff]  ;;  %4420 = vmatpush.bf16.msrb.mxu2 %v11857_v21  ;;  %v16581_v21 = vshll.u32 %v13469_v5, 16 }
 0x16f   : > { %4131 = vmatpush.bf16.msrb.mxu1 %v11841_v44  ;;  %v3204_v47 = vrot.slane %v3202_v3, 2  ;;  %v16579_v44 = vshll.u32 %v13434_v6, 16 }
 0x170   : > { %v2547_v9 = vpop.f32.mrf.mxu2  ;;  %v1970_v40 = vpop.f32.mrf.mxu0 }
 0x171   : > { %v2717_v34 = vpop.f32.mrf.mxu3  ;;  %v2583_v26 = vadd.f32 %v2547_v9, %v2294_v39  ;;  %v2260_v14 = vpop.f32.mrf.mxu1  ;;  %v2005_v45 = vadd.f32 %v1970_v40, %v13394_v10  ;;  %v3199_v10 = vor.u32 %v3198_v52, %v3195_v20 }
 0x173   : > { %v13678_v56 = vadd.f32 %v2717_v34, %v2583_v26  ;;  %v2295_v25 = vadd.f32 %v2260_v14, %v2005_v45  ;;  %v3200_v22 = vsel %vm16537_vm0, %v3190_v31, %v3199_v10  ;;  %v3205_v31 = vshll.u32 %v13693_v15, 16 }
 0x174   : > { %v2812_v34 = vrot.slane %v2430_v32, 2  ;;  %v3590_v14 = vrot.slane %v3202_v3, 3 }
 0x175   : > { %v3207_v26 = vrot.slane %v3205_v31, 3  ;;  %v3591_v7 = vrot.slane %v3205_v31, 4 }
 0x176   : > { %v13715_v45 = vor.u32 %v2812_v34, %v2811_v37 }
 0x177   : > { %v13717_v13 = vor.u32 %v3207_v26, %v3204_v47  ;;  %v13720_v32 = vor.u32 %v3591_v7, %v3590_v14  ;;  %v16580_v7 = vshrl.u32 %v13469_v5, 16 }
 0x178   : > { %v2549_v57 = vpop.f32.mrf.mxu2  ;;  %v1973_v61 = vpop.f32.mrf.mxu0 }
 0x179   : > { %v2719_v28 = vpop.f32.mrf.mxu3  ;;  %v2584_v50 = vadd.f32 %v2549_v57, %v2295_v25  ;;  %v2263_v33 = vpop.f32.mrf.mxu1  ;;  %v2006_v60 = vadd.f32 %v1973_v61, %v13406_v36  ;;  %v2814_v57 = vsel %vm16543_vm5, %v2809_v46, %v13715_v45  ;;  %v3408_v61 = vsel %vm16534_vm1, %v3405_v16, %v3407_v17  ;;  %v11832_v46 = vld [vmem:[%s16517_s1 + $0xd0] sm:$0xff] }
 0x17a   : > { %v11840_v16 = vld [vmem:[%s16517_s1 + $0x110] sm:$0xff]  ;;  %3978 = vmatpush.bf16.msrb.mxu0 %v11832_v46 }
 0x17b   : > { %v13698_v18 = vadd.f32 %v2719_v28, %v2584_v50  ;;  %v2296_v39 = vadd.f32 %v2263_v33, %v2006_v60  ;;  %2916 = vmatmul.bf16.gmra.mxu0 %v2810_v11  ;;  %v3209_v28 = vsel %vm16537_vm0, %v3199_v10, %v13717_v13  ;;  %v3593_v33 = vsel %vm16551_vm2, %v3588_v41, %v13720_v32  ;;  %v13749_v41 = vld [vmem:[%s12964_s24 + $0x84] sm:$0xff] }
 0x17c   : > { %3326 = vmatmul.bf16.gmra.mxu1 %v3200_v22  ;;  %v3211_v22 = vshrl.u32 %v13723_v54, 16  ;;  %v3214_v60 = vshll.u32 %v13723_v54, 16  ;;  %v3411_v15 = vrot.slane %v13749_v41, 3 }
 0x17d   : > { %3497 = vmatmul.bf16.gmra.mxu2 %v3406_v48  ;;  %v16578_v48 = vshrl.u32 %v13434_v6, 16  ;;  %4132 = vmatpush.bf16.msrb.mxu1 %v11840_v16 }
 0x17e   : > { %3695 = vmatmul.bf16.gmra.mxu3 %v3589_v12  ;;  %v3213_v3 = vrot.slane %v3211_v22, 2  ;;  %v3216_v31 = vrot.slane %v3214_v60, 3  ;;  %v3594_v37 = vrot.slane %v3211_v22, 3 }
 0x17f   : > { %v2815_v12 = vrot.slane %v16578_v48, 1 }
 0x180   : > { %v2552_v36 = vpop.f32.mrf.mxu2  ;;  %v1975_v51 = vpop.f32.mrf.mxu0 }
 0x181   : > { %v2722_v55 = vpop.f32.mrf.mxu3  ;;  %v2585_v1 = vadd.f32 %v2552_v36, %v2296_v39  ;;  %v2265_v9 = vpop.f32.mrf.mxu1  ;;  %v2007_v40 = vadd.f32 %v1975_v51, %v13421_v0  ;;  %v2816_v39 = vrot.slane %v16579_v44, 2  ;;  %v3220_v51 = vshrl.u32 %v13749_v41, 16 }
 0x183   : > { %v13710_v20 = vadd.f32 %v2722_v55, %v2585_v1  ;;  %v2297_v52 = vadd.f32 %v2265_v9, %v2007_v40  ;;  %v3595_v1 = vrot.slane %v3214_v60, 4  ;;  %v3223_v9 = vshll.u32 %v13749_v41, 16 }
 0x184   : > { %v234_v40 = vlaneseq  ;;  %v2817_v14 = vor.u32 %v2816_v39, %v2815_v12 }
 0x185   : > { %v3599_v22 = vrot.slane %v3223_v9, 4 }
 0x186   : > { %v2818_v5 = vsel %vm16543_vm5, %v13715_v45, %v2817_v14 }
 0x188   : > { %v2554_v0 = vpop.f32.mrf.mxu2  ;;  %v1978_v30 = vpop.f32.mrf.mxu0 }
 0x189   : > { %v2724_v25 = vpop.f32.mrf.mxu3  ;;  %v2586_v2 = vadd.f32 %v2554_v0, %v2297_v52  ;;  %v2268_v35 = vpop.f32.mrf.mxu1  ;;  %v2008_v50 = vadd.f32 %v1978_v30, %v13439_v23  ;;  %v11873_v23 = vld [vmem:[%s16517_s1 + $0x190] sm:$0xff]  ;;  %v2819_v52 = vrot.slane %v16580_v7, 1  ;;  %v2820_v0 = vrot.slane %v16581_v21, 2  ;;  %v11839_v21 = vld [vmem:[%s16517_s1 + $0x108] sm:$0xff] }
 0x18a   : > { %4708 = vmatpush.bf16.msrb.mxu3 %v11873_v23  ;;  %v3409_v30 = vrot.slane %v13723_v54, 3  ;;  %4133 = vmatpush.bf16.msrb.mxu1 %v11839_v21 }
 0x18b   : > { %v13735_v11 = vadd.f32 %v2724_v25, %v2586_v2  ;;  %v2298_v10 = vadd.f32 %v2268_v35, %v2008_v50  ;;  %2921 = vmatmul.bf16.gmra.mxu0 %v2814_v57  ;;  %v3217_v2 = vor.u32 %v3216_v31, %v3213_v3  ;;  %v13765_v35 = vshrl.u32 %v234_v40, 7 }
 0x18c   : > { %3331 = vmatmul.bf16.gmra.mxu1 %v3209_v28  ;;  %v3596_v28 = vor.u32 %v3595_v1, %v3594_v37  ;;  %v3222_v50 = vrot.slane %v3220_v51, 2  ;;  %v13771_v46 = vor.u32 %v2820_v0, %v2819_v52  ;;  %v3410_v23 = vsel %vm16534_vm1, %v3407_v17, %v3409_v30 }
 0x18d   : > { %3502 = vmatmul.bf16.gmra.mxu2 %v3408_v61  ;;  %v3225_v61 = vrot.slane %v3223_v9, 3  ;;  %v256_v60 = vand.u32 65535, %v13765_v35  ;;  %v3218_v54 = vsel %vm16537_vm0, %v13717_v13, %v3217_v2  ;;  %v2823_v37 = vrot.slane %v2458_v49, 1  ;;  %v11872_v49 = vld [vmem:[%s16517_s1 + $0x188] sm:$0xff] }
 0x18e   : > { %3700 = vmatmul.bf16.gmra.mxu3 %v3593_v33  ;;  %v13768_v33 = vld [vmem:[%s12964_s24 + $0x8c] sm:$0xff]  ;;  %v3597_v12 = vsel %vm16551_vm2, %v13720_v32, %v3596_v28  ;;  %v13795_v32 = vsel %vm16543_vm5, %v2817_v14, %v13771_v46  ;;  %v16582_v1 = vshll.u32 %v13493_v8, 16  ;;  %v13821_v7 = vsel %vm16534_vm1, %v3409_v30, %v3411_v15 }
 0x18f   : > { %v13783_v44 = vor.u32 %v3225_v61, %v3222_v50  ;;  %v3229_v39 = vshrl.u32 %v13768_v33, 16  ;;  %v3232_v45 = vshll.u32 %v13768_v33, 16  ;;  %v13790_v17 = vmul.u32 58254, %v256_v60  ;;  %v11831_v8 = vld [vmem:[%s16517_s1 + $0xc8] sm:$0xff]  ;;  %4709 = vmatpush.bf16.msrb.mxu3 %v11872_v49 }
 0x190   : > { %v2557_v36 = vpop.f32.mrf.mxu2  ;;  %v1980_v47 = vpop.f32.mrf.mxu0  ;;  %3979 = vmatpush.bf16.msrb.mxu0 %v11831_v8  ;;  %v3546_v8 = vld [vmem:[%s12964_s24 + $0x94] sm:$0xf]  ;;  %v13901_v41 = vadd.s32 16, %v13765_v35 }
 0x191   : > { %v2727_v55 = vpop.f32.mrf.mxu3  ;;  %v2587_v34 = vadd.f32 %v2557_v36, %v2298_v10  ;;  %v2270_v26 = vpop.f32.mrf.mxu1  ;;  %v2009_v6 = vadd.f32 %v1980_v47, %v13451_v59  ;;  %v3598_v59 = vrot.slane %v3220_v51, 3  ;;  %v257_v10 = vshrl.u32 %v13765_v35, 16 }
 0x192   : > { %v2824_v51 = vrot.slane %v16582_v1, 2  ;;  %v259_v47 = vmul.u32 14564, %v256_v60  ;;  %v13810_v40 = vsel %vm16537_vm0, %v3217_v2, %v13783_v44  ;;  %v3234_v14 = vrot.slane %v3232_v45, 3 }
 0x193   : > { %v13762_v25 = vadd.f32 %v2727_v55, %v2587_v34  ;;  %v2299_v57 = vadd.f32 %v2270_v26, %v2009_v6  ;;  %v13788_v36 = vor.u32 %v3599_v22, %v3598_v59  ;;  %v11856_v34 = vld [vmem:[%s16517_s1 + $0x148] sm:$0xff]  ;;  %v13806_v26 = vmul.u32 14564, %v257_v10 }
 0x194   : > { %v3231_v6 = vrot.slane %v3229_v39, 2  ;;  %v262_v0 = vmul.u32 58254, %v257_v10  ;;  %v263_v2 = vshll.u32 %v13790_v17, 16  ;;  %4421 = vmatpush.bf16.msrb.mxu2 %v11856_v34  ;;  %v3602_v50 = vrot.slane %v3229_v39, 3 }
 0x195   : > { %v13825_v52 = vsel %vm16551_vm2, %v3596_v28, %v13788_v36  ;;  %v3603_v61 = vrot.slane %v3232_v45, 4  ;;  %v265_v30 = vshll.u32 %v13806_v26, 16  ;;  %v13835_v28 = vadd.s32 8, %v13765_v35 }
 0x196   : > { %v13837_v59 = vor.u32 %v2824_v51, %v2823_v37  ;;  %vm267_vm6 = vc.u32 %v259_v47, %v263_v2  ;;  %v269_v22 = vadd.s32 %v263_v2, %v259_v47  ;;  %v264_v10 = vshrl.u32 %v13790_v17, 16  ;;  %v3092_v37 = vld [vmem:[%s12964_s24 + $0x94] sm:$0x7] }
 0x197   : > { %v286_v1 = vshrl.u32 %v13835_v28, 16  ;;  %v266_v34 = vshrl.u32 %v13806_v26, 16 }
 0x198   : > { %v2559_v16 = vpop.f32.mrf.mxu2  ;;  %v1983_v31 = vpop.f32.mrf.mxu0  ;;  %vm271_vm7 = vc.u32 %v269_v22, %v265_v30  ;;  %v13864_v21 = vsel %vm16543_vm5, %v13771_v46, %v13837_v59 }
 0x199   : > { %v2729_v48 = vpop.f32.mrf.mxu3  ;;  %v2588_v3 = vadd.f32 %v2559_v16, %v2299_v57  ;;  %v2273_v13 = vpop.f32.mrf.mxu1  ;;  %v2010_v55 = vadd.f32 %v1983_v31, %v13475_v38  ;;  %v16527_v57 = vmov 0   ;;  %v285_v31 = vand.u32 65535, %v13835_v28 }
 0x19a   : > { %227 = vst [vmem:[#allocation2 + $0x4] sm:$0xf] %v16527_v57  ;;  %v268_v16 = vsel %vm267_vm6, 1, %v16527_v57 }
 0x19b   : > { %v13801_v9 = vadd.f32 %v2729_v48, %v2588_v3  ;;  %v2300_v38 = vadd.f32 %v2273_v13, %v2010_v55  ;;  %2926 = vmatmul.bf16.gmra.mxu0 %v2818_v5  ;;  %228 = vst [vmem:[#allocation2 + $0x8] sm:$0xf] %v16527_v57  ;;  %v270_v45 = vadd.s32 %v268_v16, %v262_v0  ;;  %v2765_v3 = vld [vmem:[%s12964_s24 + $0x60] sm:$0x3]  ;;  %v272_v55 = vsel %vm271_vm7, 1, %v16527_v57 }
 0x19c   : > { %3336 = vmatmul.bf16.gmra.mxu1 %v3218_v54  ;;  %229 = vst [vmem:[#allocation2 + $0xc] sm:$0xf] %v16527_v57  ;;  %v13840_v54 = vor.u32 %v3234_v14, %v3231_v6  ;;  %v2784_v17 = vunpack.c.l.b16 %v2765_v3  ;;  %v13859_v6 = vor.u32 %v3603_v61, %v3602_v50  ;;  %v3564_v14 = vunpack.c.l.b16 %v3546_v8 }
 0x19d   : > { %3507 = vmatmul.bf16.gmra.mxu2 %v3410_v23  ;;  %v3413_v23 = vrot.slane %v13768_v33, 3  ;;  %230 = vst [vmem:[#allocation2 + $0x9c] sm:$0xf] %v16527_v57  ;;  %v274_v47 = vadd.s32 %v272_v55, %v270_v45  ;;  %v315_v33 = vshrl.u32 %v13901_v41, 16 }
 0x19e   : > { %3705 = vmatmul.bf16.gmra.mxu3 %v3597_v12  ;;  %231 = vst [vmem:[#allocation2 + $0xa0] sm:$0xf] %v16527_v57  ;;  %v13869_v0 = vsel %vm16537_vm0, %v13783_v44, %v13840_v54 }
 0x19f   : > { %232 = vst [vmem:[#allocation2 + $0xa4] sm:$0xf] %v16527_v57  ;;  %v275_v26 = vadd.s32 %v274_v47, %v264_v10 }
 0x1a0   : > { %v2562_v60 = vpop.f32.mrf.mxu2  ;;  %v1985_v12 = vpop.f32.mrf.mxu0  ;;  %233 = vst [vmem:[#allocation2 + $0xa8] sm:$0xf] %v16527_v57 }
 0x1a1   : > { %v2732_v5 = vpop.f32.mrf.mxu3  ;;  %v2589_v48 = vadd.f32 %v2562_v60, %v2300_v38  ;;  %v2275_v39 = vpop.f32.mrf.mxu1  ;;  %v2011_v13 = vadd.f32 %v1985_v12, %v13487_v63  ;;  %v3146_v38 = vunpack.c.l.b16 %v3092_v37  ;;  %v2785_v63 = vpack.c.b16 %v2784_v17, %v2784_v17 }
 0x1a2   : > { %v3565_v60 = vpack.c.b16 %v3564_v14, %v3564_v14  ;;  %v276_v50 = vadd.s32 %v275_v26, %v266_v34  ;;  %v288_v34 = vmul.u32 14564, %v285_v31 }
 0x1a3   : > { %v13854_v51 = vadd.f32 %v2732_v5, %v2589_v48  ;;  %v2301_v49 = vadd.f32 %v2275_v39, %v2011_v13  ;;  %v3156_v2 = vpack.c.b16 %v3146_v38, %v3146_v38  ;;  %v2828_v30 = vshrl.u32 %v2785_v63, 16 }
 0x1a4   : > { %v2831_v22 = vshll.u32 %v2785_v63, 16  ;;  %v13871_v5 = vmul.u32 58254, %v285_v31  ;;  %v13873_v48 = vmul.u32 14564, %v286_v1  ;;  %v3607_v3 = vshrl.u32 %v3565_v60, 16 }
 0x1a5   : > { %v3238_v61 = vshrl.u32 %v3156_v2, 16  ;;  %v3241_v16 = vshll.u32 %v3156_v2, 16  ;;  %v2830_v39 = vrot.slane %v2828_v30, 1  ;;  %v3610_v13 = vshll.u32 %v3565_v60, 16 }
 0x1a6   : > { %v2833_v45 = vrot.slane %v2831_v22, 2  ;;  %v277_v17 = vshrl.u32 %v276_v50, 4  ;;  %v292_v63 = vshll.u32 %v13871_v5, 16  ;;  %v3415_v30 = vrot.slane %v3156_v2, 3 }
 0x1a7   : > { %v3240_v37 = vrot.slane %v3238_v61, 2  ;;  %v3243_v47 = vrot.slane %v3241_v16, 3  ;;  %v13891_v31 = vsel %vm16551_vm2, %v13788_v36, %v13859_v6  ;;  %v291_v2 = vmul.u32 58254, %v286_v1  ;;  %v11838_v16 = vld [vmem:[%s16517_s1 + $0x100] sm:$0xff] }
 0x1a8   : > { %v2564_v12 = vpop.f32.mrf.mxu2  ;;  %v1988_v55 = vpop.f32.mrf.mxu0  ;;  %v2834_v8 = vor.u32 %v2833_v45, %v2830_v39  ;;  %v278_v26 = vmul.u32 18, %v277_v17  ;;  %v293_v1 = vshrl.u32 %v13871_v5, 16  ;;  %vm296_vm8 = vc.u32 %v288_v34, %v292_v63  ;;  %4134 = vmatpush.bf16.msrb.mxu1 %v11838_v16 }
 0x1a9   : > { %v2734_v46 = vpop.f32.mrf.mxu3  ;;  %v2590_v44 = vadd.f32 %v2564_v12, %v2301_v49  ;;  %v2278_v10 = vpop.f32.mrf.mxu1  ;;  %v2012_v38 = vadd.f32 %v1988_v55, %v13512_v43  ;;  %v3244_v57 = vor.u32 %v3243_v47, %v3240_v37  ;;  %v13886_v43 = vsel %vm16534_vm1, %v3411_v15, %v3413_v23  ;;  %v11855_v15 = vld [vmem:[%s16517_s1 + $0x140] sm:$0xff] }
 0x1aa   : > { %v294_v49 = vshll.u32 %v13873_v48, 16  ;;  %v13908_v36 = vsel %vm16543_vm5, %v13837_v59, %v2834_v8  ;;  %v298_v60 = vadd.s32 %v292_v63, %v288_v34  ;;  %v13918_v50 = vsub.s32 %v13765_v35, %v278_v26  ;;  %4422 = vmatpush.bf16.msrb.mxu2 %v11855_v15  ;;  %v12652_v34 = vld [vmem:[%s12964_s24 + $0x54] sm:$0x8]  ;;  %v12800_v63 = vld [vmem:[%s12964_s24 + $0x54] sm:$0xf0]  }
 0x1ab   : > { %v13877_v14 = vadd.f32 %v2734_v46, %v2590_v44  ;;  %v2302_v22 = vadd.f32 %v2278_v10, %v2012_v38  ;;  %2931 = vmatmul.bf16.gmra.mxu0 %v13795_v32  ;;  %v13896_v32 = vrot.slane %v3607_v3, 3  ;;  %v13922_v61 = vsel %vm16537_vm0, %v13840_v54, %v3244_v57 }
 0x1ac   : > { %3341 = vmatmul.bf16.gmra.mxu1 %v13810_v40  ;;  %v13898_v40 = vrot.slane %v3610_v13, 4  ;;  %v13927_v59 = vsel %vm16534_vm1, %v3413_v23, %v3415_v30  ;;  %v295_v5 = vshrl.u32 %v13873_v48, 16  ;;  %v16583_v39 = vmov 0  }
 0x1ad   : > { %3512 = vmatmul.bf16.gmra.mxu2 %v13821_v7  ;;  %v11830_v7 = vld [vmem:[%s16517_s1 + $0xc0] sm:$0xff]  ;;  %v297_v45 = vsel %vm296_vm8, 1, %v16583_v39  ;;  %vm300_vm9 = vc.u32 %v298_v60, %v294_v49  ;;  %v314_v57 = vand.u32 65535, %v13901_v41  ;;  %v13941_v37 = vadd.s32 24, %v13765_v35 }
 0x1ae   : > { %3710 = vmatmul.bf16.gmra.mxu3 %v13825_v52  ;;  %v11871_v52 = vld [vmem:[%s16517_s1 + $0x180] sm:$0xff]  ;;  %3980 = vmatpush.bf16.msrb.mxu0 %v11830_v7  ;;  %v3613_v13 = vor.u32 %v13898_v40, %v13896_v32  ;;  %v299_v48 = vadd.s32 %v297_v45, %v291_v2  ;;  %v301_v44 = vsel %vm300_vm9, 1, %v16583_v39  ;;  %vm775_vm10 = vcmp.ne.s32.totalorder %v13918_v50, 0  ;;  %v11918_v32 = vld [vmem:[%s16519_s3 + $0x78] sm:$0xff] }
 0x1af   : > { %4710 = vmatpush.bf16.msrb.mxu3 %v11871_v52  ;;  %v317_v10 = vmul.u32 14564, %v314_v57  ;;  %v318_v17 = vmul.u32 58254, %v314_v57  ;;  %v319_v8 = vmul.u32 14564, %v315_v33  ;;  %v320_v30 = vmul.u32 58254, %v315_v33  ;;  %v12802_v49 = vld [vmem:[%s12964_s24 + $0x5c] sm:$0xff]  }
 0x1b0   : > { %v2567_v12 = vpop.f32.mrf.mxu2  ;;  %v1990_v23 = vpop.f32.mrf.mxu0  ;;  %v303_v38 = vadd.s32 %v301_v44, %v299_v48  ;;  %v12653_v2 = vor.u32 %v12800_v63, %v12652_v34  ;;  %vm793_vm11 = vcmp.lt.s32.totalorder %v13918_v50, 0  ;;  %v3836_v45 = vshrl.u32 %v12802_v49, 16  ;;  %v11846_v33 = vld [vmem:[%s12964_s24 + $0x58] sm:$0xff]  ;;  %v13954_v34 = vld [vmem:[%s12964_s24 + $0x60] sm:$0xff] }
 0x1b1   : > { %v2737_v46 = vpop.f32.mrf.mxu3  ;;  %v2591_v54 = vadd.f32 %v2567_v12, %v2302_v22  ;;  %v2280_v3 = vpop.f32.mrf.mxu1  ;;  %v2013_v55 = vadd.f32 %v1990_v23, %v13534_v58  ;;  %v321_v22 = vshll.u32 %v318_v17, 16  ;;  %v322_v15 = vshrl.u32 %v318_v17, 16  ;;  %vm13974_vm14 = vmand %vm793_vm11, %vm775_vm10 }
 0x1b2   : > { %v304_v58 = vadd.s32 %v303_v38, %v293_v1  ;;  %v323_v7 = vshll.u32 %v319_v8, 16  ;;  %v3828_v60 = vshrl.u32 %v12653_v2, 16  ;;  %v3831_v16 = vshll.u32 %v12653_v2, 16 }
 0x1b3   : > { %v13943_v47 = vadd.f32 %v2737_v46, %v2591_v54  ;;  %v2303_v26 = vadd.f32 %v2280_v3, %v2013_v55  ;;  %vm325_vm12 = vc.u32 %v317_v10, %v321_v22  ;;  %v327_v52 = vadd.s32 %v321_v22, %v317_v10  ;;  %5615 = vmatpush.bf16.msra.mxu3 %v11918_v32 }
 0x1b4   : > { %v305_v12 = vadd.s32 %v304_v58, %v295_v5  ;;  %v326_v46 = vsel %vm325_vm12, 1, %v16583_v39  ;;  %v3839_v57 = vshll.u32 %v12802_v49, 16  ;;  %v3830_v48 = vrot.slane %v3828_v60, 3  ;;  %v13958_v58 = vld [vmem:[%s12964_s24 + $0x68] sm:$0xff]  ;;  %v13966_v60 = vld [vmem:[%s12964_s24 + $0x60] sm:$0xff]  }
 0x1b5   : > { %v328_v3 = vadd.s32 %v326_v46, %v320_v30  ;;  %vm329_vm13 = vc.u32 %v327_v52, %v323_v7  ;;  %v3833_v1 = vrot.slane %v3831_v16, 4  ;;  %v3838_v38 = vrot.slane %v3836_v45, 3 }
 0x1b6   : > { %v306_v17 = vshrl.u32 %v305_v12, 4  ;;  %v330_v5 = vsel %vm329_vm13, 1, %v16583_v39  ;;  %v324_v22 = vshrl.u32 %v319_v8, 16  ;;  %v3841_v2 = vrot.slane %v3839_v57, 4 }
 0x1b7   : > { %v332_v49 = vadd.s32 %v330_v5, %v328_v3  ;;  %v4285_v52 = vshll.u32 %v11846_v33, 16  ;;  %v3834_v12 = vor.u32 %v3833_v1, %v3830_v48  ;;  %v4283_v46 = vshrl.u32 %v11846_v33, 16 }
 0x1b8   : > { %v2569_v54 = vpop.f32.mrf.mxu2  ;;  %v1993_v55 = vpop.f32.mrf.mxu0  ;;  %v307_v7 = vmul.u32 18, %v306_v17  ;;  %v4290_v57 = vshll.u32 %v13954_v34, 16  ;;  %v343_v40 = vand.u32 65535, %v13941_v37  ;;  %v4571_v1 = vshrl.u32 %v13966_v60, 16 }
 0x1b9   : > { %v2739_v23 = vpop.f32.mrf.mxu3  ;;  %v2592_v44 = vadd.f32 %v2569_v54, %v2303_v26  ;;  %v2283_v10 = vpop.f32.mrf.mxu1  ;;  %v2014_v63 = vadd.f32 %v1993_v55, %v13551_v27  ;;  %v13963_v26 = vadd.s32 18, %v13918_v50  ;;  %v333_v8 = vadd.s32 %v332_v49, %v322_v15  ;;  %v11886_v54 = vld [vmem:[%s16517_s1 + $0x1f8] sm:$0xff] }
 0x1ba   : > { %v13981_v45 = vsub.s32 %v13835_v28, %v307_v7  ;;  %v13991_v15 = vsel %vm16551_vm2, %v13859_v6, %v3613_v13  ;;  %v11910_v28 = vld [vmem:[%s16519_s3 + $0x38] sm:$0xff]  ;;  %4871 = vmatpush.bf16.msra.mxu0 %v11886_v54  ;;  %v347_v27 = vmul.u32 58254, %v343_v40 }
 0x1bb   : > { %v13960_v30 = vadd.f32 %v2739_v23, %v2592_v44  ;;  %v2304_v16 = vadd.f32 %v2283_v10, %v2014_v63  ;;  %2936 = vmatmul.bf16.gmra.mxu0 %v13864_v21  ;;  %v13983_v21 = vor.u32 %v3841_v2, %v3838_v38  ;;  %v334_v33 = vadd.s32 %v333_v8, %v324_v22 }
 0x1bc   : > { %3346 = vmatmul.bf16.gmra.mxu1 %v13869_v0  ;;  %v4287_v0 = vrot.slane %v4285_v52, 1  ;;  %v847_v6 = vsel %vm13974_vm14, %v13963_v26, %v13918_v50  ;;  %vm776_vm15 = vcmp.ne.s32.totalorder %v13981_v45, 0  ;;  %vm794_vm6 = vcmp.lt.s32.totalorder %v13981_v45, 0  ;;  %5443 = vmatpush.bf16.msra.mxu2 %v11910_v28  ;;  %v11894_v52 = vld [vmem:[%s16517_s1 + $0x238] sm:$0xff] }
 0x1bd   : > { %3517 = vmatmul.bf16.gmra.mxu2 %v13886_v43  ;;  %v4573_v43 = vshll.u32 %v13966_v60, 16  ;;  %v830_v3 = vadd.s32 18, %v13981_v45  ;;  %v335_v48 = vshrl.u32 %v334_v33, 4  ;;  %v344_v44 = vshrl.u32 %v13941_v37, 16  ;;  %vm14014_vm7 = vmand %vm794_vm6, %vm776_vm15  ;;  %5069 = vmatpush.bf16.msra.mxu1 %v11894_v52 }
 0x1be   : > { %3715 = vmatmul.bf16.gmra.mxu3 %v13891_v31  ;;  %v16529_v31 = vshll.u32 %v13958_v58, 16  ;;  %v14020_v5 = vsel %vm16551_vm2, %v3834_v12, %v13983_v21  ;;  %v4288_v38 = vor.u32 %v4287_v0, %v4283_v46  ;;  %v14022_v63 = vrot.slane %v4290_v57, 1 }
 0x1bf   : > { %v336_v49 = vmul.u32 18, %v335_v48  ;;  %v4575_v2 = vrot.slane %v4573_v43, 1  ;;  %v348_v8 = vmul.u32 14564, %v344_v44  ;;  %v14041_v0 = vadd.s32 32, %v13765_v35 }
 0x1c0   : > { %v2572_v13 = vpop.f32.mrf.mxu2  ;;  %v1995_v10 = vpop.f32.mrf.mxu0  ;;  %v14027_v26 = vrot.slane %v16529_v31, 1  ;;  %v14045_v57 = vsel %vm16544_vm3, %v4288_v38, %v14022_v63  ;;  %v349_v33 = vmul.u32 58254, %v344_v44  ;;  %v350_v43 = vshll.u32 %v347_v27, 16 }
 0x1c1   : > { %v2742_v23 = vpop.f32.mrf.mxu3  ;;  %v2593_v55 = vadd.f32 %v2572_v13, %v2304_v16  ;;  %v2285_v50 = vpop.f32.mrf.mxu1  ;;  %v2015_v22 = vadd.f32 %v1995_v10, %v13569_v4  ;;  %v346_v16 = vmul.u32 14564, %v343_v40  ;;  %v848_v4 = vsel %vm14014_vm7, %v830_v3, %v13981_v45  ;;  %v12804_v13 = vld [vmem:[%s12964_s24 + $0x64] sm:$0xff]  }
 0x1c2   : > { %v14038_v46 = vsub.s32 %v13901_v41, %v336_v49  ;;  %v352_v28 = vshll.u32 %v348_v8, 16  ;;  %v14047_v54 = vor.u32 %v4575_v2, %v4571_v1  ;;  %v351_v32 = vshrl.u32 %v347_v27, 16  ;;  %v14060_v1 = vld [vmem:[%s16518_s2] ss:$0 sm:$0xff] }
 0x1c3   : > { %v14029_v7 = vadd.f32 %v2742_v23, %v2593_v55  ;;  %v2305_v12 = vadd.f32 %v2285_v50, %v2015_v22  ;;  %v353_v40 = vshrl.u32 %v348_v8, 16  ;;  %v372_v45 = vand.u32 65535, %v14041_v0 }
 0x1c4   : > { %vm777_vm8 = vcmp.ne.s32.totalorder %v14038_v46, 0  ;;  %vm354_vm9 = vc.u32 %v346_v16, %v350_v43  ;;  %v356_v41 = vadd.s32 %v350_v43, %v346_v16  ;;  %v373_v23 = vshrl.u32 %v14041_v0, 16 }
 0x1c5   : > { %16588 = vst [vmem:[#allocation3_spill] sm:$0xff] %v14029_v7  ;;  %vm14053_vm10 = vcmp.lt.s32.totalorder %v847_v6, 16  ;;  %v16589_v55 = vmov 0  ;;  %vm795_vm11 = vcmp.lt.s32.totalorder %v14038_v46, 0  ;;  %v14064_v44 = vadd.s32 18, %v14038_v46 }
 0x1c6   : > { %v16590_v55 = vsel %vm14053_vm10, 4294967295, %v16589_v55  ;;  %v355_v10 = vsel %vm354_vm9, 1, %v16583_v39  ;;  %v376_v50 = vmul.u32 58254, %v372_v45  ;;  %vm358_vm12 = vc.u32 %v356_v41, %v352_v28  ;;  %vm14092_vm15 = vmand %vm795_vm11, %vm777_vm8 }
 0x1c7   : > { %16591 = vst [vmem:[#allocation4_spill] sm:$0xff] %v16590_v55  ;;  %v357_v22 = vadd.s32 %v355_v10, %v349_v33  ;;  %v375_v49 = vmul.u32 14564, %v372_v45  ;;  %v359_v52 = vsel %vm358_vm12, 1, %v16583_v39  ;;  %v377_v16 = vmul.u32 14564, %v373_v23  ;;  %v12815_v55 = vld [vmem:[%s12964_s24 + $0x94] sm:$0xff]  }
 0x1c8   : > { %v2574_v3 = vpop.f32.mrf.mxu2  ;;  %v2902_v38 = vpop.f32.mrf.mxu0  ;;  %v3845_v27 = vshrl.u32 %v12804_v13, 16  ;;  %vm14071_vm13 = vcmp.lt.s32.totalorder %v848_v4, 16  ;;  %v16592_v43 = vmov 0  ;;  %v378_v7 = vmul.u32 58254, %v373_v23 }
 0x1c9   : > { %v2744_v48 = vpop.f32.mrf.mxu3  ;;  %v2594_v17 = vadd.f32 %v2574_v3, %v2305_v12  ;;  %v3312_v6 = vpop.f32.mrf.mxu1  ;;  %v2947_v2 = vadd.f32 %v2902_v38, %v13582_v19  ;;  %v16593_v43 = vsel %vm14071_vm13, 4294967295, %v16592_v43  ;;  %v361_v31 = vadd.s32 %v359_v52, %v357_v22  ;;  %v14076_v3 = vld [vmem:[%s12964_s24 + $0x68] sm:$0xff]  ;;  %v14100_v22 = vld [vmem:[%s12964_s24 + $0x70] sm:$0xff] }
 0x1ca   : > { %16594 = vst [vmem:[#allocation5_spill] sm:$0xff] %v16593_v43  ;;  %v379_v12 = vshll.u32 %v376_v50, 16  ;;  %v3360_v28 = vadd.f32 %v14060_v1, %v3312_v6  ;;  %v380_v19 = vshrl.u32 %v376_v50, 16  ;;  %v381_v45 = vshll.u32 %v377_v16, 16  ;;  %v14210_v43 = vld [vmem:[%s12964_s24 + $0x70] sm:$0xff] }
 0x1cb   : > { %v14069_v8 = vadd.f32 %v2744_v48, %v2594_v17  ;;  %v2965_v33 = vmax.f32 %v2947_v2, 0.0  ;;  %2941 = vmatmul.bf16.gmra.mxu0 %v13908_v36  ;;  %v362_v4 = vadd.s32 %v361_v31, %v351_v32  ;;  %v382_v41 = vshrl.u32 %v377_v16, 16  ;;  %v11909_v36 = vld [vmem:[%s16519_s3 + $0x30] sm:$0xff] }
 0x1cc   : > { %3351 = vmatmul.bf16.gmra.mxu1 %v13922_v61  ;;  %vm383_vm14 = vc.u32 %v375_v49, %v379_v12  ;;  %v385_v23 = vadd.s32 %v379_v12, %v375_v49  ;;  %v3847_v10 = vrot.slane %v3845_v27, 3  ;;  %v3848_v17 = vshll.u32 %v12804_v13, 16  ;;  %5444 = vmatpush.bf16.msra.mxu2 %v11909_v36 }
 0x1cd   : > { %3522 = vmatmul.bf16.gmra.mxu2 %v13927_v59  ;;  %v384_v48 = vsel %vm383_vm14, 1, %v16583_v39  ;;  %v4294_v38 = vshrl.u32 %v13954_v34, 16  ;;  %v363_v59 = vadd.s32 %v362_v4, %v353_v40  ;;  %v4298_v31 = vshll.u32 %v14076_v3, 16 }
 0x1ce   : > { %3720 = vmatmul.bf16.gmra.mxu3 %v13991_v15  ;;  %v386_v15 = vadd.s32 %v384_v48, %v378_v7  ;;  %vm387_vm6 = vc.u32 %v385_v23, %v381_v45  ;;  %v3850_v50 = vrot.slane %v3848_v17, 4  ;;  %v16531_v49 = vshrl.u32 %v13958_v58, 16 }
 0x1cf   : > { %v388_v34 = vsel %vm387_vm6, 1, %v16583_v39  ;;  %v4296_v6 = vor.u32 %v4294_v38, %v14022_v63  ;;  %v364_v40 = vshrl.u32 %v363_v59, 4  ;;  %v14103_v27 = vrot.slane %v4298_v31, 1  ;;  %v14131_v38 = vld [vmem:[%s12964_s24 + $0x6c] sm:$0xff]  }
 0x1d0   : > { %v3483_v32 = vpop.f32.mrf.mxu2  ;;  %v2904_v52 = vpop.f32.mrf.mxu0  ;;  %v390_v7 = vadd.s32 %v388_v34, %v386_v15  ;;  %v849_v63 = vsel %vm14092_vm15, %v14064_v44, %v14038_v46  ;;  %v4581_v45 = vsel %vm16544_vm3, %v14047_v54, %v14027_v26  ;;  %v14113_v4 = vor.u32 %v3850_v50, %v3847_v10  ;;  %v11917_v46 = vld [vmem:[%s16519_s3 + $0x70] sm:$0xff] }
 0x1d1   : > { %v3681_v13 = vpop.f32.mrf.mxu3  ;;  %v3528_v2 = vadd.f32 %v3483_v32, %v3360_v28  ;;  %v3314_v16 = vpop.f32.mrf.mxu1  ;;  %v2948_v12 = vadd.f32 %v2904_v52, %v13604_v62  ;;  %v3019_v28 = vsel %vm14053_vm10, %v2965_v33, 0.0  ;;  %v365_v48 = vmul.u32 18, %v364_v40  ;;  %v11885_v62 = vld [vmem:[%s16517_s1 + $0x1f0] sm:$0xff]  ;;  %5616 = vmatpush.bf16.msra.mxu3 %v11917_v46 }
 0x1d2   : > { %v391_v17 = vadd.s32 %v390_v7, %v380_v19  ;;  %v3361_v54 = vadd.f32 %v14060_v1, %v3314_v16  ;;  %v4584_v10 = vor.u32 %v16531_v49, %v14027_v26  ;;  %v16530_v33 = vshll.u32 %v14100_v22, 16  ;;  %4872 = vmatpush.bf16.msra.mxu0 %v11885_v62 }
 0x1d3   : > { %v14117_v23 = vadd.f32 %v3681_v13, %v3528_v2  ;;  %v2966_v44 = vmax.f32 %v2948_v12, 0.0  ;;  %vm14133_vm7 = vcmp.lt.s32.totalorder %v849_v63, 16  ;;  %v16597_v19 = vmov 0  ;;  %v12523_v63 = vld [vmem:[%s12964_s24 + $0x58] sm:$0xff]  }
 0x1d4   : > { %v16598_v19 = vsel %vm14133_vm7, 4294967295, %v16597_v19  ;;  %v366_v36 = vsub.s32 %v13941_v37, %v365_v48  ;;  %v392_v61 = vadd.s32 %v391_v17, %v382_v41  ;;  %v14140_v59 = vsel %vm16544_vm3, %v4296_v6, %v14103_v27  ;;  %v11893_v17 = vld [vmem:[%s16517_s1 + $0x230] sm:$0xff] }
 0x1d5   : > { %16599 = vst [vmem:[#allocation6_spill] sm:$0xff] %v16598_v19  ;;  %v14143_v15 = vadd.s32 40, %v13765_v35  ;;  %v3020_v26 = vsel %vm14071_vm13, %v2966_v44, 0.0  ;;  %v14150_v31 = vsel %vm16551_vm2, %v13983_v21, %v14113_v4  ;;  %v14154_v37 = vrot.slane %v16530_v33, 1  ;;  %5070 = vmatpush.bf16.msra.mxu1 %v11893_v17 }
 0x1d6   : > { %v14157_v41 = vadd.s32 48, %v13765_v35  ;;  %v12132_v32 = vpack.c.bf16 %v3020_v26, %v3019_v28  ;;  %vm778_vm8 = vcmp.ne.s32.totalorder %v366_v36, 0  ;;  %vm796_vm9 = vcmp.lt.s32.totalorder %v366_v36, 0 }
 0x1d7   : > { %v832_v13 = vadd.s32 18, %v366_v36  ;;  %vm14159_vm11 = vmand %vm796_vm9, %vm778_vm8  ;;  %v393_v21 = vshrl.u32 %v392_v61, 4  ;;  %v401_v2 = vand.u32 65535, %v14143_v15  ;;  %v402_v52 = vshrl.u32 %v14143_v15, 16 }
 0x1d8   : > { %v3485_v34 = vpop.f32.mrf.mxu2  ;;  %v3854_v16 = vshrl.u32 %v14131_v38, 16  ;;  %12514 = vst [vmem:[#allocation2 + $0x10] sm:$0xff] %v12132_v32   ;;  %v2907_v7 = vpop.f32.mrf.mxu0  ;;  %v14171_v48 = vsel %vm16544_vm3, %v4584_v10, %v14154_v37  ;;  %v3857_v62 = vshll.u32 %v14131_v38, 16  ;;  %v431_v61 = vshrl.u32 %v14157_v41, 16 }
 0x1d9   : > { %v3683_v50 = vpop.f32.mrf.mxu3  ;;  %v3529_v40 = vadd.f32 %v3485_v34, %v3361_v54  ;;  %v3317_v12 = vpop.f32.mrf.mxu1  ;;  %v850_v28 = vsel %vm14159_vm11, %v832_v13, %v366_v36  ;;  %v2949_v46 = vadd.f32 %v2907_v7, %v13613_v42  ;;  %v394_v44 = vmul.u32 18, %v393_v21 }
 0x1da   : > { %v430_v54 = vand.u32 65535, %v14157_v41  ;;  %v404_v36 = vmul.u32 14564, %v401_v2  ;;  %v405_v32 = vmul.u32 58254, %v401_v2  ;;  %v406_v13 = vmul.u32 14564, %v402_v52 }
 0x1db   : > { %v14180_v26 = vadd.f32 %v3683_v50, %v3529_v40  ;;  %v2967_v10 = vmax.f32 %v2949_v46, 0.0  ;;  %v3362_v34 = vadd.f32 %v14060_v1, %v3317_v12  ;;  %3981 = vmatmul.bf16.vlgmr.msrb.gmra.mxu0 %v14020_v5  ;;  %vm14184_vm12 = vcmp.lt.s32.totalorder %v850_v28, 16 }
 0x1dc   : > { %4135 = vmatmul.bf16.vlgmr.msrb.gmra.mxu1 %v12523_v63  ;;  %v16602_v38 = vmov 0  ;;  %v14189_v42 = vsub.s32 %v14041_v0, %v394_v44  ;;  %v407_v50 = vmul.u32 58254, %v402_v52  ;;  %v408_v6 = vshll.u32 %v405_v32, 16 }
 0x1dd   : > { %v16603_v38 = vsel %vm14184_vm12, 4294967295, %v16602_v38  ;;  %4423 = vmatmul.bf16.vlgmr.msrb.gmra.mxu2 %v14045_v57  ;;  %v410_v21 = vshll.u32 %v406_v13, 16  ;;  %v433_v2 = vmul.u32 14564, %v430_v54  ;;  %v409_v40 = vshrl.u32 %v405_v32, 16 }
 0x1de   : > { %16604 = vst [vmem:[#allocation7_spill] sm:$0xff] %v16603_v38  ;;  %4711 = vmatmul.bf16.vlgmr.msrb.gmra.mxu3 %v4581_v45  ;;  %vm779_vm14 = vcmp.ne.s32.totalorder %v14189_v42, 0  ;;  %vm797_vm15 = vcmp.lt.s32.totalorder %v14189_v42, 0  ;;  %v833_v5 = vadd.s32 18, %v14189_v42  ;;  %vm412_vm8 = vc.u32 %v404_v36, %v408_v6 }
 0x1df   : > { %vm14195_vm6 = vmand %vm797_vm15, %vm779_vm14  ;;  %v414_v0 = vadd.s32 %v408_v6, %v404_v36  ;;  %v434_v12 = vmul.u32 58254, %v430_v54  ;;  %v14199_v57 = vmul.u32 14564, %v431_v61  ;;  %v3021_v45 = vsel %vm14133_vm7, %v2967_v10, 0.0 }
 0x1e0   : > { %v3488_v52 = vpop.f32.mrf.mxu2  ;;  %v851_v28 = vsel %vm14195_vm6, %v833_v5, %v14189_v42  ;;  %v411_v17 = vshrl.u32 %v406_v13, 16  ;;  %v413_v46 = vsel %vm412_vm8, 1, %v16583_v39  ;;  %v2909_v32 = vpop.f32.mrf.mxu0  ;;  %v436_v54 = vmul.u32 58254, %v431_v61  ;;  %v11908_v61 = vld [vmem:[%s16519_s3 + $0x28] sm:$0xff] }
 0x1e1   : > { %v3686_v63 = vpop.f32.mrf.mxu3  ;;  %v3530_v44 = vadd.f32 %v3488_v52, %v3362_v34  ;;  %v3319_v33 = vpop.f32.mrf.mxu1  ;;  %v415_v36 = vadd.s32 %v413_v46, %v407_v50  ;;  %vm416_vm9 = vc.u32 %v414_v0, %v410_v21  ;;  %v2950_v6 = vadd.f32 %v2909_v32, %v13637_v29  ;;  %5445 = vmatpush.bf16.msra.mxu2 %v11908_v61 }
 0x1e2   : > { %v417_v10 = vsel %vm416_vm9, 1, %v16583_v39  ;;  %v437_v49 = vshll.u32 %v434_v12, 16  ;;  %v3856_v19 = vrot.slane %v3854_v16, 3  ;;  %v3363_v13 = vadd.f32 %v14060_v1, %v3319_v33 }
 0x1e3   : > { %v14212_v7 = vadd.f32 %v3686_v63, %v3530_v44  ;;  %v419_v42 = vadd.s32 %v417_v10, %v415_v36  ;;  %v439_v34 = vshll.u32 %v14199_v57, 16  ;;  %v2968_v50 = vmax.f32 %v2950_v6, 0.0  ;;  %v14222_v63 = vld [vmem:[%s12964_s24 + $0x78] sm:$0xff] }
 0x1e4   : > { %v438_v29 = vshrl.u32 %v434_v12, 16  ;;  %vm441_vm11 = vc.u32 %v433_v2, %v437_v49  ;;  %v443_v21 = vadd.s32 %v437_v49, %v433_v2  ;;  %v3859_v0 = vrot.slane %v3857_v62, 4 }
 0x1e5   : > { %v420_v5 = vadd.s32 %v419_v42, %v409_v40  ;;  %v442_v16 = vsel %vm441_vm11, 1, %v16583_v39  ;;  %v4302_v52 = vshrl.u32 %v14076_v3, 16  ;;  %v3022_v33 = vsel %vm14184_vm12, %v2968_v50, 0.0 }
 0x1e6   : > { %v444_v46 = vadd.s32 %v442_v16, %v436_v54  ;;  %vm445_vm14 = vc.u32 %v443_v21, %v439_v34  ;;  %v4306_v44 = vshll.u32 %v14210_v43, 16  ;;  %v12137_v32 = vpack.c.bf16 %v3022_v33, %v3021_v45  ;;  %v11892_v33 = vld [vmem:[%s16517_s1 + $0x228] sm:$0xff] }
 0x1e7   : > { %v421_v12 = vadd.s32 %v420_v5, %v411_v17  ;;  %v446_v49 = vsel %vm445_vm14, 1, %v16583_v39  ;;  %v14228_v2 = vor.u32 %v3859_v0, %v3856_v19  ;;  %v440_v3 = vshrl.u32 %v14199_v57, 16  ;;  %5071 = vmatpush.bf16.msra.mxu1 %v11892_v33 }
 0x1e8   : > { %v3490_v40 = vpop.f32.mrf.mxu2  ;;  %v448_v36 = vadd.s32 %v446_v49, %v444_v46  ;;  %v4304_v6 = vor.u32 %v4302_v52, %v14103_v27  ;;  %v16536_v10 = vshrl.u32 %v14100_v22, 16  ;;  %12515 = vst [vmem:[#allocation2 + $0x18] sm:$0xff] %v12137_v32   ;;  %v2912_v42 = vpop.f32.mrf.mxu0  ;;  %v14233_v17 = vrot.slane %v4306_v44, 1  ;;  %v11884_v52 = vld [vmem:[%s16517_s1 + $0x1e8] sm:$0xff] }
 0x1e9   : > { %v3688_v62 = vpop.f32.mrf.mxu3  ;;  %v3531_v54 = vadd.f32 %v3490_v40, %v3363_v13  ;;  %v3322_v34 = vpop.f32.mrf.mxu1  ;;  %v422_v45 = vshrl.u32 %v421_v12, 4  ;;  %v16535_v19 = vshll.u32 %v14222_v63, 16  ;;  %vm14236_vm15 = vcmp.lt.s32.totalorder %v851_v28, 16  ;;  %v14247_v13 = vld [vmem:[%s12964_s24 + $0x74] sm:$0xff]   ;;  %4873 = vmatpush.bf16.msra.mxu0 %v11884_v52 }
 0x1ea   : > { %v16607_v61 = vmov 0  ;;  %v2951_v57 = vadd.f32 %v2912_v42, %v13646_v53  ;;  %v449_v50 = vadd.s32 %v448_v36, %v438_v29  ;;  %v14244_v27 = vsel %vm16551_vm2, %v14113_v4, %v14228_v2 }
 0x1eb   : > { %v16608_v61 = vsel %vm14236_vm15, 4294967295, %v16607_v61  ;;  %v14249_v21 = vadd.f32 %v3688_v62, %v3531_v54  ;;  %v423_v5 = vmul.u32 18, %v422_v45  ;;  %v4592_v28 = vor.u32 %v16536_v10, %v14154_v37  ;;  %3986 = vmatmul.bf16.gmra.mxu0 %v14150_v31  ;;  %v11916_v37 = vld [vmem:[%s16519_s3 + $0x68] sm:$0xff]  ;;  %v14325_v10 = vld [vmem:[%s12964_s24 + $0x78] sm:$0xff] }
 0x1ec   : > { %16609 = vst [vmem:[#allocation8_spill] sm:$0xff] %v16608_v61  ;;  %v14256_v16 = vrot.slane %v16535_v19, 1  ;;  %v2969_v53 = vmax.f32 %v2951_v57, 0.0  ;;  %v3364_v29 = vadd.f32 %v14060_v1, %v3322_v34  ;;  %4140 = vmatmul.bf16.gmra.mxu1 %v13966_v60  ;;  %v450_v4 = vadd.s32 %v449_v50, %v440_v3  ;;  %5617 = vmatpush.bf16.msra.mxu3 %v11916_v37 }
 0x1ed   : > { %v14262_v0 = vadd.s32 56, %v13765_v35  ;;  %4428 = vmatmul.bf16.gmra.mxu2 %v14140_v59  ;;  %v424_v60 = vsub.s32 %v14143_v15, %v423_v5  ;;  %v14278_v31 = vsel %vm16544_vm3, %v4304_v6, %v14233_v17  ;;  %v14285_v44 = vadd.s32 64, %v13765_v35 }
 0x1ee   : > { %4716 = vmatmul.bf16.gmra.mxu3 %v14171_v48  ;;  %v14282_v46 = vsel %vm16544_vm3, %v4592_v28, %v14256_v16  ;;  %v451_v32 = vshrl.u32 %v450_v4, 4  ;;  %v3863_v15 = vshrl.u32 %v14247_v13, 16  ;;  %v3023_v40 = vsel %vm14236_vm15, %v2969_v53, 0.0 }
 0x1ef   : > { %v459_v12 = vand.u32 65535, %v14262_v0  ;;  %v460_v59 = vshrl.u32 %v14262_v0, 16  ;;  %vm780_vm6 = vcmp.ne.s32.totalorder %v424_v60, 0  ;;  %vm798_vm8 = vcmp.lt.s32.totalorder %v424_v60, 0 }
 0x1f0   : > { %v834_v48 = vadd.s32 18, %v424_v60  ;;  %v3493_v62 = vpop.f32.mrf.mxu2  ;;  %vm816_vm9 = vmand %vm798_vm8, %vm780_vm6  ;;  %v452_v36 = vmul.u32 18, %v451_v32  ;;  %v2914_v45 = vpop.f32.mrf.mxu0  ;;  %v488_v5 = vand.u32 65535, %v14285_v44  ;;  %v489_v53 = vshrl.u32 %v14285_v44, 16 }
 0x1f1   : > { %v3691_v3 = vpop.f32.mrf.mxu3  ;;  %v463_v6 = vmul.u32 58254, %v459_v12  ;;  %v14293_v54 = vmul.u32 14564, %v460_v59  ;;  %v3532_v42 = vadd.f32 %v3493_v62, %v3364_v29  ;;  %v3324_v57 = vpop.f32.mrf.mxu1  ;;  %v462_v50 = vmul.u32 14564, %v459_v12 }
 0x1f2   : > { %v852_v34 = vsel %vm816_vm9, %v834_v48, %v424_v60  ;;  %v2952_v28 = vadd.f32 %v2914_v45, %v13669_v24  ;;  %v453_v4 = vsub.s32 %v14157_v41, %v452_v36  ;;  %v465_v52 = vmul.u32 58254, %v460_v59 }
 0x1f3   : > { %v14299_v37 = vadd.f32 %v3691_v3, %v3532_v42  ;;  %vm14301_vm11 = vcmp.lt.s32.totalorder %v852_v34, 16  ;;  %v16610_v33 = vmov 0  ;;  %v466_v29 = vshll.u32 %v463_v6, 16 }
 0x1f4   : > { %v16611_v33 = vsel %vm14301_vm11, 4294967295, %v16610_v33  ;;  %v468_v60 = vshll.u32 %v14293_v54, 16  ;;  %v2970_v32 = vmax.f32 %v2952_v28, 0.0  ;;  %vm781_vm14 = vcmp.ne.s32.totalorder %v453_v4, 0 }
 0x1f5   : > { %16612 = vst [vmem:[#allocation9_spill] sm:$0xff] %v16611_v33  ;;  %vm799_vm6 = vcmp.lt.s32.totalorder %v453_v4, 0  ;;  %v835_v12 = vadd.s32 18, %v453_v4  ;;  %v3365_v24 = vadd.f32 %v14060_v1, %v3324_v57  ;;  %v467_v59 = vshrl.u32 %v463_v6, 16 }
 0x1f6   : > { %vm14307_vm8 = vmand %vm799_vm6, %vm781_vm14  ;;  %vm470_vm9 = vc.u32 %v462_v50, %v466_v29  ;;  %v472_v48 = vadd.s32 %v466_v29, %v462_v50  ;;  %v3024_v62 = vsel %vm14301_vm11, %v2970_v32, 0.0  ;;  %v492_v42 = vmul.u32 58254, %v488_v5 }
 0x1f7   : > { %v853_v3 = vsel %vm14307_vm8, %v835_v12, %v453_v4  ;;  %v471_v36 = vsel %vm470_vm9, 1, %v16583_v39  ;;  %v12142_v34 = vpack.c.bf16 %v3024_v62, %v3023_v40  ;;  %v491_v57 = vmul.u32 14564, %v488_v5 }
 0x1f8   : > { %v473_v45 = vadd.s32 %v471_v36, %v465_v52  ;;  %vm474_vm1 = vc.u32 %v472_v48, %v468_v60  ;;  %v3495_v28 = vpop.f32.mrf.mxu2  ;;  %v469_v6 = vshrl.u32 %v14293_v54, 16  ;;  %v493_v29 = vmul.u32 14564, %v489_v53  ;;  %v2917_v12 = vpop.f32.mrf.mxu0  ;;  %v12525_v52 = vld [vmem:[%s12964_s24 + $0x68] sm:$0xff]  }
 0x1f9   : > { %v3693_v19 = vpop.f32.mrf.mxu3  ;;  %v475_v50 = vsel %vm474_vm1, 1, %v16583_v39  ;;  %v495_v32 = vshll.u32 %v492_v42, 16  ;;  %12516 = vst [vmem:[#allocation2 + $0x20] sm:$0xff] %v12142_v34   ;;  %v3533_v41 = vadd.f32 %v3495_v28, %v3365_v24  ;;  %vm14318_vm14 = vcmp.lt.s32.totalorder %v853_v3, 16  ;;  %v3327_v40 = vpop.f32.mrf.mxu1 }
 0x1fa   : > { %v16615_v4 = vmov 0  ;;  %v477_v60 = vadd.s32 %v475_v50, %v473_v45  ;;  %v494_v5 = vmul.u32 58254, %v489_v53  ;;  %v2953_v48 = vadd.f32 %v2917_v12, %v13678_v56  ;;  %v14342_v50 = vld [vmem:[%s12964_s24 + $0x80] sm:$0xff] }
 0x1fb   : > { %v16616_v4 = vsel %vm14318_vm14, 4294967295, %v16615_v4  ;;  %v496_v62 = vshrl.u32 %v492_v42, 16  ;;  %v497_v54 = vshll.u32 %v493_v29, 16  ;;  %v3865_v36 = vrot.slane %v3863_v15, 3  ;;  %3991 = vmatmul.bf16.gmra.mxu0 %v14244_v27 }
 0x1fc   : > { %16617 = vst [vmem:[#allocation10_spill] sm:$0xff] %v16616_v4  ;;  %v14327_v49 = vadd.f32 %v3693_v19, %v3533_v41  ;;  %v478_v34 = vadd.s32 %v477_v60, %v467_v59  ;;  %vm499_vm1 = vc.u32 %v491_v57, %v495_v32  ;;  %v501_v24 = vadd.s32 %v495_v32, %v491_v57 }
 0x1fd   : > { %v2971_v3 = vmax.f32 %v2953_v48, 0.0  ;;  %v3366_v28 = vadd.f32 %v14060_v1, %v3327_v40  ;;  %4145 = vmatmul.bf16.gmra.mxu1 %v12525_v52  ;;  %v500_v53 = vsel %vm499_vm1, 1, %v16583_v39  ;;  %v16619_v56 = vshll.u32 %v14247_v13, 16  ;;  %4433 = vmatmul.bf16.gmra.mxu2 %v14278_v31 }
 0x1fe   : > { %16618 = vst [vmem:[#allocation11_spill] sm:$0xff] %v14327_v49  ;;  %4721 = vmatmul.bf16.gmra.mxu3 %v14282_v46  ;;  %v479_v19 = vadd.s32 %v478_v34, %v469_v6  ;;  %v502_v15 = vadd.s32 %v500_v53, %v494_v5  ;;  %vm503_vm6 = vc.u32 %v501_v24, %v497_v54  ;;  %v4310_v59 = vshrl.u32 %v14210_v43, 16 }
 0x1ff   : > { %v3868_v42 = vrot.slane %v16619_v56, 4  ;;  %v504_v45 = vsel %vm503_vm6, 1, %v16583_v39  ;;  %v4314_v27 = vshll.u32 %v14325_v10, 16  ;;  %v498_v13 = vshrl.u32 %v493_v29, 16 }
 0x200   : > { %v480_v32 = vshrl.u32 %v479_v19, 4  ;;  %v506_v41 = vadd.s32 %v504_v45, %v502_v15  ;;  %v14346_v31 = vsel %vm14318_vm14, %v2971_v3, 0.0  ;;  %v3498_v46 = vpop.f32.mrf.mxu2  ;;  %v16539_v12 = vshrl.u32 %v14222_v63, 16  ;;  %v2919_v60 = vpop.f32.mrf.mxu0  ;;  %v11891_v19 = vld [vmem:[%s16517_s1 + $0x220] sm:$0xff] }
 0x201   : > { %v14338_v57 = vor.u32 %v3868_v42, %v3865_v36  ;;  %v3696_v6 = vpop.f32.mrf.mxu3  ;;  %v14350_v43 = vadd.s32 72, %v13765_v35  ;;  %v3534_v40 = vadd.f32 %v3498_v46, %v3366_v28  ;;  %v3329_v5 = vpop.f32.mrf.mxu1  ;;  %v4312_v54 = vor.u32 %v4310_v59, %v14233_v17  ;;  %v11907_v17 = vld [vmem:[%s16519_s3 + $0x20] sm:$0xff]  ;;  %5072 = vmatpush.bf16.msra.mxu1 %v11891_v19 }
 0x202   : > { %v481_v52 = vmul.u32 18, %v480_v32  ;;  %v507_v48 = vadd.s32 %v506_v41, %v496_v62  ;;  %v2954_v29 = vadd.f32 %v2919_v60, %v13698_v18  ;;  %v14357_v34 = vrot.slane %v4314_v27, 1  ;;  %v11883_v18 = vld [vmem:[%s16517_s1 + $0x1e0] sm:$0xff]  ;;  %5446 = vmatpush.bf16.msra.mxu2 %v11907_v17 }
 0x203   : > { %v3870_v36 = vsel %vm16551_vm2, %v14228_v2, %v14338_v57  ;;  %v16538_v24 = vshll.u32 %v14342_v50, 16  ;;  %v14360_v3 = vadd.f32 %v3696_v6, %v3534_v40  ;;  %v517_v56 = vand.u32 65535, %v14350_v43  ;;  %v11915_v2 = vld [vmem:[%s16519_s3 + $0x60] sm:$0xff]  ;;  %4874 = vmatpush.bf16.msra.mxu0 %v11883_v18 }
 0x204   : > { %v482_v28 = vsub.s32 %v14262_v0, %v481_v52  ;;  %v508_v53 = vadd.s32 %v507_v48, %v498_v13  ;;  %v2972_v62 = vmax.f32 %v2954_v29, 0.0  ;;  %v4600_v0 = vor.u32 %v16539_v12, %v14256_v16  ;;  %5618 = vmatpush.bf16.msra.mxu3 %v11915_v2  ;;  %v12526_v2 = vld [vmem:[%s12964_s24 + $0x70] sm:$0xff]  }
 0x205   : > { %v518_v42 = vshrl.u32 %v14350_v43, 16  ;;  %v14381_v15 = vadd.s32 80, %v13765_v35  ;;  %v14385_v27 = vrot.slane %v16538_v24, 1  ;;  %v520_v16 = vmul.u32 14564, %v517_v56 }
 0x206   : > { %vm782_vm8 = vcmp.ne.s32.totalorder %v482_v28, 0  ;;  %vm800_vm9 = vcmp.lt.s32.totalorder %v482_v28, 0  ;;  %v836_v59 = vadd.s32 18, %v482_v28  ;;  %v509_v45 = vshrl.u32 %v508_v53, 4 }
 0x207   : > { %vm818_vm1 = vmand %vm800_vm9, %vm782_vm8  ;;  %v14387_v32 = vmul.u32 58254, %v517_v56  ;;  %v14389_v13 = vmul.u32 14564, %v518_v42  ;;  %v3367_v46 = vadd.f32 %v14060_v1, %v3329_v5  ;;  %v4317_v40 = vsel %vm16544_vm3, %v4312_v54, %v14357_v34 }
 0x208   : > { %v854_v41 = vsel %vm818_vm1, %v836_v59, %v482_v28  ;;  %v510_v6 = vmul.u32 18, %v509_v45  ;;  %v16620_v52 = vmov 0  ;;  %v3500_v60 = vpop.f32.mrf.mxu2  ;;  %v523_v29 = vmul.u32 58254, %v518_v42  ;;  %v2922_v18 = vpop.f32.mrf.mxu0 }
 0x209   : > { %vm14394_vm6 = vcmp.lt.s32.totalorder %v854_v41, 16  ;;  %v3698_v48 = vpop.f32.mrf.mxu3  ;;  %v524_v53 = vshll.u32 %v14387_v32, 16  ;;  %v546_v56 = vand.u32 65535, %v14381_v15  ;;  %v3535_v17 = vadd.f32 %v3500_v60, %v3367_v46  ;;  %v3332_v54 = vpop.f32.mrf.mxu1 }
 0x20a   : > { %v16621_v52 = vsel %vm14394_vm6, 4294967295, %v16620_v52  ;;  %v3026_v28 = vsel %vm14394_vm6, %v2972_v62, 0.0  ;;  %v14403_v5 = vsub.s32 %v14285_v44, %v510_v6  ;;  %v547_v19 = vshrl.u32 %v14381_v15, 16  ;;  %v12810_v6 = vld [vmem:[%s12964_s24 + $0x7c] sm:$0xff]  }
 0x20b   : > { %16622 = vst [vmem:[#allocation12_spill] sm:$0xff] %v16621_v52  ;;  %v12147_v59 = vpack.c.bf16 %v3026_v28, %v14346_v31  ;;  %v4605_v42 = vsel %vm16544_vm3, %v4600_v0, %v14385_v27  ;;  %v526_v45 = vshll.u32 %v14389_v13, 16  ;;  %vm528_vm8 = vc.u32 %v520_v16, %v524_v53  ;;  %3996 = vmatmul.bf16.gmra.mxu0 %v3870_v36 }
 0x20c   : > { %v14411_v41 = vadd.f32 %v3698_v48, %v3535_v17  ;;  %vm783_vm9 = vcmp.ne.s32.totalorder %v14403_v5, 0  ;;  %vm801_vm1 = vcmp.lt.s32.totalorder %v14403_v5, 0  ;;  %v529_v44 = vsel %vm528_vm8, 1, %v16583_v39 }
 0x20d   : > { %12517 = vst [vmem:[#allocation2 + $0x28] sm:$0xff] %v12147_v59   ;;  %4150 = vmatmul.bf16.gmra.mxu1 %v12526_v2  ;;  %v530_v62 = vadd.s32 %v524_v53, %v520_v16  ;;  %v549_v46 = vmul.u32 14564, %v546_v56  ;;  %v550_v31 = vmul.u32 58254, %v546_v56  ;;  %v14418_v0 = vadd.s32 18, %v14403_v5  ;;  %4438 = vmatmul.bf16.gmra.mxu2 %v4317_v40  ;;  %vm14425_vm0 = vmand %vm801_vm1, %vm783_vm9 }
 0x20e   : > { %16623 = vst [vmem:[#allocation13_spill] sm:$0xff] %v14411_v41  ;;  %v3368_v60 = vadd.f32 %v14060_v1, %v3332_v54  ;;  %4726 = vmatmul.bf16.gmra.mxu3 %v4605_v42  ;;  %v531_v48 = vadd.s32 %v529_v44, %v523_v29  ;;  %v551_v28 = vmul.u32 14564, %v547_v19  ;;  %v525_v16 = vshrl.u32 %v14387_v32, 16  ;;  %v14660_v41 = vld [vmem:[%s12964_s24 + $0x90] sm:$0xff] }
 0x20f   : > { %vm532_vm8 = vc.u32 %v530_v62, %v526_v45  ;;  %v552_v53 = vmul.u32 58254, %v547_v19  ;;  %v553_v56 = vshll.u32 %v550_v31, 16  ;;  %v14431_v17 = vadd.f32 %v2922_v18, %v13710_v20  ;;  %v14441_v62 = vld [vmem:[%s12964_s24 + $0x80] sm:$0xff] }
 0x210   : > { %v527_v40 = vshrl.u32 %v14389_v13, 16  ;;  %v533_v29 = vsel %vm532_vm8, 1, %v16583_v39  ;;  %v555_v54 = vshll.u32 %v551_v28, 16  ;;  %v3503_v2 = vpop.f32.mrf.mxu2  ;;  %v3872_v24 = vshrl.u32 %v12810_v6, 16  ;;  %v2924_v18 = vpop.f32.mrf.mxu0 }
 0x211   : > { %v3701_v59 = vpop.f32.mrf.mxu3  ;;  %v535_v42 = vadd.s32 %v533_v29, %v531_v48  ;;  %vm557_vm9 = vc.u32 %v549_v46, %v553_v56  ;;  %v559_v44 = vadd.s32 %v553_v56, %v549_v46  ;;  %v855_v32 = vsel %vm14425_vm0, %v14418_v0, %v14403_v5  ;;  %v3334_v19 = vpop.f32.mrf.mxu1  ;;  %v14445_v46 = vld [vmem:[%s12964_s24 + $0x88] sm:$0xff] }
 0x212   : > { %v3536_v20 = vadd.f32 %v3503_v2, %v3368_v60  ;;  %v558_v13 = vsel %vm557_vm9, 1, %v16583_v39  ;;  %v3875_v45 = vshll.u32 %v12810_v6, 16  ;;  %v554_v52 = vshrl.u32 %v550_v31, 16 }
 0x213   : > { %v536_v12 = vadd.s32 %v535_v42, %v525_v16  ;;  %v560_v4 = vadd.s32 %v558_v13, %v552_v53  ;;  %v4318_v48 = vshrl.u32 %v14325_v10, 16  ;;  %vm561_vm1 = vc.u32 %v559_v44, %v555_v54 }
 0x214   : > { %v14447_v56 = vadd.f32 %v3701_v59, %v3536_v20  ;;  %v3874_v36 = vrot.slane %v3872_v24, 3  ;;  %v3877_v5 = vrot.slane %v3875_v45, 4  ;;  %v14450_v60 = vadd.f32 %v2924_v18, %v13735_v11  ;;  %v11882_v18 = vld [vmem:[%s16517_s1 + $0x1d8] sm:$0xff] }
 0x215   : > { %v537_v0 = vadd.s32 %v536_v12, %v527_v40  ;;  %v556_v29 = vshrl.u32 %v551_v28, 16  ;;  %v562_v6 = vsel %vm561_vm1, 1, %v16583_v39  ;;  %v4322_v31 = vshll.u32 %v14441_v62, 16  ;;  %4875 = vmatpush.bf16.msra.mxu0 %v11882_v18 }
 0x216   : > { %v564_v2 = vadd.s32 %v562_v6, %v560_v4  ;;  %v14453_v16 = vor.u32 %v3877_v5, %v3874_v36  ;;  %v16546_v10 = vshrl.u32 %v14342_v50, 16  ;;  %v4320_v59 = vor.u32 %v4318_v48, %v14357_v34  ;;  %v12527_v5 = vld [vmem:[%s12964_s24 + $0x78] sm:$0xff]  }
 0x217   : > { %v538_v53 = vshrl.u32 %v537_v0, 4  ;;  %v16545_v24 = vshll.u32 %v14445_v46, 16  ;;  %v14460_v12 = vadd.s32 88, %v13765_v35  ;;  %v3369_v11 = vadd.f32 %v14060_v1, %v3334_v19  ;;  %v11914_v6 = vld [vmem:[%s16519_s3 + $0x58] sm:$0xff] }
 0x218   : > { %v565_v28 = vadd.s32 %v564_v2, %v554_v52  ;;  %v14463_v40 = vrot.slane %v4322_v31, 1  ;;  %v4608_v4 = vor.u32 %v16546_v10, %v14385_v27  ;;  %v3505_v42 = vpop.f32.mrf.mxu2  ;;  %v11906_v52 = vld [vmem:[%s16519_s3 + $0x18] sm:$0xff]  ;;  %v14482_v27 = vadd.s32 96, %v13765_v35  ;;  %v14486_v45 = vpop.f32.mrf.mxu0  ;;  %5619 = vmatpush.bf16.msra.mxu3 %v11914_v6 }
 0x219   : > { %v539_v54 = vmul.u32 18, %v538_v53  ;;  %v14468_v44 = vpop.f32.mrf.mxu3  ;;  %v14472_v34 = vrot.slane %v16545_v24, 1  ;;  %v575_v20 = vand.u32 65535, %v14460_v12  ;;  %v14484_v19 = vadd.f32 %v3505_v42, %v3369_v11  ;;  %v3337_v48 = vpop.f32.mrf.mxu1  ;;  %5447 = vmatpush.bf16.msra.mxu2 %v11906_v52 }
 0x21a   : > { %16626 = vst [vmem:[#allocation14_spill] sm:$0xff] %v14468_v44  ;;  %v566_v13 = vadd.s32 %v565_v28, %v556_v29  ;;  %v3879_v36 = vsel %vm16551_vm2, %v14338_v57, %v14453_v16  ;;  %v576_v0 = vshrl.u32 %v14460_v12, 16  ;;  %v2973_v2 = vmax.f32 %v14431_v17, 0.0  ;;  %v11890_v57 = vld [vmem:[%s16517_s1 + $0x218] sm:$0xff] }
 0x21b   : > { %16627 = vst [vmem:[#allocation15_spill] sm:$0xff] %v14484_v19  ;;  %v540_v31 = vsub.s32 %v14350_v43, %v539_v54  ;;  %v4325_v29 = vsel %vm16544_vm3, %v4320_v59, %v14463_v40  ;;  %v4613_v53 = vsel %vm16544_vm3, %v4608_v4, %v14472_v34  ;;  %vm14505_vm0 = vcmp.lt.s32.totalorder %v855_v32, 16  ;;  %4001 = vmatmul.bf16.gmra.mxu0 %v3879_v36 }
 0x21c   : > { %v16628_v11 = vmov 0  ;;  %v2974_v28 = vmax.f32 %v14450_v60, 0.0  ;;  %v567_v17 = vshrl.u32 %v566_v13, 4  ;;  %v579_v42 = vmul.u32 58254, %v575_v20  ;;  %5073 = vmatpush.bf16.msra.mxu1 %v11890_v57 }
 0x21d   : > { %v16629_v11 = vsel %vm14505_vm0, 4294967295, %v16628_v11  ;;  %vm784_vm8 = vcmp.ne.s32.totalorder %v540_v31, 0  ;;  %vm802_vm9 = vcmp.lt.s32.totalorder %v540_v31, 0  ;;  %v838_v43 = vadd.s32 18, %v540_v31  ;;  %4155 = vmatmul.bf16.gmra.mxu1 %v12527_v5  ;;  %4443 = vmatmul.bf16.gmra.mxu2 %v4325_v29 }
 0x21e   : > { %16630 = vst [vmem:[#allocation16_spill] sm:$0xff] %v16629_v11  ;;  %v578_v59 = vmul.u32 14564, %v575_v20  ;;  %vm820_vm1 = vmand %vm802_vm9, %vm784_vm8  ;;  %v568_v4 = vmul.u32 18, %v567_v17  ;;  %4731 = vmatmul.bf16.gmra.mxu3 %v4613_v53  ;;  %v580_v32 = vmul.u32 14564, %v576_v0  ;;  %v582_v54 = vshll.u32 %v579_v42, 16 }
 0x21f   : > { %v604_v52 = vand.u32 65535, %v14482_v27  ;;  %v3027_v60 = vsel %vm14505_vm0, %v2973_v2, 0.0  ;;  %v856_v13 = vsel %vm820_vm1, %v838_v43, %v540_v31  ;;  %v3370_v18 = vadd.f32 %v14060_v1, %v3337_v48 }
 0x220   : > { %vm14514_vm4 = vcmp.lt.s32.totalorder %v856_v13, 16  ;;  %v16631_v6 = vmov 0  ;;  %v14519_v20 = vsub.s32 %v14381_v15, %v568_v4  ;;  %v581_v36 = vmul.u32 58254, %v576_v0  ;;  %v3508_v53 = vpop.f32.mrf.mxu2  ;;  %v2929_v31 = vpop.f32.mrf.mxu0  ;;  %v12812_v4 = vld [vmem:[%s12964_s24 + $0x84] sm:$0xff]  }
 0x221   : > { %v16632_v6 = vsel %vm14514_vm4, 4294967295, %v16631_v6  ;;  %v584_v5 = vshll.u32 %v580_v32, 16  ;;  %v3028_v29 = vsel %vm14514_vm4, %v2974_v28, 0.0  ;;  %v3706_v17 = vpop.f32.mrf.mxu3  ;;  %vm586_vm8 = vc.u32 %v578_v59, %v582_v54  ;;  %v14526_v15 = vpop.f32.mrf.mxu1 }
 0x222   : > { %16633 = vst [vmem:[#allocation17_spill] sm:$0xff] %v16632_v6  ;;  %v588_v2 = vadd.s32 %v582_v54, %v578_v59  ;;  %v605_v1 = vshrl.u32 %v14482_v27, 16  ;;  %v12152_v48 = vpack.c.bf16 %v3028_v29, %v3027_v60  ;;  %vm785_vm9 = vcmp.ne.s32.totalorder %v14519_v20, 0  ;;  %v14539_v6 = vld [vmem:[%s12964_s24 + $0x88] sm:$0xff] }
 0x223   : > { %vm803_vm1 = vcmp.lt.s32.totalorder %v14519_v20, 0  ;;  %v608_v0 = vmul.u32 58254, %v604_v52  ;;  %v839_v57 = vadd.s32 18, %v14519_v20  ;;  %v3538_v28 = vadd.f32 %v3508_v53, %v3370_v18 }
 0x224   : > { %v587_v43 = vsel %vm586_vm8, 1, %v16583_v39  ;;  %vm590_vm5 = vc.u32 %v588_v2, %v584_v5  ;;  %12518 = vst [vmem:[#allocation2 + $0x30] sm:$0xff] %v12152_v48   ;;  %vm14531_vm3 = vmand %vm803_vm1, %vm785_vm9  ;;  %v583_v54 = vshrl.u32 %v579_v42, 16  ;;  %v607_v29 = vmul.u32 14564, %v604_v52 }
 0x225   : > { %v589_v60 = vadd.s32 %v587_v43, %v581_v36  ;;  %v591_v13 = vsel %vm590_vm5, 1, %v16583_v39  ;;  %v14536_v24 = vadd.f32 %v3706_v17, %v3538_v28  ;;  %v609_v10 = vmul.u32 14564, %v605_v1 }
 0x226   : > { %v585_v18 = vshrl.u32 %v580_v32, 16  ;;  %v610_v11 = vmul.u32 58254, %v605_v1  ;;  %v611_v5 = vshll.u32 %v608_v0, 16  ;;  %v857_v2 = vsel %vm14531_vm3, %v839_v57, %v14519_v20 }
 0x227   : > { %v593_v53 = vadd.s32 %v591_v13, %v589_v60  ;;  %v2957_v42 = vadd.f32 %v14486_v45, %v13762_v25  ;;  %v613_v36 = vshll.u32 %v609_v10, 16  ;;  %v3881_v48 = vshrl.u32 %v12812_v4, 16 }
 0x228   : > { %vm615_vm5 = vc.u32 %v607_v29, %v611_v5  ;;  %v617_v52 = vadd.s32 %v611_v5, %v607_v29  ;;  %v3884_v17 = vshll.u32 %v12812_v4, 16  ;;  %v14546_v28 = vpop.f32.mrf.mxu2  ;;  %v4326_v20 = vshrl.u32 %v14441_v62, 16  ;;  %v14555_v29 = vld [vmem:[%s12964_s24 + $0x90] sm:$0xff] }
 0x229   : > { %v594_v43 = vadd.s32 %v593_v53, %v583_v54  ;;  %v14548_v32 = vpop.f32.mrf.mxu3  ;;  %v616_v1 = vsel %vm615_vm5, 1, %v16583_v39  ;;  %v3883_v60 = vrot.slane %v3881_v48, 3  ;;  %v4330_v57 = vshll.u32 %v14539_v6, 16  ;;  %v2932_v54 = vpop.f32.mrf.mxu0  ;;  %v12528_v53 = vld [vmem:[%s12964_s24 + $0x80] sm:$0xff]  }
 0x22a   : > { %v612_v45 = vshrl.u32 %v608_v0, 16  ;;  %v618_v59 = vadd.s32 %v616_v1, %v610_v11  ;;  %vm619_vm3 = vc.u32 %v617_v52, %v613_v36  ;;  %v3342_v13 = vpop.f32.mrf.mxu1  ;;  %v2975_v4 = vmax.f32 %v2957_v42, 0.0 }
 0x22b   : > { %v595_v25 = vadd.s32 %v594_v43, %v585_v18  ;;  %v2958_v5 = vadd.f32 %v2929_v31, %v13801_v9  ;;  %v620_v44 = vsel %vm619_vm3, 1, %v16583_v39  ;;  %v3886_v19 = vrot.slane %v3884_v17, 4 }
 0x22c   : > { %v614_v33 = vshrl.u32 %v609_v10, 16  ;;  %v622_v62 = vadd.s32 %v620_v44, %v618_v59  ;;  %v4328_v61 = vor.u32 %v4326_v20, %v14463_v40  ;;  %vm14560_vm8 = vcmp.lt.s32.totalorder %v857_v2, 16  ;;  %v11905_v40 = vld [vmem:[%s16519_s3 + $0x10] sm:$0xff]  ;;  %v14585_v2 = vld [vmem:[%s16518_s2] ss:$0 sm:$0xff] }
 0x22d   : > { %v596_v48 = vshrl.u32 %v595_v25, 4  ;;  %v16636_v0 = vmov 0  ;;  %v14564_v11 = vor.u32 %v3886_v19, %v3883_v60  ;;  %4160 = vmatmul.bf16.gmra.mxu1 %v12528_v53  ;;  %v14566_v18 = vrot.slane %v4330_v57, 1  ;;  %v11881_v44 = vld [vmem:[%s16517_s1 + $0x1d0] sm:$0xff]  ;;  %5448 = vmatpush.bf16.msra.mxu2 %v11905_v40 }
 0x22e   : > { %v16637_v0 = vsel %vm14560_vm8, 4294967295, %v16636_v0  ;;  %v16554_v42 = vshrl.u32 %v14445_v46, 16  ;;  %v623_v31 = vadd.s32 %v622_v62, %v612_v45  ;;  %v16552_v36 = vshll.u32 %v14555_v29, 16  ;;  %v11913_v19 = vld [vmem:[%s16519_s3 + $0x50] sm:$0xff]  ;;  %4876 = vmatpush.bf16.msra.mxu0 %v11881_v44 }
 0x22f   : > { %16638 = vst [vmem:[#allocation18_spill] sm:$0xff] %v16637_v0  ;;  %v597_v9 = vmul.u32 18, %v596_v48  ;;  %v14571_v10 = vadd.s32 104, %v13765_v35  ;;  %v3372_v43 = vadd.f32 %v14585_v2, %v3342_v13  ;;  %v3888_v52 = vsel %vm16551_vm2, %v14453_v16, %v14564_v11  ;;  %5620 = vmatpush.bf16.msra.mxu3 %v11913_v19 }
 0x230   : > { %vm16639_vm9 = vsmask.f32 7424  ;;  %v4616_v1 = vor.u32 %v16554_v42, %v14472_v34  ;;  %v624_v20 = vadd.s32 %v623_v31, %v614_v33  ;;  %4006 = vmatmul.bf16.gmra.mxu0 %v3888_v52  ;;  %v14599_v57 = vrot.slane %v16552_v36, 1 }
 0x231   : > { %v4333_v17 = vsel %vm16639_vm9, %v4328_v61, %v14566_v18  ;;  %v598_v60 = vsub.s32 %v14460_v12, %v597_v9  ;;  %v633_v25 = vand.u32 65535, %v14571_v10  ;;  %v3029_v16 = vsel %vm14560_vm8, %v2975_v4, 0.0  ;;  %v3513_v61 = vpop.f32.mrf.mxu2  ;;  %v3711_v59 = vpop.f32.mrf.mxu3  ;;  %v11889_v4 = vld [vmem:[%s16517_s1 + $0x210] sm:$0xff] }
 0x232   : > { %4448 = vmatmul.bf16.gmra.mxu2 %v4333_v17  ;;  %v2976_v45 = vmax.f32 %v2958_v5, 0.0  ;;  %v634_v13 = vshrl.u32 %v14571_v10, 16  ;;  %v14606_v33 = vadd.s32 112, %v13765_v35  ;;  %v625_v34 = vshrl.u32 %v624_v20, 4  ;;  %v2934_v53 = vpop.f32.mrf.mxu0  ;;  %v14608_v48 = vpop.f32.mrf.mxu1  ;;  %5074 = vmatpush.bf16.msra.mxu1 %v11889_v4 }
 0x233   : > { %vm786_vm1 = vcmp.ne.s32.totalorder %v598_v60, 0  ;;  %vm804_vm5 = vcmp.lt.s32.totalorder %v598_v60, 0  ;;  %v840_v12 = vadd.s32 18, %v598_v60  ;;  %v4621_v5 = vsel %vm16639_vm9, %v4616_v1, %v14599_v57 }
 0x234   : > { %vm822_vm3 = vmand %vm804_vm5, %vm786_vm1  ;;  %v3540_v62 = vadd.f32 %v3513_v61, %v3372_v43  ;;  %v636_v9 = vmul.u32 14564, %v633_v25  ;;  %v637_v31 = vmul.u32 58254, %v633_v25  ;;  %v626_v44 = vmul.u32 18, %v625_v34  ;;  %4736 = vmatmul.bf16.gmra.mxu3 %v4621_v5  ;;  %v12814_v34 = vld [vmem:[%s12964_s24 + $0x8c] sm:$0xff]  }
 0x235   : > { %v858_v40 = vsel %vm822_vm3, %v840_v12, %v598_v60  ;;  %v14616_v52 = vadd.f32 %v2932_v54, %v13854_v51  ;;  %v638_v17 = vmul.u32 14564, %v634_v13  ;;  %v16640_v19 = vmov 0 }
 0x236   : > { %vm14618_vm2 = vcmp.lt.s32.totalorder %v858_v40, 16  ;;  %v14622_v20 = vadd.f32 %v3711_v59, %v3540_v62  ;;  %v639_v36 = vmul.u32 58254, %v634_v13  ;;  %v640_v1 = vshll.u32 %v637_v31, 16 }
 0x237   : > { %v16641_v19 = vsel %vm14618_vm2, 4294967295, %v16640_v19  ;;  %v3030_v43 = vsel %vm14618_vm2, %v2976_v45, 0.0  ;;  %v14627_v60 = vsub.s32 %v14482_v27, %v626_v44  ;;  %v642_v51 = vshll.u32 %v638_v17, 16 }
 0x238   : > { %16642 = vst [vmem:[#allocation19_spill] sm:$0xff] %v16641_v19  ;;  %v662_v54 = vand.u32 65535, %v14606_v33  ;;  %v12157_v25 = vpack.c.bf16 %v3030_v43, %v3029_v16  ;;  %vm644_vm1 = vc.u32 %v636_v9, %v640_v1  ;;  %v646_v61 = vadd.s32 %v640_v1, %v636_v9  ;;  %v12529_v1 = vld [vmem:[%s12964_s24 + $0x88] sm:$0xff]  }
 0x239   : > { %v663_v12 = vshrl.u32 %v14606_v33, 16  ;;  %vm787_vm5 = vcmp.ne.s32.totalorder %v14627_v60, 0  ;;  %vm805_vm3 = vcmp.lt.s32.totalorder %v14627_v60, 0  ;;  %v641_v59 = vshrl.u32 %v637_v31, 16  ;;  %v14641_v4 = vpop.f32.mrf.mxu2  ;;  %v14643_v5 = vpop.f32.mrf.mxu3 }
 0x23a   : > { %v645_v45 = vsel %vm644_vm1, 1, %v16583_v39  ;;  %12519 = vst [vmem:[#allocation2 + $0x38] sm:$0xff] %v12157_v25   ;;  %v14636_v27 = vadd.s32 18, %v14627_v60  ;;  %vm648_vm9 = vc.u32 %v646_v61, %v642_v51  ;;  %v14639_v16 = vadd.f32 %v2934_v53, %v13877_v14  ;;  %vm14645_vm2 = vmand %vm805_vm3, %vm787_vm5  ;;  %v14650_v44 = vpop.f32.mrf.mxu0  ;;  %v14664_v25 = vld [vmem:[%s12964_s24 + $0x98] sm:$0xff] }
 0x23b   : > { %v647_v13 = vadd.s32 %v645_v45, %v639_v36  ;;  %16643 = vst [vmem:[#allocation20_spill] sm:$0xff] %v14641_v4  ;;  %v649_v9 = vsel %vm648_vm9, 1, %v16583_v39  ;;  %v665_v31 = vmul.u32 14564, %v662_v54  ;;  %v666_v40 = vmul.u32 58254, %v662_v54  ;;  %v3347_v36 = vpop.f32.mrf.mxu1 }
 0x23c   : > { %16644 = vst [vmem:[#allocation21_spill] sm:$0xff] %v14643_v5  ;;  %v643_v43 = vshrl.u32 %v638_v17, 16  ;;  %v667_v53 = vmul.u32 14564, %v663_v12  ;;  %v3890_v51 = vshrl.u32 %v12814_v34, 16  ;;  %v668_v61 = vmul.u32 58254, %v663_v12 }
 0x23d   : > { %v651_v14 = vadd.s32 %v649_v9, %v647_v13  ;;  %v669_v45 = vshll.u32 %v666_v40, 16  ;;  %v859_v42 = vsel %vm14645_vm2, %v14636_v27, %v14627_v60  ;;  %4165 = vmatmul.bf16.gmra.mxu1 %v12529_v1  ;;  %v670_v17 = vshrl.u32 %v666_v40, 16 }
 0x23e   : > { %v671_v0 = vshll.u32 %v667_v53, 16  ;;  %v3374_v9 = vadd.f32 %v14585_v2, %v3347_v36  ;;  %v3892_v49 = vrot.slane %v3890_v51, 3  ;;  %v3893_v62 = vshll.u32 %v12814_v34, 16 }
 0x23f   : > { %v652_v54 = vadd.s32 %v651_v14, %v641_v59  ;;  %vm673_vm1 = vc.u32 %v665_v31, %v669_v45  ;;  %v675_v13 = vadd.s32 %v669_v45, %v665_v31  ;;  %v672_v60 = vshrl.u32 %v667_v53, 16 }
 0x240   : > { %v674_v38 = vsel %vm673_vm1, 1, %v16583_v39  ;;  %v4334_v27 = vshrl.u32 %v14539_v6, 16  ;;  %v3895_v40 = vrot.slane %v3893_v62, 4  ;;  %v4338_v31 = vshll.u32 %v14660_v41, 16 }
 0x241   : > { %v653_v12 = vadd.s32 %v652_v54, %v643_v43  ;;  %v676_v59 = vadd.s32 %v674_v38, %v668_v61  ;;  %vm677_vm2 = vc.u32 %v675_v13, %v671_v0  ;;  %v3518_v45 = vpop.f32.mrf.mxu2  ;;  %v3716_v36 = vpop.f32.mrf.mxu3  ;;  %v16559_v54 = vshrl.u32 %v14555_v29, 16 }
 0x242   : > { %v678_v14 = vsel %vm677_vm2, 1, %v16583_v39  ;;  %v4336_v43 = vor.u32 %v4334_v27, %v14566_v18  ;;  %v16558_v34 = vshll.u32 %v14664_v25, 16  ;;  %v2939_v53 = vpop.f32.mrf.mxu0  ;;  %v14675_v6 = vor.u32 %v3895_v40, %v3892_v49  ;;  %v11904_v49 = vld [vmem:[%s16519_s3 + $0x8] sm:$0xff] }
 0x243   : > { %v654_v1 = vshrl.u32 %v653_v12, 4  ;;  %v680_v19 = vadd.s32 %v678_v14, %v676_v59  ;;  %v14673_v38 = vpop.f32.mrf.mxu1  ;;  %v14677_v51 = vrot.slane %v4338_v31, 1  ;;  %v3542_v61 = vadd.f32 %v3518_v45, %v3374_v9  ;;  %5449 = vmatpush.bf16.msra.mxu2 %v11904_v49 }
 0x244   : > { %16647 = vst [vmem:[#allocation22_spill] sm:$0xff] %v14673_v38  ;;  %v4624_v12 = vor.u32 %v16559_v54, %v14599_v57  ;;  %v14684_v18 = vrot.slane %v16558_v34, 1  ;;  %v14687_v62 = vadd.s32 120, %v13765_v35  ;;  %vm16648_vm5 = vsmask.f32 4352 }
 0x245   : > { %v655_v0 = vmul.u32 18, %v654_v1  ;;  %v681_v13 = vadd.s32 %v680_v19, %v670_v17  ;;  %v3897_v19 = vsel %vm16648_vm5, %v14564_v11, %v14675_v6  ;;  %vm16649_vm3 = vsmask.f32 7424 }
 0x246   : > { %v4341_v57 = vsel %vm16649_vm3, %v4336_v43, %v14677_v51  ;;  %v14698_v17 = vadd.f32 %v3716_v36, %v3542_v61  ;;  %4011 = vmatmul.bf16.gmra.mxu0 %v3897_v19  ;;  %vm16651_vm9 = vmmov %vm16649_vm3  ;;  %v691_v1 = vand.u32 65535, %v14687_v62  ;;  %v692_v14 = vshrl.u32 %v14687_v62, 16 }
 0x247   : > { %v656_v59 = vsub.s32 %v14571_v10, %v655_v0  ;;  %v682_v9 = vadd.s32 %v681_v13, %v672_v60  ;;  %4453 = vmatmul.bf16.gmra.mxu2 %v4341_v57  ;;  %v4629_v27 = vsel %vm16651_vm9, %v4624_v12, %v14684_v18  ;;  %vm14704_vm1 = vcmp.lt.s32.totalorder %v859_v42, 16  ;;  %v11880_v13 = vld [vmem:[%s16517_s1 + $0x1c8] sm:$0xff]  ;;  %v12530_v57 = vld [vmem:[%s12964_s24 + $0x90] sm:$0xff]  }
 0x248   : > { %16650 = vst [vmem:[#allocation23_spill] sm:$0xff] %v14698_v17  ;;  %v16652_v10 = vmov 0  ;;  %4741 = vmatmul.bf16.gmra.mxu3 %v4629_v27  ;;  %v694_v40 = vmul.u32 14564, %v691_v1  ;;  %v695_v31 = vmul.u32 58254, %v691_v1  ;;  %v14708_v45 = vmul.u32 14564, %v692_v14  ;;  %v11912_v12 = vld [vmem:[%s16519_s3 + $0x48] sm:$0xff]  ;;  %4877 = vmatpush.bf16.msra.mxu0 %v11880_v13 }
 0x249   : > { %v16653_v10 = vsel %vm14704_vm1, 4294967295, %v16652_v10  ;;  %vm788_vm2 = vcmp.ne.s32.totalorder %v656_v59, 0  ;;  %vm806_vm5 = vcmp.lt.s32.totalorder %v656_v59, 0  ;;  %v842_v11 = vadd.s32 18, %v656_v59  ;;  %v14717_v0 = vpop.f32.mrf.mxu2  ;;  %v14719_v61 = vpop.f32.mrf.mxu3  ;;  %5621 = vmatpush.bf16.msra.mxu3 %v11912_v12  ;;  %v14785_v17 = vld [vmem:[%s12964_s24 + $0xa0] sm:$0xff] }
 0x24a   : > { %16654 = vst [vmem:[#allocation24_spill] sm:$0xff] %v16653_v10  ;;  %vm824_vm3 = vmand %vm806_vm5, %vm788_vm2  ;;  %v683_v60 = vshrl.u32 %v682_v9, 4  ;;  %v14712_v43 = vadd.f32 %v14650_v44, %v13943_v47  ;;  %v14715_v42 = vadd.f32 %v2939_v53, %v13960_v30  ;;  %v11888_v47 = vld [vmem:[%s16517_s1 + $0x208] sm:$0xff]  ;;  %v16657_v44 = vmov 0 }
 0x24b   : > { %v860_v36 = vsel %vm824_vm3, %v842_v11, %v656_v59  ;;  %16655 = vst [vmem:[#allocation25_spill] sm:$0xff] %v14717_v0  ;;  %v697_v53 = vmul.u32 58254, %v692_v14  ;;  %v698_v49 = vshll.u32 %v695_v31, 16  ;;  %v14734_v59 = vpop.f32.mrf.mxu0  ;;  %v3352_v19 = vpop.f32.mrf.mxu1  ;;  %v16660_v9 = vshrl.u32 %v13958_v58, 16  ;;  %5075 = vmatpush.bf16.msra.mxu1 %v11888_v47 }
 0x24c   : > { %16656 = vst [vmem:[#allocation26_spill] sm:$0xff] %v14719_v61  ;;  %vm14730_vm9 = vcmp.lt.s32.totalorder %v860_v36, 16  ;;  %v684_v30 = vmul.u32 18, %v683_v60  ;;  %v16661_v1 = vmax.f32 %v14616_v52, 0.0  ;;  %v16662_v36 = vmax.f32 %v14639_v16, 0.0 }
 0x24d   : > { %v16658_v44 = vsel %vm14730_vm9, 4294967295, %v16657_v44  ;;  %v14739_v27 = vrot.slane %v16660_v9, 1  ;;  %v700_v14 = vshll.u32 %v14708_v45, 16  ;;  %vm702_vm2 = vc.u32 %v694_v40, %v698_v49  ;;  %4170 = vmatmul.bf16.gmra.mxu1 %v12530_v57 }
 0x24e   : > { %16659 = vst [vmem:[#allocation27_spill] sm:$0xff] %v16658_v44  ;;  %v3031_v11 = vsel %vm14704_vm1, %v16661_v1, 0.0  ;;  %v3032_v60 = vsel %vm14730_vm9, %v16662_v36, 0.0  ;;  %v685_v54 = vsub.s32 %v14606_v33, %v684_v30  ;;  %v704_v9 = vadd.s32 %v698_v49, %v694_v40  ;;  %v14769_v36 = vld [vmem:[%s12964_s24 + $0x98] sm:$0xff] }
 0x24f   : > { %v12162_v34 = vpack.c.bf16 %v3032_v60, %v3031_v11  ;;  %v703_v1 = vsel %vm702_vm2, 1, %v16583_v39  ;;  %v14756_v44 = vadd.s32 128, %v13765_v35  ;;  %v699_v12 = vshrl.u32 %v695_v31, 16 }
 0x250   : > { %vm789_vm5 = vcmp.ne.s32.totalorder %v685_v54, 0  ;;  %vm807_vm3 = vcmp.lt.s32.totalorder %v685_v54, 0  ;;  %v843_v13 = vadd.s32 18, %v685_v54  ;;  %v705_v33 = vadd.s32 %v703_v1, %v697_v53 }
 0x251   : > { %12520 = vst [vmem:[#allocation2 + $0x40] sm:$0xff] %v12162_v34   ;;  %vm14758_vm9 = vmand %vm807_vm3, %vm789_vm5  ;;  %vm706_vm1 = vc.u32 %v704_v9, %v700_v14  ;;  %v720_v47 = vand.u32 65535, %v14756_v44  ;;  %v721_v30 = vshrl.u32 %v14756_v44, 16  ;;  %v701_v57 = vshrl.u32 %v14708_v45, 16  ;;  %v3523_v14 = vpop.f32.mrf.mxu2  ;;  %v3721_v9 = vpop.f32.mrf.mxu3 }
 0x252   : > { %v861_v49 = vsel %vm14758_vm9, %v843_v13, %v685_v54  ;;  %v707_v34 = vsel %vm706_vm1, 1, %v16583_v39  ;;  %v3899_v11 = vshrl.u32 %v12815_v55, 16  ;;  %v3376_v31 = vadd.f32 %v14585_v2, %v3352_v19 }
 0x253   : > { %v709_v53 = vadd.s32 %v707_v34, %v705_v33  ;;  %v723_v60 = vmul.u32 14564, %v720_v47  ;;  %v724_v1 = vmul.u32 58254, %v720_v47  ;;  %vm14772_vm2 = vcmp.lt.s32.totalorder %v861_v49, 16  ;;  %v14778_v40 = vpop.f32.mrf.mxu0  ;;  %v3354_v52 = vpop.f32.mrf.mxu1 }
 0x254   : > { %v16665_v16 = vmov 0  ;;  %v14776_v54 = vmul.u32 14564, %v721_v30  ;;  %v726_v45 = vmul.u32 58254, %v721_v30  ;;  %v3901_v13 = vrot.slane %v3899_v11, 3 }
 0x255   : > { %v16666_v16 = vsel %vm14772_vm2, 4294967295, %v16665_v16  ;;  %v710_v10 = vadd.s32 %v709_v53, %v699_v12  ;;  %v727_v33 = vshll.u32 %v724_v1, 16  ;;  %v728_v34 = vshrl.u32 %v724_v1, 16 }
 0x256   : > { %16667 = vst [vmem:[#allocation28_spill] sm:$0xff] %v16666_v16  ;;  %v3902_v47 = vshll.u32 %v12815_v55, 16  ;;  %v729_v19 = vshll.u32 %v14776_v54, 16  ;;  %v730_v61 = vshrl.u32 %v14776_v54, 16  ;;  %v4342_v49 = vshrl.u32 %v14660_v41, 16 }
 0x257   : > { %v4346_v0 = vshll.u32 %v14769_v36, 16  ;;  %v711_v38 = vadd.s32 %v710_v10, %v701_v57  ;;  %vm731_vm1 = vc.u32 %v723_v60, %v727_v33  ;;  %v733_v30 = vadd.s32 %v727_v33, %v723_v60  ;;  %v11903_v33 = vld [vmem:[%s16519_s3] sm:$0xff] }
 0x258   : > { %v3904_v11 = vrot.slane %v3902_v47, 4  ;;  %v732_v5 = vsel %vm731_vm1, 1, %v16583_v39  ;;  %v4344_v12 = vor.u32 %v4342_v49, %v14677_v51  ;;  %v16570_v55 = vshrl.u32 %v14664_v25, 16  ;;  %5450 = vmatpush.bf16.msra.mxu2 %v11903_v33 }
 0x259   : > { %v14789_v53 = vrot.slane %v4346_v0, 1  ;;  %v712_v1 = vshrl.u32 %v711_v38, 4  ;;  %v734_v54 = vadd.s32 %v732_v5, %v726_v45  ;;  %vm735_vm9 = vc.u32 %v733_v30, %v729_v19  ;;  %v3525_v45 = vpop.f32.mrf.mxu2 }
 0x25a   : > { %v14792_v41 = vor.u32 %v3904_v11, %v3901_v13  ;;  %v736_v4 = vsel %vm735_vm9, 1, %v16583_v39  ;;  %vm16668_vm5 = vsmask.f32 7424  ;;  %v4632_v57 = vor.u32 %v16570_v55, %v14684_v18  ;;  %v3723_v13 = vpop.f32.mrf.mxu3  ;;  %v11879_v18 = vld [vmem:[%s16517_s1 + $0x1c0] sm:$0xff] }
 0x25b   : > { %v4349_v10 = vsel %vm16668_vm5, %v4344_v12, %v14789_v53  ;;  %v16565_v51 = vshll.u32 %v14785_v17, 16  ;;  %v713_v0 = vmul.u32 18, %v712_v1  ;;  %v738_v60 = vadd.s32 %v736_v4, %v734_v54  ;;  %v11911_v4 = vld [vmem:[%s16519_s3 + $0x40] sm:$0xff]  ;;  %v3982_v30 = vpop.f32.mrf.mxu0  ;;  %v4136_v11 = vpop.f32.mrf.mxu1  ;;  %vm16672_vm1 = vmmov %vm16668_vm5  ;;  %4878 = vmatpush.bf16.msra.mxu0 %v11879_v18  ;;  %v11959_v18 = vld [vmem:[%s16519_s3 + $0x178] sm:$0xff] }
 0x25c   : > { %vm16669_vm3 = vsmask.f32 4352  ;;  %4458 = vmatmul.bf16.gmra.mxu2 %v4349_v10  ;;  %v3544_v38 = vadd.f32 %v3523_v14, %v3376_v31  ;;  %v16670_v47 = vmax.f32 %v14712_v43, 0.0  ;;  %v16671_v31 = vld [vmem:[#allocation3_spill] sm:$0xff]  ;;  %v14828_v49 = vadd.s32 136, %v13765_v35  ;;  %v11887_v43 = vld [vmem:[%s16517_s1 + $0x200] sm:$0xff]  ;;  %5622 = vmatpush.bf16.msra.mxu3 %v11911_v4 }
 0x25d   : > { %v3906_v5 = vsel %vm16669_vm3, %v14675_v6, %v14792_v41  ;;  %v14821_v14 = vadd.f32 %v14734_v59, %v16671_v31  ;;  %v14825_v19 = vrot.slane %v16565_v51, 1  ;;  %v714_v12 = vsub.s32 %v14687_v62, %v713_v0  ;;  %v12531_v31 = vld [vmem:[%s12964_s24 + $0x98] sm:$0xff]   ;;  %5076 = vmatpush.bf16.msra.mxu1 %v11887_v43 }
 0x25e   : > { %v14817_v6 = vsel %vm14772_vm2, %v16670_v47, 0.0  ;;  %4016 = vmatmul.bf16.gmra.mxu0 %v3906_v5  ;;  %v739_v1 = vadd.s32 %v738_v60, %v728_v34  ;;  %v14834_v59 = vadd.f32 %v3721_v9, %v3544_v38  ;;  %v4027_v54 = vadd.f32 %v3982_v30, %v14117_v23  ;;  %4175 = vmatmul.bf16.gmra.mxu1 %v12531_v31  ;;  %v11934_v4 = vld [vmem:[%s16519_s3 + $0xf8] sm:$0xff] }
 0x25f   : > { %v4637_v10 = vsel %vm16672_vm1, %v4632_v57, %v14825_v19  ;;  %v749_v35 = vand.u32 65535, %v14828_v49  ;;  %v750_v5 = vshrl.u32 %v14828_v49, 16  ;;  %v3377_v47 = vadd.f32 %v14585_v2, %v3354_v52  ;;  %v11942_v2 = vld [vmem:[%s16519_s3 + $0x138] sm:$0xff] }
 0x260   : > { %vm790_vm9 = vcmp.ne.s32.totalorder %v714_v12, 0  ;;  %vm808_vm5 = vcmp.lt.s32.totalorder %v714_v12, 0  ;;  %v844_v62 = vadd.s32 18, %v714_v12  ;;  %v740_v9 = vadd.s32 %v739_v1, %v730_v61  ;;  %4746 = vmatmul.bf16.gmra.mxu3 %v4637_v10  ;;  %v11926_v52 = vld [vmem:[%s16519_s3 + $0xb8] sm:$0xff]  ;;  %v4217_v10 = vld [vmem:[%s12964_s24 + $0xa0] sm:$0x1]  ;;  %6271 = vmatpush.bf16.msrb.mxu2 %v11942_v2 }
 0x261   : > { %vm826_vm3 = vmand %vm808_vm5, %vm790_vm9  ;;  %v752_v23 = vmul.u32 14564, %v749_v35  ;;  %v753_v34 = vmul.u32 58254, %v749_v35  ;;  %v14843_v57 = vmul.u32 14564, %v750_v5  ;;  %v755_v0 = vmul.u32 58254, %v750_v5  ;;  %5814 = vmatpush.bf16.msrb.mxu0 %v11926_v52  ;;  %6560 = vmatpush.bf16.msrb.mxu3 %v11959_v18 }
 0x262   : > { %v862_v60 = vsel %vm826_vm3, %v844_v62, %v714_v12  ;;  %v741_v61 = vshrl.u32 %v740_v9, 4  ;;  %v3545_v38 = vadd.f32 %v3525_v45, %v3377_v47  ;;  %v4181_v33 = vadd.f32 %v4136_v11, %v4027_v54  ;;  %v4505_v47 = vld [vmem:[%s12964_s24 + $0xa8] sm:$0x1]  ;;  %v4424_v62 = vpop.f32.mrf.mxu2  ;;  %v4712_v9 = vpop.f32.mrf.mxu3  ;;  %6116 = vmatpush.bf16.msrb.mxu1 %v11934_v4 }
 0x263   : > { %vm14857_vm1 = vcmp.lt.s32.totalorder %v862_v60, 16  ;;  %v16673_v30 = vmov 0  ;;  %v756_v43 = vshll.u32 %v753_v34, 16  ;;  %v757_v1 = vshrl.u32 %v753_v34, 16  ;;  %v3984_v60 = vpop.f32.mrf.mxu0 }
 0x264   : > { %v16674_v30 = vsel %vm14857_vm1, 4294967295, %v16673_v30  ;;  %v758_v12 = vshll.u32 %v14843_v57, 16  ;;  %v16676_v45 = vmax.f32 %v14715_v42, 0.0  ;;  %v742_v54 = vmul.u32 18, %v741_v61  ;;  %v4138_v42 = vpop.f32.mrf.mxu1 }
 0x265   : > { %16675 = vst [vmem:[#allocation3_spill] sm:$0xff] %v16674_v30  ;;  %v759_v35 = vshrl.u32 %v14843_v57, 16  ;;  %v14868_v5 = vadd.f32 %v3723_v13, %v3545_v38  ;;  %vm760_vm9 = vc.u32 %v752_v23, %v756_v43  ;;  %v762_v2 = vadd.s32 %v756_v43, %v752_v23 }
 0x266   : > { %v3034_v11 = vsel %vm14857_vm1, %v16676_v45, 0.0  ;;  %v12209_v52 = vunpack.c.h.b16 %v12531_v31  ;;  %v743_v51 = vsub.s32 %v14756_v44, %v742_v54  ;;  %v761_v61 = vsel %vm760_vm9, 1, %v16583_v39 }
 0x267   : > { %v12167_v34 = vpack.c.bf16 %v3034_v11, %v14817_v6  ;;  %v4271_v45 = vunpack.c.l.b16 %v4217_v10  ;;  %v4350_v13 = vshrl.u32 %v14769_v36, 16  ;;  %v763_v57 = vadd.s32 %v761_v61, %v755_v0 }
 0x268   : > { %vm764_vm5 = vc.u32 %v762_v2, %v758_v12  ;;  %v3826_v38 = vpack.c.b16 %v12209_v52, %v12209_v52  ;;  %v4559_v18 = vunpack.c.l.b16 %v4505_v47  ;;  %vm791_vm3 = vcmp.ne.s32.totalorder %v743_v51, 0  ;;  %v12533_v2 = vld [vmem:[%s12964_s24 + $0x60] sm:$0xf0]  ;;  %v12534_v52 = vld [vmem:[%s12964_s24 + $0x60] sm:$0xe] }
 0x269   : > { %12521 = vst [vmem:[#allocation2 + $0x48] sm:$0xff] %v12167_v34   ;;  %vm809_vm1 = vcmp.lt.s32.totalorder %v743_v51, 0  ;;  %v845_v6 = vadd.s32 18, %v743_v51  ;;  %v765_v31 = vsel %vm764_vm5, 1, %v16583_v39  ;;  %v4281_v36 = vpack.c.b16 %v4271_v45, %v4271_v45 }
 0x26a   : > { %vm14876_vm2 = vmand %vm809_vm1, %vm791_vm3  ;;  %v767_v44 = vadd.s32 %v765_v31, %v763_v57  ;;  %v3908_v4 = vshrl.u32 %v3826_v38, 16  ;;  %v3911_v43 = vshll.u32 %v3826_v38, 16  ;;  %v2981_v0 = vmax.f32 %v14821_v14, 0.0  ;;  %v4426_v14 = vpop.f32.mrf.mxu2  ;;  %v4714_v57 = vpop.f32.mrf.mxu3 }
 0x26b   : > { %v14883_v12 = vadd.f32 %v14778_v40, %v14069_v8  ;;  %v14885_v10 = vpack.c.b16 %v4559_v18, %v4559_v18  ;;  %v16569_v11 = vshrl.u32 %v14785_v17, 16  ;;  %v863_v39 = vsel %vm14876_vm2, %v845_v6, %v743_v51 }
 0x26c   : > { %v768_v54 = vadd.s32 %v767_v44, %v757_v1  ;;  %v3910_v47 = vrot.slane %v3908_v4, 3  ;;  %v3913_v34 = vrot.slane %v3911_v43, 4  ;;  %v4352_v61 = vor.u32 %v4350_v13, %v14789_v53  ;;  %v3987_v1 = vpop.f32.mrf.mxu0  ;;  %v4141_v6 = vpop.f32.mrf.mxu1 }
 0x26d   : > { %v4354_v45 = vshll.u32 %v4281_v36, 16  ;;  %v4640_v8 = vor.u32 %v16569_v11, %v14825_v19  ;;  %v4642_v40 = vshll.u32 %v14885_v10, 16  ;;  %v4469_v31 = vadd.f32 %v4424_v62, %v4181_v33 }
 0x26e   : > { %v769_v38 = vadd.s32 %v768_v54, %v759_v35  ;;  %v3914_v18 = vor.u32 %v3913_v34, %v3910_v47  ;;  %v4028_v51 = vadd.f32 %v3984_v60, %v14180_v26  ;;  %v4029_v53 = vadd.f32 %v3987_v1, %v14212_v7  ;;  %v5214_v35 = vld [vmem:[#allocation2 + $0x4] sm:$0xc]  ;;  %v5215_v54 = vld [vmem:[#allocation2 + $0x8] sm:$0xf]  ;;  %v14911_v60 = vld [vmem:[#allocation2 + $0xc] sm:$0xff] }
 0x26f   : > { %v4356_v23 = vrot.slane %v4354_v45, 1  ;;  %v4644_v44 = vrot.slane %v4642_v40, 1  ;;  %v14899_v13 = vor.u32 %v12534_v52, %v12533_v2  ;;  %vm16679_vm2 = vsmask.f32 4352  ;;  %v11925_v34 = vld [vmem:[%s16519_s3 + $0xb0] sm:$0xff] }
 0x270   : > { %v770_v4 = vshrl.u32 %v769_v38, 4  ;;  %v3915_v19 = vsel %vm16679_vm2, %v14792_v41, %v3914_v18  ;;  %v14903_v43 = vadd.f32 %v4712_v9, %v4469_v31  ;;  %v4182_v36 = vadd.f32 %v4138_v42, %v4028_v51  ;;  %v11958_v2 = vld [vmem:[%s16519_s3 + $0x170] sm:$0xff]  ;;  %5815 = vmatpush.bf16.msrb.mxu0 %v11925_v34 }
 0x271   : > { %vm14905_vm1 = vcmp.lt.s32.totalorder %v863_v39, 16  ;;  %v16680_v33 = vmov 0  ;;  %4021 = vmatmul.bf16.gmra.mxu0 %v3915_v19  ;;  %vm16683_vm9 = vsmask.f32 7424  ;;  %v4183_v62 = vadd.f32 %v4141_v6, %v4029_v53  ;;  %v11941_v39 = vld [vmem:[%s16519_s3 + $0x130] sm:$0xff]  ;;  %6561 = vmatpush.bf16.msrb.mxu3 %v11958_v2  ;;  %v14954_v2 = vld [vmem:[%s12964_s24 + $0x68] sm:$0xff] }
 0x272   : > { %v16681_v33 = vsel %vm14905_vm1, 4294967295, %v16680_v33  ;;  %v4357_v26 = vsel %vm16683_vm9, %v4352_v61, %v4356_v23  ;;  %vm16684_vm5 = vmmov %vm16683_vm9  ;;  %v771_v47 = vmul.u32 18, %v770_v4  ;;  %v2982_v41 = vmax.f32 %v14883_v12, 0.0  ;;  %v11933_v40 = vld [vmem:[%s16519_s3 + $0xf0] sm:$0xff]  ;;  %6272 = vmatpush.bf16.msrb.mxu2 %v11941_v39  ;;  %v5518_v23 = vld [vmem:[#allocation2 + $0x4] sm:$0x8]  ;;  %v4717_v53 = vpop.f32.mrf.mxu3 }
 0x273   : > { %16682 = vst [vmem:[#allocation29_spill] sm:$0xff] %v16681_v33  ;;  %v4645_v7 = vsel %vm16684_vm5, %v4640_v8, %v4644_v44  ;;  %4463 = vmatmul.bf16.gmra.mxu2 %v4357_v26  ;;  %v4470_v9 = vadd.f32 %v4426_v14, %v4182_v36  ;;  %v4964_v42 = vshrl.u32 %v14899_v13, 16  ;;  %v4967_v52 = vshll.u32 %v14899_v13, 16  ;;  %v4429_v44 = vpop.f32.mrf.mxu2  ;;  %6117 = vmatpush.bf16.msrb.mxu1 %v11933_v40  ;;  %v15145_v33 = vld [vmem:[#allocation2 + $0x34] sm:$0xff] }
 0x274   : > { %4751 = vmatmul.bf16.gmra.mxu3 %v4645_v7  ;;  %v16685_v12 = vshll.u32 %v13958_v58, 16  ;;  %v5268_v45 = vunpack.c.l.b16 %v5214_v35  ;;  %v5269_v8 = vunpack.c.l.b16 %v5215_v54  ;;  %v3035_v14 = vsel %vm14905_vm1, %v2981_v0, 0.0  ;;  %v4143_v4 = vpop.f32.mrf.mxu1 }
 0x275   : > { %v772_v38 = vsub.s32 %v14828_v49, %v771_v47  ;;  %v14933_v18 = vadd.f32 %v4714_v57, %v4470_v9  ;;  %v4966_v31 = vrot.slane %v4964_v42, 1  ;;  %v4969_v51 = vrot.slane %v4967_v52, 2  ;;  %v3989_v57 = vpop.f32.mrf.mxu0 }
 0x276   : > { %v4972_v61 = vrot.slane %v16685_v12, 2  ;;  %v5287_v1 = vpack.c.b16 %v5269_v8, %v5268_v45  ;;  %v5306_v6 = vshrl.u32 %v14911_v60, 16  ;;  %v5309_v0 = vshll.u32 %v14911_v60, 16 }
 0x277   : > { %vm792_vm3 = vcmp.ne.s32.totalorder %v772_v38, 0  ;;  %vm810_vm2 = vcmp.lt.s32.totalorder %v772_v38, 0  ;;  %v846_v49 = vadd.s32 18, %v772_v38  ;;  %v4970_v19 = vor.u32 %v4969_v51, %v4966_v31 }
 0x278   : > { %v14936_v58 = vor.u32 %v4972_v61, %v14739_v27  ;;  %vm828_vm9 = vmand %vm810_vm2, %vm792_vm3  ;;  %v4795_v27 = vrot.slane %v14899_v13, 1  ;;  %v5298_v36 = vshrl.u32 %v5287_v1, 16  ;;  %v5301_v35 = vshll.u32 %v5287_v1, 16 }
 0x279   : > { %v864_v54 = vsel %vm828_vm9, %v846_v49, %v772_v38  ;;  %v5308_v26 = vrot.slane %v5306_v6, 2  ;;  %v5311_v7 = vrot.slane %v5309_v0, 3  ;;  %v5537_v47 = vunpack.c.l.b16 %v5518_v23 }
 0x27a   : > { %vm14945_vm5 = vcmp.lt.s32.totalorder %v864_v54, 16  ;;  %v16686_v9 = vmov 0  ;;  %vm16689_vm1 = vsmask.f32 6400  ;;  %v5300_v39 = vrot.slane %v5298_v36, 2 }
 0x27b   : > { %v16687_v9 = vsel %vm14945_vm5, 4294967295, %v16686_v9  ;;  %v4974_v42 = vsel %vm16689_vm1, %v4970_v19, %v14936_v58  ;;  %v5303_v13 = vrot.slane %v5301_v35, 3  ;;  %v3036_v34 = vsel %vm14945_vm5, %v2982_v41, 0.0  ;;  %v14965_v49 = vpop.f32.mrf.mxu2  ;;  %v14967_v19 = vpop.f32.mrf.mxu3 }
 0x27c   : > { %16688 = vst [vmem:[#allocation30_spill] sm:$0xff] %v16687_v9  ;;  %v4796_v52 = vrot.slane %v14954_v2, 1  ;;  %5077 = vmatmul.bf16.vlgmr.msra.gmra.mxu1 %v4974_v42  ;;  %v5538_v12 = vpack.c.b16 %v5269_v8, %v5537_v47  ;;  %v4471_v61 = vadd.f32 %v4429_v44, %v4183_v62  ;;  %v12172_v45 = vpack.c.bf16 %v3036_v34, %v3035_v14  ;;  %v4146_v8 = vpop.f32.mrf.mxu1  ;;  %v11932_v47 = vld [vmem:[%s16519_s3 + $0xe8] sm:$0xff] }
 0x27d   : > { %v4030_v40 = vadd.f32 %v3989_v57, %v14249_v21  ;;  %v5540_v38 = vrot.slane %v14911_v60, 3  ;;  %v5304_v51 = vor.u32 %v5303_v13, %v5300_v39  ;;  %v14961_v1 = vor.u32 %v5311_v7, %v5308_v26  ;;  %v3992_v21 = vpop.f32.mrf.mxu0  ;;  %v11957_v26 = vld [vmem:[%s16519_s3 + $0x168] sm:$0xff]  ;;  %6118 = vmatpush.bf16.msrb.mxu1 %v11932_v47 }
 0x27e   : > { %v14959_v31 = vadd.f32 %v4717_v53, %v4471_v61  ;;  %12522 = vst [vmem:[#allocation2 + $0x50] sm:$0xff] %v12172_v45   ;;  %v5539_v23 = vrot.slane %v5538_v12, 3  ;;  %vm16690_vm1 = vcmask 1046528   ;;  %v4031_v14 = vadd.f32 %v3992_v21, %v14299_v37  ;;  %v11940_v37 = vld [vmem:[%s16519_s3 + $0x128] sm:$0xff]  ;;  %6562 = vmatpush.bf16.msrb.mxu3 %v11957_v26 }
 0x27f   : > { %v14963_v41 = vadd.f32 %v4143_v4, %v4030_v40  ;;  %v4797_v62 = vsel %vm16690_vm1, %v4795_v27, %v4796_v52  ;;  %v16691_v44 = vshrl.u32 %v14100_v22, 16  ;;  %v16692_v57 = vshll.u32 %v14100_v22, 16  ;;  %v14982_v27 = vld [vmem:[#allocation2 + $0x14] sm:$0xff]  ;;  %v11924_v22 = vld [vmem:[%s16519_s3 + $0xa8] sm:$0xff]  ;;  %6273 = vmatpush.bf16.msrb.mxu2 %v11940_v37 }
 0x280   : > { %vm16693_vm3 = vsmask.f32 5376  ;;  %vm16694_vm2 = vcmask 1044480   ;;  %v4185_v54 = vadd.f32 %v4146_v8, %v4031_v14  ;;  %v5709_v42 = vshrl.u32 %v5538_v12, 16  ;;  %5816 = vmatpush.bf16.msrb.mxu0 %v11924_v22 }
 0x281   : > { %v4975_v53 = vrot.slane %v16691_v44, 1  ;;  %v4976_v36 = vrot.slane %v16692_v57, 2  ;;  %4879 = vmatmul.bf16.vlgmr.msra.gmra.mxu0 %v4797_v62  ;;  %v5313_v4 = vsel %vm16693_vm3, %v5304_v51, %v14961_v1  ;;  %v5541_v35 = vsel %vm16694_vm2, %v5539_v23, %v5540_v38 }
 0x282   : > { %v5712_v39 = vshll.u32 %v5538_v12, 16  ;;  %v5716_v13 = vrot.slane %v5306_v6, 3  ;;  %v5315_v34 = vshrl.u32 %v14982_v27, 16  ;;  %v5318_v61 = vshll.u32 %v14982_v27, 16 }
 0x283   : > { %5451 = vmatmul.bf16.vlgmr.msra.gmra.mxu2 %v5313_v4  ;;  %v14993_v7 = vor.u32 %v4976_v36, %v4975_v53  ;;  %v4434_v45 = vpop.f32.mrf.mxu2  ;;  %v4722_v40 = vpop.f32.mrf.mxu3  ;;  %v5711_v51 = vrot.slane %v5709_v42, 3  ;;  %v5717_v8 = vrot.slane %v5309_v0, 4  ;;  %vm16695_vm9 = vsmask.f32 6400  ;;  %v12867_v4 = vld [vmem:[%s12964_s24 + $0x70] sm:$0xff] }
 0x284   : > { %5623 = vmatmul.bf16.vlgmr.msra.gmra.mxu3 %v5541_v35  ;;  %v5714_v23 = vrot.slane %v5712_v39, 4  ;;  %v4473_v62 = vadd.f32 %v4434_v45, %v4185_v54  ;;  %v15004_v12 = vpop.f32.mrf.mxu1  ;;  %v5317_v57 = vrot.slane %v5315_v34, 2  ;;  %v5320_v36 = vrot.slane %v5318_v61, 3  ;;  %v15014_v54 = vld [vmem:[#allocation2 + $0x1c] sm:$0xff] }
 0x285   : > { %v15002_v21 = vpop.f32.mrf.mxu0  ;;  %v4978_v6 = vsel %vm16695_vm9, %v14936_v58, %v14993_v7  ;;  %v5718_v53 = vor.u32 %v5717_v8, %v5716_v13  ;;  %v4798_v35 = vrot.slane %v12867_v4, 1  ;;  %vm16696_vm1 = vsmask.f32 4352 }
 0x286   : > { %v5715_v14 = vor.u32 %v5714_v23, %v5711_v51  ;;  %v15011_v44 = vadd.f32 %v4722_v40, %v4473_v62  ;;  %v5720_v22 = vrot.slane %v5315_v34, 3  ;;  %v15019_v0 = vor.u32 %v5320_v36, %v5317_v57 }
 0x287   : > { %v5542_v26 = vrot.slane %v14982_v27, 3  ;;  %v5721_v42 = vrot.slane %v5318_v61, 4  ;;  %vm16697_vm3 = vcmask 1046528   ;;  %v5324_v40 = vshrl.u32 %v15014_v54, 16  ;;  %v11923_v61 = vld [vmem:[%s16519_s3 + $0xa0] sm:$0xff]  ;;  %v11930_v27 = vld [vmem:[%s16519_s3 + $0xd8] sm:$0xff] }
 0x288   : > { %v15017_v37 = vsel %vm16696_vm1, %v5715_v14, %v5718_v53  ;;  %v4799_v39 = vsel %vm16697_vm3, %v4796_v52, %v4798_v35  ;;  %v16698_v34 = vshrl.u32 %v14222_v63, 16  ;;  %v16699_v62 = vshll.u32 %v14222_v63, 16  ;;  %v11939_v63 = vld [vmem:[%s16519_s3 + $0x120] sm:$0xff]  ;;  %5817 = vmatpush.bf16.msrb.mxu0 %v11923_v61 }
 0x289   : > { %v5327_v14 = vshll.u32 %v15014_v54, 16  ;;  %vm16700_vm2 = vsmask.f32 5376  ;;  %vm16701_vm9 = vcmask 1044480   ;;  %v5724_v36 = vrot.slane %v5324_v40, 3  ;;  %6274 = vmatpush.bf16.msrb.mxu2 %v11939_v63 }
 0x28a   : > { %v4979_v23 = vrot.slane %v16698_v34, 1  ;;  %v4980_v8 = vrot.slane %v16699_v62, 2  ;;  %v5322_v2 = vsel %vm16700_vm2, %v14961_v1, %v15019_v0  ;;  %v11956_v1 = vld [vmem:[%s16519_s3 + $0x160] sm:$0xff]  ;;  %vm16702_vm3 = vsmask.f32 6400  ;;  %vm16703_vm2 = vmmov %vm16696_vm1 }
 0x28b   : > { %v15022_v58 = vpop.f32.mrf.mxu2  ;;  %v15024_v47 = vpop.f32.mrf.mxu3  ;;  %v5725_v4 = vrot.slane %v5327_v14, 4  ;;  %6563 = vmatpush.bf16.msrb.mxu3 %v11956_v1 }
 0x28c   : > { %5082 = vmatmul.bf16.gmra.mxu1 %v4978_v6  ;;  %v4151_v45 = vpop.f32.mrf.mxu1  ;;  %v5722_v6 = vor.u32 %v5721_v42, %v5720_v22  ;;  %v4981_v60 = vor.u32 %v4980_v8, %v4979_v23  ;;  %v5326_v8 = vrot.slane %v5324_v40, 2 }
 0x28d   : > { %v3997_v13 = vpop.f32.mrf.mxu0 }
 0x28e   : > { %v4033_v51 = vadd.f32 %v3997_v13, %v14360_v3  ;;  %v5543_v3 = vsel %vm16701_vm9, %v5540_v38, %v5542_v26  ;;  %v15054_v57 = vsel %vm16696_vm1, %v5718_v53, %v5722_v6  ;;  %v11931_v38 = vld [vmem:[%s16519_s3 + $0xe0] sm:$0xff]  ;;  %v4982_v34 = vsel %vm16702_vm3, %v14993_v7, %v4981_v60 }
 0x28f   : > { %6119 = vmatpush.bf16.msrb.mxu1 %v11931_v38  ;;  %v15063_v53 = vld [vmem:[#allocation2 + $0x24] sm:$0xff]  ;;  %v5544_v38 = vrot.slane %v15014_v54, 3  ;;  %vm16704_vm9 = vcmask 1046528   ;;  %vm16707_vm1 = vsmask.f32 5376  ;;  %vm16708_vm3 = vcmask 1044480  }
 0x290   : > { %v4187_v52 = vadd.f32 %v4151_v45, %v4033_v51  ;;  %v5726_v51 = vor.u32 %v5725_v4, %v5724_v36  ;;  %v5336_v61 = vshll.u32 %v15063_v53, 16 }
 0x291   : > { %4884 = vmatmul.bf16.gmra.mxu0 %v4799_v39 }
 0x292   : > { %v15070_v62 = vsel %vm16703_vm2, %v5722_v6, %v5726_v51 }
 0x293   : > { %5456 = vmatmul.bf16.gmra.mxu2 %v5322_v2  ;;  %v4439_v22 = vpop.f32.mrf.mxu2  ;;  %v4727_v42 = vpop.f32.mrf.mxu3  ;;  %v5329_v2 = vrot.slane %v5327_v14, 3  ;;  %6120 = vmatpush.bf16.msrb.mxu1 %v11930_v27 }
 0x294   : > { %5628 = vmatmul.bf16.gmra.mxu3 %v5543_v3  ;;  %v4475_v39 = vadd.f32 %v4439_v22, %v4187_v52  ;;  %v15061_v45 = vpop.f32.mrf.mxu1  ;;  %v12868_v3 = vld [vmem:[%s12964_s24 + $0x78] sm:$0xff]  ;;  %v5333_v52 = vshrl.u32 %v15063_v53, 16 }
 0x295   : > { %v15059_v13 = vpop.f32.mrf.mxu0  ;;  %v4800_v63 = vrot.slane %v12868_v3, 1  ;;  %v5330_v1 = vor.u32 %v5329_v2, %v5326_v8  ;;  %v5729_v8 = vrot.slane %v5336_v61, 4 }
 0x296   : > { %v15067_v23 = vadd.f32 %v4727_v42, %v4475_v39  ;;  %v5728_v40 = vrot.slane %v5333_v52, 3  ;;  %v16705_v42 = vshrl.u32 %v14342_v50, 16 }
 0x297   : > { %v4801_v4 = vsel %vm16704_vm9, %v4798_v35, %v4800_v63  ;;  %v5331_v54 = vsel %vm16707_vm1, %v15019_v0, %v5330_v1  ;;  %v5545_v35 = vsel %vm16708_vm3, %v5542_v26, %v5544_v38  ;;  %vm16709_vm9 = vsmask.f32 6400 }
 0x298   : > { %v4983_v39 = vrot.slane %v16705_v42, 1  ;;  %v5730_v0 = vor.u32 %v5729_v8, %v5728_v40  ;;  %vm16710_vm1 = vcmask 1046528   ;;  %vm16713_vm3 = vsmask.f32 5376 }
 0x29a   : > { %v15104_v26 = vsel %vm16703_vm2, %v5726_v51, %v5730_v0  ;;  %vm16714_vm2 = vcmask 1044480  }
 0x29b   : > { %v15076_v36 = vpop.f32.mrf.mxu2  ;;  %v15078_v7 = vpop.f32.mrf.mxu3 }
 0x29c   : > { %5087 = vmatmul.bf16.gmra.mxu1 %v4982_v34  ;;  %v4156_v22 = vpop.f32.mrf.mxu1  ;;  %v16706_v34 = vshll.u32 %v14342_v50, 16  ;;  %v11922_v50 = vld [vmem:[%s16519_s3 + $0x98] sm:$0xff] }
 0x29d   : > { %v4002_v6 = vpop.f32.mrf.mxu0  ;;  %5818 = vmatpush.bf16.msrb.mxu0 %v11922_v50 }
 0x29e   : > { %v4035_v14 = vadd.f32 %v4002_v6, %v14447_v56  ;;  %v4984_v3 = vrot.slane %v16706_v34, 2  ;;  %v11938_v56 = vld [vmem:[%s16519_s3 + $0x118] sm:$0xff] }
 0x29f   : > { %6275 = vmatpush.bf16.msrb.mxu2 %v11938_v56  ;;  %v12869_v56 = vld [vmem:[%s12964_s24 + $0x80] sm:$0xff] }
 0x2a0   : > { %v4189_v2 = vadd.f32 %v4156_v22, %v4035_v14  ;;  %v4985_v6 = vor.u32 %v4984_v3, %v4983_v39  ;;  %v15106_v14 = vld [vmem:[#allocation2 + $0x2c] sm:$0xff]  ;;  %v4802_v50 = vrot.slane %v12869_v56, 1 }
 0x2a1   : > { %4889 = vmatmul.bf16.gmra.mxu0 %v4801_v4  ;;  %v11955_v4 = vld [vmem:[%s16519_s3 + $0x158] sm:$0xff]  ;;  %v5342_v51 = vshrl.u32 %v15106_v14, 16  ;;  %v5548_v30 = vrot.slane %v15106_v14, 3 }
 0x2a2   : > { %6564 = vmatpush.bf16.msrb.mxu3 %v11955_v4  ;;  %v4986_v40 = vsel %vm16709_vm9, %v4981_v60, %v4985_v6  ;;  %v5345_v4 = vshll.u32 %v15106_v14, 16  ;;  %v4803_v11 = vsel %vm16710_vm1, %v4800_v63, %v4802_v50  ;;  %v15133_v63 = vld [vmem:[%s16518_s2] ss:$0 sm:$0xff]  ;;  %vm16715_vm9 = vsmask.f32 4352 }
 0x2a3   : > { %5461 = vmatmul.bf16.gmra.mxu2 %v5331_v54  ;;  %v4444_v22 = vpop.f32.mrf.mxu2  ;;  %v4732_v39 = vpop.f32.mrf.mxu3  ;;  %v5335_v54 = vrot.slane %v5333_v52, 2  ;;  %v5732_v60 = vrot.slane %v5342_v51, 3  ;;  %vm16716_vm1 = vsmask.f32 6400 }
 0x2a4   : > { %5633 = vmatmul.bf16.gmra.mxu3 %v5545_v35  ;;  %v4477_v42 = vadd.f32 %v4444_v22, %v4189_v2  ;;  %v15108_v34 = vpop.f32.mrf.mxu1  ;;  %v5338_v35 = vrot.slane %v5336_v61, 3  ;;  %v5546_v22 = vrot.slane %v15063_v53, 3  ;;  %v16712_v61 = vshll.u32 %v14445_v46, 16 }
 0x2a5   : > { %v15111_v3 = vpop.f32.mrf.mxu0  ;;  %v5733_v9 = vrot.slane %v5345_v4, 4 }
 0x2a6   : > { %v15113_v8 = vadd.f32 %v4732_v39, %v4477_v42  ;;  %v5339_v2 = vor.u32 %v5338_v35, %v5335_v54  ;;  %v16711_v42 = vshrl.u32 %v14445_v46, 16  ;;  %v4988_v39 = vrot.slane %v16712_v61, 2 }
 0x2a7   : > { %v5547_v54 = vsel %vm16714_vm2, %v5544_v38, %v5546_v22  ;;  %v5734_v56 = vor.u32 %v5733_v9, %v5732_v60  ;;  %vm16720_vm2 = vsmask.f32 5376 }
 0x2a8   : > { %v4987_v52 = vrot.slane %v16711_v42, 1  ;;  %v3371_v42 = vadd.f32 %v15133_v63, %v14526_v15 }
 0x2a9   : > { %v15142_v9 = vsel %vm16715_vm9, %v5730_v0, %v5734_v56  ;;  %v11954_v0 = vld [vmem:[%s16519_s3 + $0x150] sm:$0xff]  ;;  %vm16721_vm9 = vcmask 1044480  }
 0x2aa   : > { %v3539_v38 = vadd.f32 %v14546_v28, %v3371_v42  ;;  %v5344_v28 = vrot.slane %v5342_v51, 2  ;;  %6565 = vmatpush.bf16.msrb.mxu3 %v11954_v0  ;;  %v16719_v0 = vshll.u32 %v14555_v29, 16 }
 0x2ab   : > { %v15119_v27 = vpop.f32.mrf.mxu2  ;;  %v15128_v35 = vpop.f32.mrf.mxu3 }
 0x2ac   : > { %5092 = vmatmul.bf16.gmra.mxu1 %v4986_v40  ;;  %v4161_v55 = vpop.f32.mrf.mxu1  ;;  %v5340_v40 = vsel %vm16713_vm3, %v5330_v1, %v5339_v2  ;;  %v4989_v1 = vor.u32 %v4988_v39, %v4987_v52  ;;  %v11921_v52 = vld [vmem:[%s16519_s3 + $0x90] sm:$0xff]  ;;  %vm16717_vm3 = vcmask 1046528  }
 0x2ad   : > { %v4007_v53 = vpop.f32.mrf.mxu0  ;;  %5819 = vmatpush.bf16.msrb.mxu0 %v11921_v52  ;;  %v16718_v52 = vshrl.u32 %v14555_v29, 16 }
 0x2ae   : > { %v4037_v46 = vadd.f32 %v4007_v53, %v14536_v24  ;;  %v4990_v15 = vsel %vm16716_vm1, %v4985_v6, %v4989_v1  ;;  %v3737_v24 = vadd.f32 %v14548_v32, %v3539_v38  ;;  %v12871_v53 = vld [vmem:[%s12964_s24 + $0x88] sm:$0xff]  ;;  %v5351_v6 = vshrl.u32 %v15145_v33, 16 }
 0x2af   : > { %v4804_v42 = vrot.slane %v12871_v53, 1  ;;  %v4991_v53 = vrot.slane %v16718_v52, 1  ;;  %vm16722_vm1 = vsmask.f32 4352 }
 0x2b0   : > { %v4191_v60 = vadd.f32 %v4161_v55, %v4037_v46  ;;  %v5347_v55 = vrot.slane %v5345_v4, 3 }
 0x2b1   : > { %4894 = vmatmul.bf16.gmra.mxu0 %v4803_v11  ;;  %v11937_v11 = vld [vmem:[%s16519_s3 + $0x110] sm:$0xff]  ;;  %v4805_v51 = vsel %vm16717_vm3, %v4802_v50, %v4804_v42  ;;  %v5549_v50 = vsel %vm16721_vm9, %v5546_v22, %v5548_v30  ;;  %vm16725_vm3 = vsmask.f32 6400  ;;  %vm16732_vm9 = vsmask.f32 5376 }
 0x2b2   : > { %6276 = vmatpush.bf16.msrb.mxu2 %v11937_v11  ;;  %v5354_v11 = vshll.u32 %v15145_v33, 16 }
 0x2b3   : > { %5466 = vmatmul.bf16.gmra.mxu2 %v5340_v40 }
 0x2b4   : > { %5638 = vmatmul.bf16.gmra.mxu3 %v5547_v54  ;;  %v4163_v61 = vpop.f32.mrf.mxu1 }
 0x2b5   : > { %v4449_v40 = vpop.f32.mrf.mxu2  ;;  %v4009_v39 = vpop.f32.mrf.mxu0 }
 0x2b6   : > { %v4479_v54 = vadd.f32 %v4449_v40, %v4191_v60  ;;  %v4038_v46 = vadd.f32 %v4009_v39, %v3737_v24  ;;  %v5348_v40 = vor.u32 %v5347_v55, %v5344_v28  ;;  %v5736_v24 = vrot.slane %v5351_v6, 3 }
 0x2b7   : > { %v4737_v32 = vpop.f32.mrf.mxu3 }
 0x2b8   : > { %v15158_v38 = vadd.f32 %v4737_v32, %v4479_v54  ;;  %v4192_v60 = vadd.f32 %v4163_v61, %v4038_v46  ;;  %v4992_v54 = vrot.slane %v16719_v0, 2  ;;  %v5737_v32 = vrot.slane %v5354_v11, 4 }
 0x2b9   : > { %v5349_v14 = vsel %vm16720_vm2, %v5339_v2, %v5348_v40  ;;  %v3373_v2 = vadd.f32 %v15133_v63, %v14608_v48  ;;  %v11936_v48 = vld [vmem:[%s16519_s3 + $0x108] sm:$0xff]  ;;  %vm16728_vm2 = vcmask 1046528  }
 0x2ba   : > { %v5738_v28 = vor.u32 %v5737_v32, %v5736_v24  ;;  %v4993_v46 = vor.u32 %v4992_v54, %v4991_v53  ;;  %v16726_v24 = vld [vmem:[#allocation20_spill] sm:$0xff]  ;;  %6277 = vmatpush.bf16.msrb.mxu2 %v11936_v48 }
 0x2bb   : > { %v12872_v53 = vld [vmem:[%s12964_s24 + $0x90] sm:$0xff] }
 0x2bc   : > { %5097 = vmatmul.bf16.gmra.mxu1 %v4990_v15  ;;  %v4166_v4 = vpop.f32.mrf.mxu1  ;;  %v11929_v15 = vld [vmem:[%s16519_s3 + $0xd0] sm:$0xff]  ;;  %v15172_v16 = vsel %vm16722_vm1, %v5734_v56, %v5738_v28  ;;  %v4806_v54 = vrot.slane %v12872_v53, 1  ;;  %v15182_v56 = vld [vmem:[#allocation2 + $0x3c] sm:$0xff]  ;;  %vm16733_vm1 = vcmask 1044480  }
 0x2bd   : > { %v4451_v39 = vpop.f32.mrf.mxu2  ;;  %6121 = vmatpush.bf16.msrb.mxu1 %v11929_v15  ;;  %16723 = vst [vmem:[#allocation31_spill] sm:$0xff] %v15172_v16  ;;  %v5356_v15 = vrot.slane %v5354_v11, 3  ;;  %v16742_v16 = vshll.u32 %v14785_v17, 16 }
 0x2be   : > { %v4480_v61 = vadd.f32 %v4451_v39, %v4192_v60  ;;  %v4994_v60 = vsel %vm16725_vm3, %v4989_v1, %v4993_v46  ;;  %v3541_v39 = vadd.f32 %v16726_v24, %v3373_v2  ;;  %v4807_v11 = vsel %vm16728_vm2, %v4804_v42, %v4806_v54 }
 0x2bf   : > { %v4739_v55 = vpop.f32.mrf.mxu3  ;;  %vm16735_vm2 = vsmask.f32 4352 }
 0x2c0   : > { %v15174_v52 = vadd.f32 %v4739_v55, %v4480_v61 }
 0x2c1   : > { %4899 = vmatmul.bf16.gmra.mxu0 %v4805_v51  ;;  %v5353_v51 = vrot.slane %v5351_v6, 2 }
 0x2c2   : > { %16724 = vst [vmem:[#allocation32_spill] sm:$0xff] %v15174_v52 }
 0x2c3   : > { %5471 = vmatmul.bf16.gmra.mxu2 %v5349_v14  ;;  %v4012_v0 = vpop.f32.mrf.mxu0  ;;  %v15184_v61 = vor.u32 %v5356_v15, %v5353_v51  ;;  %v16575_v14 = vrot.slane %v15145_v33, 3  ;;  %v5360_v15 = vshrl.u32 %v15182_v56, 16 }
 0x2c4   : > { %5643 = vmatmul.bf16.gmra.mxu3 %v5549_v50  ;;  %v4168_v29 = vpop.f32.mrf.mxu1  ;;  %v4039_v22 = vadd.f32 %v4012_v0, %v14622_v20  ;;  %v16727_v20 = vld [vmem:[#allocation21_spill] sm:$0xff] }
 0x2c5   : > { %v3739_v6 = vadd.f32 %v16727_v20, %v3541_v39  ;;  %v5363_v39 = vshll.u32 %v15182_v56, 16  ;;  %v5358_v42 = vsel %vm16732_vm9, %v5348_v40, %v15184_v61  ;;  %v11928_v20 = vld [vmem:[%s16519_s3 + $0xc8] sm:$0xff]  ;;  %vm16740_vm9 = vcmask 1046528  }
 0x2c6   : > { %v4193_v32 = vadd.f32 %v4166_v4, %v4039_v22  ;;  %v16730_v22 = vshll.u32 %v14664_v25, 16  ;;  %6122 = vmatpush.bf16.msrb.mxu1 %v11928_v20 }
 0x2c8   : > { %v4996_v51 = vrot.slane %v16730_v22, 2 }
 0x2ca   : > { %v4454_v1 = vpop.f32.mrf.mxu2 }
 0x2cb   : > { %v4481_v50 = vadd.f32 %v4454_v1, %v4193_v32  ;;  %v4742_v4 = vpop.f32.mrf.mxu3  ;;  %v4014_v55 = vpop.f32.mrf.mxu0  ;;  %v5551_v32 = vsel %vm16733_vm1, %v5548_v30, %v16575_v14  ;;  %v11953_v1 = vld [vmem:[%s16519_s3 + $0x148] sm:$0xff]  ;;  %v5740_v30 = vrot.slane %v5360_v15, 3  ;;  %vm16743_vm1 = vsmask.f32 5376 }
 0x2cc   : > { %5102 = vmatmul.bf16.gmra.mxu1 %v4994_v60  ;;  %v4171_v0 = vpop.f32.mrf.mxu1  ;;  %v16729_v60 = vshrl.u32 %v14664_v25, 16  ;;  %v4040_v53 = vadd.f32 %v4014_v55, %v3739_v6  ;;  %v11920_v25 = vld [vmem:[%s16519_s3 + $0x88] sm:$0xff]  ;;  %6566 = vmatpush.bf16.msrb.mxu3 %v11953_v1  ;;  %v5741_v6 = vrot.slane %v5363_v39, 4 }
 0x2cd   : > { %v15197_v24 = vadd.f32 %v4742_v4, %v4481_v50  ;;  %5820 = vmatpush.bf16.msrb.mxu0 %v11920_v25  ;;  %v15214_v50 = vld [vmem:[#allocation2 + $0x44] sm:$0xff]  ;;  %v15224_v25 = vld [vmem:[%s12964_s24 + $0x98] sm:$0xff] }
 0x2ce   : > { %v4995_v2 = vrot.slane %v16729_v60, 1  ;;  %v4194_v48 = vadd.f32 %v4168_v29, %v4040_v53  ;;  %v5742_v55 = vor.u32 %v5741_v6, %v5740_v30  ;;  %v4808_v1 = vrot.slane %v15224_v25, 1  ;;  %v16737_v30 = vld [vmem:[#allocation22_spill] sm:$0xff]  ;;  %v16738_v6 = vld [vmem:[#allocation23_spill] sm:$0xff] }
 0x2cf   : > { %16731 = vst [vmem:[#allocation20_spill] sm:$0xff] %v15197_v24  ;;  %v5000_v24 = vrot.slane %v16742_v16, 2 }
 0x2d0   : > { %v4997_v40 = vor.u32 %v4996_v51, %v4995_v2  ;;  %v15220_v53 = vsel %vm16735_vm2, %v5738_v28, %v5742_v55  ;;  %v5362_v2 = vrot.slane %v5360_v15, 2  ;;  %v5365_v51 = vrot.slane %v5363_v39, 3 }
 0x2d1   : > { %4904 = vmatmul.bf16.gmra.mxu0 %v4807_v11  ;;  %16736 = vst [vmem:[#allocation33_spill] sm:$0xff] %v15220_v53  ;;  %v5552_v15 = vrot.slane %v15182_v56, 3  ;;  %v4809_v53 = vsel %vm16740_vm9, %v4806_v54, %v4808_v1  ;;  %vm16747_vm9 = vsmask.f32 6400 }
 0x2d2   : > { %v4456_v11 = vpop.f32.mrf.mxu2  ;;  %v4998_v22 = vsel %vm16725_vm3, %v4993_v46, %v4997_v40  ;;  %v3375_v46 = vadd.f32 %v15133_v63, %v16737_v30  ;;  %v5366_v28 = vor.u32 %v5365_v51, %v5362_v2  ;;  %v16744_v2 = vrot.slane %v15145_v33, 3  ;;  %v16746_v51 = vld [vmem:[#allocation26_spill] sm:$0xff] }
 0x2d3   : > { %5476 = vmatmul.bf16.gmra.mxu2 %v5358_v42  ;;  %v4482_v4 = vadd.f32 %v4456_v11, %v4194_v48  ;;  %v4744_v60 = vpop.f32.mrf.mxu3  ;;  %v5372_v48 = vshll.u32 %v15214_v50, 16  ;;  %vm16745_vm3 = vcmask 1044480   ;;  %v11935_v33 = vld [vmem:[%s16519_s3 + $0x100] sm:$0xff] }
 0x2d4   : > { %5648 = vmatmul.bf16.gmra.mxu3 %v5551_v32  ;;  %v4173_v42 = vpop.f32.mrf.mxu1  ;;  %v5369_v32 = vshrl.u32 %v15214_v50, 16  ;;  %v5367_v56 = vsel %vm16743_vm1, %v15184_v61, %v5366_v28  ;;  %v11919_v61 = vld [vmem:[%s16519_s3 + $0x80] sm:$0xff]  ;;  %6278 = vmatpush.bf16.msrb.mxu2 %v11935_v33  ;;  %vm16748_vm1 = vcmask 1046528  }
 0x2d5   : > { %v15217_v29 = vadd.f32 %v4744_v60, %v4482_v4  ;;  %v16739_v4 = vld [vmem:[#allocation25_spill] sm:$0xff]  ;;  %5821 = vmatpush.bf16.msrb.mxu0 %v11919_v61 }
 0x2d6   : > { %v5744_v39 = vrot.slane %v5369_v32, 3  ;;  %v3543_v60 = vadd.f32 %v16739_v4, %v3375_v46 }
 0x2d7   : > { %16734 = vst [vmem:[#allocation21_spill] sm:$0xff] %v15217_v29  ;;  %v5745_v29 = vrot.slane %v5372_v48, 4 }
 0x2d9   : > { %v15238_v63 = vor.u32 %v5745_v29, %v5744_v39 }
 0x2db   : > { %v4017_v20 = vpop.f32.mrf.mxu0 }
 0x2dc   : > { %5107 = vmatmul.bf16.gmra.mxu1 %v4998_v22  ;;  %v4041_v11 = vadd.f32 %v4017_v20, %v16738_v6  ;;  %v16741_v22 = vshrl.u32 %v14785_v17, 16  ;;  %v3741_v20 = vadd.f32 %v16746_v51, %v3543_v60  ;;  %v15248_v17 = vsel %vm16735_vm2, %v5742_v55, %v15238_v63  ;;  %v4176_v29 = vpop.f32.mrf.mxu1 }
 0x2dd   : > { %vm16750_vm2 = vcmask 1044480  }
 0x2de   : > { %v4195_v14 = vadd.f32 %v4171_v0, %v4041_v11  ;;  %v4999_v25 = vrot.slane %v16741_v22, 1  ;;  %v5553_v0 = vsel %vm16745_vm3, %v16744_v2, %v5552_v15  ;;  %v11927_v11 = vld [vmem:[%s16519_s3 + $0xc0] sm:$0xff]  ;;  %vm16749_vm3 = vsmask.f32 5376 }
 0x2df   : > { %v4459_v52 = vpop.f32.mrf.mxu2  ;;  %6123 = vmatpush.bf16.msrb.mxu1 %v11927_v11 }
 0x2e0   : > { %v4483_v54 = vadd.f32 %v4459_v52, %v4195_v14  ;;  %v5001_v30 = vor.u32 %v5000_v24, %v4999_v25  ;;  %v4943_v52 = vld [vmem:[%s12964_s24 + $0xa8] sm:$0x3]  ;;  %v11952_v24 = vld [vmem:[%s16519_s3 + $0x140] sm:$0xff]  ;;  %v5371_v25 = vrot.slane %v5369_v32, 2 }
 0x2e1   : > { %4909 = vmatmul.bf16.gmra.mxu0 %v4809_v53  ;;  %v4961_v55 = vunpack.c.l.b16 %v4943_v52  ;;  %6567 = vmatpush.bf16.msrb.mxu3 %v11952_v24 }
 0x2e2   : > { %v5002_v39 = vsel %vm16747_vm9, %v4997_v40, %v5001_v30  ;;  %v5554_v40 = vrot.slane %v15214_v50, 3 }
 0x2e3   : > { %5481 = vmatmul.bf16.gmra.mxu2 %v5367_v56  ;;  %v4019_v16 = vpop.f32.mrf.mxu0  ;;  %v4747_v53 = vpop.f32.mrf.mxu3  ;;  %v4962_v60 = vpack.c.b16 %v4961_v55, %v4961_v55  ;;  %v12874_v56 = vld [vmem:[%s12964_s24 + $0xa0] sm:$0xff] }
 0x2e4   : > { %5653 = vmatmul.bf16.gmra.mxu3 %v5553_v0  ;;  %v4042_v46 = vadd.f32 %v4019_v16, %v3741_v20  ;;  %v15250_v6 = vadd.f32 %v4747_v53, %v4483_v54  ;;  %v4810_v2 = vrot.slane %v12874_v56, 1  ;;  %v5232_v0 = vld [vmem:[#allocation2 + $0x4c] sm:$0x7]  ;;  %v5555_v11 = vsel %vm16750_vm2, %v5552_v15, %v5554_v40 }
 0x2e5   : > { %v5004_v54 = vshrl.u32 %v4962_v60, 16  ;;  %v5007_v51 = vshll.u32 %v4962_v60, 16  ;;  %v5286_v33 = vunpack.c.l.b16 %v5232_v0 }
 0x2e6   : > { %v4196_v14 = vadd.f32 %v4173_v42, %v4042_v46  ;;  %v5374_v42 = vrot.slane %v5372_v48, 3  ;;  %v4178_v46 = vpop.f32.mrf.mxu1  ;;  %v4811_v61 = vsel %vm16748_vm1, %v4808_v1, %v4810_v2  ;;  %v11975_v1 = vld [vmem:[%s16519_s3 + $0x1b8] sm:$0xff] }
 0x2e7   : > { %v4461_v4 = vpop.f32.mrf.mxu2  ;;  %v5006_v48 = vrot.slane %v5004_v54, 1  ;;  %v12696_v54 = vld [vmem:[#allocation2 + $0xc] sm:$0x8]  ;;  %6849 = vmatpush.bf16.msra.mxu0 %v11975_v1 }
 0x2e8   : > { %v4484_v22 = vadd.f32 %v4461_v4, %v4196_v14  ;;  %v5375_v53 = vor.u32 %v5374_v42, %v5371_v25  ;;  %v5009_v14 = vrot.slane %v5007_v51, 2 }
 0x2ea   : > { %v5376_v24 = vsel %vm16749_vm3, %v5366_v28, %v5375_v53  ;;  %v5010_v4 = vor.u32 %v5009_v14, %v5006_v48  ;;  %v12007_v28 = vld [vmem:[%s16519_s3 + $0x38] sm:$0xff] }
 0x2eb   : > { %v4749_v20 = vpop.f32.mrf.mxu3  ;;  %7627 = vmatpush.bf16.msra.mxu3 %v12007_v28 }
 0x2ec   : > { %5112 = vmatmul.bf16.gmra.mxu1 %v5002_v39  ;;  %v15267_v16 = vadd.f32 %v4749_v20, %v4484_v22  ;;  %v5296_v39 = vpack.c.b16 %v5286_v33, %v5286_v33  ;;  %v5011_v0 = vsel %vm16747_vm9, %v5001_v30, %v5010_v4  ;;  %v12817_v20 = vld [vmem:[#allocation2 + $0xc] sm:$0xf0]   ;;  %v12819_v33 = vld [vmem:[#allocation2 + $0x14] sm:$0xff]   ;;  %vm16751_vm9 = vsmask.f32 4352 }
 0x2ed   : > { %v12697_v14 = vor.u32 %v12817_v20, %v12696_v54  ;;  %v5979_v30 = vshrl.u32 %v12819_v33, 16  ;;  %v11943_v20 = vld [vmem:[#allocation2 + $0x10] sm:$0xff] }
 0x2ee   : > { %v4022_v52 = vpop.f32.mrf.mxu0  ;;  %v5378_v22 = vshrl.u32 %v5296_v39, 16  ;;  %v5381_v25 = vshll.u32 %v5296_v39, 16  ;;  %v5556_v4 = vrot.slane %v5296_v39, 3 }
 0x2ef   : > { %v4043_v32 = vadd.f32 %v4022_v52, %v14834_v59  ;;  %v11991_v59 = vld [vmem:[%s16519_s3 + $0x238] sm:$0xff] }
 0x2f0   : > { %7217 = vmatpush.bf16.msra.mxu2 %v11991_v59  ;;  %v11983_v52 = vld [vmem:[%s16519_s3 + $0x1f8] sm:$0xff]  ;;  %v5383_v48 = vrot.slane %v5381_v25, 3  ;;  %v5981_v25 = vrot.slane %v5979_v30, 3 }
 0x2f1   : > { %v4197_v55 = vadd.f32 %v4176_v29, %v4043_v32  ;;  %4914 = vmatmul.bf16.gmra.mxu0 %v4811_v61  ;;  %v5380_v32 = vrot.slane %v5378_v22, 2  ;;  %7018 = vmatpush.bf16.msra.mxu1 %v11983_v52 }
 0x2f3   : > { %5486 = vmatmul.bf16.gmra.mxu2 %v5376_v24 }
 0x2f4   : > { %5658 = vmatmul.bf16.gmra.mxu3 %v5555_v11  ;;  %v5384_v11 = vor.u32 %v5383_v48, %v5380_v32 }
 0x2f6   : > { %v4464_v50 = vpop.f32.mrf.mxu2  ;;  %v4024_v29 = vpop.f32.mrf.mxu0 }
 0x2f7   : > { %v4752_v60 = vpop.f32.mrf.mxu3  ;;  %v4485_v15 = vadd.f32 %v4464_v50, %v4197_v55  ;;  %v4044_v42 = vadd.f32 %v4024_v29, %v14868_v5  ;;  %v4812_v5 = vrot.slane %v14885_v10, 1  ;;  %v5982_v50 = vshll.u32 %v12819_v33, 16  ;;  %v15302_v33 = vld [vmem:[#allocation2 + $0x18] sm:$0xff] }
 0x2f8   : > { %v5385_v29 = vsel %vm16749_vm3, %v5375_v53, %v5384_v11  ;;  %v11990_v53 = vld [vmem:[%s16519_s3 + $0x230] sm:$0xff] }
 0x2f9   : > { %v5078_v56 = vpop.f32.mrf.mxu1  ;;  %v15285_v51 = vadd.f32 %v4752_v60, %v4485_v15  ;;  %v4198_v61 = vadd.f32 %v4178_v46, %v4044_v42  ;;  %v4813_v1 = vsel %vm16748_vm1, %v4810_v2, %v4812_v5  ;;  %v5971_v15 = vshrl.u32 %v12697_v14, 16  ;;  %v15300_v2 = vld [vmem:[%s16520_s4] ss:$0 sm:$0xff]  ;;  %7218 = vmatpush.bf16.msra.mxu2 %v11990_v53  ;;  %v11974_v11 = vld [vmem:[%s16519_s3 + $0x1b0] sm:$0xff] }
 0x2fa   : > { %v5974_v46 = vshll.u32 %v12697_v14, 16  ;;  %v5557_v42 = vsel %vm16750_vm2, %v5554_v40, %v5556_v4  ;;  %v12006_v4 = vld [vmem:[%s16519_s3 + $0x30] sm:$0xff]  ;;  %6850 = vmatpush.bf16.msra.mxu0 %v11974_v11 }
 0x2fb   : > { %v5973_v39 = vrot.slane %v5971_v15, 3  ;;  %7628 = vmatpush.bf16.msra.mxu3 %v12006_v4 }
 0x2fc   : > { %5117 = vmatmul.bf16.gmra.mxu1 %v5011_v0  ;;  %v5984_v0 = vrot.slane %v5982_v50, 4  ;;  %v5976_v54 = vrot.slane %v5974_v46, 4  ;;  %v6428_v46 = vshrl.u32 %v11943_v20, 16 }
 0x2fe   : > { %v4466_v55 = vpop.f32.mrf.mxu2  ;;  %v4880_v59 = vpop.f32.mrf.mxu0  ;;  %v15304_v32 = vor.u32 %v5984_v0, %v5981_v25  ;;  %v5977_v30 = vor.u32 %v5976_v54, %v5973_v39 }
 0x2ff   : > { %v4754_v24 = vpop.f32.mrf.mxu3  ;;  %v4486_v60 = vadd.f32 %v4466_v55, %v4198_v61  ;;  %v4925_v10 = vadd.f32 %v4880_v59, %v14903_v43  ;;  %v6430_v55 = vshll.u32 %v11943_v20, 16  ;;  %v12821_v59 = vld [vmem:[#allocation2 + $0x1c] sm:$0xff]   ;;  %v4472_v20 = vadd.f32 %v14965_v49, %v14963_v41 }
 0x300   : > { %v15337_v41 = vld [vmem:[#allocation2 + $0x20] sm:$0xff] }
 0x301   : > { %v5080_v28 = vpop.f32.mrf.mxu1  ;;  %v15292_v22 = vadd.f32 %v4754_v24, %v4486_v60  ;;  %4919 = vmatmul.bf16.gmra.mxu0 %v4813_v1  ;;  %v5123_v52 = vadd.f32 %v5078_v56, %v4925_v10  ;;  %v6435_v56 = vshll.u32 %v15302_v33, 16  ;;  %v6432_v15 = vrot.slane %v6430_v55, 1 }
 0x302   : > { %v4760_v49 = vadd.f32 %v14967_v19, %v4472_v20 }
 0x303   : > { %5491 = vmatmul.bf16.gmra.mxu2 %v5385_v29  ;;  %v5141_v50 = vmax.f32 %v5123_v52, 0.0  ;;  %v6437_v25 = vrot.slane %v6435_v56, 1  ;;  %v5991_v52 = vshll.u32 %v12821_v59, 16  ;;  %v12545_v56 = vld [vmem:[#allocation2 + $0x10] sm:$0xff]  }
 0x304   : > { %5663 = vmatmul.bf16.gmra.mxu3 %v5557_v42  ;;  %v11989_v42 = vld [vmem:[%s16519_s3 + $0x228] sm:$0xff] }
 0x305   : > { %v5159_v29 = vsel %vm14053_vm10, %v5141_v50, 0.0  ;;  %vm16754_vm10 = vsmask.f32 7424  ;;  %v5993_v50 = vrot.slane %v5991_v52, 4  ;;  %7219 = vmatpush.bf16.msra.mxu2 %v11989_v42  ;;  %v15376_v42 = vld [vmem:[#allocation2 + $0x28] sm:$0xff] }
 0x306   : > { %v5452_v43 = vpop.f32.mrf.mxu2  ;;  %v4882_v48 = vpop.f32.mrf.mxu0 }
 0x307   : > { %v5624_v61 = vpop.f32.mrf.mxu3  ;;  %v5500_v40 = vadd.f32 %v15300_v2, %v5452_v43  ;;  %v4926_v5 = vadd.f32 %v4882_v48, %v14933_v18  ;;  %v5986_v18 = vsel %vm16751_vm9, %v5977_v30, %v15304_v32  ;;  %v11982_v30 = vld [vmem:[%s16519_s3 + $0x1f0] sm:$0xff] }
 0x308   : > { %7019 = vmatpush.bf16.msra.mxu1 %v11982_v30 }
 0x309   : > { %v5083_v14 = vpop.f32.mrf.mxu1  ;;  %v15311_v24 = vadd.f32 %v5624_v61, %v5500_v40  ;;  %v5124_v60 = vadd.f32 %v5080_v28, %v4926_v5  ;;  %v5988_v28 = vshrl.u32 %v12821_v59, 16  ;;  %v6433_v40 = vor.u32 %v6432_v15, %v6428_v46 }
 0x30b   : > { %v5142_v1 = vmax.f32 %v5124_v60, 0.0  ;;  %v6438_v11 = vsel %vm16754_vm10, %v6433_v40, %v6437_v25  ;;  %v5990_v4 = vrot.slane %v5988_v28, 3 }
 0x30c   : > { %6124 = vmatmul.bf16.vlgmr.msrb.gmra.mxu1 %v5986_v18 }
 0x30d   : > { %v5160_v0 = vsel %vm14071_vm13, %v5142_v1, 0.0  ;;  %v5994_v1 = vor.u32 %v5993_v50, %v5990_v4  ;;  %vm16755_vm13 = vmmov %vm16751_vm9 }
 0x30e   : > { %v5454_v39 = vpop.f32.mrf.mxu2  ;;  %v12217_v43 = vpack.c.bf16 %v5160_v0, %v5159_v29  ;;  %v4885_v53 = vpop.f32.mrf.mxu0  ;;  %v6443_v29 = vshll.u32 %v15337_v41, 16 }
 0x30f   : > { %v5626_v54 = vpop.f32.mrf.mxu3  ;;  %v5501_v61 = vadd.f32 %v15300_v2, %v5454_v39  ;;  %v4927_v55 = vadd.f32 %v4885_v53, %v14959_v31  ;;  %v5995_v19 = vsel %vm16755_vm13, %v15304_v32, %v5994_v1  ;;  %v6451_v53 = vshll.u32 %v15376_v42, 16 }
 0x310   : > { %12536 = vst [vmem:[#allocation2 + $0x58] sm:$0xff] %v12217_v43   ;;  %v6439_v43 = vshrl.u32 %v15302_v33, 16 }
 0x311   : > { %v5085_v48 = vpop.f32.mrf.mxu1  ;;  %v15329_v5 = vadd.f32 %v5626_v54, %v5501_v61  ;;  %5822 = vmatmul.bf16.vlgmr.msrb.gmra.mxu0 %v15017_v37  ;;  %v5125_v60 = vadd.f32 %v5083_v14, %v4927_v55  ;;  %v12823_v14 = vld [vmem:[#allocation2 + $0x24] sm:$0xff]   ;;  %v16756_v54 = vld [vmem:[#allocation11_spill] sm:$0xff]  ;;  %v6445_v61 = vrot.slane %v6443_v29, 1 }
 0x312   : > { %v4032_v28 = vadd.f32 %v15002_v21, %v16756_v54  ;;  %v6000_v32 = vshll.u32 %v12823_v14, 16 }
 0x313   : > { %6279 = vmatmul.bf16.vlgmr.msrb.gmra.mxu2 %v12545_v56  ;;  %v5143_v0 = vmax.f32 %v5125_v60, 0.0  ;;  %v5997_v56 = vshrl.u32 %v12823_v14, 16 }
 0x314   : > { %6568 = vmatmul.bf16.vlgmr.msrb.gmra.mxu3 %v6438_v11  ;;  %v4186_v11 = vadd.f32 %v15004_v12, %v4032_v28  ;;  %v11981_v12 = vld [vmem:[%s16519_s3 + $0x1e8] sm:$0xff]  ;;  %v6002_v29 = vrot.slane %v6000_v32, 4  ;;  %v15390_v32 = vrot.slane %v6451_v53, 1 }
 0x315   : > { %v5161_v40 = vsel %vm14133_vm7, %v5143_v0, 0.0  ;;  %vm16759_vm7 = vmmov %vm16754_vm10  ;;  %7020 = vmatpush.bf16.msra.mxu1 %v11981_v12 }
 0x316   : > { %v5457_v18 = vpop.f32.mrf.mxu2  ;;  %v4887_v15 = vpop.f32.mrf.mxu0  ;;  %v4474_v33 = vadd.f32 %v15022_v58, %v4186_v11  ;;  %v15372_v58 = vld [vmem:[#allocation2 + $0x18] sm:$0xff]  }
 0x317   : > { %v5629_v59 = vpop.f32.mrf.mxu3  ;;  %v5502_v31 = vadd.f32 %v15300_v2, %v5457_v18  ;;  %v4928_v37 = vadd.f32 %v4887_v15, %v4760_v49  ;;  %v6441_v49 = vor.u32 %v6439_v43, %v6437_v25 }
 0x318   : > { %v4762_v0 = vadd.f32 %v15024_v47, %v4474_v33  ;;  %v12825_v47 = vld [vmem:[#allocation2 + $0x2c] sm:$0xff]  }
 0x319   : > { %v5088_v46 = vpop.f32.mrf.mxu1  ;;  %v15341_v10 = vadd.f32 %v5629_v59, %v5502_v31  ;;  %v5126_v39 = vadd.f32 %v5085_v48, %v4928_v37  ;;  %v11973_v59 = vld [vmem:[%s16519_s3 + $0x1a8] sm:$0xff]  ;;  %v6446_v15 = vsel %vm16759_vm7, %v6441_v49, %v6445_v61  ;;  %v5999_v37 = vrot.slane %v5997_v56, 3 }
 0x31a   : > { %v12005_v31 = vld [vmem:[%s16519_s3 + $0x28] sm:$0xff]  ;;  %6851 = vmatpush.bf16.msra.mxu0 %v11973_v59  ;;  %v6447_v56 = vshrl.u32 %v15337_v41, 16  ;;  %v6006_v33 = vshrl.u32 %v12825_v47, 16 }
 0x31b   : > { %v5144_v52 = vmax.f32 %v5126_v39, 0.0  ;;  %7629 = vmatpush.bf16.msra.mxu3 %v12005_v31 }
 0x31c   : > { %6129 = vmatmul.bf16.gmra.mxu1 %v5995_v19 }
 0x31d   : > { %v5162_v30 = vsel %vm14184_vm12, %v5144_v52, 0.0  ;;  %vm16760_vm12 = vmmov %vm16751_vm9 }
 0x31e   : > { %v5459_v48 = vpop.f32.mrf.mxu2  ;;  %v12222_v4 = vpack.c.bf16 %v5162_v30, %v5161_v40  ;;  %v4890_v50 = vpop.f32.mrf.mxu0 }
 0x31f   : > { %v5631_v55 = vpop.f32.mrf.mxu3  ;;  %v5503_v21 = vadd.f32 %v15300_v2, %v5459_v48  ;;  %v4929_v25 = vadd.f32 %v4890_v50, %v15011_v44 }
 0x320   : > { %12537 = vst [vmem:[#allocation2 + $0x60] sm:$0xff] %v12222_v4  }
 0x321   : > { %v5090_v60 = vpop.f32.mrf.mxu1  ;;  %v15359_v18 = vadd.f32 %v5631_v55, %v5503_v21  ;;  %5827 = vmatmul.bf16.gmra.mxu0 %v15054_v57  ;;  %v5127_v39 = vadd.f32 %v5088_v46, %v4929_v25  ;;  %v15379_v57 = vor.u32 %v6002_v29, %v5999_v37  ;;  %v16761_v46 = vld [vmem:[#allocation13_spill] sm:$0xff]  ;;  %v6449_v25 = vor.u32 %v6447_v56, %v6445_v61 }
 0x322   : > { %v4034_v48 = vadd.f32 %v15059_v13, %v16761_v46  ;;  %v11988_v29 = vld [vmem:[%s16519_s3 + $0x220] sm:$0xff] }
 0x323   : > { %6284 = vmatmul.bf16.gmra.mxu2 %v15372_v58  ;;  %v5145_v40 = vmax.f32 %v5127_v39, 0.0  ;;  %v6004_v30 = vsel %vm16760_vm12, %v5994_v1, %v15379_v57  ;;  %v6009_v1 = vshll.u32 %v12825_v47, 16 }
 0x324   : > { %6573 = vmatmul.bf16.gmra.mxu3 %v6446_v15  ;;  %v4188_v59 = vadd.f32 %v15061_v45, %v4034_v48  ;;  %v12004_v45 = vld [vmem:[%s16519_s3 + $0x20] sm:$0xff]  ;;  %7220 = vmatpush.bf16.msra.mxu2 %v11988_v29  ;;  %v16765_v48 = vld [vmem:[#allocation15_spill] sm:$0xff] }
 0x325   : > { %v5163_v4 = vsel %vm14236_vm15, %v5145_v40, 0.0  ;;  %vm16764_vm15 = vmmov %vm16759_vm7  ;;  %7630 = vmatpush.bf16.msra.mxu3 %v12004_v45 }
 0x326   : > { %v5462_v44 = vpop.f32.mrf.mxu2  ;;  %v4892_v54 = vpop.f32.mrf.mxu0  ;;  %v4476_v15 = vadd.f32 %v15076_v36, %v4188_v59  ;;  %v12547_v36 = vld [vmem:[#allocation2 + $0x20] sm:$0xff]   ;;  %v6454_v39 = vsel %vm16764_vm15, %v6449_v25, %v15390_v32  ;;  %v16778_v59 = vld [vmem:[#allocation19_spill] sm:$0xff] }
 0x327   : > { %v5634_v19 = vpop.f32.mrf.mxu3  ;;  %v5504_v14 = vadd.f32 %v15300_v2, %v5462_v44  ;;  %v4930_v28 = vadd.f32 %v4892_v54, %v4762_v0  ;;  %v11972_v0 = vld [vmem:[%s16519_s3 + $0x1a0] sm:$0xff]  ;;  %v6008_v44 = vrot.slane %v6006_v33, 3  ;;  %v15417_v54 = vld [vmem:[#allocation2 + $0x30] sm:$0xff]  ;;  %v6455_v33 = vshrl.u32 %v15376_v42, 16 }
 0x328   : > { %6852 = vmatpush.bf16.msra.mxu0 %v11972_v0  ;;  %vm16779_vm1 = vnez %v16778_v59  ;;  %v16785_v59 = vld [vmem:[#allocation24_spill] sm:$0xff] }
 0x329   : > { %v5093_v52 = vpop.f32.mrf.mxu1  ;;  %v15382_v43 = vadd.f32 %v5634_v19, %v5504_v14  ;;  %v5128_v20 = vadd.f32 %v5090_v60, %v4930_v28  ;;  %v6011_v19 = vrot.slane %v6009_v1, 4  ;;  %v11980_v14 = vld [vmem:[%s16519_s3 + $0x1e0] sm:$0xff]  ;;  %vm16786_vm2 = vnez %v16785_v59 }
 0x32a   : > { %7021 = vmatpush.bf16.msra.mxu1 %v11980_v14 }
 0x32b   : > { %v5146_v55 = vmax.f32 %v5128_v20, 0.0  ;;  %v15420_v40 = vor.u32 %v6011_v19, %v6008_v44  ;;  %v11987_v44 = vld [vmem:[%s16519_s3 + $0x218] sm:$0xff] }
 0x32c   : > { %6134 = vmatmul.bf16.gmra.mxu1 %v6004_v30  ;;  %v12003_v19 = vld [vmem:[%s16519_s3 + $0x18] sm:$0xff]  ;;  %7221 = vmatpush.bf16.msra.mxu2 %v11987_v44 }
 0x32d   : > { %v5164_v50 = vsel %vm14301_vm11, %v5146_v55, 0.0  ;;  %v16766_v55 = vld [vmem:[#allocation14_spill] sm:$0xff]  ;;  %vm16767_vm11 = vmmov %vm16751_vm9  ;;  %7631 = vmatpush.bf16.msra.mxu3 %v12003_v19 }
 0x32e   : > { %v5464_v49 = vpop.f32.mrf.mxu2  ;;  %v12227_v31 = vpack.c.bf16 %v5164_v50, %v5163_v4  ;;  %v4895_v12 = vpop.f32.mrf.mxu0  ;;  %v3735_v56 = vadd.f32 %v16766_v55, %v16765_v48  ;;  %v6459_v4 = vshll.u32 %v15417_v54, 16 }
 0x32f   : > { %v5636_v60 = vpop.f32.mrf.mxu3  ;;  %v5505_v13 = vadd.f32 %v15300_v2, %v5464_v49  ;;  %v4931_v61 = vadd.f32 %v4895_v12, %v15067_v23  ;;  %v4764_v23 = vadd.f32 %v15078_v7, %v4476_v15  ;;  %v6013_v7 = vsel %vm16767_vm11, %v15379_v57, %v15420_v40 }
 0x330   : > { %12538 = vst [vmem:[#allocation2 + $0x68] sm:$0xff] %v12227_v31   ;;  %v4036_v49 = vadd.f32 %v15111_v3, %v3735_v56  ;;  %v6461_v1 = vrot.slane %v6459_v4, 1 }
 0x331   : > { %v5095_v41 = vpop.f32.mrf.mxu1  ;;  %v15399_v37 = vadd.f32 %v5636_v60, %v5505_v13  ;;  %5832 = vmatmul.bf16.gmra.mxu0 %v15070_v62  ;;  %v5129_v62 = vadd.f32 %v5093_v52, %v4931_v61  ;;  %v12827_v52 = vld [vmem:[#allocation2 + $0x34] sm:$0xff]   ;;  %v6457_v61 = vor.u32 %v6455_v33, %v15390_v32 }
 0x332   : > { %v6015_v15 = vshrl.u32 %v12827_v52, 16  ;;  %v6018_v29 = vshll.u32 %v12827_v52, 16  ;;  %v4190_v57 = vadd.f32 %v15108_v34, %v4036_v49  ;;  %v11971_v34 = vld [vmem:[%s16519_s3 + $0x198] sm:$0xff] }
 0x333   : > { %6289 = vmatmul.bf16.gmra.mxu2 %v12547_v36  ;;  %v5147_v21 = vmax.f32 %v5129_v62, 0.0  ;;  %6853 = vmatpush.bf16.msra.mxu0 %v11971_v34 }
 0x334   : > { %6578 = vmatmul.bf16.gmra.mxu3 %v6454_v39  ;;  %v4478_v36 = vadd.f32 %v15119_v27, %v4190_v57  ;;  %v12548_v27 = vld [vmem:[#allocation2 + $0x28] sm:$0xff]   ;;  %v6020_v62 = vrot.slane %v6018_v29, 4 }
 0x335   : > { %v5165_v31 = vsel %vm14318_vm14, %v5147_v21, 0.0  ;;  %vm16770_vm14 = vmmov %vm16759_vm7 }
 0x336   : > { %v5467_v28 = vpop.f32.mrf.mxu2  ;;  %v4897_v30 = vpop.f32.mrf.mxu0  ;;  %v6462_v14 = vsel %vm16770_vm14, %v6457_v61, %v6461_v1 }
 0x337   : > { %v5639_v53 = vpop.f32.mrf.mxu3  ;;  %v5506_v20 = vadd.f32 %v15300_v2, %v5467_v28  ;;  %v4932_v47 = vadd.f32 %v4897_v30, %v4764_v23  ;;  %v6017_v23 = vrot.slane %v6015_v15, 3  ;;  %v11979_v28 = vld [vmem:[%s16519_s3 + $0x1d8] sm:$0xff] }
 0x338   : > { %7022 = vmatpush.bf16.msra.mxu1 %v11979_v28 }
 0x339   : > { %v5098_v46 = vpop.f32.mrf.mxu1  ;;  %v15425_v11 = vadd.f32 %v5639_v53, %v5506_v20  ;;  %v5130_v50 = vadd.f32 %v5095_v41, %v4932_v47  ;;  %v15458_v53 = vld [vmem:[#allocation2 + $0x38] sm:$0xff]  ;;  %v6021_v47 = vor.u32 %v6020_v62, %v6017_v23 }
 0x33b   : > { %v5148_v60 = vmax.f32 %v5130_v50, 0.0  ;;  %v6467_v50 = vshll.u32 %v15458_v53, 16 }
 0x33c   : > { %6139 = vmatmul.bf16.gmra.mxu1 %v6013_v7 }
 0x33d   : > { %v5166_v12 = vsel %vm14394_vm6, %v5148_v60, 0.0  ;;  %vm16771_vm6 = vmmov %vm16751_vm9  ;;  %v12829_v60 = vld [vmem:[#allocation2 + $0x3c] sm:$0xff]   ;;  %v6469_v33 = vrot.slane %v6467_v50, 1 }
 0x33e   : > { %v5469_v25 = vpop.f32.mrf.mxu2  ;;  %v12232_v0 = vpack.c.bf16 %v5166_v12, %v5165_v31  ;;  %v4900_v45 = vpop.f32.mrf.mxu0  ;;  %v6022_v49 = vsel %vm16771_vm6, %v15420_v40, %v6021_v47  ;;  %v6024_v15 = vshrl.u32 %v12829_v60, 16  ;;  %v6027_v29 = vshll.u32 %v12829_v60, 16 }
 0x33f   : > { %v5641_v41 = vpop.f32.mrf.mxu3  ;;  %v5507_v3 = vadd.f32 %v15300_v2, %v5469_v25  ;;  %v4933_v32 = vadd.f32 %v4900_v45, %v15113_v8  ;;  %v4766_v8 = vadd.f32 %v15128_v35, %v4478_v36  ;;  %v12002_v36 = vld [vmem:[%s16519_s3 + $0x10] sm:$0xff] }
 0x340   : > { %12539 = vst [vmem:[#allocation2 + $0x70] sm:$0xff] %v12232_v0   ;;  %v6026_v19 = vrot.slane %v6024_v15, 3  ;;  %7632 = vmatpush.bf16.msra.mxu3 %v12002_v36 }
 0x341   : > { %v5100_v42 = vpop.f32.mrf.mxu1  ;;  %v15441_v39 = vadd.f32 %v5641_v41, %v5507_v3  ;;  %5837 = vmatmul.bf16.gmra.mxu0 %v15104_v26  ;;  %v5131_v26 = vadd.f32 %v5098_v46, %v4933_v32  ;;  %v6463_v46 = vshrl.u32 %v15417_v54, 16  ;;  %v11986_v54 = vld [vmem:[%s16519_s3 + $0x210] sm:$0xff]  ;;  %v6029_v32 = vrot.slane %v6027_v29, 4 }
 0x342   : > { %7222 = vmatpush.bf16.msra.mxu2 %v11986_v54  ;;  %v16781_v54 = vld [vmem:[#allocation31_spill] sm:$0xff] }
 0x343   : > { %6294 = vmatmul.bf16.gmra.mxu2 %v12548_v27  ;;  %v5149_v7 = vmax.f32 %v5131_v26, 0.0  ;;  %v6465_v3 = vor.u32 %v6463_v46, %v6461_v1  ;;  %v12549_v1 = vld [vmem:[#allocation2 + $0x30] sm:$0xff]   ;;  %v15487_v27 = vld [vmem:[#allocation2 + $0x40] sm:$0xff]  ;;  %v6030_v28 = vor.u32 %v6029_v32, %v6026_v19 }
 0x344   : > { %6583 = vmatmul.bf16.gmra.mxu3 %v6462_v14  ;;  %v16775_v26 = vld [vmem:[#allocation32_spill] sm:$0xff] }
 0x345   : > { %v5167_v31 = vsel %vm14505_vm0, %v5149_v7, 0.0  ;;  %vm16776_vm0 = vmmov %vm16771_vm6  ;;  %v12831_v7 = vld [vmem:[#allocation2 + $0x44] sm:$0xff]  }
 0x346   : > { %v5472_v20 = vpop.f32.mrf.mxu2  ;;  %v4902_v55 = vpop.f32.mrf.mxu0  ;;  %v6031_v50 = vsel %vm16776_vm0, %v6021_v47, %v6030_v28  ;;  %vm16784_vm3 = vmmov %vm16776_vm0 }
 0x347   : > { %v5644_v30 = vpop.f32.mrf.mxu3  ;;  %v5508_v48 = vadd.f32 %v15300_v2, %v5472_v20  ;;  %v4934_v56 = vadd.f32 %v4902_v55, %v4766_v8  ;;  %v6475_v55 = vshll.u32 %v15487_v27, 16  ;;  %vm16791_vm13 = vmmov %vm16776_vm0 }
 0x348   : > { %vm16797_vm11 = vmmov %vm16776_vm0 }
 0x349   : > { %v5103_v4 = vpop.f32.mrf.mxu1  ;;  %v15462_v21 = vadd.f32 %v5644_v30, %v5508_v48  ;;  %v5132_v52 = vadd.f32 %v5100_v42, %v4934_v56  ;;  %v11970_v42 = vld [vmem:[%s16519_s3 + $0x190] sm:$0xff]  ;;  %v6477_v60 = vrot.slane %v6475_v55, 1 }
 0x34a   : > { %6854 = vmatpush.bf16.msra.mxu0 %v11970_v42  ;;  %v12550_v42 = vld [vmem:[#allocation2 + $0x38] sm:$0xff]  }
 0x34b   : > { %v5150_v35 = vmax.f32 %v5132_v52, 0.0 }
 0x34c   : > { %6144 = vmatmul.bf16.gmra.mxu1 %v6022_v49  ;;  %v6471_v49 = vshrl.u32 %v15458_v53, 16  ;;  %v11985_v53 = vld [vmem:[%s16519_s3 + $0x208] sm:$0xff] }
 0x34d   : > { %v5168_v12 = vsel %vm14514_vm4, %v5150_v35, 0.0  ;;  %vm16774_vm4 = vmmov %vm16759_vm7  ;;  %7223 = vmatpush.bf16.msra.mxu2 %v11985_v53  ;;  %v6479_v35 = vshrl.u32 %v15487_v27, 16 }
 0x34e   : > { %v5474_v25 = vpop.f32.mrf.mxu2  ;;  %v12237_v57 = vpack.c.bf16 %v5168_v12, %v5167_v31  ;;  %v4905_v40 = vpop.f32.mrf.mxu0  ;;  %v6470_v34 = vsel %vm16774_vm4, %v6465_v3, %v6469_v33  ;;  %v16780_v3 = vld [vmem:[#allocation20_spill] sm:$0xff]  ;;  %vm16790_vm10 = vmmov %vm16774_vm4 }
 0x34f   : > { %v5646_v41 = vpop.f32.mrf.mxu3  ;;  %v5509_v0 = vadd.f32 %v15300_v2, %v5474_v25  ;;  %v4935_v44 = vadd.f32 %v4905_v40, %v15158_v38  ;;  %v6033_v25 = vshrl.u32 %v12831_v7, 16  ;;  %vm16796_vm15 = vmmov %vm16774_vm4 }
 0x350   : > { %12540 = vst [vmem:[#allocation2 + $0x78] sm:$0xff] %v12237_v57   ;;  %v6473_v57 = vor.u32 %v6471_v49, %v6469_v33  ;;  %v15512_v33 = vld [vmem:[#allocation2 + $0x48] sm:$0xff]  ;;  %vm16802_vm6 = vmmov %vm16774_vm4 }
 0x351   : > { %v5105_v45 = vpop.f32.mrf.mxu1  ;;  %v15473_v61 = vadd.f32 %v5646_v41, %v5509_v0  ;;  %5842 = vmatmul.bf16.gmra.mxu0 %v15142_v9  ;;  %v5133_v14 = vadd.f32 %v5103_v4, %v4935_v44  ;;  %v11978_v9 = vld [vmem:[%s16519_s3 + $0x1d0] sm:$0xff]  ;;  %v6036_v41 = vshll.u32 %v12831_v7, 16  ;;  %v6035_v44 = vrot.slane %v6033_v25, 3 }
 0x352   : > { %7023 = vmatpush.bf16.msra.mxu1 %v11978_v9  ;;  %v11977_v9 = vld [vmem:[%s16519_s3 + $0x1c8] sm:$0xff] }
 0x353   : > { %6299 = vmatmul.bf16.gmra.mxu2 %v12549_v1  ;;  %v5151_v56 = vmax.f32 %v5133_v14, 0.0  ;;  %v6038_v1 = vrot.slane %v6036_v41, 4 }
 0x354   : > { %6588 = vmatmul.bf16.gmra.mxu3 %v6470_v34 }
 0x355   : > { %v5169_v46 = vsel %vm14560_vm8, %v5151_v56, 0.0  ;;  %vm16782_vm8 = vmmov %vm16774_vm4  ;;  %v15514_v14 = vor.u32 %v6038_v1, %v6035_v44  ;;  %v6483_v56 = vshll.u32 %v15512_v33, 16  ;;  %v11984_v1 = vld [vmem:[%s16519_s3 + $0x200] sm:$0xff]  ;;  %vm16803_vm4 = vcmask 1044480  }
 0x356   : > { %v5477_v23 = vpop.f32.mrf.mxu2  ;;  %v4907_v8 = vpop.f32.mrf.mxu0  ;;  %v6478_v36 = vsel %vm16782_vm8, %v6473_v57, %v6477_v60  ;;  %7024 = vmatpush.bf16.msra.mxu1 %v11977_v9  ;;  %7224 = vmatpush.bf16.msra.mxu2 %v11984_v1  ;;  %vm16806_vm8 = vmmov %vm16802_vm6 }
 0x357   : > { %v5649_v62 = vpop.f32.mrf.mxu3  ;;  %v5510_v38 = vadd.f32 %v15300_v2, %v5477_v23  ;;  %v4936_v20 = vadd.f32 %v4907_v8, %v16775_v26  ;;  %v11969_v23 = vld [vmem:[%s16519_s3 + $0x188] sm:$0xff]  ;;  %v16783_v26 = vld [vmem:[#allocation21_spill] sm:$0xff]  ;;  %v6040_v7 = vsel %vm16784_vm3, %v6030_v28, %v15514_v14 }
 0x358   : > { %6855 = vmatpush.bf16.msra.mxu0 %v11969_v23 }
 0x359   : > { %v5108_v30 = vpop.f32.mrf.mxu1  ;;  %v15494_v48 = vadd.f32 %v5649_v62, %v5510_v38  ;;  %v5134_v4 = vadd.f32 %v5105_v45, %v4936_v20  ;;  %v12001_v62 = vld [vmem:[%s16519_s3 + $0x8] sm:$0xff] }
 0x35a   : > { %7633 = vmatpush.bf16.msra.mxu3 %v12001_v62 }
 0x35b   : > { %v5152_v52 = vmax.f32 %v5134_v4, 0.0 }
 0x35c   : > { %6149 = vmatmul.bf16.gmra.mxu1 %v6031_v50 }
 0x35d   : > { %v5170_v31 = vsel %vm16779_vm1, %v5152_v52, 0.0  ;;  %v12832_v52 = vld [vmem:[#allocation2 + $0x4c] sm:$0xff]   ;;  %vm16805_vm1 = vmmov %vm16784_vm3  ;;  %vm16807_vm3 = vsmask.f32 6400 }
 0x35e   : > { %v5479_v13 = vpop.f32.mrf.mxu2  ;;  %v12242_v15 = vpack.c.bf16 %v5170_v31, %v5169_v46  ;;  %v4910_v47 = vpop.f32.mrf.mxu0  ;;  %v6485_v46 = vrot.slane %v6483_v56, 1 }
 0x35f   : > { %v5651_v12 = vpop.f32.mrf.mxu3  ;;  %v5511_v29 = vadd.f32 %v15300_v2, %v5479_v13  ;;  %v4937_v45 = vadd.f32 %v4910_v47, %v16780_v3  ;;  %v16787_v13 = vld [vmem:[#allocation27_spill] sm:$0xff] }
 0x360   : > { %12541 = vst [vmem:[#allocation2 + $0x80] sm:$0xff] %v12242_v15   ;;  %vm16788_vm9 = vnez %v16787_v13  ;;  %v6042_v15 = vshrl.u32 %v12832_v52, 16  ;;  %v6487_v13 = vshrl.u32 %v15512_v33, 16  ;;  %v6361_v33 = vld [vmem:[#allocation2 + $0x58] sm:$0x1] }
 0x361   : > { %v5110_v0 = vpop.f32.mrf.mxu1  ;;  %v15504_v40 = vadd.f32 %v5651_v12, %v5511_v29  ;;  %5847 = vmatmul.bf16.gmra.mxu0 %v16781_v54  ;;  %v5135_v34 = vadd.f32 %v5108_v30, %v4937_v45  ;;  %v6045_v29 = vshll.u32 %v12832_v52, 16  ;;  %v16789_v45 = vld [vmem:[#allocation33_spill] sm:$0xff] }
 0x362   : > { %v12551_v54 = vld [vmem:[#allocation2 + $0x40] sm:$0xff]  }
 0x363   : > { %6304 = vmatmul.bf16.gmra.mxu2 %v12550_v42  ;;  %v5153_v4 = vmax.f32 %v5135_v34, 0.0  ;;  %v6047_v44 = vrot.slane %v6045_v29, 4  ;;  %v11968_v34 = vld [vmem:[%s16519_s3 + $0x180] sm:$0xff] }
 0x364   : > { %6593 = vmatmul.bf16.gmra.mxu3 %v6478_v36  ;;  %v6044_v36 = vrot.slane %v6042_v15, 3  ;;  %6856 = vmatpush.bf16.msra.mxu0 %v11968_v34  ;;  %v16794_v15 = vld [vmem:[#allocation3_spill] sm:$0xff] }
 0x365   : > { %v5171_v31 = vsel %vm16786_vm2, %v5153_v4, 0.0  ;;  %vm16795_vm12 = vnez %v16794_v15  ;;  %v12552_v34 = vld [vmem:[#allocation2 + $0x48] sm:$0xff]   ;;  %vm16808_vm2 = vsmask.f32 5376 }
 0x366   : > { %v5482_v19 = vpop.f32.mrf.mxu2  ;;  %v4912_v8 = vpop.f32.mrf.mxu0 }
 0x367   : > { %v5654_v32 = vpop.f32.mrf.mxu3  ;;  %v5512_v38 = vadd.f32 %v15300_v2, %v5482_v19  ;;  %v4938_v20 = vadd.f32 %v4912_v8, %v16783_v26  ;;  %v11976_v19 = vld [vmem:[%s16519_s3 + $0x1c0] sm:$0xff] }
 0x368   : > { %7025 = vmatpush.bf16.msra.mxu1 %v11976_v19 }
 0x369   : > { %v5113_v30 = vpop.f32.mrf.mxu1  ;;  %v15527_v55 = vadd.f32 %v5654_v32, %v5512_v38  ;;  %v5136_v50 = vadd.f32 %v5110_v0, %v4938_v20  ;;  %v6481_v0 = vor.u32 %v6479_v35, %v6477_v60  ;;  %v15546_v60 = vld [vmem:[#allocation2 + $0x50] sm:$0xff]   ;;  %v15559_v38 = vor.u32 %v6047_v44, %v6044_v36 }
 0x36a   : > { %v15557_v32 = vld [vmem:[#allocation2 + $0x50] sm:$0xff]  ;;  %v12294_v8 = vunpack.c.h.b16 %v15546_v60 }
 0x36b   : > { %v5154_v49 = vmax.f32 %v5136_v50, 0.0  ;;  %v6486_v42 = vsel %vm16790_vm10, %v6481_v0, %v6485_v46  ;;  %v15570_v35 = vld [vmem:[#allocation2 + $0x4c] sm:$0xff]   ;;  %vm16810_vm10 = vmmov %vm16803_vm4 }
 0x36c   : > { %6154 = vmatmul.bf16.gmra.mxu1 %v6040_v7  ;;  %v6491_v7 = vshll.u32 %v15557_v32, 16  ;;  %v5969_v59 = vpack.c.b16 %v12294_v8, %v12294_v8 }
 0x36d   : > { %v5172_v12 = vsel %vm16788_vm9, %v5154_v49, 0.0 }
 0x36e   : > { %v5484_v25 = vpop.f32.mrf.mxu2  ;;  %v12247_v47 = vpack.c.bf16 %v5172_v12, %v5171_v31  ;;  %v4915_v28 = vpop.f32.mrf.mxu0  ;;  %v15573_v12 = vrot.slane %v6491_v7, 1 }
 0x36f   : > { %v5656_v41 = vpop.f32.mrf.mxu3  ;;  %v5513_v57 = vadd.f32 %v15300_v2, %v5484_v25  ;;  %v4939_v27 = vadd.f32 %v4915_v28, %v15250_v6  ;;  %v12000_v6 = vld [vmem:[%s16519_s3] sm:$0xff]  ;;  %v16792_v25 = vld [vmem:[#allocation28_spill] sm:$0xff]  ;;  %v6054_v28 = vshll.u32 %v5969_v59, 16 }
 0x370   : > { %12542 = vst [vmem:[#allocation2 + $0x88] sm:$0xff] %v12247_v47   ;;  %7634 = vmatpush.bf16.msra.mxu3 %v12000_v6  ;;  %vm16793_vm7 = vnez %v16792_v25 }
 0x371   : > { %v5115_v53 = vpop.f32.mrf.mxu1  ;;  %v15538_v3 = vadd.f32 %v5656_v41, %v5513_v57  ;;  %5852 = vmatmul.bf16.gmra.mxu0 %v16789_v45  ;;  %v5137_v23 = vadd.f32 %v5113_v30, %v4939_v27  ;;  %v6049_v30 = vsel %vm16791_vm13, %v15514_v14, %v15559_v38  ;;  %v6051_v14 = vshrl.u32 %v5969_v59, 16  ;;  %vm16811_vm13 = vmmov %vm16805_vm1 }
 0x372   : > { %v6489_v45 = vor.u32 %v6487_v13, %v6485_v46  ;;  %v6056_v19 = vrot.slane %v6054_v28, 4  ;;  %v12031_v46 = vld [vmem:[%s16519_s3 + $0xf8] sm:$0xff] }
 0x373   : > { %6309 = vmatmul.bf16.gmra.mxu2 %v12551_v54  ;;  %v5155_v52 = vmax.f32 %v5137_v23, 0.0  ;;  %v6053_v6 = vrot.slane %v6051_v14, 3  ;;  %v6416_v23 = vunpack.c.l.b16 %v6361_v33 }
 0x374   : > { %6598 = vmatmul.bf16.gmra.mxu3 %v6486_v42  ;;  %v6494_v36 = vsel %vm16796_vm15, %v6489_v45, %v15573_v12  ;;  %8297 = vmatpush.bf16.msrb.mxu2 %v12031_v46  ;;  %v16798_v45 = vld [vmem:[#allocation29_spill] sm:$0xff]  ;;  %vm16814_vm15 = vmmov %vm16808_vm2 }
 0x375   : > { %v5173_v41 = vsel %vm16793_vm7, %v5155_v52, 0.0  ;;  %v6426_v7 = vpack.c.b16 %v6416_v23, %v6416_v23  ;;  %vm16799_vm14 = vnez %v16798_v45  ;;  %v15614_v46 = vld [vmem:[#allocation2 + $0x20] sm:$0xff]  ;;  %vm16812_vm7 = vmmov %vm16802_vm6 }
 0x376   : > { %v5487_v62 = vpop.f32.mrf.mxu2  ;;  %v4917_v20 = vpop.f32.mrf.mxu0 }
 0x377   : > { %v5659_v9 = vpop.f32.mrf.mxu3  ;;  %v5514_v26 = vadd.f32 %v15300_v2, %v5487_v62  ;;  %v4940_v56 = vadd.f32 %v4917_v20, %v15267_v16  ;;  %v5706_v16 = vunpack.c.l.b16 %v15570_v35  ;;  %v12015_v62 = vld [vmem:[%s16519_s3 + $0x78] sm:$0xff] }
 0x378   : > { %7798 = vmatpush.bf16.msrb.mxu0 %v12015_v62  ;;  %v7398_v62 = vld [vmem:[#allocation2 + $0x4c] sm:$0xc] }
 0x379   : > { %v5118_v4 = vpop.f32.mrf.mxu1  ;;  %v15564_v50 = vadd.f32 %v5659_v9, %v5514_v26  ;;  %v5138_v49 = vadd.f32 %v5115_v53, %v4940_v56  ;;  %v5707_v44 = vpack.c.b16 %v5706_v16, %v5706_v16  ;;  %v6057_v56 = vor.u32 %v6056_v19, %v6053_v6 }
 0x37b   : > { %v5156_v31 = vmax.f32 %v5138_v49, 0.0  ;;  %v5749_v9 = vshrl.u32 %v5707_v44, 16 }
 0x37c   : > { %6159 = vmatmul.bf16.gmra.mxu1 %v6049_v30 }
 0x37d   : > { %v5174_v29 = vsel %vm16795_vm12, %v5156_v31, 0.0  ;;  %v7702_v31 = vld [vmem:[#allocation2 + $0x4c] sm:$0x8]  ;;  %v5751_v16 = vrot.slane %v5749_v9, 3  ;;  %vm16813_vm12 = vmmov %vm16807_vm3 }
 0x37e   : > { %v5489_v47 = vpop.f32.mrf.mxu2  ;;  %v12252_v0 = vpack.c.bf16 %v5174_v29, %v5173_v41  ;;  %v4920_v27 = vpop.f32.mrf.mxu0  ;;  %v7453_v41 = vunpack.c.h.b16 %v15570_v35 }
 0x37f   : > { %v5661_v57 = vpop.f32.mrf.mxu3  ;;  %v5515_v53 = vadd.f32 %v15300_v2, %v5489_v47  ;;  %v4941_v1 = vadd.f32 %v4920_v27, %v15285_v51  ;;  %v12039_v51 = vld [vmem:[%s16519_s3 + $0x138] sm:$0xff]  ;;  %v6058_v47 = vsel %vm16797_vm11, %v15559_v38, %v6057_v56  ;;  %vm16815_vm11 = vmmov %vm16803_vm4 }
 0x380   : > { %12543 = vst [vmem:[#allocation2 + $0x90] sm:$0xff] %v12252_v0   ;;  %8451 = vmatpush.bf16.msrb.mxu3 %v12039_v51  ;;  %v12555_v0 = vld [vmem:[#allocation2 + $0x18] sm:$0xf0] }
 0x381   : > { %v5120_v54 = vpop.f32.mrf.mxu1  ;;  %v15581_v42 = vadd.f32 %v5661_v57, %v5515_v53  ;;  %5857 = vmatmul.bf16.gmra.mxu0 %v15248_v17  ;;  %v5752_v17 = vshll.u32 %v5707_v44, 16  ;;  %v5139_v8 = vadd.f32 %v5118_v4, %v4941_v1  ;;  %v12023_v4 = vld [vmem:[%s16519_s3 + $0xb8] sm:$0xff]  ;;  %v6499_v57 = vshll.u32 %v6426_v7, 16 }
 0x382   : > { %7996 = vmatpush.bf16.msrb.mxu1 %v12023_v4  ;;  %v12556_v53 = vld [vmem:[#allocation2 + $0x18] sm:$0xe]  ;;  %v6495_v1 = vshrl.u32 %v15557_v32, 16  ;;  %v6728_v4 = vshrl.u32 %v15614_v46, 16 }
 0x383   : > { %6314 = vmatmul.bf16.gmra.mxu2 %v12552_v34  ;;  %v5754_v25 = vrot.slane %v5752_v17, 4  ;;  %v5157_v15 = vmax.f32 %v5139_v8, 0.0  ;;  %v6501_v38 = vrot.slane %v6499_v57, 1  ;;  %v15611_v34 = vld [vmem:[#allocation2 + $0x54] sm:$0xff]  ;;  %v12557_v8 = vor.u32 %v12556_v53, %v12555_v0 }
 0x384   : > { %6603 = vmatmul.bf16.gmra.mxu3 %v6494_v36  ;;  %v6497_v9 = vor.u32 %v6495_v1, %v15573_v12  ;;  %v12030_v12 = vld [vmem:[%s16519_s3 + $0xf0] sm:$0xff]  ;;  %v6719_v57 = vshll.u32 %v15372_v58, 16  ;;  %v7119_v1 = vrot.slane %v6728_v4, 1 }
 0x385   : > { %v5755_v28 = vor.u32 %v5754_v25, %v5751_v16  ;;  %v5175_v35 = vsel %vm16799_vm14, %v5157_v15, 0.0  ;;  %v6942_v25 = vrot.slane %v12557_v8, 1  ;;  %8298 = vmatpush.bf16.msrb.mxu2 %v12030_v12  ;;  %v7112_v53 = vshrl.u32 %v12557_v8, 16 }
 0x386   : > { %v5492_v26 = vpop.f32.mrf.mxu2  ;;  %v4922_v49 = vpop.f32.mrf.mxu0 }
 0x387   : > { %v5664_v20 = vpop.f32.mrf.mxu3  ;;  %v5516_v52 = vadd.f32 %v15300_v2, %v5492_v26  ;;  %v4942_v30 = vadd.f32 %v4922_v49, %v15292_v22  ;;  %v7720_v22 = vunpack.c.l.b16 %v7702_v31  ;;  %v7490_v49 = vshrl.u32 %v15611_v34, 16 }
 0x388   : > { %v7493_v31 = vshll.u32 %v15611_v34, 16 }
 0x389   : > { %v6125_v59 = vpop.f32.mrf.mxu1  ;;  %v15598_v13 = vadd.f32 %v5664_v20, %v5516_v52  ;;  %v5140_v29 = vadd.f32 %v5120_v54, %v4942_v30  ;;  %v7721_v27 = vpack.c.b16 %v7453_v41, %v7720_v22  ;;  %v7452_v52 = vunpack.c.l.b16 %v7398_v62 }
 0x38a   : > { %v6724_v30 = vshll.u32 %v15614_v46, 16  ;;  %v7492_v62 = vrot.slane %v7490_v49, 2 }
 0x38b   : > { %v5158_v14 = vmax.f32 %v5140_v29, 0.0  ;;  %v7891_v20 = vshrl.u32 %v7721_v27, 16  ;;  %v7894_v56 = vshll.u32 %v7721_v27, 16  ;;  %v7722_v16 = vrot.slane %v7721_v27, 3 }
 0x38c   : > { %6164 = vmatmul.bf16.gmra.mxu1 %v6058_v47  ;;  %v7115_v27 = vshll.u32 %v12557_v8, 16 }
 0x38d   : > { %v5176_v36 = vsel %vm14945_vm5, %v5158_v14, 0.0  ;;  %vm16801_vm5 = vmmov %vm16776_vm0  ;;  %v7896_v15 = vrot.slane %v7894_v56, 4  ;;  %v7898_v14 = vrot.slane %v7490_v49, 3  ;;  %vm16804_vm0 = vcmask 1046528  }
 0x38e   : > { %v5494_v44 = vpop.f32.mrf.mxu2  ;;  %v12257_v6 = vpack.c.bf16 %v5176_v36, %v5175_v35  ;;  %v5823_v23 = vpop.f32.mrf.mxu0  ;;  %v5756_v32 = vsel %vm16801_vm5, %v15238_v63, %v5755_v28  ;;  %v7723_v63 = vrot.slane %v15611_v34, 3  ;;  %v7117_v56 = vrot.slane %v7115_v27, 2  ;;  %vm16809_vm9 = vmmov %vm16804_vm0  ;;  %v15718_v34 = vld [vmem:[#allocation2 + $0x64] sm:$0xff] }
 0x38f   : > { %v5666_v54 = vpop.f32.mrf.mxu3  ;;  %v5517_v19 = vadd.f32 %v15300_v2, %v5494_v44  ;;  %v5868_v51 = vadd.f32 %v5823_v23, %v15311_v24  ;;  %v6502_v2 = vsel %vm16802_vm6, %v6497_v9, %v6501_v38  ;;  %v6943_v24 = vrot.slane %v15614_v46, 1  ;;  %v12022_v9 = vld [vmem:[%s16519_s3 + $0xb0] sm:$0xff]  ;;  %vm16816_vm14 = vmmov %vm16804_vm0 }
 0x390   : > { %12544 = vst [vmem:[#allocation2 + $0x98] sm:$0xff] %v12257_v6   ;;  %v15637_v22 = vsel %vm16803_vm4, %v7722_v16, %v7723_v63  ;;  %v7899_v44 = vrot.slane %v7493_v31, 4  ;;  %v7120_v38 = vrot.slane %v6724_v30, 2  ;;  %v12014_v6 = vld [vmem:[%s16519_s3 + $0x70] sm:$0xff]  ;;  %7997 = vmatpush.bf16.msrb.mxu1 %v12022_v9  ;;  %v6726_v49 = vrot.slane %v6724_v30, 1  ;;  %v15673_v30 = vld [vmem:[#allocation2 + $0x5c] sm:$0xff]  ;;  %vm16817_vm5 = vmmov %vm16805_vm1 }
 0x391   : > { %v6127_v17 = vpop.f32.mrf.mxu1  ;;  %v15618_v26 = vadd.f32 %v5666_v54, %v5517_v19  ;;  %v6170_v7 = vadd.f32 %v6125_v59, %v5868_v51  ;;  %5862 = vmatmul.bf16.gmra.mxu0 %v5756_v32  ;;  %v7471_v59 = vpack.c.b16 %v7453_v41, %v7452_v52  ;;  %v6944_v0 = vsel %vm16804_vm0, %v6942_v25, %v6943_v24  ;;  %v12038_v19 = vld [vmem:[%s16519_s3 + $0x130] sm:$0xff]  ;;  %vm16818_vm4 = vmmov %vm16807_vm3 }
 0x392   : > { %v7495_v51 = vrot.slane %v7493_v31, 3  ;;  %v15656_v8 = vor.u32 %v7899_v44, %v7898_v14  ;;  %v6721_v32 = vrot.slane %v6719_v57, 1  ;;  %7799 = vmatpush.bf16.msrb.mxu0 %v12014_v6  ;;  %8452 = vmatpush.bf16.msrb.mxu3 %v12038_v19  ;;  %v6717_v52 = vshrl.u32 %v15372_v58, 16  ;;  %vm16819_vm0 = vmmov %vm16808_vm2 }
 0x393   : > { %6319 = vmatmul.bf16.gmra.mxu2 %v15546_v60  ;;  %v7893_v60 = vrot.slane %v7891_v20, 3  ;;  %v7482_v33 = vshrl.u32 %v7471_v59, 16  ;;  %v7485_v36 = vshll.u32 %v7471_v59, 16  ;;  %v7114_v20 = vrot.slane %v7112_v53, 1 }
 0x394   : > { %6608 = vmatmul.bf16.gmra.mxu3 %v6502_v2  ;;  %v15663_v31 = vor.u32 %v7120_v38, %v7119_v1  ;;  %v15665_v16 = vor.u32 %v7495_v51, %v7492_v62  ;;  %v7725_v38 = vrot.slane %v15673_v30, 3 }
 0x395   : > { %v7897_v23 = vor.u32 %v7896_v15, %v7893_v60  ;;  %v7487_v2 = vrot.slane %v7485_v36, 3  ;;  %v6722_v15 = vor.u32 %v6721_v32, %v6717_v52  ;;  %v7499_v36 = vshrl.u32 %v15673_v30, 16  ;;  %v12021_v52 = vld [vmem:[%s16519_s3 + $0xa8] sm:$0xff] }
 0x396   : > { %v6280_v29 = vpop.f32.mrf.mxu2  ;;  %v5825_v28 = vpop.f32.mrf.mxu0  ;;  %7998 = vmatpush.bf16.msrb.mxu1 %v12021_v52 }
 0x397   : > { %v6569_v47 = vpop.f32.mrf.mxu3  ;;  %v6325_v41 = vadd.f32 %v6280_v29, %v6170_v7  ;;  %v5869_v45 = vadd.f32 %v5825_v28, %v15329_v5  ;;  %v7484_v7 = vrot.slane %v7482_v33, 2  ;;  %v6727_v58 = vsel %vm16806_vm8, %v6722_v15, %v6726_v49  ;;  %vm16821_vm8 = vmmov %vm16809_vm9 }
 0x399   : > { %v6130_v35 = vpop.f32.mrf.mxu1  ;;  %v15643_v54 = vadd.f32 %v6569_v47, %v6325_v41  ;;  %v6171_v5 = vadd.f32 %v6127_v17, %v5869_v45  ;;  %v15660_v17 = vsel %vm16805_vm1, %v7897_v23, %v15656_v8  ;;  %v7118_v47 = vor.u32 %v7117_v56, %v7114_v20  ;;  %v15668_v41 = vld [vmem:[#allocation2 + $0x28] sm:$0xff]  ;;  %vm16820_vm1 = vmmov %vm16810_vm10 }
 0x39a   : > { %v7488_v57 = vor.u32 %v7487_v2, %v7484_v7  ;;  %v6732_v45 = vshll.u32 %v15668_v41, 16  ;;  %v6736_v33 = vshrl.u32 %v15668_v41, 16  ;;  %v7501_v20 = vrot.slane %v7499_v36, 2  ;;  %v12029_v56 = vld [vmem:[%s16519_s3 + $0xe8] sm:$0xff] }
 0x39b   : > { %v7122_v53 = vsel %vm16807_vm3, %v7118_v47, %v15663_v31  ;;  %v12013_v2 = vld [vmem:[%s16519_s3 + $0x68] sm:$0xff]  ;;  %8299 = vmatpush.bf16.msrb.mxu2 %v12029_v56  ;;  %vm16822_vm3 = vmmov %vm16817_vm5 }
 0x39c   : > { %7026 = vmatmul.bf16.vlgmr.msra.gmra.mxu1 %v6944_v0  ;;  %v7497_v27 = vsel %vm16808_vm2, %v7488_v57, %v15665_v16  ;;  %v7123_v9 = vrot.slane %v6736_v33, 1  ;;  %v7124_v32 = vrot.slane %v6732_v45, 2  ;;  %7800 = vmatpush.bf16.msrb.mxu0 %v12013_v2  ;;  %vm16823_vm2 = vmmov %vm16802_vm6 }
 0x39e   : > { %v6282_v12 = vpop.f32.mrf.mxu2  ;;  %v5828_v60 = vpop.f32.mrf.mxu0  ;;  %v15714_v15 = vor.u32 %v7124_v32, %v7123_v9 }
 0x39f   : > { %v6571_v59 = vpop.f32.mrf.mxu3  ;;  %v6326_v25 = vadd.f32 %v6282_v12, %v6171_v5  ;;  %v5870_v29 = vadd.f32 %v5828_v60, %v15341_v10  ;;  %v6945_v10 = vrot.slane %v15668_v41, 1  ;;  %v15710_v12 = vsel %vm16810_vm10, %v7723_v63, %v7725_v38  ;;  %vm16825_vm10 = vmmov %vm16819_vm0 }
 0x3a0   : > { %v15712_v60 = vrot.slane %v6732_v45, 1 }
 0x3a1   : > { %v6132_v14 = vpop.f32.mrf.mxu1  ;;  %v15670_v28 = vadd.f32 %v6571_v59, %v6326_v25  ;;  %v6172_v0 = vadd.f32 %v6130_v35, %v5870_v29  ;;  %6857 = vmatmul.bf16.vlgmr.msra.gmra.mxu0 %v6727_v58  ;;  %v7502_v35 = vshll.u32 %v15673_v30, 16  ;;  %v6946_v62 = vsel %vm16809_vm9, %v6943_v24, %v6945_v10  ;;  %v12037_v24 = vld [vmem:[%s16519_s3 + $0x128] sm:$0xff]  ;;  %vm16824_vm9 = vmmov %vm16818_vm4 }
 0x3a2   : > { %v7902_v59 = vrot.slane %v7499_v36, 3  ;;  %8453 = vmatpush.bf16.msrb.mxu3 %v12037_v24  ;;  %v6730_v30 = vor.u32 %v6728_v4, %v6726_v49  ;;  %v7727_v49 = vrot.slane %v15718_v34, 3 }
 0x3a3   : > { %7225 = vmatmul.bf16.vlgmr.msra.gmra.mxu2 %v7122_v53  ;;  %v7903_v25 = vrot.slane %v7502_v35, 4 }
 0x3a4   : > { %7635 = vmatmul.bf16.vlgmr.msra.gmra.mxu3 %v7497_v27  ;;  %v6735_v36 = vsel %vm16812_vm7, %v6730_v30, %v15712_v60  ;;  %vm16827_vm7 = vmmov %vm16821_vm8 }
 0x3a5   : > { %v7904_v29 = vor.u32 %v7903_v25, %v7902_v59 }
 0x3a6   : > { %v6285_v44 = vpop.f32.mrf.mxu2  ;;  %v5830_v19 = vpop.f32.mrf.mxu0 }
 0x3a7   : > { %v6574_v1 = vpop.f32.mrf.mxu3  ;;  %v6327_v6 = vadd.f32 %v6285_v44, %v6172_v0  ;;  %v5871_v23 = vadd.f32 %v5830_v19, %v15359_v18  ;;  %v7504_v18 = vrot.slane %v7502_v35, 3  ;;  %v15724_v0 = vsel %vm16811_vm13, %v15656_v8, %v7904_v29  ;;  %vm16826_vm13 = vmmov %vm16820_vm1 }
 0x3a8   : > { %v7126_v44 = vsel %vm16813_vm12, %v15663_v31, %v15714_v15  ;;  %v7511_v8 = vshll.u32 %v15718_v34, 16  ;;  %vm16828_vm12 = vmmov %vm16822_vm3 }
 0x3a9   : > { %v6135_v5 = vpop.f32.mrf.mxu1  ;;  %v15691_v51 = vadd.f32 %v6574_v1, %v6327_v6  ;;  %v6173_v7 = vadd.f32 %v6132_v14, %v5871_v23  ;;  %v15716_v14 = vor.u32 %v7504_v18, %v7501_v20  ;;  %v15734_v1 = vld [vmem:[#allocation2 + $0x30] sm:$0xff] }
 0x3aa   : > { %v6740_v35 = vshll.u32 %v15734_v1, 16  ;;  %v6947_v31 = vrot.slane %v15734_v1, 1  ;;  %v6744_v6 = vshrl.u32 %v15734_v1, 16  ;;  %v7513_v25 = vrot.slane %v7511_v8, 3 }
 0x3ab   : > { %v7506_v4 = vsel %vm16814_vm15, %v15665_v16, %v15716_v14  ;;  %vm16829_vm15 = vmmov %vm16823_vm2 }
 0x3ac   : > { %7031 = vmatmul.bf16.gmra.mxu1 %v6946_v62  ;;  %v7907_v62 = vrot.slane %v7511_v8, 4  ;;  %v6948_v2 = vsel %vm16816_vm14, %v6945_v10, %v6947_v31  ;;  %v7128_v24 = vrot.slane %v6740_v35, 2  ;;  %vm16831_vm14 = vmmov %vm16819_vm0 }
 0x3ae   : > { %v6287_v47 = vpop.f32.mrf.mxu2  ;;  %v5833_v58 = vpop.f32.mrf.mxu0 }
 0x3af   : > { %v6576_v57 = vpop.f32.mrf.mxu3  ;;  %v6328_v63 = vadd.f32 %v6287_v47, %v6173_v7  ;;  %v5872_v53 = vadd.f32 %v5833_v58, %v15382_v43  ;;  %v7508_v43 = vshrl.u32 %v15718_v34, 16  ;;  %v12012_v47 = vld [vmem:[%s16519_s3 + $0x60] sm:$0xff] }
 0x3b0   : > { %v12020_v34 = vld [vmem:[%s16519_s3 + $0xa0] sm:$0xff]  ;;  %7801 = vmatpush.bf16.msrb.mxu0 %v12012_v47 }
 0x3b1   : > { %v6137_v27 = vpop.f32.mrf.mxu1  ;;  %v15727_v45 = vadd.f32 %v6576_v57, %v6328_v63  ;;  %v6174_v46 = vadd.f32 %v6135_v5, %v5872_v53  ;;  %6862 = vmatmul.bf16.gmra.mxu0 %v6735_v36  ;;  %v15746_v5 = vsel %vm16815_vm11, %v7725_v38, %v7727_v49  ;;  %v7906_v16 = vrot.slane %v7508_v43, 3  ;;  %v12036_v57 = vld [vmem:[%s16519_s3 + $0x120] sm:$0xff]  ;;  %7999 = vmatpush.bf16.msrb.mxu1 %v12020_v34  ;;  %v15780_v36 = vld [vmem:[#allocation2 + $0x6c] sm:$0xff]  ;;  %vm16830_vm11 = vmmov %vm16818_vm4 }
 0x3b2   : > { %v7127_v38 = vrot.slane %v6744_v6, 1  ;;  %v7510_v59 = vrot.slane %v7508_v43, 2  ;;  %v6742_v63 = vrot.slane %v6740_v35, 1  ;;  %8454 = vmatpush.bf16.msrb.mxu3 %v12036_v57 }
 0x3b3   : > { %7230 = vmatmul.bf16.gmra.mxu2 %v7126_v44  ;;  %v15749_v7 = vor.u32 %v7907_v62, %v7906_v16 }
 0x3b4   : > { %7640 = vmatmul.bf16.gmra.mxu3 %v7506_v4  ;;  %v15776_v58 = vor.u32 %v7128_v24, %v7127_v38 }
 0x3b5   : > { %v15771_v10 = vsel %vm16817_vm5, %v7904_v29, %v15749_v7  ;;  %vm16832_vm5 = vmmov %vm16820_vm1 }
 0x3b6   : > { %v6290_v19 = vpop.f32.mrf.mxu2  ;;  %v5835_v32 = vpop.f32.mrf.mxu0 }
 0x3b7   : > { %v6579_v23 = vpop.f32.mrf.mxu3  ;;  %v6329_v9 = vadd.f32 %v6290_v19, %v6174_v46  ;;  %v5873_v20 = vadd.f32 %v5835_v32, %v15399_v37  ;;  %v12028_v37 = vld [vmem:[%s16519_s3 + $0xe0] sm:$0xff]  ;;  %v6738_v46 = vor.u32 %v6736_v33, %v15712_v60  ;;  %v7130_v19 = vsel %vm16818_vm4, %v15714_v15, %v15776_v58  ;;  %vm16834_vm4 = vmmov %vm16822_vm3 }
 0x3b8   : > { %8300 = vmatpush.bf16.msrb.mxu2 %v12028_v37  ;;  %v7517_v33 = vshrl.u32 %v15780_v36, 16  ;;  %v7729_v60 = vrot.slane %v15780_v36, 3 }
 0x3b9   : > { %v6140_v56 = vpop.f32.mrf.mxu1  ;;  %v15751_v18 = vadd.f32 %v6579_v23, %v6329_v9  ;;  %v6175_v52 = vadd.f32 %v6137_v27, %v5873_v20  ;;  %v15778_v27 = vor.u32 %v7513_v25, %v7510_v59  ;;  %v6743_v35 = vsel %vm16802_vm6, %v6738_v46, %v6742_v63  ;;  %v15792_v23 = vld [vmem:[#allocation2 + $0x38] sm:$0xff]  ;;  %vm16833_vm6 = vmmov %vm16827_vm7 }
 0x3ba   : > { %v6748_v62 = vshll.u32 %v15792_v23, 16  ;;  %v6949_v15 = vrot.slane %v15792_v23, 1  ;;  %v6752_v9 = vshrl.u32 %v15792_v23, 16  ;;  %v12034_v23 = vld [vmem:[%s16519_s3 + $0x110] sm:$0xff] }
 0x3bb   : > { %v7515_v41 = vsel %vm16819_vm0, %v15716_v14, %v15778_v27  ;;  %v7910_v14 = vrot.slane %v7517_v33, 3  ;;  %vm16835_vm0 = vmmov %vm16823_vm2 }
 0x3bc   : > { %7036 = vmatmul.bf16.gmra.mxu1 %v6948_v2  ;;  %v6950_v47 = vsel %vm16821_vm8, %v6947_v31, %v6949_v15  ;;  %v7132_v57 = vrot.slane %v6748_v62, 2  ;;  %vm16837_vm8 = vmmov %vm16825_vm10 }
 0x3be   : > { %v6292_v30 = vpop.f32.mrf.mxu2  ;;  %v5838_v44 = vpop.f32.mrf.mxu0 }
 0x3bf   : > { %v6581_v53 = vpop.f32.mrf.mxu3  ;;  %v6330_v29 = vadd.f32 %v6292_v30, %v6175_v52  ;;  %v5874_v4 = vadd.f32 %v5838_v44, %v15425_v11  ;;  %v7520_v11 = vshll.u32 %v15780_v36, 16  ;;  %v7519_v30 = vrot.slane %v7517_v33, 2  ;;  %v12011_v36 = vld [vmem:[%s16519_s3 + $0x58] sm:$0xff] }
 0x3c0   : > { %7802 = vmatpush.bf16.msrb.mxu0 %v12011_v36  ;;  %v6750_v44 = vrot.slane %v6748_v62, 1  ;;  %v6746_v33 = vor.u32 %v6744_v6, %v6742_v63 }
 0x3c1   : > { %v6142_v43 = vpop.f32.mrf.mxu1  ;;  %v15786_v8 = vadd.f32 %v6581_v53, %v6330_v29  ;;  %v6176_v16 = vadd.f32 %v6140_v56, %v5874_v4  ;;  %6867 = vmatmul.bf16.gmra.mxu0 %v6743_v35  ;;  %v15804_v56 = vsel %vm16820_vm1, %v7727_v49, %v7729_v60  ;;  %v7911_v2 = vrot.slane %v7520_v11, 4  ;;  %v12035_v29 = vld [vmem:[%s16519_s3 + $0x118] sm:$0xff]  ;;  %vm16836_vm1 = vmmov %vm16824_vm9 }
 0x3c2   : > { %v7131_v49 = vrot.slane %v6752_v9, 1  ;;  %v7522_v53 = vrot.slane %v7520_v11, 3  ;;  %8455 = vmatpush.bf16.msrb.mxu3 %v12035_v29  ;;  %v6751_v62 = vsel %vm16823_vm2, %v6746_v33, %v6750_v44  ;;  %vm16839_vm2 = vmmov %vm16833_vm6 }
 0x3c3   : > { %7235 = vmatmul.bf16.gmra.mxu2 %v7130_v19  ;;  %v15807_v25 = vor.u32 %v7911_v2, %v7910_v14  ;;  %v15836_v19 = vld [vmem:[#allocation2 + $0x74] sm:$0xff]  ;;  %v15847_v14 = vld [vmem:[#allocation2 + $0x40] sm:$0xff] }
 0x3c4   : > { %7645 = vmatmul.bf16.gmra.mxu3 %v7515_v41  ;;  %v15832_v46 = vor.u32 %v7132_v57, %v7131_v49  ;;  %v15834_v35 = vor.u32 %v7522_v53, %v7519_v30  ;;  %v12019_v2 = vld [vmem:[%s16519_s3 + $0x98] sm:$0xff]  ;;  %v7526_v1 = vshrl.u32 %v15836_v19, 16  ;;  %v7529_v6 = vshll.u32 %v15836_v19, 16 }
 0x3c5   : > { %v15830_v31 = vsel %vm16822_vm3, %v15749_v7, %v15807_v25  ;;  %v7731_v63 = vrot.slane %v15836_v19, 3  ;;  %8000 = vmatpush.bf16.msrb.mxu1 %v12019_v2  ;;  %vm16838_vm3 = vmmov %vm16832_vm5 }
 0x3c6   : > { %v6295_v32 = vpop.f32.mrf.mxu2  ;;  %v5840_v24 = vpop.f32.mrf.mxu0  ;;  %v7915_v57 = vrot.slane %v7529_v6, 4  ;;  %8456 = vmatpush.bf16.msrb.mxu3 %v12034_v23 }
 0x3c7   : > { %v6584_v20 = vpop.f32.mrf.mxu3  ;;  %v6331_v38 = vadd.f32 %v6295_v32, %v6176_v16  ;;  %v5875_v52 = vadd.f32 %v5840_v24, %v15441_v39  ;;  %v12027_v39 = vld [vmem:[%s16519_s3 + $0xd8] sm:$0xff]  ;;  %v6951_v24 = vrot.slane %v15847_v14, 1  ;;  %v15862_v49 = vsel %vm16826_vm13, %v7729_v60, %v7731_v63  ;;  %vm16842_vm13 = vmmov %vm16836_vm1 }
 0x3c8   : > { %8301 = vmatpush.bf16.msrb.mxu2 %v12027_v39 }
 0x3c9   : > { %v6145_v59 = vpop.f32.mrf.mxu1  ;;  %v15809_v37 = vadd.f32 %v6584_v20, %v6331_v38  ;;  %v6177_v34 = vadd.f32 %v6142_v43, %v5875_v52  ;;  %v7134_v20 = vsel %vm16824_vm9, %v15776_v58, %v15832_v46  ;;  %v6756_v58 = vshll.u32 %v15847_v14, 16  ;;  %vm16840_vm9 = vmmov %vm16834_vm4 }
 0x3ca   : > { %v6760_v52 = vshrl.u32 %v15847_v14, 16 }
 0x3cc   : > { %7041 = vmatmul.bf16.gmra.mxu1 %v6950_v47  ;;  %v7135_v60 = vrot.slane %v6760_v52, 1 }
 0x3ce   : > { %v6297_v4 = vpop.f32.mrf.mxu2  ;;  %v5843_v41 = vpop.f32.mrf.mxu0 }
 0x3cf   : > { %v6586_v43 = vpop.f32.mrf.mxu3  ;;  %v6332_v16 = vadd.f32 %v6297_v4, %v6177_v34  ;;  %v5876_v7 = vadd.f32 %v5843_v41, %v15462_v21  ;;  %v7524_v21 = vsel %vm16825_vm10, %v15778_v27, %v15834_v35  ;;  %v7914_v27 = vrot.slane %v7526_v1, 3  ;;  %vm16841_vm10 = vmmov %vm16835_vm0 }
 0x3d0   : > { %v6952_v4 = vsel %vm16827_vm7, %v6949_v15, %v6951_v24  ;;  %v7531_v41 = vrot.slane %v7529_v6, 3  ;;  %vm16843_vm7 = vmmov %vm16837_vm8 }
 0x3d1   : > { %v6147_v11 = vpop.f32.mrf.mxu1  ;;  %v15841_v32 = vadd.f32 %v6586_v43, %v6332_v16  ;;  %v6178_v38 = vadd.f32 %v6145_v59, %v5876_v7  ;;  %6872 = vmatmul.bf16.gmra.mxu0 %v6751_v62  ;;  %v7916_v36 = vor.u32 %v7915_v57, %v7914_v27  ;;  %v7136_v43 = vrot.slane %v6756_v58, 2  ;;  %v15896_v27 = vld [vmem:[#allocation2 + $0x48] sm:$0xff]  ;;  %v12010_v57 = vld [vmem:[%s16519_s3 + $0x50] sm:$0xff] }
 0x3d2   : > { %v7528_v16 = vrot.slane %v7526_v1, 2  ;;  %v6758_v7 = vrot.slane %v6756_v58, 1  ;;  %v6754_v1 = vor.u32 %v6752_v9, %v6750_v44  ;;  %7803 = vmatpush.bf16.msrb.mxu0 %v12010_v57 }
 0x3d3   : > { %7240 = vmatmul.bf16.gmra.mxu2 %v7134_v20  ;;  %v15879_v33 = vsel %vm16828_vm12, %v15807_v25, %v7916_v36  ;;  %v15881_v62 = vor.u32 %v7136_v43, %v7135_v60  ;;  %vm16844_vm12 = vmmov %vm16838_vm3 }
 0x3d4   : > { %7650 = vmatmul.bf16.gmra.mxu3 %v7524_v21  ;;  %v15883_v2 = vor.u32 %v7531_v41, %v7528_v16  ;;  %v6759_v58 = vsel %vm16829_vm15, %v6754_v1, %v6758_v7  ;;  %vm16846_vm15 = vmmov %vm16838_vm3 }
 0x3d6   : > { %v6300_v59 = vpop.f32.mrf.mxu2  ;;  %v5845_v30 = vpop.f32.mrf.mxu0  ;;  %v7533_v9 = vsel %vm16831_vm14, %v15834_v35, %v15883_v2  ;;  %v6768_v35 = vshrl.u32 %v15896_v27, 16  ;;  %vm16849_vm14 = vmmov %vm16834_vm4 }
 0x3d7   : > { %v6589_v47 = vpop.f32.mrf.mxu3  ;;  %v6333_v34 = vadd.f32 %v6300_v59, %v6178_v38  ;;  %v5877_v53 = vadd.f32 %v5845_v30, %v15473_v61  ;;  %v12026_v61 = vld [vmem:[%s16519_s3 + $0xd0] sm:$0xff] }
 0x3d8   : > { %8302 = vmatpush.bf16.msrb.mxu2 %v12026_v61 }
 0x3d9   : > { %v6150_v39 = vpop.f32.mrf.mxu1  ;;  %v15865_v29 = vadd.f32 %v6589_v47, %v6333_v34  ;;  %v6179_v19 = vadd.f32 %v6147_v11, %v5877_v53  ;;  %v15885_v11 = vld [vmem:[#allocation2 + $0x7c] sm:$0xff]  ;;  %v7138_v47 = vsel %vm16830_vm11, %v15832_v46, %v15881_v62  ;;  %v12018_v34 = vld [vmem:[%s16519_s3 + $0x90] sm:$0xff]  ;;  %v6764_v53 = vshll.u32 %v15896_v27, 16  ;;  %vm16848_vm11 = vmmov %vm16839_vm2 }
 0x3da   : > { %v7535_v44 = vshrl.u32 %v15885_v11, 16  ;;  %v7538_v46 = vshll.u32 %v15885_v11, 16  ;;  %v7733_v30 = vrot.slane %v15885_v11, 3  ;;  %8001 = vmatpush.bf16.msrb.mxu1 %v12018_v34 }
 0x3dc   : > { %7046 = vmatmul.bf16.gmra.mxu1 %v6952_v4  ;;  %v15919_v43 = vsel %vm16832_vm5, %v7731_v63, %v7733_v30  ;;  %v7919_v16 = vrot.slane %v7538_v46, 4  ;;  %v7139_v63 = vrot.slane %v6768_v35, 1  ;;  %v7540_v57 = vrot.slane %v7538_v46, 3  ;;  %vm16851_vm5 = vmmov %vm16835_vm0 }
 0x3de   : > { %v6302_v15 = vpop.f32.mrf.mxu2  ;;  %v5848_v21 = vpop.f32.mrf.mxu0 }
 0x3df   : > { %v6591_v20 = vpop.f32.mrf.mxu3  ;;  %v6334_v38 = vadd.f32 %v6302_v15, %v6179_v19  ;;  %v5878_v6 = vadd.f32 %v5848_v21, %v15494_v48  ;;  %v7918_v19 = vrot.slane %v7535_v44, 3 }
 0x3e1   : > { %v6152_v25 = vpop.f32.mrf.mxu1  ;;  %v15890_v59 = vadd.f32 %v6591_v20, %v6334_v38  ;;  %v6180_v48 = vadd.f32 %v6150_v39, %v5878_v6  ;;  %6877 = vmatmul.bf16.gmra.mxu0 %v6759_v58  ;;  %v6953_v39 = vrot.slane %v15896_v27, 1  ;;  %v7920_v38 = vor.u32 %v7919_v16, %v7918_v19 }
 0x3e2   : > { %v7140_v6 = vrot.slane %v6764_v53, 2 }
 0x3e3   : > { %7245 = vmatmul.bf16.gmra.mxu2 %v7138_v47  ;;  %v6954_v1 = vsel %vm16833_vm6, %v6951_v24, %v6953_v39  ;;  %v7537_v47 = vrot.slane %v7535_v44, 2  ;;  %v15932_v23 = vsel %vm16834_vm4, %v7916_v36, %v7920_v38  ;;  %vm16852_vm6 = vmmov %vm16836_vm1 }
 0x3e4   : > { %7655 = vmatmul.bf16.gmra.mxu3 %v7533_v9  ;;  %vm16853_vm4 = vmmov %vm16843_vm7 }
 0x3e6   : > { %v6305_v4 = vpop.f32.mrf.mxu2  ;;  %v5850_v61 = vpop.f32.mrf.mxu0 }
 0x3e7   : > { %v6594_v60 = vpop.f32.mrf.mxu3  ;;  %v6335_v41 = vadd.f32 %v6305_v4, %v6180_v48  ;;  %v5879_v15 = vadd.f32 %v5850_v61, %v15504_v40  ;;  %v6766_v40 = vrot.slane %v6764_v53, 1  ;;  %v15934_v48 = vor.u32 %v7140_v6, %v7139_v63  ;;  %v12025_v61 = vld [vmem:[%s16519_s3 + $0xc8] sm:$0xff] }
 0x3e8   : > { %v15936_v4 = vor.u32 %v7540_v57, %v7537_v47  ;;  %8303 = vmatpush.bf16.msrb.mxu2 %v12025_v61 }
 0x3e9   : > { %v6155_v20 = vpop.f32.mrf.mxu1  ;;  %v15922_v21 = vadd.f32 %v6594_v60, %v6335_v41  ;;  %v6181_v58 = vadd.f32 %v6152_v25, %v5879_v15  ;;  %v15938_v60 = vld [vmem:[#allocation2 + $0x84] sm:$0xff]  ;;  %v6762_v25 = vor.u32 %v6760_v52, %v6758_v7  ;;  %v7142_v16 = vsel %vm16836_vm1, %v15881_v62, %v15934_v48  ;;  %v15949_v41 = vld [vmem:[#allocation2 + $0x50] sm:$0xff]  ;;  %vm16856_vm1 = vmmov %vm16851_vm5 }
 0x3ea   : > { %v7544_v14 = vshrl.u32 %v15938_v60, 16  ;;  %v7547_v52 = vshll.u32 %v15938_v60, 16  ;;  %v12009_v7 = vld [vmem:[%s16519_s3 + $0x48] sm:$0xff]  ;;  %v6955_v63 = vrot.slane %v15949_v41, 1  ;;  %v16576_v6 = vshrl.u32 %v15949_v41, 16 }
 0x3eb   : > { %v6767_v53 = vsel %vm16835_vm0, %v6762_v25, %v6766_v40  ;;  %v12033_v62 = vld [vmem:[%s16519_s3 + $0x108] sm:$0xff]  ;;  %7804 = vmatpush.bf16.msrb.mxu0 %v12009_v7  ;;  %vm16854_vm0 = vmmov %vm16839_vm2 }
 0x3ec   : > { %7051 = vmatmul.bf16.gmra.mxu1 %v6954_v1  ;;  %v6772_v1 = vshll.u32 %v15949_v41, 16  ;;  %8457 = vmatpush.bf16.msrb.mxu3 %v12033_v62  ;;  %v6956_v11 = vsel %vm16839_vm2, %v6953_v39, %v6955_v63  ;;  %v7549_v7 = vrot.slane %v7547_v52, 3  ;;  %vm16859_vm2 = vmmov %vm16840_vm9 }
 0x3ee   : > { %v6307_v9 = vpop.f32.mrf.mxu2  ;;  %v5853_v19 = vpop.f32.mrf.mxu0  ;;  %v7144_v61 = vrot.slane %v6772_v1, 2  ;;  %v15995_v62 = vrot.slane %v6772_v1, 1 }
 0x3ef   : > { %v6596_v34 = vpop.f32.mrf.mxu3  ;;  %v6336_v24 = vadd.f32 %v6307_v9, %v6181_v58  ;;  %v5880_v44 = vadd.f32 %v5853_v19, %v15527_v55  ;;  %v7542_v55 = vsel %vm16837_vm8, %v15883_v2, %v15936_v4  ;;  %v7735_v2 = vrot.slane %v15938_v60, 3  ;;  %vm16857_vm8 = vmmov %vm16852_vm6 }
 0x3f0   : > { %v7922_v9 = vrot.slane %v7544_v14, 3 }
 0x3f1   : > { %v6157_v46 = vpop.f32.mrf.mxu1  ;;  %v15943_v36 = vadd.f32 %v6596_v34, %v6336_v24  ;;  %v6182_v15 = vadd.f32 %v6155_v20, %v5880_v44  ;;  %6882 = vmatmul.bf16.gmra.mxu0 %v6767_v53  ;;  %v12017_v20 = vld [vmem:[%s16519_s3 + $0x88] sm:$0xff]  ;;  %v15977_v57 = vsel %vm16838_vm3, %v7733_v30, %v7735_v2  ;;  %v7923_v34 = vrot.slane %v7547_v52, 4  ;;  %vm16858_vm3 = vmmov %vm16853_vm4 }
 0x3f2   : > { %8002 = vmatpush.bf16.msrb.mxu1 %v12017_v20  ;;  %v7143_v30 = vrot.slane %v16576_v6, 1 }
 0x3f3   : > { %7250 = vmatmul.bf16.gmra.mxu2 %v7142_v16  ;;  %v15980_v53 = vor.u32 %v7923_v34, %v7922_v9 }
 0x3f4   : > { %7660 = vmatmul.bf16.gmra.mxu3 %v7542_v55  ;;  %v15997_v20 = vor.u32 %v7144_v61, %v7143_v30  ;;  %v7416_v30 = vld [vmem:[#allocation2 + $0x94] sm:$0x7] }
 0x3f6   : > { %v6310_v58 = vpop.f32.mrf.mxu2  ;;  %v5855_v19 = vpop.f32.mrf.mxu0 }
 0x3f7   : > { %v6599_v47 = vpop.f32.mrf.mxu3  ;;  %v6337_v24 = vadd.f32 %v6310_v58, %v6182_v15  ;;  %v5881_v25 = vadd.f32 %v5855_v19, %v15538_v3  ;;  %v7546_v15 = vrot.slane %v7544_v14, 2  ;;  %v15993_v3 = vsel %vm16840_vm9, %v7920_v38, %v15980_v53  ;;  %v11999_v58 = vld [vmem:[#allocation2 + $0x8c] sm:$0xff]  ;;  %v16004_v38 = vld [vmem:[#allocation2 + $0x58] sm:$0xff]  ;;  %vm16860_vm9 = vmmov %vm16859_vm2 }
 0x3f8   : > { %v7556_v27 = vshll.u32 %v11999_v58, 16 }
 0x3f9   : > { %v6160_v44 = vpop.f32.mrf.mxu1  ;;  %v15982_v16 = vadd.f32 %v6599_v47, %v6337_v24  ;;  %v6183_v55 = vadd.f32 %v6157_v46, %v5881_v25  ;;  %v15999_v39 = vor.u32 %v7549_v7, %v7546_v15  ;;  %v6770_v46 = vor.u32 %v6768_v35, %v6766_v40  ;;  %v12024_v35 = vld [vmem:[%s16519_s3 + $0xc0] sm:$0xff] }
 0x3fa   : > { %v7146_v25 = vsel %vm16842_vm13, %v15934_v48, %v15997_v20  ;;  %v7470_v40 = vunpack.c.l.b16 %v7416_v30  ;;  %v12008_v48 = vld [vmem:[%s16519_s3 + $0x40] sm:$0xff]  ;;  %v16577_v15 = vshrl.u32 %v16004_v38, 16  ;;  %8304 = vmatpush.bf16.msrb.mxu2 %v12024_v35  ;;  %v7558_v6 = vrot.slane %v7556_v27, 3  ;;  %vm16862_vm13 = vmmov %vm16859_vm2 }
 0x3fb   : > { %v6775_v1 = vsel %vm16841_vm10, %v6770_v46, %v15995_v62  ;;  %7805 = vmatpush.bf16.msrb.mxu0 %v12008_v48  ;;  %vm16861_vm10 = vmmov %vm16859_vm2 }
 0x3fc   : > { %7056 = vmatmul.bf16.gmra.mxu1 %v6956_v11  ;;  %v7553_v11 = vshrl.u32 %v11999_v58, 16  ;;  %v16029_v7 = vpack.c.b16 %v7470_v40, %v7470_v40  ;;  %v7147_v60 = vrot.slane %v16577_v15, 1 }
 0x3fe   : > { %v6312_v47 = vpop.f32.mrf.mxu2  ;;  %v5858_v24 = vpop.f32.mrf.mxu0 }
 0x3ff   : > { %v6601_v9 = vpop.f32.mrf.mxu3  ;;  %v6338_v34 = vadd.f32 %v6312_v47, %v6183_v55  ;;  %v5882_v14 = vadd.f32 %v5858_v24, %v15564_v50  ;;  %v7551_v50 = vsel %vm16843_vm7, %v15936_v4, %v15999_v39  ;;  %v12016_v4 = vld [vmem:[%s16519_s3 + $0x80] sm:$0xff]  ;;  %v7737_v55 = vrot.slane %v11999_v58, 3  ;;  %vm16863_vm7 = vmmov %vm16859_vm2 }
 0x400   : > { %v6780_v47 = vshll.u32 %v16004_v38, 16  ;;  %8003 = vmatpush.bf16.msrb.mxu1 %v12016_v4  ;;  %v7927_v58 = vrot.slane %v7556_v27, 4 }
 0x401   : > { %v6162_v52 = vpop.f32.mrf.mxu1  ;;  %v16006_v19 = vadd.f32 %v6601_v9, %v6338_v34  ;;  %v6184_v61 = vadd.f32 %v6160_v44, %v5882_v14  ;;  %6887 = vmatmul.bf16.gmra.mxu0 %v6775_v1  ;;  %v12032_v44 = vld [vmem:[%s16519_s3 + $0x100] sm:$0xff]  ;;  %v16035_v9 = vsel %vm16844_vm12, %v7735_v2, %v7737_v55  ;;  %v7926_v34 = vrot.slane %v7553_v11, 3  ;;  %vm16864_vm12 = vmmov %vm16859_vm2 }
 0x402   : > { %8458 = vmatpush.bf16.msrb.mxu3 %v12032_v44  ;;  %16845 = vst [vmem:[#allocation22_spill] sm:$0xff] %v16035_v9  ;;  %v6957_v14 = vrot.slane %v16004_v38, 1  ;;  %v7739_v1 = vrot.slane %v16029_v7, 3  ;;  %v7148_v2 = vrot.slane %v6780_v47, 2 }
 0x403   : > { %7255 = vmatmul.bf16.gmra.mxu2 %v7146_v25  ;;  %v16044_v48 = vor.u32 %v7927_v58, %v7926_v34  ;;  %v6782_v34 = vrot.slane %v6780_v47, 1 }
 0x404   : > { %7665 = vmatmul.bf16.gmra.mxu3 %v7551_v50  ;;  %v16047_v44 = vsel %vm16846_vm15, %v7737_v55, %v7739_v1  ;;  %vm16865_vm15 = vmmov %vm16859_vm2 }
 0x405   : > { %16847 = vst [vmem:[#allocation23_spill] sm:$0xff] %v16047_v44 }
 0x406   : > { %v6315_v24 = vpop.f32.mrf.mxu2  ;;  %v5860_v30 = vpop.f32.mrf.mxu0 }
 0x407   : > { %v6604_v46 = vpop.f32.mrf.mxu3  ;;  %v6339_v25 = vadd.f32 %v6315_v24, %v6184_v61  ;;  %v5883_v50 = vadd.f32 %v5860_v30, %v15581_v42  ;;  %v6958_v61 = vsel %vm16848_vm11, %v6955_v63, %v6957_v14  ;;  %v7555_v24 = vrot.slane %v7553_v11, 2  ;;  %v6650_v42 = vld [vmem:[#allocation2 + $0x60] sm:$0x1]  ;;  %vm16867_vm11 = vmmov %vm16859_vm2 }
 0x408   : > { %v7090_v30 = vld [vmem:[#allocation2 + $0x60] sm:$0x3]  ;;  %v6705_v58 = vunpack.c.l.b16 %v6650_v42  ;;  %v16850_v63 = vshrl.u32 %v15949_v41, 16 }
 0x409   : > { %v6165_v35 = vpop.f32.mrf.mxu1  ;;  %v16042_v40 = vadd.f32 %v6604_v46, %v6339_v25  ;;  %v6185_v4 = vadd.f32 %v6162_v52, %v5883_v50  ;;  %v16055_v46 = vsel %vm16849_vm14, %v15980_v53, %v16044_v48  ;;  %v7109_v25 = vunpack.c.l.b16 %v7090_v30  ;;  %vm16868_vm14 = vmmov %vm16859_vm2 }
 0x40a   : > { %v7149_v52 = vor.u32 %v7148_v2, %v7147_v60  ;;  %v7559_v50 = vor.u32 %v7558_v6, %v7555_v24  ;;  %v6778_v11 = vor.u32 %v16850_v63, %v15995_v62  ;;  %v6715_v47 = vpack.c.b16 %v6705_v58, %v6705_v58  ;;  %v12088_v58 = vld [vmem:[%s16519_s3 + $0x238] sm:$0xff] }
 0x40b   : > { %v7110_v42 = vpack.c.b16 %v7109_v25, %v7109_v25  ;;  %9393 = vmatpush.bf16.msra.mxu3 %v12088_v58  ;;  %v12740_v58 = vld [vmem:[#allocation2 + $0x54] sm:$0x8] }
 0x40c   : > { %7061 = vmatmul.bf16.gmra.mxu1 %v6958_v61  ;;  %v6783_v53 = vsel %vm16851_vm5, %v6778_v11, %v6782_v34  ;;  %v7150_v6 = vsel %vm16852_vm6, %v15997_v20, %v7149_v52  ;;  %v7560_v60 = vsel %vm16853_vm4, %v15999_v39, %v7559_v50  ;;  %v6959_v41 = vrot.slane %v6715_v47, 1  ;;  %v12080_v20 = vld [vmem:[%s16519_s3 + $0x1f8] sm:$0xff]  ;;  %vm16870_vm5 = vmmov %vm16859_vm2 }
 0x40d   : > { %v7152_v62 = vshrl.u32 %v7110_v42, 16  ;;  %v12056_v39 = vld [vmem:[%s16519_s3 + $0x178] sm:$0xff]  ;;  %9195 = vmatpush.bf16.msra.mxu2 %v12080_v20  ;;  %vm16871_vm6 = vmmov %vm16856_vm1 }
 0x40e   : > { %v6317_v55 = vpop.f32.mrf.mxu2  ;;  %v5863_v44 = vpop.f32.mrf.mxu0  ;;  %v6960_v63 = vsel %vm16854_vm0, %v6957_v14, %v6959_v41  ;;  %8739 = vmatpush.bf16.msra.mxu0 %v12056_v39  ;;  %v12836_v39 = vld [vmem:[#allocation2 + $0x5c] sm:$0xff]   ;;  %vm16872_vm4 = vmmov %vm16856_vm1 }
 0x40f   : > { %v6606_v1 = vpop.f32.mrf.mxu3  ;;  %v6340_v15 = vadd.f32 %v6317_v55, %v6185_v4  ;;  %v5884_v27 = vadd.f32 %v5863_v44, %v15598_v13  ;;  %v7562_v44 = vshrl.u32 %v16029_v7, 16  ;;  %v7565_v4 = vshll.u32 %v16029_v7, 16 }
 0x410   : > { %v6788_v7 = vshll.u32 %v6715_v47, 16  ;;  %v7154_v11 = vrot.slane %v7152_v62, 1  ;;  %v16855_v62 = vshrl.u32 %v16004_v38, 16 }
 0x411   : > { %v6167_v61 = vpop.f32.mrf.mxu1  ;;  %v16061_v9 = vadd.f32 %v6606_v1, %v6340_v15  ;;  %v6186_v30 = vadd.f32 %v6165_v35, %v5884_v27  ;;  %6892 = vmatmul.bf16.gmra.mxu0 %v6783_v53  ;;  %v7155_v15 = vshll.u32 %v7110_v42, 16  ;;  %v7564_v42 = vrot.slane %v7562_v44, 2 }
 0x413   : > { %7260 = vmatmul.bf16.gmra.mxu2 %v7150_v6  ;;  %v7157_v53 = vrot.slane %v7155_v15, 2  ;;  %v12072_v6 = vld [vmem:[%s16519_s3 + $0x1b8] sm:$0xff] }
 0x414   : > { %7670 = vmatmul.bf16.gmra.mxu3 %v7560_v60  ;;  %9027 = vmatpush.bf16.msra.mxu1 %v12072_v6 }
 0x415   : > { %v7158_v47 = vor.u32 %v7157_v53, %v7154_v11  ;;  %v8163_v11 = vshll.u32 %v12836_v39, 16  ;;  %v12079_v53 = vld [vmem:[%s16519_s3 + $0x1f0] sm:$0xff] }
 0x416   : > { %v6320_v13 = vpop.f32.mrf.mxu2  ;;  %v5865_v35 = vpop.f32.mrf.mxu0  ;;  %9196 = vmatpush.bf16.msra.mxu2 %v12079_v53 }
 0x417   : > { %v6609_v2 = vpop.f32.mrf.mxu3  ;;  %v6341_v24 = vadd.f32 %v6320_v13, %v6186_v30  ;;  %v5885_v25 = vadd.f32 %v5865_v35, %v15618_v26  ;;  %v7567_v30 = vrot.slane %v7565_v4, 3  ;;  %v6790_v26 = vrot.slane %v6788_v7, 1 }
 0x418   : > { %v7159_v35 = vsel %vm16857_vm8, %v7149_v52, %v7158_v47  ;;  %v12558_v52 = vld [vmem:[%s12964_s24 + $0x10] sm:$0xff]  }
 0x419   : > { %v7027_v55 = vpop.f32.mrf.mxu1  ;;  %v16080_v1 = vadd.f32 %v6609_v2, %v6341_v24  ;;  %v6187_v27 = vadd.f32 %v6167_v61, %v5885_v25  ;;  %v7568_v2 = vor.u32 %v7567_v30, %v7564_v42  ;;  %v6786_v61 = vor.u32 %v16855_v62, %v6782_v34  ;;  %v12834_v24 = vld [vmem:[#allocation2 + $0x54] sm:$0xf0]  }
 0x41a   : > { %v12741_v25 = vor.u32 %v12834_v24, %v12740_v58  ;;  %v12301_v47 = vunpack.c.l.bf16 %v12558_v52 }
 0x41b   : > { %v6791_v4 = vsel %vm16856_vm1, %v6786_v61, %v6790_v26  ;;  %v7569_v20 = vsel %vm16858_vm3, %v7559_v50, %v7568_v2  ;;  %v12055_v2 = vld [vmem:[%s16519_s3 + $0x170] sm:$0xff]  ;;  %v12302_v61 = vunpack.c.h.bf16 %v12558_v52  ;;  %vm16873_vm1 = vmmov %vm16857_vm8 }
 0x41c   : > { %7066 = vmatmul.bf16.gmra.mxu1 %v6960_v63  ;;  %v8160_v63 = vshrl.u32 %v12836_v39, 16  ;;  %v8152_v50 = vshrl.u32 %v12741_v25, 16  ;;  %v8155_v30 = vshll.u32 %v12741_v25, 16  ;;  %8740 = vmatpush.bf16.msra.mxu0 %v12055_v2  ;;  %vm16874_vm8 = vmmov %vm16872_vm4 }
 0x41d   : > { %vm16875_vm3 = vmmov %vm16872_vm4 }
 0x41e   : > { %v6322_v60 = vpop.f32.mrf.mxu2  ;;  %v6858_v41 = vpop.f32.mrf.mxu0 }
 0x41f   : > { %v6611_v13 = vpop.f32.mrf.mxu3  ;;  %v6342_v14 = vadd.f32 %v6322_v60, %v6187_v27  ;;  %v6903_v38 = vadd.f32 %v6858_v41, %v15643_v54  ;;  %v8162_v60 = vrot.slane %v8160_v63, 3  ;;  %v8165_v54 = vrot.slane %v8163_v11, 4  ;;  %v12838_v63 = vld [vmem:[#allocation2 + $0x64] sm:$0xff]  }
 0x420   : > { %v8157_v41 = vrot.slane %v8155_v30, 4  ;;  %v8169_v30 = vshrl.u32 %v12838_v63, 16 }
 0x421   : > { %v7029_v15 = vpop.f32.mrf.mxu1  ;;  %v16088_v44 = vadd.f32 %v6611_v13, %v6342_v14  ;;  %6897 = vmatmul.bf16.gmra.mxu0 %v6791_v4  ;;  %v7072_v6 = vadd.f32 %v7027_v55, %v6903_v38  ;;  %v12087_v14 = vld [vmem:[%s16519_s3 + $0x230] sm:$0xff]  ;;  %v8154_v55 = vrot.slane %v8152_v50, 3  ;;  %v8166_v24 = vor.u32 %v8165_v54, %v8162_v60  ;;  %v12559_v60 = vld [vmem:[%s12964_s24 + $0x18] sm:$0xff]  }
 0x422   : > { %9394 = vmatpush.bf16.msra.mxu3 %v12087_v14  ;;  %v8171_v2 = vrot.slane %v8169_v30, 3 }
 0x423   : > { %7265 = vmatmul.bf16.gmra.mxu2 %v7159_v35  ;;  %v8158_v58 = vor.u32 %v8157_v41, %v8154_v55  ;;  %v12305_v55 = vunpack.c.l.bf16 %v12559_v60  ;;  %v12054_v41 = vld [vmem:[%s16519_s3 + $0x168] sm:$0xff] }
 0x424   : > { %7675 = vmatmul.bf16.gmra.mxu3 %v7569_v20  ;;  %8741 = vmatpush.bf16.msra.mxu0 %v12054_v41 }
 0x426   : > { %v7226_v34 = vpop.f32.mrf.mxu2  ;;  %v6860_v27 = vpop.f32.mrf.mxu0 }
 0x427   : > { %v16094_v7 = vpop.f32.mrf.mxu3  ;;  %v6904_v26 = vadd.f32 %v6860_v27, %v15670_v28  ;;  %v7271_v13 = vadd.f32 %v7226_v34, %v7072_v6  ;;  %v12071_v28 = vld [vmem:[%s16519_s3 + $0x1b0] sm:$0xff]  ;;  %v8167_v34 = vsel %vm16859_vm2, %v8158_v58, %v8166_v24  ;;  %v8172_v6 = vshll.u32 %v12838_v63, 16  ;;  %vm16876_vm2 = vmmov %vm16854_vm0 }
 0x428   : > { %9028 = vmatpush.bf16.msra.mxu1 %v12071_v28  ;;  %v12840_v63 = vld [vmem:[#allocation2 + $0x6c] sm:$0xff]  }
 0x429   : > { %v7032_v42 = vpop.f32.mrf.mxu1  ;;  %v7073_v62 = vadd.f32 %v7029_v15, %v6904_v26  ;;  %v7325_v35 = vadd.f32 %v12301_v47, %v7271_v13  ;;  %v12575_v15 = vld [vmem:[#allocation2 + $0x58] sm:$0xff]   ;;  %v8174_v14 = vrot.slane %v8172_v6, 4  ;;  %v8178_v6 = vshrl.u32 %v12840_v63, 16 }
 0x42b   : > { %v7343_v11 = vmax.f32 %v7325_v35, 0.0  ;;  %v8175_v35 = vor.u32 %v8174_v14, %v8171_v2  ;;  %v8180_v2 = vrot.slane %v8178_v6, 3 }
 0x42c   : > { %8004 = vmatmul.bf16.vlgmr.msrb.gmra.mxu1 %v15660_v17 }
 0x42e   : > { %v7228_v17 = vpop.f32.mrf.mxu2  ;;  %v6863_v39 = vpop.f32.mrf.mxu0 }
 0x42f   : > { %v16111_v4 = vpop.f32.mrf.mxu3  ;;  %v7272_v20 = vadd.f32 %v7228_v17, %v7073_v62  ;;  %v6905_v52 = vadd.f32 %v6863_v39, %v15691_v51  ;;  %v12078_v51 = vld [vmem:[%s16519_s3 + $0x1e8] sm:$0xff] }
 0x430   : > { %9197 = vmatpush.bf16.msra.mxu2 %v12078_v51  ;;  %v12053_v51 = vld [vmem:[%s16519_s3 + $0x160] sm:$0xff] }
 0x431   : > { %v7034_v25 = vpop.f32.mrf.mxu1  ;;  %v7326_v38 = vadd.f32 %v12302_v61, %v7272_v20  ;;  %7806 = vmatmul.bf16.vlgmr.msrb.gmra.mxu0 %v15637_v22  ;;  %v7074_v13 = vadd.f32 %v7032_v42, %v6905_v52  ;;  %v12086_v42 = vld [vmem:[%s16519_s3 + $0x228] sm:$0xff]  ;;  %v12306_v61 = vunpack.c.h.bf16 %v12559_v60  ;;  %v12560_v60 = vld [vmem:[%s12964_s24 + $0x20] sm:$0xff]  }
 0x432   : > { %9395 = vmatpush.bf16.msra.mxu3 %v12086_v42  ;;  %v12310_v42 = vunpack.c.h.bf16 %v12560_v60  ;;  %8742 = vmatpush.bf16.msra.mxu0 %v12053_v51 }
 0x433   : > { %v7344_v27 = vmax.f32 %v7326_v38, 0.0  ;;  %8305 = vmatmul.bf16.vlgmr.msrb.gmra.mxu2 %v8167_v34 }
 0x434   : > { %8459 = vmatmul.bf16.vlgmr.msrb.gmra.mxu3 %v12575_v15  ;;  %v16144_v15 = vld [vmem:[#allocation2 + $0x60] sm:$0xff]  }
 0x435   : > { %v12338_v53 = vpack.c.bf16 %v7344_v27, %v7343_v11 }
 0x436   : > { %v7231_v50 = vpop.f32.mrf.mxu2  ;;  %v6865_v26 = vpop.f32.mrf.mxu0 }
 0x437   : > { %v16122_v22 = vpop.f32.mrf.mxu3  ;;  %12339 = vst [vmem:[%s16119_s11] sm:$0xff] %v12338_v53   ;;  %v6906_v47 = vadd.f32 %v6865_v26, %v15727_v45  ;;  %v7273_v28 = vadd.f32 %v7231_v50, %v7074_v13  ;;  %v12070_v45 = vld [vmem:[%s16519_s3 + $0x1a8] sm:$0xff]  ;;  %v8181_v26 = vshll.u32 %v12840_v63, 16 }
 0x438   : > { %9029 = vmatpush.bf16.msra.mxu1 %v12070_v45 }
 0x439   : > { %v7037_v54 = vpop.f32.mrf.mxu1  ;;  %v7075_v62 = vadd.f32 %v7034_v25, %v6906_v47  ;;  %v7327_v20 = vadd.f32 %v12305_v55, %v7273_v28  ;;  %v8176_v25 = vsel %vm16860_vm9, %v8166_v24, %v8175_v35  ;;  %v8183_v14 = vrot.slane %v8181_v26, 4  ;;  %vm16877_vm9 = vmmov %vm16873_vm1 }
 0x43a   : > { %v12309_v55 = vunpack.c.l.bf16 %v12560_v60 }
 0x43b   : > { %v7345_v11 = vmax.f32 %v7327_v20, 0.0 }
 0x43c   : > { %8009 = vmatmul.bf16.gmra.mxu1 %v15724_v0 }
 0x43e   : > { %v7233_v0 = vpop.f32.mrf.mxu2  ;;  %v6868_v58 = vpop.f32.mrf.mxu0 }
 0x43f   : > { %v16140_v17 = vpop.f32.mrf.mxu3  ;;  %v7274_v39 = vadd.f32 %v7233_v0, %v7075_v62  ;;  %v6907_v52 = vadd.f32 %v6868_v58, %v15751_v18  ;;  %v12077_v18 = vld [vmem:[%s16519_s3 + $0x1e0] sm:$0xff]  ;;  %v8184_v62 = vor.u32 %v8183_v14, %v8180_v2 }
 0x440   : > { %9198 = vmatpush.bf16.msra.mxu2 %v12077_v18 }
 0x441   : > { %v7039_v38 = vpop.f32.mrf.mxu1  ;;  %v7328_v34 = vadd.f32 %v12306_v61, %v7274_v39  ;;  %7811 = vmatmul.bf16.gmra.mxu0 %v15710_v12  ;;  %v7076_v13 = vadd.f32 %v7037_v54, %v6907_v52  ;;  %v12085_v54 = vld [vmem:[%s16519_s3 + $0x220] sm:$0xff] }
 0x442   : > { %9396 = vmatpush.bf16.msra.mxu3 %v12085_v54 }
 0x443   : > { %v7346_v27 = vmax.f32 %v7328_v34, 0.0  ;;  %8310 = vmatmul.bf16.gmra.mxu2 %v8176_v25  ;;  %v12577_v34 = vld [vmem:[#allocation2 + $0x68] sm:$0xff]   ;;  %v12842_v25 = vld [vmem:[#allocation2 + $0x74] sm:$0xff]  }
 0x444   : > { %8464 = vmatmul.bf16.gmra.mxu3 %v16144_v15  ;;  %v8187_v6 = vshrl.u32 %v12842_v25, 16  ;;  %v8190_v26 = vshll.u32 %v12842_v25, 16 }
 0x445   : > { %v12343_v53 = vpack.c.bf16 %v7346_v27, %v7345_v11 }
 0x446   : > { %v7236_v50 = vpop.f32.mrf.mxu2  ;;  %v6870_v12 = vpop.f32.mrf.mxu0  ;;  %v8192_v2 = vrot.slane %v8190_v26, 4 }
 0x447   : > { %v16148_v30 = vpop.f32.mrf.mxu3  ;;  %12567 = vst [vmem:[%s16119_s11 + $0x8] sm:$0xff] %v12343_v53   ;;  %v6908_v47 = vadd.f32 %v6870_v12, %v15786_v8  ;;  %v7275_v28 = vadd.f32 %v7236_v50, %v7076_v13  ;;  %v12069_v8 = vld [vmem:[%s16519_s3 + $0x1a0] sm:$0xff] }
 0x448   : > { %9030 = vmatpush.bf16.msra.mxu1 %v12069_v8 }
 0x449   : > { %v7042_v24 = vpop.f32.mrf.mxu1  ;;  %v7077_v41 = vadd.f32 %v7039_v38, %v6908_v47  ;;  %v7329_v61 = vadd.f32 %v12309_v55, %v7275_v28  ;;  %v8185_v38 = vsel %vm16861_vm10, %v8175_v35, %v8184_v62  ;;  %v8189_v47 = vrot.slane %v8187_v6, 3  ;;  %v12052_v55 = vld [vmem:[%s16519_s3 + $0x158] sm:$0xff]  ;;  %vm16878_vm10 = vmmov %vm16875_vm3 }
 0x44a   : > { %8743 = vmatpush.bf16.msra.mxu0 %v12052_v55 }
 0x44b   : > { %v7347_v63 = vmax.f32 %v7329_v61, 0.0 }
 0x44c   : > { %8014 = vmatmul.bf16.gmra.mxu1 %v15771_v10 }
 0x44e   : > { %v7238_v10 = vpop.f32.mrf.mxu2  ;;  %v6873_v20 = vpop.f32.mrf.mxu0 }
 0x44f   : > { %v16166_v45 = vpop.f32.mrf.mxu3  ;;  %v7276_v0 = vadd.f32 %v7238_v10, %v7077_v41  ;;  %v6909_v53 = vadd.f32 %v6873_v20, %v15809_v37  ;;  %v12076_v37 = vld [vmem:[%s16519_s3 + $0x1d8] sm:$0xff]  ;;  %v12578_v20 = vld [vmem:[#allocation2 + $0x70] sm:$0xff]  }
 0x450   : > { %9199 = vmatpush.bf16.msra.mxu2 %v12076_v37 }
 0x451   : > { %v7044_v39 = vpop.f32.mrf.mxu1  ;;  %v7330_v58 = vadd.f32 %v12310_v42, %v7276_v0  ;;  %7816 = vmatmul.bf16.gmra.mxu0 %v15746_v5  ;;  %v12561_v5 = vld [vmem:[%s12964_s24 + $0x28] sm:$0xff]   ;;  %v7078_v13 = vadd.f32 %v7042_v24, %v6909_v53  ;;  %v12084_v24 = vld [vmem:[%s16519_s3 + $0x218] sm:$0xff] }
 0x452   : > { %v12313_v28 = vunpack.c.l.bf16 %v12561_v5  ;;  %9397 = vmatpush.bf16.msra.mxu3 %v12084_v24 }
 0x453   : > { %v7348_v11 = vmax.f32 %v7330_v58, 0.0  ;;  %8315 = vmatmul.bf16.gmra.mxu2 %v8185_v38 }
 0x454   : > { %8469 = vmatmul.bf16.gmra.mxu3 %v12577_v34 }
 0x455   : > { %v12348_v27 = vpack.c.bf16 %v7348_v11, %v7347_v63 }
 0x456   : > { %v7241_v52 = vpop.f32.mrf.mxu2  ;;  %v6875_v12 = vpop.f32.mrf.mxu0 }
 0x457   : > { %v16171_v50 = vpop.f32.mrf.mxu3  ;;  %12568 = vst [vmem:[%s16119_s11 + $0x10] sm:$0xff] %v12348_v27   ;;  %v6910_v35 = vadd.f32 %v6875_v12, %v15841_v32  ;;  %v7277_v14 = vadd.f32 %v7241_v52, %v7078_v13  ;;  %v12314_v32 = vunpack.c.h.bf16 %v12561_v5 }
 0x459   : > { %v7047_v60 = vpop.f32.mrf.mxu1  ;;  %v7079_v18 = vadd.f32 %v7044_v39, %v6910_v35  ;;  %v7331_v8 = vadd.f32 %v12313_v28, %v7277_v14  ;;  %v12844_v39 = vld [vmem:[#allocation2 + $0x7c] sm:$0xff]  }
 0x45a   : > { %v8196_v27 = vshrl.u32 %v12844_v39, 16  ;;  %v8199_v53 = vshll.u32 %v12844_v39, 16 }
 0x45b   : > { %v7349_v58 = vmax.f32 %v7331_v8, 0.0  ;;  %v12846_v8 = vld [vmem:[#allocation2 + $0x84] sm:$0xff]  }
 0x45c   : > { %8019 = vmatmul.bf16.gmra.mxu1 %v15830_v31  ;;  %v8193_v31 = vor.u32 %v8192_v2, %v8189_v47  ;;  %v8198_v5 = vrot.slane %v8196_v27, 3  ;;  %v8201_v13 = vrot.slane %v8199_v53, 4  ;;  %v12075_v47 = vld [vmem:[%s16519_s3 + $0x1d0] sm:$0xff]  ;;  %v8205_v39 = vshrl.u32 %v12846_v8, 16 }
 0x45d   : > { %9200 = vmatpush.bf16.msra.mxu2 %v12075_v47 }
 0x45e   : > { %v7243_v51 = vpop.f32.mrf.mxu2  ;;  %v6878_v42 = vpop.f32.mrf.mxu0  ;;  %v8194_v0 = vsel %vm16862_vm13, %v8184_v62, %v8193_v31  ;;  %v12562_v62 = vld [vmem:[%s12964_s24 + $0x30] sm:$0xff]   ;;  %v8207_v53 = vrot.slane %v8205_v39, 3  ;;  %vm16879_vm13 = vmmov %vm16875_vm3 }
 0x45f   : > { %v16186_v54 = vpop.f32.mrf.mxu3  ;;  %v7278_v41 = vadd.f32 %v7243_v51, %v7079_v18  ;;  %v6911_v25 = vadd.f32 %v6878_v42, %v15865_v29  ;;  %v12317_v35 = vunpack.c.l.bf16 %v12562_v62  ;;  %v12318_v14 = vunpack.c.h.bf16 %v12562_v62  ;;  %v12579_v51 = vld [vmem:[#allocation2 + $0x78] sm:$0xff]  }
 0x461   : > { %v7049_v10 = vpop.f32.mrf.mxu1  ;;  %v7332_v61 = vadd.f32 %v12314_v32, %v7278_v41  ;;  %7821 = vmatmul.bf16.gmra.mxu0 %v15804_v56  ;;  %v12068_v56 = vld [vmem:[%s16519_s3 + $0x198] sm:$0xff]  ;;  %v7080_v26 = vadd.f32 %v7047_v60, %v6911_v25  ;;  %v8202_v60 = vor.u32 %v8201_v13, %v8198_v5 }
 0x462   : > { %9031 = vmatpush.bf16.msra.mxu1 %v12068_v56 }
 0x463   : > { %v7350_v38 = vmax.f32 %v7332_v61, 0.0  ;;  %8320 = vmatmul.bf16.gmra.mxu2 %v8194_v0 }
 0x464   : > { %8474 = vmatmul.bf16.gmra.mxu3 %v12578_v20 }
 0x465   : > { %v12353_v34 = vpack.c.bf16 %v7350_v38, %v7349_v58  ;;  %v8208_v58 = vshll.u32 %v12846_v8, 16 }
 0x466   : > { %v7246_v63 = vpop.f32.mrf.mxu2  ;;  %v6880_v52 = vpop.f32.mrf.mxu0 }
 0x467   : > { %v16191_v11 = vpop.f32.mrf.mxu3  ;;  %12569 = vst [vmem:[%s16119_s11 + $0x18] sm:$0xff] %v12353_v34   ;;  %v6912_v12 = vadd.f32 %v6880_v52, %v15890_v59  ;;  %v7279_v29 = vadd.f32 %v7246_v63, %v7080_v26  ;;  %v12067_v34 = vld [vmem:[%s16519_s3 + $0x190] sm:$0xff]  ;;  %v8210_v52 = vrot.slane %v8208_v58, 4 }
 0x468   : > { %9032 = vmatpush.bf16.msra.mxu1 %v12067_v34 }
 0x469   : > { %v7052_v6 = vpop.f32.mrf.mxu1  ;;  %v7081_v2 = vadd.f32 %v7049_v10, %v6912_v12  ;;  %v7333_v55 = vadd.f32 %v12317_v35, %v7279_v29  ;;  %v8211_v29 = vor.u32 %v8210_v52, %v8207_v53 }
 0x46b   : > { %v7351_v41 = vmax.f32 %v7333_v55, 0.0  ;;  %v12848_v55 = vld [vmem:[#allocation2 + $0x8c] sm:$0xff]  }
 0x46c   : > { %8024 = vmatmul.bf16.gmra.mxu1 %v15879_v33  ;;  %v8203_v33 = vsel %vm16863_vm7, %v8193_v31, %v8202_v60  ;;  %v12083_v31 = vld [vmem:[%s16519_s3 + $0x210] sm:$0xff]  ;;  %v8217_v8 = vshll.u32 %v12848_v55, 16  ;;  %vm16880_vm7 = vmmov %vm16854_vm0 }
 0x46d   : > { %9398 = vmatpush.bf16.msra.mxu3 %v12083_v31 }
 0x46e   : > { %v7248_v28 = vpop.f32.mrf.mxu2  ;;  %v6883_v24 = vpop.f32.mrf.mxu0 }
 0x46f   : > { %v16203_v37 = vpop.f32.mrf.mxu3  ;;  %v7280_v59 = vadd.f32 %v7248_v28, %v7081_v2  ;;  %v6913_v61 = vadd.f32 %v6883_v24, %v15922_v21  ;;  %v12563_v21 = vld [vmem:[%s12964_s24 + $0x38] sm:$0xff]   ;;  %v12580_v28 = vld [vmem:[#allocation2 + $0x80] sm:$0xff]  }
 0x470   : > { %v12321_v62 = vunpack.c.l.bf16 %v12563_v21  ;;  %v12322_v12 = vunpack.c.h.bf16 %v12563_v21 }
 0x471   : > { %v7054_v18 = vpop.f32.mrf.mxu1  ;;  %v7334_v32 = vadd.f32 %v12318_v14, %v7280_v59  ;;  %7826 = vmatmul.bf16.gmra.mxu0 %v15862_v49  ;;  %v12051_v49 = vld [vmem:[%s16519_s3 + $0x150] sm:$0xff]  ;;  %v7082_v63 = vadd.f32 %v7052_v6, %v6913_v61  ;;  %v8212_v14 = vsel %vm16864_vm12, %v8202_v60, %v8211_v29  ;;  %v12050_v60 = vld [vmem:[%s16519_s3 + $0x148] sm:$0xff]  ;;  %vm16881_vm12 = vmmov %vm16873_vm1 }
 0x472   : > { %8744 = vmatpush.bf16.msra.mxu0 %v12051_v49  ;;  %v12066_v61 = vld [vmem:[%s16519_s3 + $0x188] sm:$0xff] }
 0x473   : > { %v7352_v42 = vmax.f32 %v7334_v32, 0.0  ;;  %8325 = vmatmul.bf16.gmra.mxu2 %v8203_v33  ;;  %9033 = vmatpush.bf16.msra.mxu1 %v12066_v61  ;;  %v16269_v61 = vld [vmem:[#allocation2 + $0x98] sm:$0xff]  }
 0x474   : > { %8479 = vmatmul.bf16.gmra.mxu3 %v12579_v51  ;;  %v8214_v51 = vshrl.u32 %v12848_v55, 16 }
 0x475   : > { %v12358_v10 = vpack.c.bf16 %v7352_v42, %v7351_v41  ;;  %v12082_v42 = vld [vmem:[%s16519_s3 + $0x208] sm:$0xff] }
 0x476   : > { %v7251_v0 = vpop.f32.mrf.mxu2  ;;  %v6885_v38 = vpop.f32.mrf.mxu0  ;;  %8745 = vmatpush.bf16.msra.mxu0 %v12050_v60  ;;  %v8216_v58 = vrot.slane %v8214_v51, 3  ;;  %9399 = vmatpush.bf16.msra.mxu3 %v12082_v42 }
 0x477   : > { %v16208_v20 = vpop.f32.mrf.mxu3  ;;  %12570 = vst [vmem:[%s16119_s11 + $0x20] sm:$0xff] %v12358_v10   ;;  %v6914_v27 = vadd.f32 %v6885_v38, %v15943_v36  ;;  %v7281_v56 = vadd.f32 %v7251_v0, %v7082_v63  ;;  %v8219_v38 = vrot.slane %v8217_v8, 4 }
 0x479   : > { %v7057_v25 = vpop.f32.mrf.mxu1  ;;  %v7083_v26 = vadd.f32 %v7054_v18, %v6914_v27  ;;  %v7335_v35 = vadd.f32 %v12321_v62, %v7281_v56  ;;  %v8220_v53 = vor.u32 %v8219_v38, %v8216_v58 }
 0x47c   : > { %8029 = vmatmul.bf16.gmra.mxu1 %v15932_v23  ;;  %v7353_v23 = vmax.f32 %v7335_v35, 0.0 }
 0x47e   : > { %v7253_v5 = vpop.f32.mrf.mxu2  ;;  %v6888_v6 = vpop.f32.mrf.mxu0 }
 0x47f   : > { %v16223_v13 = vpop.f32.mrf.mxu3  ;;  %v7282_v47 = vadd.f32 %v7253_v5, %v7083_v26  ;;  %v6915_v18 = vadd.f32 %v6888_v6, %v15982_v16  ;;  %v12564_v16 = vld [vmem:[%s12964_s24 + $0x40] sm:$0xff]   ;;  %v8221_v26 = vsel %vm16865_vm15, %v8211_v29, %v8220_v53  ;;  %v12849_v5 = vld [vmem:[#allocation2 + $0x94] sm:$0xff]   ;;  %vm16882_vm15 = vmmov %vm16875_vm3 }
 0x480   : > { %v12325_v31 = vunpack.c.l.bf16 %v12564_v16  ;;  %v12326_v21 = vunpack.c.h.bf16 %v12564_v16  ;;  %v8226_v55 = vshll.u32 %v12849_v5, 16  ;;  %v12073_v29 = vld [vmem:[%s16519_s3 + $0x1c0] sm:$0xff] }
 0x481   : > { %v7059_v2 = vpop.f32.mrf.mxu1  ;;  %v7336_v36 = vadd.f32 %v12322_v12, %v7282_v47  ;;  %7831 = vmatmul.bf16.gmra.mxu0 %v15919_v43  ;;  %v12074_v43 = vld [vmem:[%s16519_s3 + $0x1c8] sm:$0xff]  ;;  %v7084_v0 = vadd.f32 %v7057_v25, %v6915_v18  ;;  %v7870_v47 = vld [vmem:[#allocation2 + $0x94] sm:$0xf] }
 0x482   : > { %9201 = vmatpush.bf16.msra.mxu2 %v12074_v43  ;;  %v12581_v12 = vld [vmem:[#allocation2 + $0x88] sm:$0xff]   ;;  %v8228_v43 = vrot.slane %v8226_v55, 4 }
 0x483   : > { %v7354_v59 = vmax.f32 %v7336_v36, 0.0  ;;  %8330 = vmatmul.bf16.gmra.mxu2 %v8212_v14 }
 0x484   : > { %8484 = vmatmul.bf16.gmra.mxu3 %v12580_v28  ;;  %v8223_v28 = vshrl.u32 %v12849_v5, 16 }
 0x485   : > { %v12363_v24 = vpack.c.bf16 %v7354_v59, %v7353_v23  ;;  %v12049_v59 = vld [vmem:[%s16519_s3 + $0x140] sm:$0xff] }
 0x486   : > { %v7256_v32 = vpop.f32.mrf.mxu2  ;;  %v6890_v41 = vpop.f32.mrf.mxu0  ;;  %9202 = vmatpush.bf16.msra.mxu2 %v12073_v29  ;;  %8746 = vmatpush.bf16.msra.mxu0 %v12049_v59 }
 0x487   : > { %v16228_v33 = vpop.f32.mrf.mxu3  ;;  %12571 = vst [vmem:[%s16119_s11 + $0x28] sm:$0xff] %v12363_v24   ;;  %v6916_v39 = vadd.f32 %v6890_v41, %v16006_v19  ;;  %v7283_v49 = vadd.f32 %v7256_v32, %v7084_v0  ;;  %v12565_v24 = vld [vmem:[%s12964_s24 + $0x48] sm:$0xff]   ;;  %v12065_v32 = vld [vmem:[%s16519_s3 + $0x180] sm:$0xff]  ;;  %v8225_v41 = vrot.slane %v8223_v28, 3 }
 0x488   : > { %9034 = vmatpush.bf16.msra.mxu1 %v12065_v32  ;;  %v12329_v16 = vunpack.c.l.bf16 %v12565_v24 }
 0x489   : > { %v7062_v10 = vpop.f32.mrf.mxu1  ;;  %v7085_v34 = vadd.f32 %v7059_v2, %v6916_v39  ;;  %v7337_v52 = vadd.f32 %v12325_v31, %v7283_v49  ;;  %v12330_v39 = vunpack.c.h.bf16 %v12565_v24  ;;  %v12415_v31 = vunpack.c.h.b16 %v16269_v61 }
 0x48b   : > { %v7355_v35 = vmax.f32 %v7337_v52, 0.0 }
 0x48c   : > { %8034 = vmatmul.bf16.gmra.mxu1 %v15993_v3 }
 0x48e   : > { %v7258_v63 = vpop.f32.mrf.mxu2  ;;  %v6893_v56 = vpop.f32.mrf.mxu0 }
 0x48f   : > { %v16246_v27 = vpop.f32.mrf.mxu3  ;;  %v7284_v25 = vadd.f32 %v7258_v63, %v7085_v34  ;;  %v6917_v2 = vadd.f32 %v6893_v56, %v16042_v40  ;;  %v12081_v40 = vld [vmem:[%s16519_s3 + $0x200] sm:$0xff] }
 0x490   : > { %9400 = vmatpush.bf16.msra.mxu3 %v12081_v40  ;;  %v16866_v56 = vld [vmem:[#allocation22_spill] sm:$0xff]  ;;  %v16285_v40 = vld [vmem:[%s16520_s4] ss:$0 sm:$0xff] }
 0x491   : > { %v7064_v19 = vpop.f32.mrf.mxu1  ;;  %v7338_v62 = vadd.f32 %v12326_v21, %v7284_v25  ;;  %7836 = vmatmul.bf16.gmra.mxu0 %v15977_v57  ;;  %v7888_v57 = vunpack.c.l.b16 %v7870_v47  ;;  %v7086_v51 = vadd.f32 %v7062_v10, %v6917_v2  ;;  %v8229_v10 = vor.u32 %v8228_v43, %v8225_v41 }
 0x493   : > { %v7356_v3 = vmax.f32 %v7338_v62, 0.0  ;;  %8335 = vmatmul.bf16.gmra.mxu2 %v8221_v26  ;;  %v7889_v60 = vpack.c.b16 %v7888_v57, %v7888_v57  ;;  %v12566_v57 = vld [vmem:[%s12964_s24 + $0x50] sm:$0xff]  }
 0x494   : > { %8489 = vmatmul.bf16.gmra.mxu3 %v12581_v12  ;;  %v8150_v12 = vpack.c.b16 %v12415_v31, %v12415_v31  ;;  %v12334_v43 = vunpack.c.h.bf16 %v12566_v57 }
 0x495   : > { %v12368_v6 = vpack.c.bf16 %v7356_v3, %v7355_v35  ;;  %v7934_v49 = vshll.u32 %v7889_v60, 16 }
 0x496   : > { %v7261_v36 = vpop.f32.mrf.mxu2  ;;  %v6895_v23 = vpop.f32.mrf.mxu0  ;;  %v8232_v28 = vshrl.u32 %v8150_v12, 16  ;;  %v8235_v55 = vshll.u32 %v8150_v12, 16 }
 0x497   : > { %v16251_v14 = vpop.f32.mrf.mxu3  ;;  %12572 = vst [vmem:[%s16119_s11 + $0x30] sm:$0xff] %v12368_v6   ;;  %v6918_v8 = vadd.f32 %v6895_v23, %v16061_v9  ;;  %v7285_v42 = vadd.f32 %v7261_v36, %v7086_v51  ;;  %v7931_v9 = vshrl.u32 %v7889_v60, 16  ;;  %v7936_v26 = vrot.slane %v7934_v49, 4 }
 0x498   : > { %v8234_v24 = vrot.slane %v8232_v28, 3  ;;  %v8237_v32 = vrot.slane %v8235_v55, 4  ;;  %v8897_v49 = vshll.u32 %v16144_v15, 16 }
 0x499   : > { %v7067_v18 = vpop.f32.mrf.mxu1  ;;  %v7087_v0 = vadd.f32 %v7064_v19, %v6918_v8  ;;  %v7339_v34 = vadd.f32 %v12329_v16, %v7285_v42  ;;  %v12582_v19 = vld [vmem:[#allocation2 + $0x90] sm:$0xff]   ;;  %v7933_v62 = vrot.slane %v7931_v9, 3  ;;  %v12333_v8 = vunpack.c.l.bf16 %v12566_v57  ;;  %v16293_v16 = vld [vmem:[#allocation2 + $0x68] sm:$0xff] }
 0x49a   : > { %v8238_v42 = vor.u32 %v8237_v32, %v8234_v24 }
 0x49b   : > { %v7357_v5 = vmax.f32 %v7339_v34, 0.0  ;;  %v7937_v36 = vor.u32 %v7936_v26, %v7933_v62  ;;  %v12585_v34 = vld [vmem:[#allocation2 + $0x60] sm:$0xf0]  ;;  %v8899_v62 = vrot.slane %v8897_v49, 1  ;;  %v16314_v49 = vld [vmem:[#allocation2 + $0x70] sm:$0xff] }
 0x49c   : > { %8039 = vmatmul.bf16.gmra.mxu1 %v16055_v46  ;;  %v8230_v46 = vsel %vm16867_vm11, %v8220_v53, %v8229_v10  ;;  %vm16883_vm11 = vmmov %vm16875_vm3 }
 0x49e   : > { %v7263_v58 = vpop.f32.mrf.mxu2  ;;  %v6898_v63 = vpop.f32.mrf.mxu0 }
 0x49f   : > { %v16271_v38 = vpop.f32.mrf.mxu3  ;;  %v7286_v21 = vadd.f32 %v7263_v58, %v7087_v0  ;;  %v6919_v47 = vadd.f32 %v6898_v63, %v16080_v1  ;;  %v7938_v1 = vsel %vm16868_vm14, %v16044_v48, %v7937_v36  ;;  %v8906_v36 = vshrl.u32 %v16293_v16, 16  ;;  %vm16884_vm14 = vmmov %vm16854_vm0 }
 0x4a1   : > { %v7069_v52 = vpop.f32.mrf.mxu1  ;;  %v7340_v25 = vadd.f32 %v12330_v39, %v7286_v21  ;;  %7841 = vmatmul.bf16.gmra.mxu0 %v16866_v56  ;;  %v7088_v29 = vadd.f32 %v7067_v18, %v6919_v47  ;;  %v7684_v18 = vadd.f32 %v16285_v40, %v16094_v7  ;;  %v12586_v21 = vld [vmem:[#allocation2 + $0x60] sm:$0xe]  ;;  %v8239_v7 = vsel %vm16870_vm5, %v8229_v10, %v8238_v42  ;;  %vm16885_vm5 = vmmov %vm16873_vm1 }
 0x4a2   : > { %v12587_v26 = vor.u32 %v12586_v21, %v12585_v34  ;;  %v8895_v10 = vshrl.u32 %v16144_v15, 16  ;;  %v9295_v15 = vrot.slane %v8906_v36, 1  ;;  %v7686_v42 = vadd.f32 %v16285_v40, %v16122_v22 }
 0x4a3   : > { %v7358_v35 = vmax.f32 %v7340_v25, 0.0  ;;  %8340 = vmatmul.bf16.gmra.mxu2 %v8230_v46  ;;  %v8902_v25 = vshll.u32 %v16293_v16, 16 }
 0x4a4   : > { %8494 = vmatmul.bf16.gmra.mxu3 %v12582_v19  ;;  %v12040_v19 = vld [vmem:[#allocation2 + $0x58] sm:$0xff] }
 0x4a5   : > { %v12373_v3 = vpack.c.bf16 %v7358_v35, %v7357_v5  ;;  %v16300_v5 = vld [vmem:[#allocation2 + $0x60] sm:$0xff]  ;;  %v7685_v35 = vadd.f32 %v16285_v40, %v16111_v4 }
 0x4a6   : > { %v7266_v6 = vpop.f32.mrf.mxu2  ;;  %v6900_v53 = vpop.f32.mrf.mxu0  ;;  %v8614_v4 = vshll.u32 %v16300_v5, 16 }
 0x4a7   : > { %v16277_v2 = vpop.f32.mrf.mxu3  ;;  %12573 = vst [vmem:[%s16119_s11 + $0x38] sm:$0xff] %v12373_v3   ;;  %v6920_v59 = vadd.f32 %v6900_v53, %v16088_v44  ;;  %v7287_v51 = vadd.f32 %v7266_v6, %v7088_v29  ;;  %v8904_v6 = vrot.slane %v8902_v25, 1  ;;  %v9288_v29 = vshrl.u32 %v12587_v26, 16 }
 0x4a9   : > { %v8005_v23 = vpop.f32.mrf.mxu1  ;;  %v7089_v41 = vadd.f32 %v7069_v52, %v6920_v59  ;;  %v7341_v0 = vadd.f32 %v12333_v8, %v7287_v51  ;;  %v16869_v52 = vld [vmem:[#allocation23_spill] sm:$0xff]  ;;  %v9291_v59 = vshll.u32 %v12587_v26, 16  ;;  %v9296_v51 = vrot.slane %v8902_v25, 2 }
 0x4ab   : > { %v7359_v56 = vmax.f32 %v7341_v0, 0.0 }
 0x4ac   : > { %8044 = vmatmul.bf16.gmra.mxu1 %v7938_v1 }
 0x4ae   : > { %v7268_v60 = vpop.f32.mrf.mxu2  ;;  %v7807_v58 = vpop.f32.mrf.mxu0 }
 0x4af   : > { %v16291_v44 = vpop.f32.mrf.mxu3  ;;  %v7288_v39 = vadd.f32 %v7268_v60, %v7089_v41  ;;  %v7852_v48 = vadd.f32 %v7807_v58, %v7684_v18  ;;  %v9290_v41 = vrot.slane %v9288_v29, 1  ;;  %v8607_v18 = vshrl.u32 %v12040_v19, 16 }
 0x4b0   : > { %v8616_v60 = vrot.slane %v8614_v4, 1  ;;  %v9120_v58 = vrot.slane %v16293_v16, 1 }
 0x4b1   : > { %v8007_v9 = vpop.f32.mrf.mxu1  ;;  %v7342_v31 = vadd.f32 %v12334_v43, %v7288_v39  ;;  %v8050_v63 = vadd.f32 %v8005_v23, %v7852_v48  ;;  %7846 = vmatmul.bf16.gmra.mxu0 %v16869_v52  ;;  %v8900_v23 = vor.u32 %v8899_v62, %v8895_v10  ;;  %v9293_v43 = vrot.slane %v9291_v59, 2  ;;  %v16322_v62 = vld [vmem:[#allocation2 + $0x68] sm:$0xff] }
 0x4b2   : > { %v9297_v48 = vor.u32 %v9296_v51, %v9295_v15  ;;  %v7688_v15 = vadd.f32 %v16285_v40, %v16148_v30 }
 0x4b3   : > { %v7360_v46 = vmax.f32 %v7342_v31, 0.0  ;;  %8345 = vmatmul.bf16.gmra.mxu2 %v8239_v7  ;;  %v8905_v32 = vsel %vm16871_vm6, %v8900_v23, %v8904_v6  ;;  %v9294_v52 = vor.u32 %v9293_v43, %v9290_v41  ;;  %v8622_v23 = vshll.u32 %v16322_v62, 16  ;;  %v16335_v41 = vld [vmem:[#allocation2 + $0x78] sm:$0xff]  ;;  %vm16886_vm6 = vmmov %vm16875_vm3 }
 0x4b4   : > { %8499 = vmatmul.bf16.gmra.mxu3 %v16269_v61  ;;  %v8609_v61 = vshll.u32 %v12040_v19, 16  ;;  %v8910_v19 = vshll.u32 %v16314_v49, 16 }
 0x4b5   : > { %v12378_v12 = vpack.c.bf16 %v7360_v46, %v7359_v56  ;;  %v9298_v16 = vsel %vm16873_vm1, %v9294_v52, %v9297_v48 }
 0x4b6   : > { %v8306_v3 = vpop.f32.mrf.mxu2  ;;  %v7809_v55 = vpop.f32.mrf.mxu0  ;;  %v8611_v8 = vrot.slane %v8609_v61, 1 }
 0x4b7   : > { %v8460_v47 = vpop.f32.mrf.mxu3  ;;  %12574 = vst [vmem:[%s16119_s11 + $0x40] sm:$0xff] %v12378_v12   ;;  %v8351_v28 = vadd.f32 %v8306_v3, %v8050_v63  ;;  %v7853_v53 = vadd.f32 %v7809_v55, %v7685_v35  ;;  %v9119_v63 = vrot.slane %v12587_v26, 1  ;;  %v7687_v26 = vadd.f32 %v16285_v40, %v16140_v17 }
 0x4b8   : > { %v8612_v34 = vor.u32 %v8611_v8, %v8607_v18  ;;  %v8912_v3 = vrot.slane %v8910_v19, 1  ;;  %v8618_v17 = vshrl.u32 %v16300_v5, 16 }
 0x4b9   : > { %v8010_v57 = vpop.f32.mrf.mxu1  ;;  %v16307_v1 = vadd.f32 %v8460_v47, %v8351_v28  ;;  %v8051_v24 = vadd.f32 %v8007_v9, %v7853_v53  ;;  %v9121_v22 = vsel %vm16854_vm0, %v9119_v63, %v9120_v58  ;;  %v8914_v47 = vshrl.u32 %v16314_v49, 16 }
 0x4ba   : > { %v8617_v56 = vsel %vm16872_vm4, %v8612_v34, %v8616_v60  ;;  %v8908_v53 = vor.u32 %v8906_v36, %v8904_v6  ;;  %v9122_v6 = vrot.slane %v16314_v49, 1  ;;  %v8918_v49 = vshll.u32 %v16335_v41, 16  ;;  %vm16887_vm4 = vmmov %vm16875_vm3 }
 0x4bb   : > { %v9299_v4 = vrot.slane %v8914_v47, 1 }
 0x4bc   : > { %9035 = vmatmul.bf16.vlgmr.msra.gmra.mxu1 %v8905_v32  ;;  %v8913_v59 = vsel %vm16874_vm8, %v8908_v53, %v8912_v3  ;;  %v8624_v32 = vrot.slane %v8622_v23, 1  ;;  %v9123_v30 = vsel %vm16876_vm2, %v9120_v58, %v9122_v6  ;;  %vm16888_vm8 = vmmov %vm16875_vm3 }
 0x4bd   : > { %vm16889_vm2 = vmmov %vm16854_vm0 }
 0x4be   : > { %v8308_v0 = vpop.f32.mrf.mxu2  ;;  %v7812_v31 = vpop.f32.mrf.mxu0 }
 0x4bf   : > { %v8462_v39 = vpop.f32.mrf.mxu3  ;;  %v8352_v9 = vadd.f32 %v8308_v0, %v8051_v24  ;;  %v7854_v21 = vadd.f32 %v7812_v31, %v7686_v42  ;;  %v9300_v24 = vrot.slane %v8910_v19, 2  ;;  %v8620_v42 = vor.u32 %v8618_v17, %v8616_v60 }
 0x4c0   : > { %v7689_v60 = vadd.f32 %v16285_v40, %v16166_v45  ;;  %v8916_v19 = vor.u32 %v8914_v47, %v8912_v3  ;;  %v8626_v45 = vshrl.u32 %v16322_v62, 16  ;;  %v9124_v3 = vrot.slane %v16335_v41, 1 }
 0x4c1   : > { %v8012_v7 = vpop.f32.mrf.mxu1  ;;  %v16316_v25 = vadd.f32 %v8462_v39, %v8352_v9  ;;  %v8052_v46 = vadd.f32 %v8010_v57, %v7854_v21  ;;  %8747 = vmatmul.bf16.vlgmr.msra.gmra.mxu0 %v8617_v56  ;;  %v9301_v36 = vor.u32 %v9300_v24, %v9299_v4  ;;  %v8625_v5 = vsel %vm16875_vm3, %v8620_v42, %v8624_v32  ;;  %v16343_v21 = vld [vmem:[#allocation2 + $0x70] sm:$0xff] }
 0x4c2   : > { %v8922_v56 = vshrl.u32 %v16335_v41, 16  ;;  %v8628_v24 = vor.u32 %v8626_v45, %v8624_v32  ;;  %v7691_v32 = vadd.f32 %v16285_v40, %v16186_v54  ;;  %v8634_v54 = vshrl.u32 %v16343_v21, 16 }
 0x4c3   : > { %9203 = vmatmul.bf16.vlgmr.msra.gmra.mxu2 %v9121_v22  ;;  %v9302_v34 = vsel %vm16877_vm9, %v9297_v48, %v9301_v36  ;;  %vm16890_vm9 = vmmov %vm16873_vm1 }
 0x4c4   : > { %9401 = vmatmul.bf16.vlgmr.msra.gmra.mxu3 %v9298_v16 }
 0x4c6   : > { %v8311_v12 = vpop.f32.mrf.mxu2  ;;  %v7814_v28 = vpop.f32.mrf.mxu0 }
 0x4c7   : > { %v8465_v35 = vpop.f32.mrf.mxu3  ;;  %v8353_v10 = vadd.f32 %v8311_v12, %v8052_v46  ;;  %v7855_v55 = vadd.f32 %v7814_v28, %v7687_v26  ;;  %v8630_v26 = vshll.u32 %v16343_v21, 16  ;;  %v9304_v28 = vrot.slane %v8918_v49, 2 }
 0x4c9   : > { %v8015_v61 = vpop.f32.mrf.mxu1  ;;  %v16327_v57 = vadd.f32 %v8465_v35, %v8353_v10  ;;  %v8053_v29 = vadd.f32 %v8012_v7, %v7855_v55  ;;  %v8920_v7 = vrot.slane %v8918_v49, 1  ;;  %v9303_v10 = vrot.slane %v8922_v56, 1 }
 0x4ca   : > { %v8632_v55 = vrot.slane %v8630_v26, 1 }
 0x4cb   : > { %v8921_v35 = vsel %vm16878_vm10, %v8916_v19, %v8920_v7  ;;  %v9305_v47 = vor.u32 %v9304_v28, %v9303_v10  ;;  %v8924_v49 = vor.u32 %v8922_v56, %v8920_v7  ;;  %vm16891_vm10 = vmmov %vm16875_vm3 }
 0x4cc   : > { %9040 = vmatmul.bf16.gmra.mxu1 %v8913_v59  ;;  %v8633_v62 = vsel %vm16879_vm13, %v8628_v24, %v8632_v55  ;;  %v8636_v28 = vor.u32 %v8634_v54, %v8632_v55  ;;  %v7693_v55 = vadd.f32 %v16285_v40, %v16203_v37  ;;  %vm16892_vm13 = vmmov %vm16875_vm3 }
 0x4ce   : > { %v8313_v51 = vpop.f32.mrf.mxu2  ;;  %v7817_v18 = vpop.f32.mrf.mxu0 }
 0x4cf   : > { %v8467_v8 = vpop.f32.mrf.mxu3  ;;  %v8354_v43 = vadd.f32 %v8313_v51, %v8053_v29  ;;  %v7856_v0 = vadd.f32 %v7817_v18, %v7688_v15  ;;  %v16356_v29 = vld [vmem:[#allocation2 + $0x80] sm:$0xff]  ;;  %v16364_v18 = vld [vmem:[#allocation2 + $0x78] sm:$0xff] }
 0x4d0   : > { %v8926_v41 = vshll.u32 %v16356_v29, 16  ;;  %v9126_v7 = vrot.slane %v16356_v29, 1  ;;  %v8642_v37 = vshrl.u32 %v16364_v18, 16 }
 0x4d1   : > { %v8017_v39 = vpop.f32.mrf.mxu1  ;;  %v16337_v9 = vadd.f32 %v8467_v8, %v8354_v43  ;;  %v8054_v31 = vadd.f32 %v8015_v61, %v7856_v0  ;;  %8752 = vmatmul.bf16.gmra.mxu0 %v8625_v5  ;;  %v7690_v61 = vadd.f32 %v16285_v40, %v16171_v50  ;;  %v9125_v50 = vsel %vm16880_vm7, %v9122_v6, %v9124_v3  ;;  %vm16893_vm7 = vmmov %vm16854_vm0 }
 0x4d2   : > { %v9306_v43 = vsel %vm16881_vm12, %v9301_v36, %v9305_v47  ;;  %v8930_v5 = vshrl.u32 %v16356_v29, 16  ;;  %vm16894_vm12 = vmmov %vm16873_vm1 }
 0x4d3   : > { %9208 = vmatmul.bf16.gmra.mxu2 %v9123_v30 }
 0x4d4   : > { %9406 = vmatmul.bf16.gmra.mxu3 %v9302_v34 }
 0x4d6   : > { %v8316_v63 = vpop.f32.mrf.mxu2  ;;  %v7819_v22 = vpop.f32.mrf.mxu0 }
 0x4d7   : > { %v8470_v52 = vpop.f32.mrf.mxu3  ;;  %v8355_v46 = vadd.f32 %v8316_v63, %v8054_v31  ;;  %v7857_v16 = vadd.f32 %v7819_v22, %v7689_v60  ;;  %v8638_v60 = vshll.u32 %v16364_v18, 16  ;;  %v9308_v22 = vrot.slane %v8926_v41, 2 }
 0x4d9   : > { %v8020_v58 = vpop.f32.mrf.mxu1  ;;  %v16348_v48 = vadd.f32 %v8470_v52, %v8355_v46  ;;  %v8055_v12 = vadd.f32 %v8017_v39, %v7857_v16  ;;  %v8928_v39 = vrot.slane %v8926_v41, 1  ;;  %v9307_v46 = vrot.slane %v8930_v5, 1 }
 0x4da   : > { %v8640_v16 = vrot.slane %v8638_v60, 1 }
 0x4db   : > { %v8929_v52 = vsel %vm16882_vm15, %v8924_v49, %v8928_v39  ;;  %v9309_v56 = vor.u32 %v9308_v22, %v9307_v46  ;;  %v8932_v41 = vor.u32 %v8930_v5, %v8928_v39  ;;  %vm16895_vm15 = vmmov %vm16875_vm3 }
 0x4dc   : > { %9045 = vmatmul.bf16.gmra.mxu1 %v8921_v35  ;;  %v8641_v21 = vsel %vm16883_vm11, %v8636_v28, %v8640_v16  ;;  %v8644_v22 = vor.u32 %v8642_v37, %v8640_v16  ;;  %v7695_v16 = vadd.f32 %v16285_v40, %v16223_v13  ;;  %vm16896_vm11 = vmmov %vm16875_vm3 }
 0x4de   : > { %v8318_v53 = vpop.f32.mrf.mxu2  ;;  %v7822_v4 = vpop.f32.mrf.mxu0 }
 0x4df   : > { %v8472_v23 = vpop.f32.mrf.mxu3  ;;  %v8356_v59 = vadd.f32 %v8318_v53, %v8055_v12  ;;  %v7858_v17 = vadd.f32 %v7822_v4, %v7690_v61  ;;  %v16377_v12 = vld [vmem:[#allocation2 + $0x88] sm:$0xff]  ;;  %v16385_v4 = vld [vmem:[#allocation2 + $0x80] sm:$0xff] }
 0x4e0   : > { %v8934_v29 = vshll.u32 %v16377_v12, 16  ;;  %v9128_v39 = vrot.slane %v16377_v12, 1  ;;  %v8650_v13 = vshrl.u32 %v16385_v4, 16 }
 0x4e1   : > { %v8022_v15 = vpop.f32.mrf.mxu1  ;;  %v16358_v51 = vadd.f32 %v8472_v23, %v8356_v59  ;;  %v8056_v8 = vadd.f32 %v8020_v58, %v7858_v17  ;;  %8757 = vmatmul.bf16.gmra.mxu0 %v8633_v62  ;;  %v7692_v58 = vadd.f32 %v16285_v40, %v16191_v11  ;;  %v9127_v11 = vsel %vm16884_vm14, %v9124_v3, %v9126_v7  ;;  %vm16897_vm14 = vmmov %vm16854_vm0 }
 0x4e2   : > { %v9310_v59 = vsel %vm16885_vm5, %v9305_v47, %v9309_v56  ;;  %v8938_v62 = vshrl.u32 %v16377_v12, 16  ;;  %vm16898_vm5 = vmmov %vm16873_vm1 }
 0x4e3   : > { %9213 = vmatmul.bf16.gmra.mxu2 %v9125_v50 }
 0x4e4   : > { %9411 = vmatmul.bf16.gmra.mxu3 %v9306_v43 }
 0x4e6   : > { %v8321_v42 = vpop.f32.mrf.mxu2  ;;  %v7824_v30 = vpop.f32.mrf.mxu0 }
 0x4e7   : > { %v8475_v0 = vpop.f32.mrf.mxu3  ;;  %v8357_v31 = vadd.f32 %v8321_v42, %v8056_v8  ;;  %v7859_v34 = vadd.f32 %v7824_v30, %v7691_v32  ;;  %v8646_v32 = vshll.u32 %v16385_v4, 16  ;;  %v9312_v30 = vrot.slane %v8934_v29, 2 }
 0x4e9   : > { %v8025_v6 = vpop.f32.mrf.mxu1  ;;  %v16369_v36 = vadd.f32 %v8475_v0, %v8357_v31  ;;  %v8057_v63 = vadd.f32 %v8022_v15, %v7859_v34  ;;  %v8936_v15 = vrot.slane %v8934_v29, 1  ;;  %v9311_v31 = vrot.slane %v8938_v62, 1 }
 0x4ea   : > { %v8648_v34 = vrot.slane %v8646_v32, 1 }
 0x4eb   : > { %v8937_v0 = vsel %vm16886_vm6, %v8932_v41, %v8936_v15  ;;  %v9313_v5 = vor.u32 %v9312_v30, %v9311_v31  ;;  %v8940_v29 = vor.u32 %v8938_v62, %v8936_v15  ;;  %vm16899_vm6 = vmmov %vm16875_vm3 }
 0x4ec   : > { %9050 = vmatmul.bf16.gmra.mxu1 %v8929_v52  ;;  %v8649_v18 = vsel %vm16887_vm4, %v8644_v22, %v8648_v34  ;;  %v8652_v30 = vor.u32 %v8650_v13, %v8648_v34  ;;  %v7697_v34 = vadd.f32 %v16285_v40, %v16246_v27  ;;  %vm16900_vm4 = vmmov %vm16854_vm0 }
 0x4ee   : > { %v8323_v19 = vpop.f32.mrf.mxu2  ;;  %v7827_v10 = vpop.f32.mrf.mxu0 }
 0x4ef   : > { %v8477_v26 = vpop.f32.mrf.mxu3  ;;  %v8358_v35 = vadd.f32 %v8323_v19, %v8057_v63  ;;  %v7860_v45 = vadd.f32 %v7827_v10, %v7692_v58  ;;  %v16398_v63 = vld [vmem:[#allocation2 + $0x90] sm:$0xff]  ;;  %v16406_v10 = vld [vmem:[#allocation2 + $0x88] sm:$0xff] }
 0x4f0   : > { %v8942_v12 = vshll.u32 %v16398_v63, 16  ;;  %v9130_v15 = vrot.slane %v16398_v63, 1  ;;  %v8658_v27 = vshrl.u32 %v16406_v10, 16 }
 0x4f1   : > { %v8027_v61 = vpop.f32.mrf.mxu1  ;;  %v16379_v53 = vadd.f32 %v8477_v26, %v8358_v35  ;;  %v8058_v23 = vadd.f32 %v8025_v6, %v7860_v45  ;;  %8762 = vmatmul.bf16.gmra.mxu0 %v8641_v21  ;;  %v7694_v6 = vadd.f32 %v16285_v40, %v16208_v20  ;;  %v9129_v20 = vsel %vm16854_vm0, %v9126_v7, %v9128_v39  ;;  %vm16901_vm0 = vmmov %vm16873_vm1 }
 0x4f2   : > { %v9314_v35 = vsel %vm16873_vm1, %v9309_v56, %v9313_v5  ;;  %v8946_v21 = vshrl.u32 %v16398_v63, 16  ;;  %vm16902_vm1 = vmmov %vm16875_vm3 }
 0x4f3   : > { %9218 = vmatmul.bf16.gmra.mxu2 %v9127_v11 }
 0x4f4   : > { %9416 = vmatmul.bf16.gmra.mxu3 %v9310_v59 }
 0x4f6   : > { %v8326_v24 = vpop.f32.mrf.mxu2  ;;  %v7829_v50 = vpop.f32.mrf.mxu0 }
 0x4f7   : > { %v8480_v17 = vpop.f32.mrf.mxu3  ;;  %v8359_v8 = vadd.f32 %v8326_v24, %v8058_v23  ;;  %v7861_v43 = vadd.f32 %v7829_v50, %v7693_v55  ;;  %v8654_v55 = vshll.u32 %v16406_v10, 16  ;;  %v9316_v50 = vrot.slane %v8942_v12, 2 }
 0x4f9   : > { %v8030_v3 = vpop.f32.mrf.mxu1  ;;  %v16390_v47 = vadd.f32 %v8480_v17, %v8359_v8  ;;  %v8059_v42 = vadd.f32 %v8027_v61, %v7861_v43  ;;  %v8944_v61 = vrot.slane %v8942_v12, 1  ;;  %v9315_v8 = vrot.slane %v8946_v21, 1 }
 0x4fa   : > { %v8656_v43 = vrot.slane %v8654_v55, 1 }
 0x4fb   : > { %v8945_v17 = vsel %vm16888_vm8, %v8940_v29, %v8944_v61  ;;  %v9317_v62 = vor.u32 %v9316_v50, %v9315_v8  ;;  %v8948_v12 = vor.u32 %v8946_v21, %v8944_v61 }
 0x4fc   : > { %9055 = vmatmul.bf16.gmra.mxu1 %v8937_v0  ;;  %v8657_v4 = vsel %vm16875_vm3, %v8652_v30, %v8656_v43  ;;  %v8660_v8 = vor.u32 %v8658_v27, %v8656_v43  ;;  %v8829_v43 = vld [vmem:[#allocation2 + $0xa8] sm:$0x1]  ;;  %v7699_v30 = vadd.f32 %v16285_v40, %v16271_v38 }
 0x4fe   : > { %v8328_v49 = vpop.f32.mrf.mxu2  ;;  %v7832_v46 = vpop.f32.mrf.mxu0 }
 0x4ff   : > { %v8482_v60 = vpop.f32.mrf.mxu3  ;;  %v8360_v52 = vadd.f32 %v8328_v49, %v8059_v42  ;;  %v7862_v54 = vadd.f32 %v7832_v46, %v7694_v6  ;;  %v16419_v42 = vld [vmem:[#allocation2 + $0x98] sm:$0xff]  ;;  %v16427_v46 = vld [vmem:[#allocation2 + $0x90] sm:$0xff] }
 0x500   : > { %v8950_v63 = vshll.u32 %v16419_v42, 16  ;;  %v9132_v61 = vrot.slane %v16419_v42, 1 }
 0x501   : > { %v8032_v58 = vpop.f32.mrf.mxu1  ;;  %v16400_v19 = vadd.f32 %v8482_v60, %v8360_v52  ;;  %v8060_v26 = vadd.f32 %v8030_v3, %v7862_v54  ;;  %8767 = vmatmul.bf16.gmra.mxu0 %v8649_v18  ;;  %v7696_v3 = vadd.f32 %v16285_v40, %v16228_v33  ;;  %v9131_v33 = vsel %vm16889_vm2, %v9128_v39, %v9130_v15 }
 0x502   : > { %v9318_v52 = vsel %vm16890_vm9, %v9313_v5, %v9317_v62  ;;  %v8954_v18 = vshrl.u32 %v16419_v42, 16 }
 0x503   : > { %9223 = vmatmul.bf16.gmra.mxu2 %v9129_v20 }
 0x504   : > { %9421 = vmatmul.bf16.gmra.mxu3 %v9314_v35 }
 0x506   : > { %v8331_v28 = vpop.f32.mrf.mxu2  ;;  %v7834_v11 = vpop.f32.mrf.mxu0 }
 0x507   : > { %v8485_v45 = vpop.f32.mrf.mxu3  ;;  %v8361_v23 = vadd.f32 %v8331_v28, %v8060_v26  ;;  %v7863_v59 = vadd.f32 %v7834_v11, %v7695_v16  ;;  %v8662_v16 = vshll.u32 %v16427_v46, 16  ;;  %v9320_v11 = vrot.slane %v8950_v63, 2 }
 0x509   : > { %v8035_v7 = vpop.f32.mrf.mxu1  ;;  %v16411_v56 = vadd.f32 %v8485_v45, %v8361_v23  ;;  %v8061_v24 = vadd.f32 %v8032_v58, %v7863_v59  ;;  %v8952_v58 = vrot.slane %v8950_v63, 1  ;;  %v9319_v23 = vrot.slane %v8954_v18, 1 }
 0x50a   : > { %v8664_v59 = vrot.slane %v8662_v16, 1 }
 0x50b   : > { %v8953_v45 = vsel %vm16891_vm10, %v8948_v12, %v8952_v58  ;;  %v9321_v21 = vor.u32 %v9320_v11, %v9319_v23  ;;  %v8666_v12 = vshrl.u32 %v16427_v46, 16 }
 0x50c   : > { %9060 = vmatmul.bf16.gmra.mxu1 %v8945_v17  ;;  %v8665_v10 = vsel %vm16892_vm13, %v8660_v8, %v8664_v59 }
 0x50e   : > { %v8333_v41 = vpop.f32.mrf.mxu2  ;;  %v7837_v31 = vpop.f32.mrf.mxu0 }
 0x50f   : > { %v8487_v32 = vpop.f32.mrf.mxu3  ;;  %v8362_v0 = vadd.f32 %v8333_v41, %v8061_v24  ;;  %v7864_v37 = vadd.f32 %v7837_v31, %v7696_v3  ;;  %v16440_v3 = vld [vmem:[#allocation2 + $0xa0] sm:$0xff]  ;;  %v16448_v31 = vld [vmem:[#allocation2 + $0x98] sm:$0xff] }
 0x510   : > { %v8958_v42 = vshll.u32 %v16440_v3, 16  ;;  %v9134_v11 = vrot.slane %v16440_v3, 1 }
 0x511   : > { %v8037_v6 = vpop.f32.mrf.mxu1  ;;  %v16421_v49 = vadd.f32 %v8487_v32, %v8362_v0  ;;  %v8062_v60 = vadd.f32 %v8035_v7, %v7864_v37  ;;  %8772 = vmatmul.bf16.gmra.mxu0 %v8657_v4  ;;  %v7698_v7 = vadd.f32 %v16285_v40, %v16251_v14  ;;  %v9133_v14 = vsel %vm16893_vm7, %v9130_v15, %v9132_v61 }
 0x512   : > { %v9322_v0 = vsel %vm16894_vm12, %v9317_v62, %v9321_v21  ;;  %v8956_v4 = vor.u32 %v8954_v18, %v8952_v58 }
 0x513   : > { %9228 = vmatmul.bf16.gmra.mxu2 %v9131_v33  ;;  %v8962_v33 = vshrl.u32 %v16440_v3, 16 }
 0x514   : > { %9426 = vmatmul.bf16.gmra.mxu3 %v9318_v52 }
 0x515   : > { %v9323_v38 = vrot.slane %v8962_v33, 1 }
 0x516   : > { %v8336_v22 = vpop.f32.mrf.mxu2  ;;  %v7839_v20 = vpop.f32.mrf.mxu0 }
 0x517   : > { %v8490_v54 = vpop.f32.mrf.mxu3  ;;  %v8363_v26 = vadd.f32 %v8336_v22, %v8062_v60  ;;  %v7865_v35 = vadd.f32 %v7839_v20, %v7697_v34  ;;  %v8960_v60 = vrot.slane %v8958_v42, 1  ;;  %v8883_v34 = vunpack.c.l.b16 %v8829_v43 }
 0x519   : > { %v8040_v39 = vpop.f32.mrf.mxu1  ;;  %v16432_v5 = vadd.f32 %v8490_v54, %v8363_v26  ;;  %v8063_v28 = vadd.f32 %v8037_v6, %v7865_v35  ;;  %v8670_v54 = vshll.u32 %v16448_v31, 16  ;;  %v9267_v26 = vld [vmem:[#allocation2 + $0xa8] sm:$0x3]  ;;  %v8961_v35 = vsel %vm16895_vm15, %v8956_v4, %v8960_v60 }
 0x51a   : > { %v8893_v58 = vpack.c.b16 %v8883_v34, %v8883_v34  ;;  %v9285_v18 = vunpack.c.l.b16 %v9267_v26  ;;  %v8674_v26 = vshrl.u32 %v16448_v31, 16 }
 0x51b   : > { %v8672_v16 = vrot.slane %v8670_v54, 1 }
 0x51c   : > { %9065 = vmatmul.bf16.gmra.mxu1 %v8953_v45 }
 0x51e   : > { %v8338_v29 = vpop.f32.mrf.mxu2  ;;  %v7842_v17 = vpop.f32.mrf.mxu0 }
 0x51f   : > { %v8492_v55 = vpop.f32.mrf.mxu3  ;;  %v8364_v24 = vadd.f32 %v8338_v29, %v8063_v28  ;;  %v7866_v50 = vadd.f32 %v7842_v17, %v7698_v7  ;;  %v7700_v28 = vadd.f32 %v16285_v40, %v16277_v2  ;;  %v8541_v7 = vld [vmem:[#allocation2 + $0xa0] sm:$0x1]  ;;  %v9135_v2 = vsel %vm16897_vm14, %v9132_v61, %v9134_v11 }
 0x521   : > { %v8042_v13 = vpop.f32.mrf.mxu1  ;;  %v16442_v41 = vadd.f32 %v8492_v55, %v8364_v24  ;;  %v8064_v32 = vadd.f32 %v8040_v39, %v7866_v50  ;;  %8777 = vmatmul.bf16.gmra.mxu0 %v8665_v10  ;;  %v9324_v39 = vrot.slane %v8958_v42, 2  ;;  %v8668_v24 = vor.u32 %v8666_v12, %v8664_v59 }
 0x522   : > { %v8966_v50 = vshll.u32 %v8893_v58, 16 }
 0x523   : > { %9233 = vmatmul.bf16.gmra.mxu2 %v9133_v14  ;;  %v9325_v27 = vor.u32 %v9324_v39, %v9323_v38  ;;  %v8673_v46 = vsel %vm16896_vm11, %v8668_v24, %v8672_v16 }
 0x524   : > { %9431 = vmatmul.bf16.gmra.mxu3 %v9322_v0  ;;  %v8964_v0 = vor.u32 %v8962_v33, %v8960_v60  ;;  %v8968_v42 = vrot.slane %v8966_v50, 1  ;;  %v12588_v50 = vld [vmem:[%s12964_s24 + $0x58] sm:$0xff]  }
 0x525   : > { %v9326_v3 = vsel %vm16898_vm5, %v9321_v21, %v9325_v27 }
 0x526   : > { %v8341_v37 = vpop.f32.mrf.mxu2  ;;  %v7844_v15 = vpop.f32.mrf.mxu0  ;;  %v8969_v61 = vsel %vm16899_vm6, %v8964_v0, %v8968_v42 }
 0x527   : > { %v8495_v6 = vpop.f32.mrf.mxu3  ;;  %v8365_v52 = vadd.f32 %v8341_v37, %v8064_v32  ;;  %v7867_v63 = vadd.f32 %v7844_v15, %v7699_v30  ;;  %v8595_v32 = vunpack.c.l.b16 %v8541_v7  ;;  %v7701_v37 = vadd.f32 %v16285_v40, %v16291_v44 }
 0x528   : > { %v8676_v40 = vor.u32 %v8674_v26, %v8672_v16 }
 0x529   : > { %v8045_v62 = vpop.f32.mrf.mxu1  ;;  %v16453_v22 = vadd.f32 %v8495_v6, %v8365_v52  ;;  %v8065_v20 = vadd.f32 %v8042_v13, %v7867_v63  ;;  %v9286_v13 = vpack.c.b16 %v9285_v18, %v9285_v18  ;;  %v8605_v30 = vpack.c.b16 %v8595_v32, %v8595_v32 }
 0x52b   : > { %v9328_v59 = vshrl.u32 %v9286_v13, 16  ;;  %v9331_v43 = vshll.u32 %v9286_v13, 16  ;;  %v8678_v60 = vshll.u32 %v8605_v30, 16  ;;  %v12422_v13 = vunpack.c.l.bf16 %v12588_v50 }
 0x52c   : > { %9070 = vmatmul.bf16.gmra.mxu1 %v8961_v35 }
 0x52d   : > { %v9330_v34 = vrot.slane %v9328_v59, 1  ;;  %v9333_v21 = vrot.slane %v9331_v43, 2  ;;  %v8680_v44 = vrot.slane %v8678_v60, 1 }
 0x52e   : > { %v8343_v45 = vpop.f32.mrf.mxu2  ;;  %v7847_v55 = vpop.f32.mrf.mxu0 }
 0x52f   : > { %v8497_v23 = vpop.f32.mrf.mxu3  ;;  %v8366_v29 = vadd.f32 %v8343_v45, %v8065_v20  ;;  %v7868_v17 = vadd.f32 %v7847_v55, %v7700_v28  ;;  %v9136_v20 = vrot.slane %v8893_v58, 1  ;;  %v9334_v35 = vor.u32 %v9333_v21, %v9330_v34  ;;  %v12589_v21 = vld [vmem:[%s12964_s24 + $0x60] sm:$0xff]  }
 0x531   : > { %v8047_v8 = vpop.f32.mrf.mxu1  ;;  %v16461_v10 = vadd.f32 %v8497_v23, %v8366_v29  ;;  %v8066_v14 = vadd.f32 %v8045_v62, %v7868_v17  ;;  %8782 = vmatmul.bf16.gmra.mxu0 %v8673_v46  ;;  %v9137_v28 = vsel %vm16900_vm4, %v9134_v11, %v9136_v20  ;;  %v9335_v45 = vsel %vm16901_vm0, %v9325_v27, %v9334_v35 }
 0x532   : > { %v8681_v29 = vsel %vm16902_vm1, %v8676_v40, %v8680_v44 }
 0x533   : > { %9238 = vmatmul.bf16.gmra.mxu2 %v9135_v2 }
 0x534   : > { %9436 = vmatmul.bf16.gmra.mxu3 %v9326_v3  ;;  %v12423_v3 = vunpack.c.h.bf16 %v12588_v50 }
 0x536   : > { %v8346_v6 = vpop.f32.mrf.mxu2  ;;  %v7849_v15 = vpop.f32.mrf.mxu0 }
 0x537   : > { %v8500_v4 = vpop.f32.mrf.mxu3  ;;  %v8367_v52 = vadd.f32 %v8346_v6, %v8066_v14  ;;  %v7869_v63 = vadd.f32 %v7849_v15, %v7701_v37 }
 0x539   : > { %v9036_v62 = vpop.f32.mrf.mxu1  ;;  %v16469_v54 = vadd.f32 %v8500_v4, %v8367_v52  ;;  %v8067_v33 = vadd.f32 %v8047_v8, %v7869_v63 }
 0x53c   : > { %9075 = vmatmul.bf16.gmra.mxu1 %v8969_v61 }
 0x53e   : > { %v8348_v38 = vpop.f32.mrf.mxu2  ;;  %v8748_v12 = vpop.f32.mrf.mxu0 }
 0x53f   : > { %v8502_v39 = vpop.f32.mrf.mxu3  ;;  %v8368_v18 = vadd.f32 %v8348_v38, %v8067_v33  ;;  %v8793_v31 = vadd.f32 %v8748_v12, %v16307_v1  ;;  %v12426_v33 = vunpack.c.l.bf16 %v12589_v21 }
 0x541   : > { %v9038_v23 = vpop.f32.mrf.mxu1  ;;  %v16474_v7 = vadd.f32 %v8502_v39, %v8368_v18  ;;  %8787 = vmatmul.bf16.gmra.mxu0 %v8681_v29  ;;  %v9081_v55 = vadd.f32 %v9036_v62, %v8793_v31 }
 0x543   : > { %9243 = vmatmul.bf16.gmra.mxu2 %v9137_v28 }
 0x544   : > { %9441 = vmatmul.bf16.gmra.mxu3 %v9335_v45 }
 0x546   : > { %v9204_v58 = vpop.f32.mrf.mxu2  ;;  %v8750_v24 = vpop.f32.mrf.mxu0 }
 0x547   : > { %v9402_v16 = vpop.f32.mrf.mxu3  ;;  %v9249_v8 = vadd.f32 %v9204_v58, %v9081_v55  ;;  %v8794_v11 = vadd.f32 %v8750_v24, %v16316_v25 }
 0x549   : > { %v9041_v17 = vpop.f32.mrf.mxu1  ;;  %v9447_v27 = vadd.f32 %v9402_v16, %v9249_v8  ;;  %v9082_v46 = vadd.f32 %v9038_v23, %v8794_v11  ;;  %v12590_v8 = vld [vmem:[%s12964_s24 + $0x68] sm:$0xff]  }
 0x54a   : > { %v12430_v50 = vunpack.c.l.bf16 %v12590_v8 }
 0x54b   : > { %v9501_v42 = vadd.f32 %v12422_v13, %v9447_v27 }
 0x54d   : > { %v9519_v37 = vmax.f32 %v9501_v42, 0.0 }
 0x54e   : > { %v9206_v32 = vpop.f32.mrf.mxu2  ;;  %v8753_v1 = vpop.f32.mrf.mxu0 }
 0x54f   : > { %v9404_v14 = vpop.f32.mrf.mxu3  ;;  %v9250_v2 = vadd.f32 %v9206_v32, %v9082_v46  ;;  %v8795_v30 = vadd.f32 %v8753_v1, %v16327_v57  ;;  %v12427_v57 = vunpack.c.h.bf16 %v12589_v21 }
 0x551   : > { %v9043_v0 = vpop.f32.mrf.mxu1  ;;  %v9448_v59 = vadd.f32 %v9404_v14, %v9250_v2  ;;  %v9083_v15 = vadd.f32 %v9041_v17, %v8795_v30 }
 0x553   : > { %v9502_v43 = vadd.f32 %v12423_v3, %v9448_v59 }
 0x555   : > { %v9520_v6 = vmax.f32 %v9502_v43, 0.0 }
 0x556   : > { %v9209_v25 = vpop.f32.mrf.mxu2  ;;  %v8755_v63 = vpop.f32.mrf.mxu0 }
 0x557   : > { %v9407_v4 = vpop.f32.mrf.mxu3  ;;  %v12459_v52 = vpack.c.bf16 %v9520_v6, %v9519_v37  ;;  %v9251_v61 = vadd.f32 %v9209_v25, %v9083_v15  ;;  %v8796_v34 = vadd.f32 %v8755_v63, %v16337_v9  ;;  %v12591_v63 = vld [vmem:[%s12964_s24 + $0x70] sm:$0xff]  }
 0x559   : > { %v9046_v62 = vpop.f32.mrf.mxu1  ;;  %12597 = vst [vmem:[%s16119_s11 + $0x48] sm:$0xff] %v12459_v52   ;;  %v9449_v60 = vadd.f32 %v9407_v4, %v9251_v61  ;;  %v9084_v26 = vadd.f32 %v9043_v0, %v8796_v34  ;;  %v12434_v61 = vunpack.c.l.bf16 %v12591_v63 }
 0x55b   : > { %v9503_v39 = vadd.f32 %v12426_v33, %v9449_v60 }
 0x55d   : > { %v9521_v45 = vmax.f32 %v9503_v39, 0.0 }
 0x55e   : > { %v9211_v20 = vpop.f32.mrf.mxu2  ;;  %v8758_v44 = vpop.f32.mrf.mxu0 }
 0x55f   : > { %v9409_v35 = vpop.f32.mrf.mxu3  ;;  %v9252_v40 = vadd.f32 %v9211_v20, %v9084_v26  ;;  %v8797_v28 = vadd.f32 %v8758_v44, %v16348_v48  ;;  %v12431_v48 = vunpack.c.h.bf16 %v12590_v8 }
 0x561   : > { %v9048_v38 = vpop.f32.mrf.mxu1  ;;  %v9450_v18 = vadd.f32 %v9409_v35, %v9252_v40  ;;  %v9085_v58 = vadd.f32 %v9046_v62, %v8797_v28 }
 0x563   : > { %v9504_v12 = vadd.f32 %v12427_v57, %v9450_v18 }
 0x565   : > { %v9522_v23 = vmax.f32 %v9504_v12, 0.0 }
 0x566   : > { %v9214_v9 = vpop.f32.mrf.mxu2  ;;  %v8760_v16 = vpop.f32.mrf.mxu0 }
 0x567   : > { %v9412_v29 = vpop.f32.mrf.mxu3  ;;  %v12464_v31 = vpack.c.bf16 %v9522_v23, %v9521_v45  ;;  %v9253_v24 = vadd.f32 %v9214_v9, %v9085_v58  ;;  %v8798_v17 = vadd.f32 %v8760_v16, %v16358_v51 }
 0x569   : > { %v9051_v55 = vpop.f32.mrf.mxu1  ;;  %12598 = vst [vmem:[%s16119_s11 + $0x50] sm:$0xff] %v12464_v31   ;;  %v9451_v11 = vadd.f32 %v9412_v29, %v9253_v24  ;;  %v9086_v27 = vadd.f32 %v9048_v38, %v8798_v17  ;;  %v12592_v31 = vld [vmem:[%s12964_s24 + $0x78] sm:$0xff]  }
 0x56a   : > { %v12438_v16 = vunpack.c.l.bf16 %v12592_v31  ;;  %v12439_v8 = vunpack.c.h.bf16 %v12592_v31 }
 0x56b   : > { %v9505_v3 = vadd.f32 %v12430_v50, %v9451_v11 }
 0x56d   : > { %v9523_v59 = vmax.f32 %v9505_v3, 0.0 }
 0x56e   : > { %v9216_v13 = vpop.f32.mrf.mxu2  ;;  %v8763_v14 = vpop.f32.mrf.mxu0 }
 0x56f   : > { %v9414_v46 = vpop.f32.mrf.mxu3  ;;  %v9254_v32 = vadd.f32 %v9216_v13, %v9086_v27  ;;  %v8799_v42 = vadd.f32 %v8763_v14, %v16369_v36  ;;  %v12435_v36 = vunpack.c.h.bf16 %v12591_v63 }
 0x571   : > { %v9053_v2 = vpop.f32.mrf.mxu1  ;;  %v9452_v1 = vadd.f32 %v9414_v46, %v9254_v32  ;;  %v9087_v6 = vadd.f32 %v9051_v55, %v8799_v42 }
 0x573   : > { %v9506_v0 = vadd.f32 %v12431_v48, %v9452_v1 }
 0x575   : > { %v9524_v43 = vmax.f32 %v9506_v0, 0.0 }
 0x576   : > { %v9219_v51 = vpop.f32.mrf.mxu2  ;;  %v8765_v25 = vpop.f32.mrf.mxu0 }
 0x577   : > { %v9417_v30 = vpop.f32.mrf.mxu3  ;;  %v12469_v37 = vpack.c.bf16 %v9524_v43, %v9523_v59  ;;  %v9255_v52 = vadd.f32 %v9219_v51, %v9087_v6  ;;  %v8800_v15 = vadd.f32 %v8765_v25, %v16379_v53  ;;  %v12593_v51 = vld [vmem:[%s12964_s24 + $0x80] sm:$0xff]  }
 0x579   : > { %v9056_v4 = vpop.f32.mrf.mxu1  ;;  %12599 = vst [vmem:[%s16119_s11 + $0x58] sm:$0xff] %v12469_v37   ;;  %v9453_v62 = vadd.f32 %v9417_v30, %v9255_v52  ;;  %v9088_v34 = vadd.f32 %v9053_v2, %v8800_v15  ;;  %v12442_v37 = vunpack.c.l.bf16 %v12593_v51  ;;  %v12443_v52 = vunpack.c.h.bf16 %v12593_v51 }
 0x57b   : > { %v9507_v35 = vadd.f32 %v12434_v61, %v9453_v62 }
 0x57d   : > { %v9525_v38 = vmax.f32 %v9507_v35, 0.0 }
 0x57e   : > { %v9221_v21 = vpop.f32.mrf.mxu2  ;;  %v8768_v26 = vpop.f32.mrf.mxu0 }
 0x57f   : > { %v9419_v60 = vpop.f32.mrf.mxu3  ;;  %v9256_v33 = vadd.f32 %v9221_v21, %v9088_v34  ;;  %v8801_v44 = vadd.f32 %v8768_v26, %v16390_v47 }
 0x581   : > { %v9058_v20 = vpop.f32.mrf.mxu1  ;;  %v9454_v40 = vadd.f32 %v9419_v60, %v9256_v33  ;;  %v9089_v28 = vadd.f32 %v9056_v4, %v8801_v44  ;;  %v12594_v44 = vld [vmem:[%s12964_s24 + $0x88] sm:$0xff]  }
 0x583   : > { %v9508_v57 = vadd.f32 %v12435_v36, %v9454_v40 }
 0x585   : > { %v9526_v39 = vmax.f32 %v9508_v57, 0.0 }
 0x586   : > { %v9224_v53 = vpop.f32.mrf.mxu2  ;;  %v8770_v45 = vpop.f32.mrf.mxu0 }
 0x587   : > { %v9422_v18 = vpop.f32.mrf.mxu3  ;;  %v12474_v12 = vpack.c.bf16 %v9526_v39, %v9525_v38  ;;  %v9257_v9 = vadd.f32 %v9224_v53, %v9089_v28  ;;  %v8802_v29 = vadd.f32 %v8770_v45, %v16400_v19  ;;  %v12446_v39 = vunpack.c.l.bf16 %v12594_v44 }
 0x588   : > { %v12447_v45 = vunpack.c.h.bf16 %v12594_v44 }
 0x589   : > { %v9061_v23 = vpop.f32.mrf.mxu1  ;;  %12600 = vst [vmem:[%s16119_s11 + $0x60] sm:$0xff] %v12474_v12   ;;  %v9455_v58 = vadd.f32 %v9422_v18, %v9257_v9  ;;  %v9090_v55 = vadd.f32 %v9058_v20, %v8802_v29 }
 0x58b   : > { %v9509_v27 = vadd.f32 %v12438_v16, %v9455_v58 }
 0x58d   : > { %v9527_v48 = vmax.f32 %v9509_v27, 0.0 }
 0x58e   : > { %v9226_v24 = vpop.f32.mrf.mxu2  ;;  %v8773_v11 = vpop.f32.mrf.mxu0 }
 0x58f   : > { %v9424_v17 = vpop.f32.mrf.mxu3  ;;  %v9258_v47 = vadd.f32 %v9226_v24, %v9090_v55  ;;  %v8803_v32 = vadd.f32 %v8773_v11, %v16411_v56 }
 0x591   : > { %v9063_v50 = vpop.f32.mrf.mxu1  ;;  %v9456_v13 = vadd.f32 %v9424_v17, %v9258_v47  ;;  %v9091_v1 = vadd.f32 %v9061_v23, %v8803_v32 }
 0x593   : > { %v9510_v46 = vadd.f32 %v12439_v8, %v9456_v13  ;;  %v12595_v13 = vld [vmem:[%s12964_s24 + $0x90] sm:$0xff]  }
 0x594   : > { %v12450_v32 = vunpack.c.l.bf16 %v12595_v13 }
 0x595   : > { %v9528_v14 = vmax.f32 %v9510_v46, 0.0 }
 0x596   : > { %v9229_v19 = vpop.f32.mrf.mxu2  ;;  %v8775_v0 = vpop.f32.mrf.mxu0 }
 0x597   : > { %v9427_v2 = vpop.f32.mrf.mxu3  ;;  %v12479_v3 = vpack.c.bf16 %v9528_v14, %v9527_v48  ;;  %v9259_v42 = vadd.f32 %v9229_v19, %v9091_v1  ;;  %v8804_v59 = vadd.f32 %v8775_v0, %v16421_v49 }
 0x599   : > { %12601 = vst [vmem:[%s16119_s11 + $0x68] sm:$0xff] %v12479_v3   ;;  %v9066_v43 = vpop.f32.mrf.mxu1  ;;  %v9457_v30 = vadd.f32 %v9427_v2, %v9259_v42  ;;  %v9092_v6 = vadd.f32 %v9063_v50, %v8804_v59  ;;  %v12451_v2 = vunpack.c.h.bf16 %v12595_v13 }
 0x59b   : > { %v9511_v63 = vadd.f32 %v12442_v37, %v9457_v30 }
 0x59d   : > { %v9529_v60 = vmax.f32 %v9511_v63, 0.0 }
 0x59e   : > { %v9231_v25 = vpop.f32.mrf.mxu2  ;;  %v8778_v15 = vpop.f32.mrf.mxu0 }
 0x59f   : > { %v9429_v4 = vpop.f32.mrf.mxu3  ;;  %v9260_v56 = vadd.f32 %v9231_v25, %v9092_v6  ;;  %v8805_v34 = vadd.f32 %v8778_v15, %v16432_v5  ;;  %v12596_v15 = vld [vmem:[%s12964_s24 + $0x98] sm:$0xff]  }
 0x5a1   : > { %v9458_v62 = vadd.f32 %v9429_v4, %v9260_v56  ;;  %v9068_v21 = vpop.f32.mrf.mxu1  ;;  %v9093_v20 = vadd.f32 %v9066_v43, %v8805_v34 }
 0x5a3   : > { %v9512_v61 = vadd.f32 %v12443_v52, %v9458_v62 }
 0x5a5   : > { %v9530_v49 = vmax.f32 %v9512_v61, 0.0  ;;  %v12454_v61 = vunpack.c.l.bf16 %v12596_v15 }
 0x5a6   : > { %v9234_v33 = vpop.f32.mrf.mxu2  ;;  %v8780_v35 = vpop.f32.mrf.mxu0 }
 0x5a7   : > { %v9432_v36 = vpop.f32.mrf.mxu3  ;;  %v12484_v26 = vpack.c.bf16 %v9530_v49, %v9529_v60  ;;  %v9261_v40 = vadd.f32 %v9234_v33, %v9093_v20  ;;  %v8806_v57 = vadd.f32 %v8780_v35, %v16442_v41 }
 0x5a9   : > { %12602 = vst [vmem:[%s16119_s11 + $0x70] sm:$0xff] %v12484_v26   ;;  %v9459_v38 = vadd.f32 %v9432_v36, %v9261_v40  ;;  %v9094_v53 = vadd.f32 %v9068_v21, %v8806_v57  ;;  %v9071_v18 = vpop.f32.mrf.mxu1 }
 0x5ab   : > { %v9513_v9 = vadd.f32 %v12446_v39, %v9459_v38 }
 0x5ad   : > { %v9531_v16 = vmax.f32 %v9513_v9, 0.0 }
 0x5ae   : > { %v9236_v12 = vpop.f32.mrf.mxu2  ;;  %v8783_v23 = vpop.f32.mrf.mxu0 }
 0x5af   : > { %v9434_v28 = vpop.f32.mrf.mxu3  ;;  %v9262_v5 = vadd.f32 %v9236_v12, %v9094_v53  ;;  %v8807_v58 = vadd.f32 %v8783_v23, %v16453_v22 }
 0x5b1   : > { %v9460_v29 = vadd.f32 %v9434_v28, %v9262_v5  ;;  %v9095_v47 = vadd.f32 %v9071_v18, %v8807_v58  ;;  %v9073_v11 = vpop.f32.mrf.mxu1 }
 0x5b3   : > { %v9514_v31 = vadd.f32 %v12447_v45, %v9460_v29 }
 0x5b5   : > { %v9532_v55 = vmax.f32 %v9514_v31, 0.0 }
 0x5b6   : > { %v9239_v41 = vpop.f32.mrf.mxu2  ;;  %v8785_v8 = vpop.f32.mrf.mxu0 }
 0x5b7   : > { %v9437_v24 = vpop.f32.mrf.mxu3  ;;  %v12489_v17 = vpack.c.bf16 %v9532_v55, %v9531_v16  ;;  %v9263_v50 = vadd.f32 %v9239_v41, %v9095_v47  ;;  %v8808_v27 = vadd.f32 %v8785_v8, %v16461_v10 }
 0x5b9   : > { %12603 = vst [vmem:[%s16119_s11 + $0x78] sm:$0xff] %v12489_v17   ;;  %v9461_v46 = vadd.f32 %v9437_v24, %v9263_v50  ;;  %v9096_v48 = vadd.f32 %v9073_v11, %v8808_v27  ;;  %v9076_v42 = vpop.f32.mrf.mxu1 }
 0x5bb   : > { %v9515_v1 = vadd.f32 %v12450_v32, %v9461_v46 }
 0x5bd   : > { %v9533_v51 = vmax.f32 %v9515_v1, 0.0 }
 0x5be   : > { %v9241_v14 = vpop.f32.mrf.mxu2  ;;  %v8788_v3 = vpop.f32.mrf.mxu0 }
 0x5bf   : > { %v9439_v19 = vpop.f32.mrf.mxu3  ;;  %v9264_v22 = vadd.f32 %v9241_v14, %v9096_v48  ;;  %v8809_v43 = vadd.f32 %v8788_v3, %v16469_v54  ;;  %v12455_v54 = vunpack.c.h.bf16 %v12596_v15 }
 0x5c1   : > { %v9462_v0 = vadd.f32 %v9439_v19, %v9264_v22  ;;  %v9097_v25 = vadd.f32 %v9076_v42, %v8809_v43  ;;  %v9078_v63 = vpop.f32.mrf.mxu1 }
 0x5c3   : > { %v9516_v59 = vadd.f32 %v12451_v2, %v9462_v0 }
 0x5c5   : > { %v9534_v30 = vmax.f32 %v9516_v59, 0.0 }
 0x5c6   : > { %v9244_v10 = vpop.f32.mrf.mxu2  ;;  %v8790_v4 = vpop.f32.mrf.mxu0 }
 0x5c7   : > { %v9442_v37 = vpop.f32.mrf.mxu3  ;;  %v12494_v6 = vpack.c.bf16 %v9534_v30, %v9533_v51  ;;  %v9265_v56 = vadd.f32 %v9244_v10, %v9097_v25  ;;  %v8810_v52 = vadd.f32 %v8790_v4, %v16474_v7 }
 0x5c9   : > { %12604 = vst [vmem:[%s16119_s11 + $0x80] sm:$0xff] %v12494_v6   ;;  %v9463_v62 = vadd.f32 %v9442_v37, %v9265_v56  ;;  %v9098_v34 = vadd.f32 %v9078_v63, %v8810_v52 }
 0x5cb   : > { %v9517_v33 = vadd.f32 %v12454_v61, %v9463_v62 }
 0x5cd   : > { %v9535_v20 = vmax.f32 %v9517_v33, 0.0 }
 0x5ce   : > { %v9246_v21 = vpop.f32.mrf.mxu2 }
 0x5cf   : > { %v9266_v60 = vadd.f32 %v9246_v21, %v9098_v34  ;;  %v9444_v49 = vpop.f32.mrf.mxu3 }
 0x5d1   : > { %v9464_v36 = vadd.f32 %v9444_v49, %v9266_v60 }
 0x5d3   : > { %v9518_v26 = vadd.f32 %v12455_v54, %v9464_v36 }
 0x5d5   : > { %v9536_v35 = vmax.f32 %v9518_v26, 0.0 }
 0x5d7   : > { %v12499_v40 = vpack.c.bf16 %v9536_v35, %v9535_v20 }
 0x5d9   : > { %12605 = vst [vmem:[%s16119_s11 + $0x88] sm:$0xff] %v12499_v40  }
 0x5da PF: > { %s15_s18 = sadd.s32 1, %s12881_s18  }
 0x5db   : > { %p12_p4 = scmp.ge.s32.totalorder %s15_s18, 4  }
 0x5dd   :  { %14 = sbr.rel (!%p12_p4) target bundleno = 1 (0x1), region = 86 }

</bundles_post_ra>
